<compile_context>
chip_gen: v6e
topology: v6e:2x2x1
jax: 0.10.0
libtpu: 0.0.40
codegen_flags: <defaults>
</compile_context>

<pallas_src>
import jax
import jax.numpy as jnp
from jax.experimental import pallas as pl
from jax.experimental.pallas import tpu as pltpu

HIDDEN = 32                   # args.hidden_size
DEPTH = 3                     # args.depth
ATOM_FDIM = 16
BOND_FDIM = ATOM_FDIM + 16    # chemprop concatenates atom features into bond features
OUT_LANES = 128               # lane-dense output slab width

# Synthetic batched-graph configuration (uniform blocks of path molecules).
ATOMS_PER_MOL = 8
MOLS_PER_BLOCK = 32           # 32 molecules  -> 256 atoms / 448 directed bonds per block
NUM_BLOCKS = 4                # grid size (parallel axis)

# Output-slab lane assignment / packed-bias row assignment.
LANE_OUT0, LANE_OUT1, LANE_OUT2, LANE_ATT = 0, 1, 2, 3
ROW_B_O, ROW_A_B1, ROW_A_B2, ROW_B_B1, ROW_B_B2, ROW_LANE0 = 0, 1, 2, 3, 4, 5


def _round_up(n, m):
    return ((n + m - 1) // m) * m


def _vmem_limit_bytes():
    # Per-generation VMEM ceiling: ~3/4 of physical VMEM, capped at 100 MiB
    # (=> ~48 MiB on v7x's 64 MiB VMEM, ~96-100 MiB on v5e/v6e's 128 MiB).
    cap = 64 * 1024 * 1024
    try:
        cap = int(pltpu.get_tpu_info().vmem_capacity_bytes)
    except Exception:
        pass
    return int(min(cap * 3 // 4, 100 * 1024 * 1024))


# ---------------------------------------------------------------------------
# Fused per-block kernel: MPN encoder + MultiReadout (constrained atom head,
# plain atom head, symmetric bond head).  One grid step = one molecule block.
# ---------------------------------------------------------------------------
def _fused_block_kernel(f_atoms_ref, f_bonds_ref, a2b_ref, route_ref, gu_ref, gv_ref,
                        maskT_ref, constr_ref,
                        w_i_ref, w_h_ref, w_oa_ref, w_om_ref,
                        a_w1_ref, a_w2_ref, b_w1u_ref, b_w1v_ref, b_w2_ref,
                        bias_ref,
                        out_ref):
    f32, bf16 = jnp.float32, jnp.bfloat16

    # coalesced bias buffer (one [8,128] VMEM tile instead of six tiny operands)
    b_o = bias_ref[ROW_B_O:ROW_B_O + 1, 0:HIDDEN]            # [1, H]
    a_b1 = bias_ref[ROW_A_B1:ROW_A_B1 + 1, 0:2 * HIDDEN]     # [1, 2H]
    a_b2 = bias_ref[ROW_A_B2:ROW_A_B2 + 1, :]                # [1, 128] (lane-padded)
    b_b1 = bias_ref[ROW_B_B1:ROW_B_B1 + 1, 0:2 * HIDDEN]     # [1, 2H]
    b_b2 = bias_ref[ROW_B_B2:ROW_B_B2 + 1, :]                # [1, 128] (lane-padded)
    lane0 = bias_ref[ROW_LANE0:ROW_LANE0 + 1, :]             # [1, 128] one-hot lane-0 mask

    # ---------------- MPN encoder (directed-bond D-MPNN) ----------------
    # input = ReLU(W_i(f_bonds)); chemprop W_i has no bias.  Dense weight
    # matmuls stay f32; routing matmuls feed the MXU in bf16 (exact 0/±1
    # coefficients) with f32 accumulation.
    h0 = jnp.maximum(
        jnp.dot(f_bonds_ref[...], w_i_ref[...], preferred_element_type=f32), 0.0)
    route = route_ref[...]          # bf16, ROUTE = B2A @ A2B - REV (folded routing)
    w_h = w_h_ref[...]
    msg = h0
    # Dropout between message-passing steps is identity at inference; omitted.
    for _ in range(DEPTH - 1):
        routed = jnp.dot(route, msg.astype(bf16), preferred_element_type=f32)
        msg = jnp.maximum(h0 + jnp.dot(routed, w_h, preferred_element_type=f32), 0.0)

    a_msg = jnp.dot(a2b_ref[...], msg.astype(bf16), preferred_element_type=f32)  # [R, H]
    # atom_hiddens = ReLU(W_o(cat([f_atoms, a_message]))); concat folded into
    # the split weight (W_o_atom | W_o_msg).
    atom_h = jnp.maximum(
        jnp.dot(f_atoms_ref[...], w_oa_ref[...], preferred_element_type=f32)
        + jnp.dot(a_msg, w_om_ref[...], preferred_element_type=f32)
        + b_o, 0.0)                                                               # [R, H]

    # ---------------- atom heads (lane-packed) ----------------
    # first layers of head0|head1 packed on the lane axis -> one [H, 2H] matmul
    h_pack = jnp.maximum(
        jnp.dot(atom_h, a_w1_ref[...], preferred_element_type=f32) + a_b1, 0.0)   # [R, 2H]
    # second layers: block-diagonal weights pre-padded to 128 lanes, so this
    # matmul already lands lane-dense in the output slab layout:
    #   lane 0 = o (constrained raw), lane 1 = out1 (plain head), lane 3 = attention logits
    y = jnp.dot(h_pack, a_w2_ref[...], preferred_element_type=f32) + a_b2         # [R, 128]
    o = y[:, LANE_OUT0:LANE_OUT0 + 1]
    w_att = y[:, LANE_ATT:LANE_ATT + 1]

    # constrained redistribution: block-local per-molecule softmax over atoms
    maskT = maskT_ref[...].astype(f32)                       # [R, M] atom->molecule mask
    neg = jnp.float32(-1e30)
    wm = jnp.where(maskT > 0, w_att, neg)
    wm = wm - jnp.max(wm, axis=0, keepdims=True)             # per-molecule max (block-local)
    e = jnp.where(maskT > 0, jnp.exp(wm), 0.0)
    denom = jnp.maximum(jnp.sum(e, axis=0, keepdims=True), 1e-30)   # guard empty molecule
    soft = e / denom
    mol_sum = jnp.sum(maskT * o, axis=0, keepdims=True)      # [1, M]
    dev = constr_ref[...] - mol_sum                          # [1, M]
    delta = jnp.sum(soft * dev, axis=1, keepdims=True)       # [R, 1] per-atom correction

    # ---------------- bond head (symmetric FFN, both orders lane-packed) ----------------
    atom_h_b = atom_h.astype(bf16)
    h_u = jnp.dot(gu_ref[...], atom_h_b, preferred_element_type=f32)   # [R, H]
    h_v = jnp.dot(gv_ref[...], atom_h_b, preferred_element_type=f32)   # [R, H]
    # hid = [ ReLU(h_u@W1a + h_v@W1b + b1) | ReLU(h_v@W1a + h_u@W1b + b1) ]
    hid = jnp.maximum(
        jnp.dot(h_u, b_w1u_ref[...], preferred_element_type=f32)
        + jnp.dot(h_v, b_w1v_ref[...], preferred_element_type=f32)
        + b_b1, 0.0)                                                    # [R, 2H]
    # b_w2 pre-padded to 128 lanes with 0.5*[W2; W2] in lane 2 -> 0.5*(FFN(u,v)+FFN(v,u))
    bond = jnp.dot(hid, b_w2_ref[...], preferred_element_type=f32) + b_b2   # [R, 128]

    # lane-dense output slab: lane0 = o + delta, lane1 = out1, lane2 = out2.
    # (lane 3 carries the attention logits; the wrapper ignores it.)
    out_ref[...] = y + bond + delta * lane0


# ---------------------------------------------------------------------------
# Parameter packing (folds concats / head fusion / bias coalescing into layout).
# ---------------------------------------------------------------------------
def pack_params(p):
    h = HIDDEN
    f32 = jnp.float32

    a_w1 = jnp.concatenate([p["a0_W1"], p["a1_W1"]], axis=1)            # [H, 2H]

    # second-layer atom weights, block-diagonal and pre-padded to 128 lanes
    a_w2 = jnp.zeros((2 * h, OUT_LANES), f32)
    a_w2 = a_w2.at[:h, LANE_OUT0:LANE_OUT0 + 1].set(p["a0_W2"])
    a_w2 = a_w2.at[h:, LANE_OUT1:LANE_OUT1 + 1].set(p["a1_W2"])
    a_w2 = a_w2.at[:h, LANE_ATT:LANE_ATT + 1].set(p["a0_W3"])

    b_w1u = jnp.concatenate([p["b_W1a"], p["b_W1b"]], axis=1)           # [H, 2H]
    b_w1v = jnp.concatenate([p["b_W1b"], p["b_W1a"]], axis=1)           # [H, 2H]
    b_w2 = jnp.zeros((2 * h, OUT_LANES), f32)
    b_w2 = b_w2.at[:h, LANE_OUT2:LANE_OUT2 + 1].set(0.5 * p["b_W2"])
    b_w2 = b_w2.at[h:, LANE_OUT2:LANE_OUT2 + 1].set(0.5 * p["b_W2"])

    # one packed [8,128] bias buffer (replaces six tiny [1,k] operands)
    bias = jnp.zeros((8, OUT_LANES), f32)
    bias = bias.at[ROW_B_O, 0:h].set(p["b_o"][0])
    bias = bias.at[ROW_A_B1, 0:2 * h].set(
        jnp.concatenate([p["a0_b1"], p["a1_b1"]], axis=1)[0])
    bias = bias.at[ROW_A_B2, LANE_OUT0].set(p["a0_b2"][0, 0])
    bias = bias.at[ROW_A_B2, LANE_OUT1].set(p["a1_b2"][0, 0])
    bias = bias.at[ROW_A_B2, LANE_ATT].set(p["a0_b3"][0, 0])
    bias = bias.at[ROW_B_B1, 0:2 * h].set(
        jnp.concatenate([p["b_b1"], p["b_b1"]], axis=1)[0])
    bias = bias.at[ROW_B_B2, LANE_OUT2].set(p["b_b2"][0, 0])
    bias = bias.at[ROW_LANE0, 0].set(1.0)     # lane-0 one-hot mask for the constrained delta

    return {
        "W_i": p["W_i"], "W_h": p["W_h"],
        "W_o_atom": p["W_o_atom"], "W_o_msg": p["W_o_msg"],
        "a_w1": a_w1, "a_w2": a_w2,
        "b_w1u": b_w1u, "b_w1v": b_w1v, "b_w2": b_w2,
        "bias": bias,
    }


# ---------------------------------------------------------------------------
# Wrapper: one pallas_call, grid over molecule blocks (parallel).
# ---------------------------------------------------------------------------
def molecule_model_forward(feats, graph, params):
    kp = pack_params(params)
    num_blocks = feats["f_atoms"].shape[0]
    r_blk, nb_blk, m_blk = graph["R_BLK"], graph["NB_BLK"], graph["M_BLK"]

    def graph_spec(d1, d2):
        # one molecule-block per grid step; leading batch dim squeezed away
        return pl.BlockSpec((None, d1, d2), lambda g: (g, 0, 0))

    def full_spec(shape):
        # weights: whole array resident (constant block index across the grid)
        return pl.BlockSpec(shape, lambda g: (0,) * len(shape))

    in_specs = [
        graph_spec(r_blk, ATOM_FDIM),          # f_atoms
        graph_spec(nb_blk, BOND_FDIM),         # f_bonds
        graph_spec(r_blk, nb_blk),             # A2B
        graph_spec(nb_blk, nb_blk),            # ROUTE
        graph_spec(r_blk, r_blk),              # GU
        graph_spec(r_blk, r_blk),              # GV
        graph_spec(r_blk, m_blk),              # mol_maskT
        graph_spec(1, m_blk),                  # constraints
        full_spec((BOND_FDIM, HIDDEN)),        # W_i
        full_spec((HIDDEN, HIDDEN)),           # W_h
        full_spec((ATOM_FDIM, HIDDEN)),        # W_o_atom
        full_spec((HIDDEN, HIDDEN)),           # W_o_msg
        full_spec((HIDDEN, 2 * HIDDEN)),       # a_w1
        full_spec((2 * HIDDEN, OUT_LANES)),    # a_w2 (lane-padded)
        full_spec((HIDDEN, 2 * HIDDEN)),       # b_w1u
        full_spec((HIDDEN, 2 * HIDDEN)),       # b_w1v
        full_spec((2 * HIDDEN, OUT_LANES)),    # b_w2 (lane-padded)
        full_spec((8, OUT_LANES)),             # packed bias buffer
    ]

    slab = pl.pallas_call(
        _fused_block_kernel,
        grid=(num_blocks,),
        out_shape=jax.ShapeDtypeStruct((num_blocks, r_blk, OUT_LANES), jnp.float32),
        in_specs=in_specs,
        out_specs=pl.BlockSpec((None, r_blk, OUT_LANES), lambda g: (g, 0, 0)),
        compiler_params=pltpu.CompilerParams(
            dimension_semantics=("parallel",),
            vmem_limit_bytes=_vmem_limit_bytes()),
    )(feats["f_atoms"], feats["f_bonds"], graph["A2B"], graph["ROUTE"],
      graph["GU"], graph["GV"], graph["mol_maskT"], graph["constraints"],
      kp["W_i"], kp["W_h"], kp["W_o_atom"], kp["W_o_msg"],
      kp["a_w1"], kp["a_w2"], kp["b_w1u"], kp["b_w1v"], kp["b_w2"], kp["bias"])

    n_a, n_ub = graph["n_atoms_blk"], graph["n_ub_blk"]
    out0 = slab[:, :n_a, LANE_OUT0].reshape(-1, 1)   # constrained atom target
    out1 = slab[:, :n_a, LANE_OUT1].reshape(-1, 1)   # plain atom target
    out2 = slab[:, :n_ub, LANE_OUT2].reshape(-1, 1)  # bond target
    return [out0, out1, out2]


# ---------------------------------------------------------------------------
# Pure-JAX reference (unfused / unfolded semantics), optionally matching the
# kernel's bf16 routing casts, for verification.
# ---------------------------------------------------------------------------
def reference_forward(feats, graph, params, *, bf16_routing=False):
    relu = jax.nn.relu
    ref = graph["ref"]
    A2B, B2A, REV = ref["A2B"], ref["B2A"], ref["REV"]
    GU, GV, maskT = ref["GU"], ref["GV"], ref["maskT"]
    if bf16_routing:
        cast = lambda x: x.astype(jnp.bfloat16).astype(jnp.float32)
    else:
        cast = lambda x: x

    num_blocks = feats["f_atoms"].shape[0]
    n_a, n_ub = graph["n_atoms_blk"], graph["n_ub_blk"]
    out0s, out1s, out2s = [], [], []
    for g in range(num_blocks):
        f_atoms = feats["f_atoms"][g]
        f_bonds = feats["f_bonds"][g]
        constr = graph["constraints"][g]

        h0 = relu(f_bonds @ params["W_i"])
        msg = h0
        for _ in range(DEPTH - 1):
            m = cast(msg)
            msg = relu(h0 + (B2A @ (A2B @ m) - REV @ m) @ params["W_h"])
        a_msg = A2B @ cast(msg)
        atom_h = relu(f_atoms @ params["W_o_atom"]
                      + a_msg @ params["W_o_msg"] + params["b_o"])

        # atom head 0 (constrained)
        h = relu(atom_h @ params["a0_W1"] + params["a0_b1"])
        o = h @ params["a0_W2"] + params["a0_b2"]
        w = h @ params["a0_W3"] + params["a0_b3"]
        wm = jnp.where(maskT > 0, w, -1e30)
        wm = wm - jnp.max(wm, axis=0, keepdims=True)
        e = jnp.where(maskT > 0, jnp.exp(wm), 0.0)
        soft = e / jnp.maximum(e.sum(0, keepdims=True), 1e-30)
        dev = constr - (maskT * o).sum(0, keepdims=True)
        out0 = o + (soft * dev).sum(1, keepdims=True)

        # atom head 1 (plain)
        h1 = relu(atom_h @ params["a1_W1"] + params["a1_b1"])
        out1 = h1 @ params["a1_W2"] + params["a1_b2"]

        # bond head (symmetric FFN over endpoint hiddens)
        ah = cast(atom_h)
        hu = GU @ ah
        hv = GV @ ah

        def mlp(a, b):
            hid = relu(a @ params["b_W1a"] + b @ params["b_W1b"] + params["b_b1"])
            return hid @ params["b_W2"] + params["b_b2"]

        out2 = 0.5 * (mlp(hu, hv) + mlp(hv, hu))

        out0s.append(out0[:n_a])
        out1s.append(out1[:n_a])
        out2s.append(out2[:n_ub])
    return (jnp.concatenate(out0s), jnp.concatenate(out1s), jnp.concatenate(out2s))


# ---------------------------------------------------------------------------
# Parameters & synthetic batched graph
# ---------------------------------------------------------------------------
def init_params(key):
    ks = jax.random.split(key, 20)

    def w(k, shape):
        return (0.05 * jax.random.normal(k, shape)).astype(jnp.float32)

    return {
        # MPN encoder
        "W_i": w(ks[0], (BOND_FDIM, HIDDEN)),
        "W_h": w(ks[1], (HIDDEN, HIDDEN)),
        "W_o_atom": w(ks[2], (ATOM_FDIM, HIDDEN)),
        "W_o_msg": w(ks[3], (HIDDEN, HIDDEN)),
        "b_o": w(ks[4], (1, HIDDEN)),
        # atom head 0 (constrained)
        "a0_W1": w(ks[5], (HIDDEN, HIDDEN)), "a0_b1": w(ks[6], (1, HIDDEN)),
        "a0_W2": w(ks[7], (HIDDEN, 1)),      "a0_b2": w(ks[8], (1, 1)),
        "a0_W3": w(ks[9], (HIDDEN, 1)),      "a0_b3": w(ks[10], (1, 1)),
        # atom head 1 (plain)
        "a1_W1": w(ks[11], (HIDDEN, HIDDEN)), "a1_b1": w(ks[12], (1, HIDDEN)),
        "a1_W2": w(ks[13], (HIDDEN, 1)),      "a1_b2": w(ks[14], (1, 1)),
        # bond head
        "b_W1a": w(ks[15], (HIDDEN, HIDDEN)), "b_W1b": w(ks[16], (HIDDEN, HIDDEN)),
        "b_b1": w(ks[17], (1, HIDDEN)),
        "b_W2": w(ks[18], (HIDDEN, 1)),       "b_b2": w(ks[19], (1, 1)),
    }


def build_graph(key, num_blocks):
    # Uniform molecule blocks: MOLS_PER_BLOCK path molecules of ATOMS_PER_MOL atoms.
    atoms_blk = MOLS_PER_BLOCK * ATOMS_PER_MOL
    und, mol_of_atom = [], []
    for m in range(MOLS_PER_BLOCK):
        s = m * ATOMS_PER_MOL
        mol_of_atom += [m] * ATOMS_PER_MOL
        for i in range(ATOMS_PER_MOL - 1):
            und.append((s + i, s + i + 1))
    n_ub = len(und)
    n_db = 2 * n_ub

    # sublane-dim padding to multiples of 8 (inert zero rows/cols)
    r_blk = max(_round_up(atoms_blk, 8), _round_up(n_ub, 8))
    nb_blk = _round_up(n_db, 8)

    b2a_idx, tgt_idx, rev_idx = [], [], []
    for k, (u, v) in enumerate(und):
        b2a_idx += [u, v]            # source atom of directed bonds 2k, 2k+1
        tgt_idx += [v, u]            # target atom
        rev_idx += [2 * k + 1, 2 * k]

    bonds = jnp.arange(n_db)
    A2B = jnp.zeros((r_blk, nb_blk), jnp.float32).at[jnp.array(tgt_idx), bonds].set(1.0)
    B2A = jnp.zeros((nb_blk, r_blk), jnp.float32).at[bonds, jnp.array(b2a_idx)].set(1.0)
    REV = jnp.zeros((nb_blk, nb_blk), jnp.float32).at[bonds, jnp.array(rev_idx)].set(1.0)
    ROUTE = B2A @ A2B - REV          # folded message-routing operator (entries in {-1,0,1})

    ubs = jnp.arange(n_ub)
    GU = jnp.zeros((r_blk, r_blk), jnp.float32).at[ubs, jnp.array([u for u, _ in und])].set(1.0)
    GV = jnp.zeros((r_blk, r_blk), jnp.float32).at[ubs, jnp.array([v for _, v in und])].set(1.0)

    mol_id = jnp.array(mol_of_atom)
    maskT = jnp.zeros((r_blk, MOLS_PER_BLOCK), jnp.float32).at[
        jnp.arange(atoms_blk), mol_id].set(1.0)

    # per-block, per-molecule integer total-charge constraints in {-1, 0, 1}
    constraints = jax.random.randint(
        key, (num_blocks, 1, MOLS_PER_BLOCK), -1, 2).astype(jnp.float32)

    def tile_bf16(x):   # 0/±1 entries are exact in bf16
        return jnp.tile(x[None].astype(jnp.bfloat16), (num_blocks, 1, 1))

    return {
        "n_atoms_blk": atoms_blk, "n_ub_blk": n_ub, "n_db_blk": n_db,
        "R_BLK": r_blk, "NB_BLK": nb_blk, "M_BLK": MOLS_PER_BLOCK,
        "A2B": tile_bf16(A2B), "ROUTE": tile_bf16(ROUTE),
        "GU": tile_bf16(GU), "GV": tile_bf16(GV), "mol_maskT": tile_bf16(maskT),
        "constraints": constraints,
        # f32 single-block topology for the pure-JAX reference
        "ref": {"A2B": A2B, "B2A": B2A, "REV": REV, "GU": GU, "GV": GV, "maskT": maskT},
    }


if __name__ == "__main__":
    key = jax.random.PRNGKey(0)
    k_graph, k_fa, k_fb, k_params = jax.random.split(key, 4)

    graph = build_graph(k_graph, NUM_BLOCKS)
    r_blk, nb_blk = graph["R_BLK"], graph["NB_BLK"]
    n_a, n_ub = graph["n_atoms_blk"], graph["n_ub_blk"]

    f_atoms = jax.random.normal(k_fa, (NUM_BLOCKS, r_blk, ATOM_FDIM), jnp.float32)
    f_bonds = jax.random.normal(k_fb, (NUM_BLOCKS, nb_blk, BOND_FDIM), jnp.float32)
    # (with this block config n_atoms_blk == R_BLK and n_db_blk == NB_BLK, so
    #  there are no padded input rows; padding only exists on bond-output rows
    #  >= n_ub, which the wrapper slices off)
    feats = {"f_atoms": f_atoms, "f_bonds": f_bonds}
    params = init_params(k_params)

    outputs = molecule_model_forward(feats, graph, params)
    outputs = jax.block_until_ready(outputs)

    assert outputs[0].shape == (NUM_BLOCKS * n_a, 1)
    assert outputs[1].shape == (NUM_BLOCKS * n_a, 1)
    assert outputs[2].shape == (NUM_BLOCKS * n_ub, 1)

    # References computed at full f32 matmul precision.
    with jax.default_matmul_precision("highest"):
        refm = reference_forward(feats, graph, params, bf16_routing=True)   # matches kernel casts
        reff = reference_forward(feats, graph, params, bf16_routing=False)  # pure f32 model

    # 1) tight wiring check vs. the cast-matched reference
    assert jnp.allclose(outputs[0], refm[0], atol=2e-2)
    assert jnp.allclose(outputs[1], refm[1], atol=2e-2)
    assert jnp.allclose(outputs[2], refm[2], atol=2e-2)
    # 2) mixed-precision sanity vs. the pure-f32 reference
    assert jnp.allclose(outputs[0], reff[0], atol=5e-2)
    assert jnp.allclose(outputs[1], reff[1], atol=5e-2)
    assert jnp.allclose(outputs[2], reff[2], atol=5e-2)

    # 3) constrained head: per-molecule sums of out0 must equal the constraints
    maskT = graph["ref"]["maskT"][:n_a]                       # [atoms/block, mols/block]
    out0_blocks = outputs[0].reshape(NUM_BLOCKS, n_a)
    mol_sums = (maskT[None, :, :] * out0_blocks[:, :, None]).sum(axis=1)   # [G, M]
    assert jnp.allclose(mol_sums, graph["constraints"][:, 0, :], atol=1e-3)

    print("KERNEL_OK")
</pallas_src>

<mosaic_0001>
module attributes {stable_mosaic.version = 11 : i64} {
  func.func @_fused_block_kernel(%arg0: i32, %arg1: memref<1x256x16xf32, #tpu.memory_space<vmem>>, %arg2: memref<1x448x32xf32, #tpu.memory_space<vmem>>, %arg3: memref<1x256x448xbf16, #tpu.memory_space<vmem>>, %arg4: memref<1x448x448xbf16, #tpu.memory_space<vmem>>, %arg5: memref<1x256x256xbf16, #tpu.memory_space<vmem>>, %arg6: memref<1x256x256xbf16, #tpu.memory_space<vmem>>, %arg7: memref<1x256x32xbf16, #tpu.memory_space<vmem>>, %arg8: memref<1x1x32xf32, #tpu.memory_space<vmem>>, %arg9: memref<32x32xf32, #tpu.memory_space<vmem>>, %arg10: memref<32x32xf32, #tpu.memory_space<vmem>>, %arg11: memref<16x32xf32, #tpu.memory_space<vmem>>, %arg12: memref<32x32xf32, #tpu.memory_space<vmem>>, %arg13: memref<32x64xf32, #tpu.memory_space<vmem>>, %arg14: memref<64x128xf32, #tpu.memory_space<vmem>>, %arg15: memref<32x64xf32, #tpu.memory_space<vmem>>, %arg16: memref<32x64xf32, #tpu.memory_space<vmem>>, %arg17: memref<64x128xf32, #tpu.memory_space<vmem>>, %arg18: memref<8x128xf32, #tpu.memory_space<vmem>>, %arg19: memref<1x256x128xf32, #tpu.memory_space<vmem>>) attributes {dimension_semantics = [#tpu.dimension_semantics<parallel>], iteration_bounds = array<i64: 4>, scalar_prefetch = 0 : i64, scratch_operands = 0 : i64, tpu.core_type = #tpu.core_type<tc>, window_params = [{transform_indices = @transform_0, window_bounds = array<i64: 1, 256, 16>}, {transform_indices = @transform_1, window_bounds = array<i64: 1, 448, 32>}, {transform_indices = @transform_2, window_bounds = array<i64: 1, 256, 448>}, {transform_indices = @transform_3, window_bounds = array<i64: 1, 448, 448>}, {transform_indices = @transform_4, window_bounds = array<i64: 1, 256, 256>}, {transform_indices = @transform_5, window_bounds = array<i64: 1, 256, 256>}, {transform_indices = @transform_6, window_bounds = array<i64: 1, 256, 32>}, {transform_indices = @transform_7, window_bounds = array<i64: 1, 1, 32>}, {pipeline_mode = #tpu.pipeline_mode<synchronous>, transform_indices = @transform_8, window_bounds = array<i64: 32, 32>}, {pipeline_mode = #tpu.pipeline_mode<synchronous>, transform_indices = @transform_9, window_bounds = array<i64: 32, 32>}, {pipeline_mode = #tpu.pipeline_mode<synchronous>, transform_indices = @transform_10, window_bounds = array<i64: 16, 32>}, {pipeline_mode = #tpu.pipeline_mode<synchronous>, transform_indices = @transform_11, window_bounds = array<i64: 32, 32>}, {pipeline_mode = #tpu.pipeline_mode<synchronous>, transform_indices = @transform_12, window_bounds = array<i64: 32, 64>}, {pipeline_mode = #tpu.pipeline_mode<synchronous>, transform_indices = @transform_13, window_bounds = array<i64: 64, 128>}, {pipeline_mode = #tpu.pipeline_mode<synchronous>, transform_indices = @transform_14, window_bounds = array<i64: 32, 64>}, {pipeline_mode = #tpu.pipeline_mode<synchronous>, transform_indices = @transform_15, window_bounds = array<i64: 32, 64>}, {pipeline_mode = #tpu.pipeline_mode<synchronous>, transform_indices = @transform_16, window_bounds = array<i64: 64, 128>}, {pipeline_mode = #tpu.pipeline_mode<synchronous>, transform_indices = @transform_17, window_bounds = array<i64: 8, 128>}, {transform_indices = @transform_18, window_bounds = array<i64: 1, 256, 128>}]} {
    %c0 = arith.constant 0 : index
    %c0_0 = arith.constant 0 : index
    %0 = vector.load %arg18[%c0, %c0_0] : memref<8x128xf32, #tpu.memory_space<vmem>>, vector<1x32xf32>
    %c1 = arith.constant 1 : index
    %c0_1 = arith.constant 0 : index
    %1 = vector.load %arg18[%c1, %c0_1] : memref<8x128xf32, #tpu.memory_space<vmem>>, vector<1x64xf32>
    %c2 = arith.constant 2 : index
    %c0_2 = arith.constant 0 : index
    %2 = vector.load %arg18[%c2, %c0_2] : memref<8x128xf32, #tpu.memory_space<vmem>>, vector<1x128xf32>
    %c3 = arith.constant 3 : index
    %c0_3 = arith.constant 0 : index
    %3 = vector.load %arg18[%c3, %c0_3] : memref<8x128xf32, #tpu.memory_space<vmem>>, vector<1x64xf32>
    %c4 = arith.constant 4 : index
    %c0_4 = arith.constant 0 : index
    %4 = vector.load %arg18[%c4, %c0_4] : memref<8x128xf32, #tpu.memory_space<vmem>>, vector<1x128xf32>
    %c5 = arith.constant 5 : index
    %c0_5 = arith.constant 0 : index
    %5 = vector.load %arg18[%c5, %c0_5] : memref<8x128xf32, #tpu.memory_space<vmem>>, vector<1x128xf32>
    %c0_6 = arith.constant 0 : index
    %c0_7 = arith.constant 0 : index
    %c0_8 = arith.constant 0 : index
    %6 = vector.load %arg2[%c0_6, %c0_7, %c0_8] : memref<1x448x32xf32, #tpu.memory_space<vmem>>, vector<1x448x32xf32>
    %7 = vector.shape_cast %6 : vector<1x448x32xf32> to vector<448x32xf32>
    %c0_9 = arith.constant 0 : index
    %c0_10 = arith.constant 0 : index
    %8 = vector.load %arg9[%c0_9, %c0_10] : memref<32x32xf32, #tpu.memory_space<vmem>>, vector<32x32xf32>
    %cst = arith.constant dense<0.000000e+00> : vector<448x32xf32>
    %9 = tpu.matmul %7, %8, %cst {dimension_numbers = #tpu.dot_dimension_numbers<[1], [0], [0], [1], [0, 0, 1, 1], [], []>} : vector<448x32xf32>, vector<32x32xf32>, vector<448x32xf32> -> vector<448x32xf32>
    %cst_11 = arith.constant 0.000000e+00 : f32
    %10 = vector.broadcast %cst_11 : f32 to vector<448x32xf32>
    %11 = arith.maximumf %9, %10 : vector<448x32xf32>
    %c0_12 = arith.constant 0 : index
    %c0_13 = arith.constant 0 : index
    %c0_14 = arith.constant 0 : index
    %12 = vector.load %arg4[%c0_12, %c0_13, %c0_14] : memref<1x448x448xbf16, #tpu.memory_space<vmem>>, vector<1x448x448xbf16>
    %13 = vector.shape_cast %12 : vector<1x448x448xbf16> to vector<448x448xbf16>
    %c0_15 = arith.constant 0 : index
    %c0_16 = arith.constant 0 : index
    %14 = vector.load %arg10[%c0_15, %c0_16] : memref<32x32xf32, #tpu.memory_space<vmem>>, vector<32x32xf32>
    %15 = arith.truncf %11 : vector<448x32xf32> to vector<448x32xbf16>
    %cst_17 = arith.constant dense<0.000000e+00> : vector<448x32xf32>
    %16 = tpu.matmul %13, %15, %cst_17 {dimension_numbers = #tpu.dot_dimension_numbers<[1], [0], [0], [1], [0, 0, 1, 1], [], []>} : vector<448x448xbf16>, vector<448x32xbf16>, vector<448x32xf32> -> vector<448x32xf32>
    %cst_18 = arith.constant dense<0.000000e+00> : vector<448x32xf32>
    %17 = tpu.matmul %16, %14, %cst_18 {dimension_numbers = #tpu.dot_dimension_numbers<[1], [0], [0], [1], [0, 0, 1, 1], [], []>} : vector<448x32xf32>, vector<32x32xf32>, vector<448x32xf32> -> vector<448x32xf32>
    %18 = arith.addf %11, %17 : vector<448x32xf32>
    %cst_19 = arith.constant 0.000000e+00 : f32
    %19 = vector.broadcast %cst_19 : f32 to vector<448x32xf32>
    %20 = arith.maximumf %18, %19 : vector<448x32xf32>
    %21 = arith.truncf %20 : vector<448x32xf32> to vector<448x32xbf16>
    %cst_20 = arith.constant dense<0.000000e+00> : vector<448x32xf32>
    %22 = tpu.matmul %13, %21, %cst_20 {dimension_numbers = #tpu.dot_dimension_numbers<[1], [0], [0], [1], [0, 0, 1, 1], [], []>} : vector<448x448xbf16>, vector<448x32xbf16>, vector<448x32xf32> -> vector<448x32xf32>
    %cst_21 = arith.constant dense<0.000000e+00> : vector<448x32xf32>
    %23 = tpu.matmul %22, %14, %cst_21 {dimension_numbers = #tpu.dot_dimension_numbers<[1], [0], [0], [1], [0, 0, 1, 1], [], []>} : vector<448x32xf32>, vector<32x32xf32>, vector<448x32xf32> -> vector<448x32xf32>
    %24 = arith.addf %11, %23 : vector<448x32xf32>
    %cst_22 = arith.constant 0.000000e+00 : f32
    %25 = vector.broadcast %cst_22 : f32 to vector<448x32xf32>
    %26 = arith.maximumf %24, %25 : vector<448x32xf32>
    %c0_23 = arith.constant 0 : index
    %c0_24 = arith.constant 0 : index
    %c0_25 = arith.constant 0 : index
    %27 = vector.load %arg3[%c0_23, %c0_24, %c0_25] : memref<1x256x448xbf16, #tpu.memory_space<vmem>>, vector<1x256x448xbf16>
    %28 = vector.shape_cast %27 : vector<1x256x448xbf16> to vector<256x448xbf16>
    %29 = arith.truncf %26 : vector<448x32xf32> to vector<448x32xbf16>
    %cst_26 = arith.constant dense<0.000000e+00> : vector<256x32xf32>
    %30 = tpu.matmul %28, %29, %cst_26 {dimension_numbers = #tpu.dot_dimension_numbers<[1], [0], [0], [1], [0, 0, 1, 1], [], []>} : vector<256x448xbf16>, vector<448x32xbf16>, vector<256x32xf32> -> vector<256x32xf32>
    %c0_27 = arith.constant 0 : index
    %c0_28 = arith.constant 0 : index
    %c0_29 = arith.constant 0 : index
    %31 = vector.load %arg1[%c0_27, %c0_28, %c0_29] : memref<1x256x16xf32, #tpu.memory_space<vmem>>, vector<1x256x16xf32>
    %32 = vector.shape_cast %31 : vector<1x256x16xf32> to vector<256x16xf32>
    %c0_30 = arith.constant 0 : index
    %c0_31 = arith.constant 0 : index
    %33 = vector.load %arg11[%c0_30, %c0_31] : memref<16x32xf32, #tpu.memory_space<vmem>>, vector<16x32xf32>
    %cst_32 = arith.constant dense<0.000000e+00> : vector<256x32xf32>
    %34 = tpu.matmul %32, %33, %cst_32 {dimension_numbers = #tpu.dot_dimension_numbers<[1], [0], [0], [1], [0, 0, 1, 1], [], []>} : vector<256x16xf32>, vector<16x32xf32>, vector<256x32xf32> -> vector<256x32xf32>
    %c0_33 = arith.constant 0 : index
    %c0_34 = arith.constant 0 : index
    %35 = vector.load %arg12[%c0_33, %c0_34] : memref<32x32xf32, #tpu.memory_space<vmem>>, vector<32x32xf32>
    %cst_35 = arith.constant dense<0.000000e+00> : vector<256x32xf32>
    %36 = tpu.matmul %30, %35, %cst_35 {dimension_numbers = #tpu.dot_dimension_numbers<[1], [0], [0], [1], [0, 0, 1, 1], [], []>} : vector<256x32xf32>, vector<32x32xf32>, vector<256x32xf32> -> vector<256x32xf32>
    %37 = arith.addf %34, %36 : vector<256x32xf32>
    %38 = vector.broadcast %0 : vector<1x32xf32> to vector<256x32xf32>
    %39 = arith.addf %37, %38 : vector<256x32xf32>
    %cst_36 = arith.constant 0.000000e+00 : f32
    %40 = vector.broadcast %cst_36 : f32 to vector<256x32xf32>
    %41 = arith.maximumf %39, %40 : vector<256x32xf32>
    %c0_37 = arith.constant 0 : index
    %c0_38 = arith.constant 0 : index
    %42 = vector.load %arg13[%c0_37, %c0_38] : memref<32x64xf32, #tpu.memory_space<vmem>>, vector<32x64xf32>
    %cst_39 = arith.constant dense<0.000000e+00> : vector<256x64xf32>
    %43 = tpu.matmul %41, %42, %cst_39 {dimension_numbers = #tpu.dot_dimension_numbers<[1], [0], [0], [1], [0, 0, 1, 1], [], []>} : vector<256x32xf32>, vector<32x64xf32>, vector<256x64xf32> -> vector<256x64xf32>
    %44 = vector.broadcast %1 : vector<1x64xf32> to vector<256x64xf32>
    %45 = arith.addf %43, %44 : vector<256x64xf32>
    %cst_40 = arith.constant 0.000000e+00 : f32
    %46 = vector.broadcast %cst_40 : f32 to vector<256x64xf32>
    %47 = arith.maximumf %45, %46 : vector<256x64xf32>
    %c0_41 = arith.constant 0 : index
    %c0_42 = arith.constant 0 : index
    %48 = vector.load %arg14[%c0_41, %c0_42] : memref<64x128xf32, #tpu.memory_space<vmem>>, vector<64x128xf32>
    %cst_43 = arith.constant dense<0.000000e+00> : vector<256x128xf32>
    %49 = tpu.matmul %47, %48, %cst_43 {dimension_numbers = #tpu.dot_dimension_numbers<[1], [0], [0], [1], [0, 0, 1, 1], [], []>} : vector<256x64xf32>, vector<64x128xf32>, vector<256x128xf32> -> vector<256x128xf32>
    %50 = vector.broadcast %2 : vector<1x128xf32> to vector<256x128xf32>
    %51 = arith.addf %49, %50 : vector<256x128xf32>
    %52 = vector.extract_strided_slice %51 {offsets = [0, 0], sizes = [256, 1], strides = [1, 1]} : vector<256x128xf32> to vector<256x1xf32>
    %53 = vector.extract_strided_slice %51 {offsets = [0, 3], sizes = [256, 1], strides = [1, 1]} : vector<256x128xf32> to vector<256x1xf32>
    %c0_44 = arith.constant 0 : index
    %c0_45 = arith.constant 0 : index
    %c0_46 = arith.constant 0 : index
    %54 = vector.load %arg7[%c0_44, %c0_45, %c0_46] : memref<1x256x32xbf16, #tpu.memory_space<vmem>>, vector<1x256x32xbf16>
    %55 = vector.shape_cast %54 : vector<1x256x32xbf16> to vector<256x32xbf16>
    %56 = arith.extf %55 : vector<256x32xbf16> to vector<256x32xf32>
    %cst_47 = arith.constant 0.000000e+00 : f32
    %57 = vector.broadcast %cst_47 : f32 to vector<256x32xf32>
    %58 = arith.cmpf ogt, %56, %57 : vector<256x32xf32>
    %cst_48 = arith.constant -1.000000e+30 : f32
    %59 = vector.shape_cast %53 : vector<256x1xf32> to vector<256x1xf32>
    %60 = vector.broadcast %59 : vector<256x1xf32> to vector<256x32xf32>
    %61 = vector.broadcast %cst_48 : f32 to vector<256x32xf32>
    %62 = arith.select %58, %60, %61 : vector<256x32xi1>, vector<256x32xf32>
    %cst_49 = arith.constant dense<0xFF800000> : vector<32xf32>
    %63 = vector.multi_reduction <maximumf>, %62, %cst_49 [0] : vector<256x32xf32> to vector<32xf32>
    %64 = vector.shape_cast %63 : vector<32xf32> to vector<1x32xf32>
    %65 = vector.broadcast %64 : vector<1x32xf32> to vector<256x32xf32>
    %66 = arith.subf %62, %65 : vector<256x32xf32>
    %cst_50 = arith.constant 0.000000e+00 : f32
    %67 = vector.broadcast %cst_50 : f32 to vector<256x32xf32>
    %68 = arith.cmpf ogt, %56, %67 : vector<256x32xf32>
    %69 = math.exp %66 : vector<256x32xf32>
    %cst_51 = arith.constant 0.000000e+00 : f32
    %70 = vector.broadcast %cst_51 : f32 to vector<256x32xf32>
    %71 = arith.select %68, %69, %70 : vector<256x32xi1>, vector<256x32xf32>
    %cst_52 = arith.constant dense<0.000000e+00> : vector<32xf32>
    %72 = vector.multi_reduction <add>, %71, %cst_52 [0] : vector<256x32xf32> to vector<32xf32>
    %73 = vector.shape_cast %72 : vector<32xf32> to vector<1x32xf32>
    %cst_53 = arith.constant 1.000000e-30 : f32
    %74 = vector.broadcast %cst_53 : f32 to vector<1x32xf32>
    %75 = arith.maximumf %73, %74 : vector<1x32xf32>
    %76 = vector.broadcast %75 : vector<1x32xf32> to vector<256x32xf32>
    %77 = arith.divf %71, %76 : vector<256x32xf32>
    %78 = vector.broadcast %52 : vector<256x1xf32> to vector<256x32xf32>
    %79 = arith.mulf %56, %78 : vector<256x32xf32>
    %cst_54 = arith.constant dense<0.000000e+00> : vector<32xf32>
    %80 = vector.multi_reduction <add>, %79, %cst_54 [0] : vector<256x32xf32> to vector<32xf32>
    %81 = vector.shape_cast %80 : vector<32xf32> to vector<1x32xf32>
    %c0_55 = arith.constant 0 : index
    %c0_56 = arith.constant 0 : index
    %c0_57 = arith.constant 0 : index
    %82 = vector.load %arg8[%c0_55, %c0_56, %c0_57] : memref<1x1x32xf32, #tpu.memory_space<vmem>>, vector<1x1x32xf32>
    %83 = vector.shape_cast %82 : vector<1x1x32xf32> to vector<1x32xf32>
    %84 = arith.subf %83, %81 : vector<1x32xf32>
    %85 = vector.broadcast %84 : vector<1x32xf32> to vector<256x32xf32>
    %86 = arith.mulf %77, %85 : vector<256x32xf32>
    %cst_58 = arith.constant dense<0.000000e+00> : vector<256xf32>
    %87 = vector.multi_reduction <add>, %86, %cst_58 [1] : vector<256x32xf32> to vector<256xf32>
    %88 = vector.shape_cast %87 : vector<256xf32> to vector<256x1xf32>
    %89 = arith.truncf %41 : vector<256x32xf32> to vector<256x32xbf16>
    %c0_59 = arith.constant 0 : index
    %c0_60 = arith.constant 0 : index
    %c0_61 = arith.constant 0 : index
    %90 = vector.load %arg5[%c0_59, %c0_60, %c0_61] : memref<1x256x256xbf16, #tpu.memory_space<vmem>>, vector<1x256x256xbf16>
    %91 = vector.shape_cast %90 : vector<1x256x256xbf16> to vector<256x256xbf16>
    %cst_62 = arith.constant dense<0.000000e+00> : vector<256x32xf32>
    %92 = tpu.matmul %91, %89, %cst_62 {dimension_numbers = #tpu.dot_dimension_numbers<[1], [0], [0], [1], [0, 0, 1, 1], [], []>} : vector<256x256xbf16>, vector<256x32xbf16>, vector<256x32xf32> -> vector<256x32xf32>
    %c0_63 = arith.constant 0 : index
    %c0_64 = arith.constant 0 : index
    %c0_65 = arith.constant 0 : index
    %93 = vector.load %arg6[%c0_63, %c0_64, %c0_65] : memref<1x256x256xbf16, #tpu.memory_space<vmem>>, vector<1x256x256xbf16>
    %94 = vector.shape_cast %93 : vector<1x256x256xbf16> to vector<256x256xbf16>
    %cst_66 = arith.constant dense<0.000000e+00> : vector<256x32xf32>
    %95 = tpu.matmul %94, %89, %cst_66 {dimension_numbers = #tpu.dot_dimension_numbers<[1], [0], [0], [1], [0, 0, 1, 1], [], []>} : vector<256x256xbf16>, vector<256x32xbf16>, vector<256x32xf32> -> vector<256x32xf32>
    %c0_67 = arith.constant 0 : index
    %c0_68 = arith.constant 0 : index
    %96 = vector.load %arg15[%c0_67, %c0_68] : memref<32x64xf32, #tpu.memory_space<vmem>>, vector<32x64xf32>
    %cst_69 = arith.constant dense<0.000000e+00> : vector<256x64xf32>
    %97 = tpu.matmul %92, %96, %cst_69 {dimension_numbers = #tpu.dot_dimension_numbers<[1], [0], [0], [1], [0, 0, 1, 1], [], []>} : vector<256x32xf32>, vector<32x64xf32>, vector<256x64xf32> -> vector<256x64xf32>
    %c0_70 = arith.constant 0 : index
    %c0_71 = arith.constant 0 : index
    %98 = vector.load %arg16[%c0_70, %c0_71] : memref<32x64xf32, #tpu.memory_space<vmem>>, vector<32x64xf32>
    %cst_72 = arith.constant dense<0.000000e+00> : vector<256x64xf32>
    %99 = tpu.matmul %95, %98, %cst_72 {dimension_numbers = #tpu.dot_dimension_numbers<[1], [0], [0], [1], [0, 0, 1, 1], [], []>} : vector<256x32xf32>, vector<32x64xf32>, vector<256x64xf32> -> vector<256x64xf32>
    %100 = arith.addf %97, %99 : vector<256x64xf32>
    %101 = vector.broadcast %3 : vector<1x64xf32> to vector<256x64xf32>
    %102 = arith.addf %100, %101 : vector<256x64xf32>
    %cst_73 = arith.constant 0.000000e+00 : f32
    %103 = vector.broadcast %cst_73 : f32 to vector<256x64xf32>
    %104 = arith.maximumf %102, %103 : vector<256x64xf32>
    %c0_74 = arith.constant 0 : index
    %c0_75 = arith.constant 0 : index
    %105 = vector.load %arg17[%c0_74, %c0_75] : memref<64x128xf32, #tpu.memory_space<vmem>>, vector<64x128xf32>
    %cst_76 = arith.constant dense<0.000000e+00> : vector<256x128xf32>
    %106 = tpu.matmul %104, %105, %cst_76 {dimension_numbers = #tpu.dot_dimension_numbers<[1], [0], [0], [1], [0, 0, 1, 1], [], []>} : vector<256x64xf32>, vector<64x128xf32>, vector<256x128xf32> -> vector<256x128xf32>
    %107 = vector.broadcast %4 : vector<1x128xf32> to vector<256x128xf32>
    %108 = arith.addf %106, %107 : vector<256x128xf32>
    %109 = arith.addf %51, %108 : vector<256x128xf32>
    %110 = vector.broadcast %88 : vector<256x1xf32> to vector<256x128xf32>
    %111 = vector.broadcast %5 : vector<1x128xf32> to vector<256x128xf32>
    %112 = arith.mulf %110, %111 : vector<256x128xf32>
    %113 = arith.addf %109, %112 : vector<256x128xf32>
    %c0_77 = arith.constant 0 : index
    %c0_78 = arith.constant 0 : index
    %c0_79 = arith.constant 0 : index
    %114 = vector.load %arg19[%c0_77, %c0_78, %c0_79] : memref<1x256x128xf32, #tpu.memory_space<vmem>>, vector<1x256x128xf32>
    %115 = vector.shape_cast %114 : vector<1x256x128xf32> to vector<256x128xf32>
    %116 = vector.shape_cast %113 : vector<256x128xf32> to vector<1x256x128xf32>
    tpu.vector_store %arg19[%c0_77, %c0_78, %c0_79], %116 {strides = array<i32>} : memref<1x256x128xf32, #tpu.memory_space<vmem>>, vector<1x256x128xf32>,
    return
  }
  func.func @transform_0(%arg0: i32) -> (i32, i32, i32) {
    %c0_i32 = arith.constant 0 : i32
    %c0_i32_0 = arith.constant 0 : i32
    %c0_i32_1 = arith.constant 0 : i32
    return %arg0, %c0_i32, %c0_i32_0 : i32, i32, i32
  }
  func.func @transform_1(%arg0: i32) -> (i32, i32, i32) {
    %c0_i32 = arith.constant 0 : i32
    %c0_i32_0 = arith.constant 0 : i32
    %c0_i32_1 = arith.constant 0 : i32
    return %arg0, %c0_i32, %c0_i32_0 : i32, i32, i32
  }
  func.func @transform_2(%arg0: i32) -> (i32, i32, i32) {
    %c0_i32 = arith.constant 0 : i32
    %c0_i32_0 = arith.constant 0 : i32
    %c0_i32_1 = arith.constant 0 : i32
    return %arg0, %c0_i32, %c0_i32_0 : i32, i32, i32
  }
  func.func @transform_3(%arg0: i32) -> (i32, i32, i32) {
    %c0_i32 = arith.constant 0 : i32
    %c0_i32_0 = arith.constant 0 : i32
    %c0_i32_1 = arith.constant 0 : i32
    return %arg0, %c0_i32, %c0_i32_0 : i32, i32, i32
  }
  func.func @transform_4(%arg0: i32) -> (i32, i32, i32) {
    %c0_i32 = arith.constant 0 : i32
    %c0_i32_0 = arith.constant 0 : i32
    %c0_i32_1 = arith.constant 0 : i32
    return %arg0, %c0_i32, %c0_i32_0 : i32, i32, i32
  }
  func.func @transform_5(%arg0: i32) -> (i32, i32, i32) {
    %c0_i32 = arith.constant 0 : i32
    %c0_i32_0 = arith.constant 0 : i32
    %c0_i32_1 = arith.constant 0 : i32
    return %arg0, %c0_i32, %c0_i32_0 : i32, i32, i32
  }
  func.func @transform_6(%arg0: i32) -> (i32, i32, i32) {
    %c0_i32 = arith.constant 0 : i32
    %c0_i32_0 = arith.constant 0 : i32
    %c0_i32_1 = arith.constant 0 : i32
    return %arg0, %c0_i32, %c0_i32_0 : i32, i32, i32
  }
  func.func @transform_7(%arg0: i32) -> (i32, i32, i32) {
    %c0_i32 = arith.constant 0 : i32
    %c0_i32_0 = arith.constant 0 : i32
    %c0_i32_1 = arith.constant 0 : i32
    return %arg0, %c0_i32, %c0_i32_0 : i32, i32, i32
  }
  func.func @transform_8(%arg0: i32) -> (i32, i32) {
    %c0_i32 = arith.constant 0 : i32
    %c0_i32_0 = arith.constant 0 : i32
    %c0_i32_1 = arith.constant 0 : i32
    return %c0_i32, %c0_i32_0 : i32, i32
  }
  func.func @transform_9(%arg0: i32) -> (i32, i32) {
    %c0_i32 = arith.constant 0 : i32
    %c0_i32_0 = arith.constant 0 : i32
    %c0_i32_1 = arith.constant 0 : i32
    return %c0_i32, %c0_i32_0 : i32, i32
  }
  func.func @transform_10(%arg0: i32) -> (i32, i32) {
    %c0_i32 = arith.constant 0 : i32
    %c0_i32_0 = arith.constant 0 : i32
    %c0_i32_1 = arith.constant 0 : i32
    return %c0_i32, %c0_i32_0 : i32, i32
  }
  func.func @transform_11(%arg0: i32) -> (i32, i32) {
    %c0_i32 = arith.constant 0 : i32
    %c0_i32_0 = arith.constant 0 : i32
    %c0_i32_1 = arith.constant 0 : i32
    return %c0_i32, %c0_i32_0 : i32, i32
  }
  func.func @transform_12(%arg0: i32) -> (i32, i32) {
    %c0_i32 = arith.constant 0 : i32
    %c0_i32_0 = arith.constant 0 : i32
    %c0_i32_1 = arith.constant 0 : i32
    return %c0_i32, %c0_i32_0 : i32, i32
  }
  func.func @transform_13(%arg0: i32) -> (i32, i32) {
    %c0_i32 = arith.constant 0 : i32
    %c0_i32_0 = arith.constant 0 : i32
    %c0_i32_1 = arith.constant 0 : i32
    return %c0_i32, %c0_i32_0 : i32, i32
  }
  func.func @transform_14(%arg0: i32) -> (i32, i32) {
    %c0_i32 = arith.constant 0 : i32
    %c0_i32_0 = arith.constant 0 : i32
    %c0_i32_1 = arith.constant 0 : i32
    return %c0_i32, %c0_i32_0 : i32, i32
  }
  func.func @transform_15(%arg0: i32) -> (i32, i32) {
    %c0_i32 = arith.constant 0 : i32
    %c0_i32_0 = arith.constant 0 : i32
    %c0_i32_1 = arith.constant 0 : i32
    return %c0_i32, %c0_i32_0 : i32, i32
  }
  func.func @transform_16(%arg0: i32) -> (i32, i32) {
    %c0_i32 = arith.constant 0 : i32
    %c0_i32_0 = arith.constant 0 : i32
    %c0_i32_1 = arith.constant 0 : i32
    return %c0_i32, %c0_i32_0 : i32, i32
  }
  func.func @transform_17(%arg0: i32) -> (i32, i32) {
    %c0_i32 = arith.constant 0 : i32
    %c0_i32_0 = arith.constant 0 : i32
    %c0_i32_1 = arith.constant 0 : i32
    return %c0_i32, %c0_i32_0 : i32, i32
  }
  func.func @transform_18(%arg0: i32) -> (i32, i32, i32) {
    %c0_i32 = arith.constant 0 : i32
    %c0_i32_0 = arith.constant 0 : i32
    %c0_i32_1 = arith.constant 0 : i32
    return %arg0, %c0_i32, %c0_i32_0 : i32, i32, i32
  }
}

</mosaic_0001>

<bundles_post_ra>
// kernel: tpu_custom_call.1
= control target key start
LH: loop header
LB: loop body
LE: loop exit
PB: predicated region body
PF: predicated region fallthrough
CT: control target
= control target key end

     0   :  { %s16525_s0 = inlined_call_operand.vmem [shape: f32[4,256,16], index: 0, kind: input, shape index: {}]   ;;  %s16526_s1 = inlined_call_operand.vmem [shape: f32[4,448,32], index: 1, kind: input, shape index: {}]   ;;  %s16527_s2 = inlined_call_operand.vmem [shape: bf16[4,256,448], index: 2, kind: input, shape index: {}]   ;;  %s16528_s3 = inlined_call_operand.vmem [shape: bf16[4,448,448], index: 3, kind: input, shape index: {}]   ;;  %s16529_s4 = inlined_call_operand.vmem [shape: bf16[4,256,256], index: 4, kind: input, shape index: {}]   ;;  %s16530_s5 = inlined_call_operand.vmem [shape: bf16[4,256,256], index: 5, kind: input, shape index: {}]   ;;  %s16531_s6 = inlined_call_operand.vmem [shape: bf16[4,256,32], index: 6, kind: input, shape index: {}]   ;;  %s16532_s7 = inlined_call_operand.vmem [shape: f32[4,1,32], index: 7, kind: input, shape index: {}]   ;;  %s16533_s8 = inlined_call_operand.vmem [shape: f32[32,32], index: 8, kind: input, shape index: {}]   ;;  %s16534_s9 = inlined_call_operand.vmem [shape: f32[32,32], index: 9, kind: input, shape index: {}]   ;;  %s16535_s10 = inlined_call_operand.vmem [shape: f32[16,32], index: 10, kind: input, shape index: {}]   ;;  %s16536_s11 = inlined_call_operand.vmem [shape: f32[32,32], index: 11, kind: input, shape index: {}]   ;;  %s16537_s12 = inlined_call_operand.vmem [shape: f32[32,64], index: 12, kind: input, shape index: {}]   ;;  %s16538_s13 = inlined_call_operand.vmem [shape: f32[64,128], index: 13, kind: input, shape index: {}]   ;;  %s16539_s14 = inlined_call_operand.vmem [shape: f32[32,64], index: 14, kind: input, shape index: {}]   ;;  %s16540_s15 = inlined_call_operand.vmem [shape: f32[32,64], index: 15, kind: input, shape index: {}]   ;;  %s16541_s16 = inlined_call_operand.vmem [shape: f32[64,128], index: 16, kind: input, shape index: {}]   ;;  %s16542_s17 = inlined_call_operand.vmem [shape: f32[8,128], index: 17, kind: input, shape index: {}]   ;;  %s16543_s18 = inlined_call_operand.hbm [shape: f32[4,256,128], index: 18, kind: output, shape index: {}]  }
   0x1   :  { %16714 = sst [smem:[#allocation83_spill]] %s16525_s0 }
   0x2   :  { %16715 = sst [smem:[#allocation84_spill]] %s16526_s1 }
   0x3   :  { %16716 = sst [smem:[#allocation85_spill]] %s16527_s2 }
   0x4   :  { %16717 = sst [smem:[#allocation86_spill]] %s16543_s18 }
   0x5   :  { %23 = vsyncpa [#allocation3], 0 }
   0x6   :  { %25 = vsyncpa [#allocation3 + $0x1], 0  ;;  %s12667_s27 = smov 0   ;;  %s12669_s28 = smov 0  }
   0x7   :  { %s12671_s29 = smov 0   ;;  %s12673_s30 = smov 0  }
   0x8 LB: > { %16718 = sst [smem:[#allocation5_spill]] %s12553_s27  ;;  %s12688_s0 = sadd.s32 4294967295, %s12565_s30   ;;  %s12565_s30 = sphi %s12673_s30, %s17260_s30   ;;  %s12561_s29 = sphi %s12671_s29, %s17262_s29   ;;  %s12557_s28 = sphi %s12669_s28, %s17264_s28   ;;  %s12553_s27 = sphi %s12667_s27, %s17263_s27  }
   0x9   : > { %16719 = sst [smem:[#allocation6_spill]] %s12561_s29  ;;  %s9636_s19 = sadd.s32 4294967294, %s12565_s30  }
   0xa   : > { %16720 = sst [smem:[#allocation7_spill]] %s12565_s30  ;;  %s12692_s1 = sadd.s32 1, %s12565_s30  }
   0xb   : > { %16721 = sst [smem:[#allocation8_spill]] %s12692_s1  ;;  %s456_s20 = sadd.s32 1, %s12561_s29 }
   0xc   : > { %s453_s21 = ssub.s32 %s12565_s30, %s12692_s1  ;;  %p466_p0 = scmp.ne.s32.totalorder %s12561_s29, %s12557_s28 }
   0xd   : > { %p454_p1 = scmp.eq.s32.totalorder %s453_s21, 0  ;;  %p467_p2 = scmp.eq.s32.totalorder %s12688_s0, 3 }
   0xe   : > { %p472_p3 = scmp.ne.s32.totalorder %s12557_s28, %s12553_s27  ;;  %p473_p4 = scmp.eq.s32.totalorder %s9636_s19, 3 }
   0xf   : > { %s12703_s22 = scalar_select %p454_p1, %s12561_s29, %s456_s20  }
  0x10   : > { %p12705_p5 = por %p467_p2, %p466_p0  ;;  %p12709_p6 = por %p473_p4, %p472_p3 }
  0x11   : > { %16722 = sst [smem:[#allocation9_spill]] %s12703_s22  ;;  %p9639_p7 = scmp.ge.s32.totalorder %s12565_s30, 1 }
  0x12   : > { %s16724_s23 = scalar_select %p12709_p6, 1, 0 }
  0x13   : > { %p583_p8 = scmp.lt.s32.totalorder %s12565_s30, 5 }
  0x14   : > { %16725 = sst [smem:[#allocation10_spill]] %s16724_s23 }
  0x15   : > { %p584_p9 = pnand %p9639_p7, %p583_p8 }
  0x17   : > { %587 = sbr.rel (%p584_p9) target bundleno = 3109 (0xc25), region = 92 }
  0x1c   : > { %v774_v0 = vld [vmem:[%s16533_s8 + $0x18] sm:$0xff]  ;;  %v773_v1 = vld [vmem:[%s16533_s8 + $0x10] sm:$0xff]  ;;  %p670_p10 = scmp.lt.s32.totalorder %s12688_s0, 3  ;;  %v772_v2 = vld [vmem:[%s16533_s8 + $0x8] sm:$0xff]  ;;  %s16726_s23 = sld [smem:[#allocation85_spill]]  ;;  %vm16628_vm0 = vcmask 261120  }
  0x1d   : > { %11227 = vmatprep.subr.mxu0 %v774_v0  ;;  %v771_v3 = vld [vmem:[%s16533_s8] sm:$0xff]  ;;  %s16727_s30 = sld [smem:[#allocation84_spill]]  ;;  %v16557_v57 = vmov 0   ;;  %vm16626_vm1 = vcmask 523264   ;;  %vm5537_vm2 = vcmask 130048   ;;  %s10373_s25 = sshll.u32 %s12688_s0, 12 }
  0x1e   : > { %11228 = vmatpush3.msra.mxu0 %v774_v0  ;;  %s12726_s22 = scalar_select %p670_p10, %s12688_s0, 3  ;;  %2106 = vmatprep.subr.bf16.mxu1 %v16557_v57 }
  0x1f   : > { %11229 = vmatprep.subr.mxu0 %v773_v1  ;;  %s16812_s21 = sld [smem:[#allocation83_spill]] }
  0x20   : > { %11230 = vmatpush3.msra.mxu0 %v773_v1  ;;  %s11915_s29 = smul.u32 448, %s12726_s22  ;;  %s10369_s26 = sshll.u32 %s12726_s22, 9 }
  0x21   : > { %11231 = vmatprep.subr.mxu0 %v772_v2 }
  0x22   : > { %s12736_s27 = scalar_lea.vmem %s16726_s23, %s10369_s26  ;;  %11232 = vmatpush3.msra.mxu0 %v772_v2 }
  0x23   : > { %s12741_s18 = scalar_lea.vmem %s16727_s30, %s11915_s29  ;;  %11233 = vmatprep.subr.mxu0 %v771_v3  ;;  %s11916_s29 = smul.u32 896, %s12726_s22 }
  0x24   : > { %v715_v4 = vld [vmem:[%s12741_s18] sm:$0xff]  ;;  %v716_v5 = vld [vmem:[%s12741_s18 + $0x8] sm:$0xff]  ;;  %v717_v6 = vld [vmem:[%s12741_s18 + $0x10] sm:$0xff]  ;;  %11234 = vmatpush3.msra.mxu0 %v771_v3 }
  0x25   : > { %11235 = vmatprep.mubr.msk.f32.mxu0 %vm16628_vm0, %v715_v4  ;;  %v718_v7 = vld [vmem:[%s12741_s18 + $0x18] sm:$0xff]  ;;  %v719_v8 = vld [vmem:[%s12741_s18 + $0x20] sm:$0xff]  ;;  %v720_v9 = vld [vmem:[%s12741_s18 + $0x28] sm:$0xff]  ;;  %s12767_s23 = scalar_lea.vmem %s16528_s3, %s11916_s29  ;;  %2363 = vmatprep.subr.bf16.mxu0 %v16557_v57 }
  0x26   : > { %11236 = vmatmul.mubr.msk.f32.vlgmr.msra.gmra.mxu0 %vm16628_vm0, %v716_v5  ;;  %v721_v10 = vld [vmem:[%s12741_s18 + $0x30] sm:$0xff]  ;;  %v722_v11 = vld [vmem:[%s12741_s18 + $0x38] sm:$0xff]  ;;  %v723_v12 = vld [vmem:[%s12741_s18 + $0x40] sm:$0xff] }
  0x27   : > { %11238 = vmatprep.mubr.msk.f32.mxu0 %vm16628_vm0, %v717_v6  ;;  %v724_v13 = vld [vmem:[%s12741_s18 + $0x48] sm:$0xff]  ;;  %v725_v14 = vld [vmem:[%s12741_s18 + $0x50] sm:$0xff]  ;;  %v726_v15 = vld [vmem:[%s12741_s18 + $0x58] sm:$0xff] }
  0x28   : > { %v727_v16 = vld [vmem:[%s12741_s18 + $0x60] sm:$0xff]  ;;  %v728_v17 = vld [vmem:[%s12741_s18 + $0x68] sm:$0xff]  ;;  %v729_v18 = vld [vmem:[%s12741_s18 + $0x70] sm:$0xff] }
  0x29   : > { %v730_v19 = vld [vmem:[%s12741_s18 + $0x78] sm:$0xff]  ;;  %v731_v20 = vld [vmem:[%s12741_s18 + $0x80] sm:$0xff]  ;;  %v732_v21 = vld [vmem:[%s12741_s18 + $0x88] sm:$0xff] }
  0x2a   : > { %11239 = vmatmul.mubr.msk.f32.gmra.mxu0 %vm16628_vm0, %v718_v7  ;;  %v733_v22 = vld [vmem:[%s12741_s18 + $0x90] sm:$0xff]  ;;  %v734_v23 = vld [vmem:[%s12741_s18 + $0x98] sm:$0xff]  ;;  %v735_v24 = vld [vmem:[%s12741_s18 + $0xa0] sm:$0xff] }
  0x2b   : > { %11241 = vmatprep.mubr.msk.f32.mxu0 %vm16628_vm0, %v719_v8  ;;  %v736_v25 = vld [vmem:[%s12741_s18 + $0xa8] sm:$0xff]  ;;  %v737_v26 = vld [vmem:[%s12741_s18 + $0xb0] sm:$0xff]  ;;  %v738_v27 = vld [vmem:[%s12741_s18 + $0xb8] sm:$0xff] }
  0x2c   : > { %v739_v28 = vld [vmem:[%s12741_s18 + $0xc0] sm:$0xff]  ;;  %v740_v29 = vld [vmem:[%s12741_s18 + $0xc8] sm:$0xff]  ;;  %v741_v30 = vld [vmem:[%s12741_s18 + $0xd0] sm:$0xff] }
  0x2d   : > { %v742_v31 = vld [vmem:[%s12741_s18 + $0xd8] sm:$0xff]  ;;  %v743_v32 = vld [vmem:[%s12741_s18 + $0xe0] sm:$0xff]  ;;  %v744_v33 = vld [vmem:[%s12741_s18 + $0xe8] sm:$0xff] }
  0x2e   : > { %11242 = vmatmul.mubr.msk.f32.gmra.mxu0 %vm16628_vm0, %v720_v9  ;;  %v745_v34 = vld [vmem:[%s12741_s18 + $0xf0] sm:$0xff]  ;;  %v746_v35 = vld [vmem:[%s12741_s18 + $0xf8] sm:$0xff]  ;;  %v747_v36 = vld [vmem:[%s12741_s18 + $0x100] sm:$0xff] }
  0x2f   : > { %11244 = vmatprep.mubr.msk.f32.mxu0 %vm16628_vm0, %v721_v10  ;;  %v748_v37 = vld [vmem:[%s12741_s18 + $0x108] sm:$0xff]  ;;  %v749_v38 = vld [vmem:[%s12741_s18 + $0x110] sm:$0xff]  ;;  %v750_v39 = vld [vmem:[%s12741_s18 + $0x118] sm:$0xff] }
  0x30   : > { %v751_v40 = vld [vmem:[%s12741_s18 + $0x120] sm:$0xff]  ;;  %v752_v41 = vld [vmem:[%s12741_s18 + $0x128] sm:$0xff]  ;;  %v753_v42 = vld [vmem:[%s12741_s18 + $0x130] sm:$0xff] }
  0x31   : > { %v754_v43 = vld [vmem:[%s12741_s18 + $0x138] sm:$0xff]  ;;  %v755_v44 = vld [vmem:[%s12741_s18 + $0x140] sm:$0xff]  ;;  %v756_v45 = vld [vmem:[%s12741_s18 + $0x148] sm:$0xff] }
  0x32   : > { %11245 = vmatmul.mubr.msk.f32.gmra.mxu0 %vm16628_vm0, %v722_v11  ;;  %v757_v46 = vld [vmem:[%s12741_s18 + $0x150] sm:$0xff]  ;;  %v758_v47 = vld [vmem:[%s12741_s18 + $0x158] sm:$0xff]  ;;  %v759_v48 = vld [vmem:[%s12741_s18 + $0x160] sm:$0xff] }
  0x33   : > { %11247 = vmatprep.mubr.msk.f32.mxu0 %vm16628_vm0, %v723_v12  ;;  %v760_v49 = vld [vmem:[%s12741_s18 + $0x168] sm:$0xff]  ;;  %v761_v50 = vld [vmem:[%s12741_s18 + $0x170] sm:$0xff]  ;;  %v762_v51 = vld [vmem:[%s12741_s18 + $0x178] sm:$0xff] }
  0x34   : > { %v763_v52 = vld [vmem:[%s12741_s18 + $0x180] sm:$0xff]  ;;  %v764_v53 = vld [vmem:[%s12741_s18 + $0x188] sm:$0xff]  ;;  %v765_v54 = vld [vmem:[%s12741_s18 + $0x190] sm:$0xff] }
  0x35   : > { %v766_v55 = vld [vmem:[%s12741_s18 + $0x198] sm:$0xff]  ;;  %v767_v56 = vld [vmem:[%s12741_s18 + $0x1a0] sm:$0xff]  ;;  %v768_v58 = vld [vmem:[%s12741_s18 + $0x1a8] sm:$0xff] }
  0x36   : > { %11248 = vmatmul.mubr.msk.f32.gmra.mxu0 %vm16628_vm0, %v724_v13  ;;  %v769_v59 = vld [vmem:[%s12741_s18 + $0x1b0] sm:$0xff]  ;;  %v770_v60 = vld [vmem:[%s12741_s18 + $0x1b8] sm:$0xff] }
  0x37   : > { %11250 = vmatprep.mubr.msk.f32.mxu0 %vm16628_vm0, %v725_v14  ;;  %v12864_v61 = vld [vmem:[%s12767_s23 + $0x4] ss:$16 sps:$4 sm:$0xff]   ;;  %v11978_v7 = vld [vmem:[%s12767_s23 + $0xc] ss:$16 sps:$4 sm:$0xff]  }
  0x38   : > { %2138 = vmatprep.mubr.bf16.mxu1 %v12864_v61 }
  0x3a   : > { %11251 = vmatmul.mubr.msk.f32.gmra.mxu0 %vm16628_vm0, %v726_v15 }
  0x3b   : > { %11253 = vmatprep.mubr.msk.f32.mxu0 %vm16628_vm0, %v727_v16 }
  0x3e   : > { %11254 = vmatmul.mubr.msk.f32.gmra.mxu0 %vm16628_vm0, %v728_v17 }
  0x3f   : > { %11256 = vmatprep.mubr.msk.f32.mxu0 %vm16628_vm0, %v729_v18 }
  0x42   : > { %11257 = vmatmul.mubr.msk.f32.gmra.mxu0 %vm16628_vm0, %v730_v19 }
  0x43   : > { %11259 = vmatprep.mubr.msk.f32.mxu0 %vm16628_vm0, %v731_v20 }
  0x46   : > { %11260 = vmatmul.mubr.msk.f32.gmra.mxu0 %vm16628_vm0, %v732_v21 }
  0x47   : > { %11262 = vmatprep.mubr.msk.f32.mxu0 %vm16628_vm0, %v733_v22 }
  0x4a   : > { %11263 = vmatmul.mubr.msk.f32.gmra.mxu0 %vm16628_vm0, %v734_v23 }
  0x4b   : > { %11265 = vmatprep.mubr.msk.f32.mxu0 %vm16628_vm0, %v735_v24 }
  0x4e   : > { %11266 = vmatmul.mubr.msk.f32.gmra.mxu0 %vm16628_vm0, %v736_v25 }
  0x4f   : > { %11268 = vmatprep.mubr.msk.f32.mxu0 %vm16628_vm0, %v737_v26 }
  0x52   : > { %11269 = vmatmul.mubr.msk.f32.gmra.mxu0 %vm16628_vm0, %v738_v27 }
  0x53   : > { %11271 = vmatprep.mubr.msk.f32.mxu0 %vm16628_vm0, %v739_v28 }
  0x56   : > { %11272 = vmatmul.mubr.msk.f32.gmra.mxu0 %vm16628_vm0, %v740_v29 }
  0x57   : > { %11274 = vmatprep.mubr.msk.f32.mxu0 %vm16628_vm0, %v741_v30 }
  0x5a   : > { %11275 = vmatmul.mubr.msk.f32.gmra.mxu0 %vm16628_vm0, %v742_v31 }
  0x5b   : > { %11277 = vmatprep.mubr.msk.f32.mxu0 %vm16628_vm0, %v743_v32 }
  0x5e   : > { %11278 = vmatmul.mubr.msk.f32.gmra.mxu0 %vm16628_vm0, %v744_v33 }
  0x5f   : > { %11280 = vmatprep.mubr.msk.f32.mxu0 %vm16628_vm0, %v745_v34 }
  0x62   : > { %11281 = vmatmul.mubr.msk.f32.gmra.mxu0 %vm16628_vm0, %v746_v35 }
  0x63   : > { %11283 = vmatprep.mubr.msk.f32.mxu0 %vm16628_vm0, %v747_v36 }
  0x66   : > { %11284 = vmatmul.mubr.msk.f32.gmra.mxu0 %vm16628_vm0, %v748_v37 }
  0x67   : > { %11286 = vmatprep.mubr.msk.f32.mxu0 %vm16628_vm0, %v749_v38 }
  0x6a   : > { %11287 = vmatmul.mubr.msk.f32.gmra.mxu0 %vm16628_vm0, %v750_v39 }
  0x6b   : > { %11289 = vmatprep.mubr.msk.f32.mxu0 %vm16628_vm0, %v751_v40 }
  0x6e   : > { %11290 = vmatmul.mubr.msk.f32.gmra.mxu0 %vm16628_vm0, %v752_v41 }
  0x6f   : > { %11292 = vmatprep.mubr.msk.f32.mxu0 %vm16628_vm0, %v753_v42 }
  0x72   : > { %11293 = vmatmul.mubr.msk.f32.gmra.mxu0 %vm16628_vm0, %v754_v43 }
  0x73   : > { %11295 = vmatprep.mubr.msk.f32.mxu0 %vm16628_vm0, %v755_v44 }
  0x76   : > { %11296 = vmatmul.mubr.msk.f32.gmra.mxu0 %vm16628_vm0, %v756_v45 }
  0x77   : > { %11298 = vmatprep.mubr.msk.f32.mxu0 %vm16628_vm0, %v757_v46 }
  0x7a   : > { %11299 = vmatmul.mubr.msk.f32.gmra.mxu0 %vm16628_vm0, %v758_v47 }
  0x7b   : > { %11301 = vmatprep.mubr.msk.f32.mxu0 %vm16628_vm0, %v759_v48 }
  0x7e   : > { %11302 = vmatmul.mubr.msk.f32.gmra.mxu0 %vm16628_vm0, %v760_v49 }
  0x7f   : > { %11304 = vmatprep.mubr.msk.f32.mxu0 %vm16628_vm0, %v761_v50 }
  0x82   : > { %11305 = vmatmul.mubr.msk.f32.gmra.mxu0 %vm16628_vm0, %v762_v51 }
  0x83   : > { %11307 = vmatprep.mubr.msk.f32.mxu0 %vm16628_vm0, %v763_v52 }
  0x86   : > { %11308 = vmatmul.mubr.msk.f32.gmra.mxu0 %vm16628_vm0, %v764_v53 }
  0x87   : > { %11310 = vmatprep.mubr.msk.f32.mxu0 %vm16628_vm0, %v765_v54 }
  0x8a   : > { %11311 = vmatmul.mubr.msk.f32.gmra.mxu0 %vm16628_vm0, %v766_v55 }
  0x8b   : > { %11313 = vmatprep.mubr.msk.f32.mxu0 %vm16628_vm0, %v767_v56 }
  0x8e   : > { %11314 = vmatmul.mubr.msk.f32.gmra.mxu0 %vm16628_vm0, %v768_v58 }
  0x8f   : > { %11316 = vmatprep.mubr.msk.f32.mxu0 %vm16628_vm0, %v769_v59 }
  0x92   : > { %11317 = vmatmul.mubr.msk.f32.gmra.mxu0 %vm16628_vm0, %v770_v60 }
  0x93   : > { %9821 = vmatprep.mubr.msk.bf16.mxu0 %vm16626_vm1, %v11978_v7 }
  0xe6   : > { %v12867_v62 = vpop.f32.mrf.mxu0 }
  0xe7   : > { %v12934_v51 = vmax.f32 %v12867_v62, 0.0 }
  0xe8   : > { %v1010_v63 = vpop.f32.mrf.mxu0 }
  0xe9   : > { %v12929_v48 = vmax.f32 %v1010_v63, 0.0 }
  0xea   : > { %v11240_v0 = vpop.f32.mrf.mxu0 }
  0xeb   : > { %v12926_v46 = vmax.f32 %v11240_v0, 0.0  ;;  %v1461_v53 = vpack.c.bf16 %v12934_v51, %v12929_v48 }
  0xec   : > { %v1020_v1 = vpop.f32.mrf.mxu0 }
  0xed   : > { %v12922_v43 = vmax.f32 %v1020_v1, 0.0 }
  0xee   : > { %v11243_v2 = vpop.f32.mrf.mxu0 }
  0xef   : > { %v12919_v41 = vmax.f32 %v11243_v2, 0.0  ;;  %v1462_v49 = vpack.c.bf16 %v12926_v46, %v12922_v43 }
  0xf0   : > { %v1030_v3 = vpop.f32.mrf.mxu0 }
  0xf1   : > { %v12915_v38 = vmax.f32 %v1030_v3, 0.0 }
  0xf2   : > { %v11246_v4 = vpop.f32.mrf.mxu0 }
  0xf3   : > { %v12912_v36 = vmax.f32 %v11246_v4, 0.0  ;;  %v1463_v44 = vpack.c.bf16 %v12919_v41, %v12915_v38 }
  0xf4   : > { %v1040_v5 = vpop.f32.mrf.mxu0 }
  0xf5   : > { %v12908_v33 = vmax.f32 %v1040_v5, 0.0 }
  0xf6   : > { %v11249_v6 = vpop.f32.mrf.mxu0 }
  0xf7   : > { %v12905_v31 = vmax.f32 %v11249_v6, 0.0  ;;  %v1464_v39 = vpack.c.bf16 %v12912_v36, %v12908_v33 }
  0xf8   : > { %v1050_v8 = vpop.f32.mrf.mxu0 }
  0xf9   : > { %v12899_v28 = vmax.f32 %v1050_v8, 0.0 }
  0xfa   : > { %v11252_v9 = vpop.f32.mrf.mxu0 }
  0xfb   : > { %v12894_v26 = vmax.f32 %v11252_v9, 0.0  ;;  %v1465_v34 = vpack.c.bf16 %v12905_v31, %v12899_v28 }
  0xfc   : > { %v1060_v10 = vpop.f32.mrf.mxu0 }
  0xfd   : > { %v12888_v23 = vmax.f32 %v1060_v10, 0.0 }
  0xfe   : > { %v11255_v11 = vpop.f32.mrf.mxu0 }
  0xff   : > { %v12883_v21 = vmax.f32 %v11255_v11, 0.0  ;;  %v1466_v29 = vpack.c.bf16 %v12894_v26, %v12888_v23 }
 0x100   : > { %v1070_v12 = vpop.f32.mrf.mxu0 }
 0x101   : > { %v12877_v18 = vmax.f32 %v1070_v12, 0.0 }
 0x102   : > { %v11258_v13 = vpop.f32.mrf.mxu0 }
 0x103   : > { %v12871_v15 = vmax.f32 %v11258_v13, 0.0  ;;  %16729 = vst [vmem:[#allocation12_spill] sm:$0xff] %v12877_v18  ;;  %v1467_v24 = vpack.c.bf16 %v12883_v21, %v12877_v18 }
 0x104   : > { %v1080_v14 = vpop.f32.mrf.mxu0 }
 0x105   : > { %16728 = vst [vmem:[#allocation11_spill] sm:$0xff] %v12871_v15  ;;  %v12873_v16 = vmax.f32 %v1080_v14, 0.0 }
 0x106   : > { %v12875_v17 = vpop.f32.mrf.mxu0 }
 0x107   : > { %v1468_v19 = vpack.c.bf16 %v12871_v15, %v12873_v16 }
 0x108   : > { %v12881_v20 = vpop.f32.mrf.mxu0 }
 0x109   : > { %2107 = vmatpush1.bf16.msra.mxu1 %v1468_v19 }
 0x10a   : > { %v12885_v22 = vpop.f32.mrf.mxu0  ;;  %2108 = vmatprep.subr.bf16.mxu1 %v16557_v57 }
 0x10c   : > { %v12892_v25 = vpop.f32.mrf.mxu0 }
 0x10d   : > { %2109 = vmatpush1.bf16.msra.mxu1 %v1467_v24 }
 0x10e   : > { %v12896_v27 = vpop.f32.mrf.mxu0  ;;  %2110 = vmatprep.subr.bf16.mxu1 %v16557_v57 }
 0x110   : > { %v12903_v30 = vpop.f32.mrf.mxu0 }
 0x111   : > { %2111 = vmatpush1.bf16.msra.mxu1 %v1466_v29  ;;  %v12987_v24 = vmax.f32 %v12903_v30, 0.0 }
 0x112   : > { %v11270_v32 = vpop.f32.mrf.mxu0  ;;  %2112 = vmatprep.subr.bf16.mxu1 %v16557_v57 }
 0x113   : > { %v12983_v14 = vmax.f32 %v11270_v32, 0.0  ;;  %v12996_v32 = vmax.f32 %v12892_v25, 0.0 }
 0x114   : > { %v1120_v35 = vpop.f32.mrf.mxu0 }
 0x115   : > { %2113 = vmatpush1.bf16.msra.mxu1 %v1465_v34  ;;  %v12979_v11 = vmax.f32 %v1120_v35, 0.0  ;;  %v12992_v35 = vmax.f32 %v12896_v27, 0.0  ;;  %v13005_v27 = vmax.f32 %v12881_v20, 0.0 }
 0x116   : > { %v11273_v37 = vpop.f32.mrf.mxu0  ;;  %2114 = vmatprep.subr.bf16.mxu1 %v16557_v57 }
 0x117   : > { %v12974_v9 = vmax.f32 %v11273_v37, 0.0  ;;  %v1472_v29 = vpack.c.bf16 %v12983_v14, %v12979_v11 }
 0x118   : > { %v1130_v40 = vpop.f32.mrf.mxu0 }
 0x119   : > { %2115 = vmatpush1.bf16.msra.mxu1 %v1464_v39  ;;  %v12968_v6 = vmax.f32 %v1130_v40, 0.0  ;;  %v1471_v39 = vpack.c.bf16 %v12992_v35, %v12987_v24  ;;  %v13001_v40 = vmax.f32 %v12885_v22, 0.0 }
 0x11a   : > { %v11276_v42 = vpop.f32.mrf.mxu0  ;;  %2116 = vmatprep.subr.bf16.mxu1 %v16557_v57 }
 0x11b   : > { %v12963_v4 = vmax.f32 %v11276_v42, 0.0  ;;  %v1473_v12 = vpack.c.bf16 %v12974_v9, %v12968_v6  ;;  %v1470_v25 = vpack.c.bf16 %v13001_v40, %v12996_v32 }
 0x11c   : > { %v1140_v45 = vpop.f32.mrf.mxu0 }
 0x11d   : > { %2117 = vmatpush1.bf16.msra.mxu1 %v1463_v44  ;;  %v12957_v1 = vmax.f32 %v1140_v45, 0.0  ;;  %v13010_v45 = vmax.f32 %v12875_v17, 0.0 }
 0x11e   : > { %v11279_v47 = vpop.f32.mrf.mxu0  ;;  %2118 = vmatprep.subr.bf16.mxu1 %v16557_v57 }
 0x11f   : > { %v12952_v63 = vmax.f32 %v11279_v47, 0.0  ;;  %v1474_v7 = vpack.c.bf16 %v12963_v4, %v12957_v1  ;;  %16730 = vst [vmem:[#allocation13_spill] sm:$0xff] %v13010_v45  ;;  %v1469_v22 = vpack.c.bf16 %v13010_v45, %v13005_v27 }
 0x120   : > { %v1150_v50 = vpop.f32.mrf.mxu0 }
 0x121   : > { %2119 = vmatpush1.bf16.msra.mxu1 %v1462_v49  ;;  %v12946_v59 = vmax.f32 %v1150_v50, 0.0  ;;  %v11964_v50 = vld [vmem:[%s12767_s23] ss:$16 sps:$4 sm:$0xff]  }
 0x122   : > { %v11282_v52 = vpop.f32.mrf.mxu0  ;;  %2120 = vmatprep.subr.bf16.mxu1 %v16557_v57 }
 0x123   : > { %v12939_v55 = vmax.f32 %v11282_v52, 0.0  ;;  %v1475_v2 = vpack.c.bf16 %v12952_v63, %v12946_v59 }
 0x124   : > { %v1160_v54 = vpop.f32.mrf.mxu0 }
 0x125   : > { %v12941_v56 = vmax.f32 %v1160_v54, 0.0  ;;  %2121 = vmatpush1.bf16.msra.mxu1 %v1461_v53  ;;  %v11967_v53 = vld [vmem:[%s12767_s23 + $0x24] ss:$16 sps:$4 sm:$0xff]  }
 0x126   : > { %v12943_v58 = vpop.f32.mrf.mxu0  ;;  %2122 = vmatprep.subr.bf16.mxu1 %v16557_v57 }
 0x127   : > { %v1476_v60 = vpack.c.bf16 %v12939_v55, %v12941_v56 }
 0x128   : > { %v12950_v62 = vpop.f32.mrf.mxu0 }
 0x129   : > { %2123 = vmatpush2.bf16.msra.mxu1 %v1476_v60 }
 0x12a   : > { %v12954_v0 = vpop.f32.mrf.mxu0  ;;  %2124 = vmatprep.subr.bf16.mxu1 %v16557_v57 }
 0x12c   : > { %v12961_v3 = vpop.f32.mrf.mxu0 }
 0x12d   : > { %2125 = vmatpush2.bf16.msra.mxu1 %v1475_v2 }
 0x12e   : > { %v12965_v5 = vpop.f32.mrf.mxu0  ;;  %2126 = vmatprep.subr.bf16.mxu1 %v16557_v57 }
 0x130   : > { %v12972_v8 = vpop.f32.mrf.mxu0 }
 0x131   : > { %2127 = vmatpush2.bf16.msra.mxu1 %v1474_v7 }
 0x132   : > { %v12976_v10 = vpop.f32.mrf.mxu0  ;;  %2128 = vmatprep.subr.bf16.mxu1 %v16557_v57 }
 0x134   : > { %v1200_v13 = vpop.f32.mrf.mxu0 }
 0x135   : > { %2129 = vmatpush2.bf16.msra.mxu1 %v1473_v12 }
 0x136   : > { %v11297_v19 = vpop.f32.mrf.mxu0  ;;  %2130 = vmatprep.subr.bf16.mxu1 %v16557_v57 }
 0x138   : > { %v1210_v34 = vpop.f32.mrf.mxu0 }
 0x139   : > { %2131 = vmatpush2.bf16.msra.mxu1 %v1472_v29 }
 0x13a   : > { %v11300_v37 = vpop.f32.mrf.mxu0  ;;  %2132 = vmatprep.subr.bf16.mxu1 %v16557_v57 }
 0x13c   : > { %v1220_v30 = vpop.f32.mrf.mxu0 }
 0x13d   : > { %2133 = vmatpush2.bf16.msra.mxu1 %v1471_v39  ;;  %v13032_v12 = vmax.f32 %v1220_v30, 0.0 }
 0x13e   : > { %v11303_v42 = vpop.f32.mrf.mxu0  ;;  %2134 = vmatprep.subr.bf16.mxu1 %v16557_v57 }
 0x13f   : > { %v13029_v7 = vmax.f32 %v11303_v42, 0.0  ;;  %16735 = vst [vmem:[#allocation18_spill] sm:$0xff] %v13032_v12  ;;  %v13041_v42 = vmax.f32 %v1210_v34, 0.0  ;;  %v13054_v34 = vmax.f32 %v12976_v10, 0.0  ;;  %v13068_v10 = vmax.f32 %v12961_v3, 0.0 }
 0x140   : > { %v1230_v44 = vpop.f32.mrf.mxu0 }
 0x141   : > { %2135 = vmatpush2.bf16.msra.mxu1 %v1470_v25  ;;  %v13023_v17 = vmax.f32 %v1230_v44, 0.0  ;;  %16734 = vst [vmem:[#allocation17_spill] sm:$0xff] %v13029_v7  ;;  %v11969_v25 = vld [vmem:[%s12767_s23 + $0x20] ss:$16 sps:$4 sm:$0xff]   ;;  %v13037_v44 = vmax.f32 %v11300_v37, 0.0  ;;  %16737 = vst [vmem:[#allocation20_spill] sm:$0xff] %v13041_v42 }
 0x142   : > { %v11306_v47 = vpop.f32.mrf.mxu0  ;;  %2136 = vmatprep.subr.bf16.mxu1 %v16557_v57  ;;  %v13048_v37 = vmax.f32 %v1200_v13, 0.0  ;;  %16740 = vst [vmem:[#allocation23_spill] sm:$0xff] %v13054_v34  ;;  %16743 = vst [vmem:[#allocation26_spill] sm:$0xff] %v13068_v10 }
 0x143   : > { %v13016_v52 = vmax.f32 %v11306_v47, 0.0  ;;  %16733 = vst [vmem:[#allocation16_spill] sm:$0xff] %v13023_v17  ;;  %v1483_v29 = vpack.c.bf16 %v13029_v7, %v13023_v17  ;;  %16736 = vst [vmem:[#allocation19_spill] sm:$0xff] %v13037_v44  ;;  %v11970_v47 = vld [vmem:[%s12767_s23 + $0x44] ss:$16 sps:$4 sm:$0xff]  }
 0x144   : > { %v1240_v49 = vpop.f32.mrf.mxu0  ;;  %16739 = vst [vmem:[#allocation22_spill] sm:$0xff] %v13048_v37  ;;  %v1480_v13 = vpack.c.bf16 %v13054_v34, %v13048_v37  ;;  %v13074_v34 = vmax.f32 %v12954_v0, 0.0 }
 0x145   : > { %16731 = vst [vmem:[#allocation14_spill] sm:$0xff] %v13016_v52  ;;  %v13018_v20 = vmax.f32 %v1240_v49, 0.0  ;;  %2137 = vmatpush2.bf16.msra.mxu1 %v1469_v22  ;;  %v1482_v22 = vpack.c.bf16 %v13037_v44, %v13032_v12  ;;  %v13045_v49 = vmax.f32 %v11297_v19, 0.0  ;;  %v13059_v19 = vmax.f32 %v12972_v8, 0.0  ;;  %v12126_v44 = vld [vmem:[%s12767_s23 + $0x34c] ss:$16 sps:$4 sm:$0xff]  }
 0x146   : > { %v13021_v54 = vpop.f32.mrf.mxu0  ;;  %16744 = vst [vmem:[#allocation27_spill] sm:$0xff] %v13074_v34  ;;  %v1478_v3 = vpack.c.bf16 %v13074_v34, %v13068_v10  ;;  %v11985_v34 = vld [vmem:[%s12767_s23 + $0xa4] ss:$16 sps:$4 sm:$0xff]   ;;  %v12122_v10 = vld [vmem:[%s12767_s23 + $0x308] ss:$16 sps:$4 sm:$0xff]  }
 0x147   : > { %16732 = vst [vmem:[#allocation15_spill] sm:$0xff] %v13018_v20  ;;  %v1484_v60 = vpack.c.bf16 %v13016_v52, %v13018_v20  ;;  %16738 = vst [vmem:[#allocation21_spill] sm:$0xff] %v13045_v49 }
 0x148   : > { %v13027_v2 = vpop.f32.mrf.mxu0  ;;  %2139 = vmatmul.mubr.bf16.vlgmr.msra.gmra.mxu1 %v11964_v50  ;;  %v1481_v50 = vpack.c.bf16 %v13045_v49, %v13041_v42  ;;  %16741 = vst [vmem:[#allocation24_spill] sm:$0xff] %v13059_v19 }
 0x149   : > { %2364 = vmatpush1.bf16.msra.mxu0 %v1484_v60  ;;  %2146 = vmatprep.mubr.bf16.mxu1 %v11967_v53  ;;  %v11972_v60 = vld [vmem:[%s12767_s23 + $0x40] ss:$16 sps:$4 sm:$0xff]  }
 0x14a   : > { %2365 = vmatprep.subr.bf16.mxu0 %v16557_v57  ;;  %v11312_v39 = vpop.f32.mrf.mxu0 }
 0x14c   : > { %v1260_v30 = vpop.f32.mrf.mxu0 }
 0x14d   : > { %2366 = vmatpush1.bf16.msra.mxu0 %v1483_v29  ;;  %v11973_v29 = vld [vmem:[%s12767_s23 + $0x64] ss:$16 sps:$4 sm:$0xff]  }
 0x14e   : > { %2367 = vmatprep.subr.bf16.mxu0 %v16557_v57  ;;  %v11315_v53 = vpop.f32.mrf.mxu0 }
 0x150   : > { %2147 = vmatmul.mubr.bf16.gmra.mxu1 %v11969_v25  ;;  %v1270_v25 = vpop.f32.mrf.mxu0 }
 0x151   : > { %2368 = vmatpush1.bf16.msra.mxu0 %v1482_v22  ;;  %2154 = vmatprep.mubr.bf16.mxu1 %v11970_v47  ;;  %v13064_v47 = vmax.f32 %v12965_v5, 0.0  ;;  %v11979_v5 = vld [vmem:[%s12767_s23 + $0x84] ss:$16 sps:$4 sm:$0xff]  }
 0x152   : > { %2369 = vmatprep.subr.bf16.mxu0 %v16557_v57  ;;  %v11318_v8 = vpop.f32.mrf.mxu0 }
 0x153   : > { %16742 = vst [vmem:[#allocation25_spill] sm:$0xff] %v13064_v47  ;;  %v1479_v22 = vpack.c.bf16 %v13064_v47, %v13059_v19  ;;  %v11981_v47 = vld [vmem:[%s12767_s23 + $0x80] ss:$16 sps:$4 sm:$0xff]  }
 0x155   : > { %2370 = vmatpush1.bf16.msra.mxu0 %v1481_v50  ;;  %v11975_v50 = vld [vmem:[%s12767_s23 + $0x60] ss:$16 sps:$4 sm:$0xff]  }
 0x156   : > { %2371 = vmatprep.subr.bf16.mxu0 %v16557_v57 }
 0x158   : > { %2155 = vmatmul.mubr.bf16.gmra.mxu1 %v11972_v60  ;;  %v13079_v60 = vmax.f32 %v12950_v62, 0.0 }
 0x159   : > { %2372 = vmatpush1.bf16.msra.mxu0 %v1480_v13  ;;  %2162 = vmatprep.mubr.bf16.mxu1 %v11973_v29  ;;  %v1280_v29 = vpop.f32.mrf.mxu0  ;;  %v13084_v13 = vmax.f32 %v12943_v58, 0.0  ;;  %v13096_v58 = vmax.f32 %v11315_v53, 0.0 }
 0x15a   : > { %2373 = vmatprep.subr.bf16.mxu0 %v16557_v57  ;;  %16745 = vst [vmem:[#allocation28_spill] sm:$0xff] %v13079_v60  ;;  %v13091_v62 = vmax.f32 %v1280_v29, 0.0  ;;  %v11991_v29 = vld [vmem:[%s12767_s23 + $0xc4] ss:$16 sps:$4 sm:$0xff]  }
 0x15b   : > { %16746 = vst [vmem:[#allocation29_spill] sm:$0xff] %v13084_v13  ;;  %v1477_v0 = vpack.c.bf16 %v13084_v13, %v13079_v60  ;;  %16749 = vst [vmem:[#allocation32_spill] sm:$0xff] %v13096_v58 }
 0x15c   : > { %16748 = vst [vmem:[#allocation31_spill] sm:$0xff] %v13091_v62 }
 0x15d   : > { %2374 = vmatpush1.bf16.msra.mxu0 %v1479_v22  ;;  %v13089_v22 = vmax.f32 %v11318_v8, 0.0  ;;  %v13103_v8 = vmax.f32 %v11312_v39, 0.0 }
 0x15e   : > { %2375 = vmatprep.subr.bf16.mxu0 %v16557_v57 }
 0x15f   : > { %16747 = vst [vmem:[#allocation30_spill] sm:$0xff] %v13089_v22  ;;  %16751 = vst [vmem:[#allocation34_spill] sm:$0xff] %v13103_v8 }
 0x160   : > { %2163 = vmatmul.mubr.bf16.gmra.mxu1 %v11975_v50  ;;  %v13098_v50 = vmax.f32 %v1270_v25, 0.0  ;;  %v11987_v25 = vld [vmem:[%s12767_s23 + $0xa0] ss:$16 sps:$4 sm:$0xff]  }
 0x161   : > { %2376 = vmatpush1.bf16.msra.mxu0 %v1478_v3  ;;  %2170 = vmatprep.mubr.bf16.mxu1 %v11979_v5  ;;  %v1488_v5 = vpack.c.bf16 %v13089_v22, %v13091_v62  ;;  %v13105_v3 = vmax.f32 %v1260_v30, 0.0 }
 0x162   : > { %2377 = vmatprep.subr.bf16.mxu0 %v16557_v57  ;;  %16750 = vst [vmem:[#allocation33_spill] sm:$0xff] %v13098_v50  ;;  %v1487_v53 = vpack.c.bf16 %v13096_v58, %v13098_v50  ;;  %v12117_v58 = vld [vmem:[%s12767_s23 + $0x364] ss:$16 sps:$4 sm:$0xff]  }
 0x163   : > { %16752 = vst [vmem:[#allocation35_spill] sm:$0xff] %v13105_v3  ;;  %v1486_v39 = vpack.c.bf16 %v13103_v8, %v13105_v3 }
 0x165   : > { %2378 = vmatpush1.bf16.msra.mxu0 %v1477_v0  ;;  %v11993_v0 = vld [vmem:[%s12767_s23 + $0xc0] ss:$16 sps:$4 sm:$0xff]  }
 0x166   : > { %2387 = vmatprep.subr.bf16.mxu0 %v16557_v57 }
 0x168   : > { %2171 = vmatmul.mubr.bf16.gmra.mxu1 %v11981_v47  ;;  %v13116_v47 = vmax.f32 %v13027_v2, 0.0  ;;  %v11982_v2 = vld [vmem:[%s12767_s23 + $0x2c] ss:$16 sps:$4 sm:$0xff]  }
 0x169   : > { %2388 = vmatpush2.bf16.msra.mxu0 %v1488_v5  ;;  %2178 = vmatprep.mubr.bf16.mxu1 %v11985_v34  ;;  %v13113_v34 = vmax.f32 %v13021_v54, 0.0  ;;  %v11976_v54 = vld [vmem:[%s12767_s23 + $0x8] ss:$16 sps:$4 sm:$0xff]   ;;  %v11997_v5 = vld [vmem:[%s12767_s23 + $0xe4] ss:$16 sps:$4 sm:$0xff]  }
 0x16a   : > { %2389 = vmatprep.subr.bf16.mxu0 %v16557_v57  ;;  %16754 = vst [vmem:[#allocation37_spill] sm:$0xff] %v13116_v47 }
 0x16b   : > { %16753 = vst [vmem:[#allocation36_spill] sm:$0xff] %v13113_v34  ;;  %v1485_v30 = vpack.c.bf16 %v13113_v34, %v13116_v47  ;;  %v12095_v34 = vld [vmem:[%s12767_s23 + $0x2e0] ss:$16 sps:$4 sm:$0xff]   ;;  %v12111_v47 = vld [vmem:[%s12767_s23 + $0x344] ss:$16 sps:$4 sm:$0xff]  }
 0x16d   : > { %2390 = vmatpush2.bf16.msra.mxu0 %v1487_v53  ;;  %v11984_v53 = vld [vmem:[%s12767_s23 + $0x28] ss:$16 sps:$4 sm:$0xff]  }
 0x16e   : > { %2391 = vmatprep.subr.bf16.mxu0 %v16557_v57 }
 0x170   : > { %2179 = vmatmul.mubr.bf16.gmra.mxu1 %v11987_v25  ;;  %v11999_v25 = vld [vmem:[%s12767_s23 + $0xe0] ss:$16 sps:$4 sm:$0xff]  }
 0x171   : > { %2392 = vmatpush2.bf16.msra.mxu0 %v1486_v39  ;;  %2186 = vmatprep.mubr.bf16.mxu1 %v11991_v29  ;;  %v11988_v29 = vld [vmem:[%s12767_s23 + $0x4c] ss:$16 sps:$4 sm:$0xff]   ;;  %v12003_v39 = vld [vmem:[%s12767_s23 + $0x104] ss:$16 sps:$4 sm:$0xff]  }
 0x172   : > { %2393 = vmatprep.subr.bf16.mxu0 %v16557_v57 }
 0x175   : > { %2394 = vmatpush2.bf16.msra.mxu0 %v1485_v30  ;;  %v11990_v30 = vld [vmem:[%s12767_s23 + $0x48] ss:$16 sps:$4 sm:$0xff]  }
 0x176   : > { %3273 = vmatprep.subr.bf16.mxu0 %v16557_v57  ;;  %v12029_v57 = vld [vmem:[%s12767_s23 + $0x180] ss:$16 sps:$4 sm:$0xff]  }
 0x178   : > { %2396 = vmatmul.mubr.bf16.vlgmr.msra.gmra.mxu0 %v11976_v54  ;;  %2187 = vmatmul.mubr.bf16.gmra.mxu1 %v11993_v0  ;;  %v12005_v54 = vld [vmem:[%s12767_s23 + $0x100] ss:$16 sps:$4 sm:$0xff]   ;;  %v11994_v0 = vld [vmem:[%s12767_s23 + $0x6c] ss:$16 sps:$4 sm:$0xff]  }
 0x179   : > { %9822 = vmatprep.mubr.msk.bf16.mxu0 %vm16626_vm1, %v11982_v2  ;;  %2194 = vmatprep.mubr.bf16.mxu1 %v11997_v5  ;;  %v12009_v2 = vld [vmem:[%s12767_s23 + $0x124] ss:$16 sps:$4 sm:$0xff]   ;;  %v11996_v5 = vld [vmem:[%s12767_s23 + $0x68] ss:$16 sps:$4 sm:$0xff]  }
 0x180   : > { %2404 = vmatmul.mubr.bf16.gmra.mxu0 %v11984_v53  ;;  %2195 = vmatmul.mubr.bf16.gmra.mxu1 %v11999_v25  ;;  %v12011_v53 = vld [vmem:[%s12767_s23 + $0x120] ss:$16 sps:$4 sm:$0xff]   ;;  %v12000_v25 = vld [vmem:[%s12767_s23 + $0x8c] ss:$16 sps:$4 sm:$0xff]  }
 0x181   : > { %9823 = vmatprep.mubr.msk.bf16.mxu0 %vm16626_vm1, %v11988_v29  ;;  %2202 = vmatprep.mubr.bf16.mxu1 %v12003_v39  ;;  %v12015_v29 = vld [vmem:[%s12767_s23 + $0x144] ss:$16 sps:$4 sm:$0xff]   ;;  %v12002_v39 = vld [vmem:[%s12767_s23 + $0x88] ss:$16 sps:$4 sm:$0xff]  }
 0x188   : > { %2412 = vmatmul.mubr.bf16.gmra.mxu0 %v11990_v30  ;;  %2203 = vmatmul.mubr.bf16.gmra.mxu1 %v12005_v54  ;;  %v12017_v30 = vld [vmem:[%s12767_s23 + $0x140] ss:$16 sps:$4 sm:$0xff]   ;;  %v12006_v54 = vld [vmem:[%s12767_s23 + $0xac] ss:$16 sps:$4 sm:$0xff]  }
 0x189   : > { %9824 = vmatprep.mubr.msk.bf16.mxu0 %vm16626_vm1, %v11994_v0  ;;  %2210 = vmatprep.mubr.bf16.mxu1 %v12009_v2  ;;  %v12021_v0 = vld [vmem:[%s12767_s23 + $0x164] ss:$16 sps:$4 sm:$0xff]   ;;  %v12008_v2 = vld [vmem:[%s12767_s23 + $0xa8] ss:$16 sps:$4 sm:$0xff]  }
 0x190   : > { %2420 = vmatmul.mubr.bf16.gmra.mxu0 %v11996_v5  ;;  %2211 = vmatmul.mubr.bf16.gmra.mxu1 %v12011_v53  ;;  %v12023_v5 = vld [vmem:[%s12767_s23 + $0x160] ss:$16 sps:$4 sm:$0xff]   ;;  %v12012_v53 = vld [vmem:[%s12767_s23 + $0xcc] ss:$16 sps:$4 sm:$0xff]  }
 0x191   : > { %9825 = vmatprep.mubr.msk.bf16.mxu0 %vm16626_vm1, %v12000_v25  ;;  %2218 = vmatprep.mubr.bf16.mxu1 %v12015_v29  ;;  %v12027_v25 = vld [vmem:[%s12767_s23 + $0x184] ss:$16 sps:$4 sm:$0xff]   ;;  %v12014_v29 = vld [vmem:[%s12767_s23 + $0xc8] ss:$16 sps:$4 sm:$0xff]  }
 0x198   : > { %2428 = vmatmul.mubr.bf16.gmra.mxu0 %v12002_v39  ;;  %2219 = vmatmul.mubr.bf16.gmra.mxu1 %v12017_v30  ;;  %v12018_v39 = vld [vmem:[%s12767_s23 + $0xec] ss:$16 sps:$4 sm:$0xff]   ;;  %v12033_v30 = vld [vmem:[%s12767_s23 + $0x1a4] ss:$16 sps:$4 sm:$0xff]  }
 0x199   : > { %9826 = vmatprep.mubr.msk.bf16.mxu0 %vm16626_vm1, %v12006_v54  ;;  %2226 = vmatprep.mubr.bf16.mxu1 %v12021_v0  ;;  %v12020_v54 = vld [vmem:[%s12767_s23 + $0xe8] ss:$16 sps:$4 sm:$0xff]   ;;  %v12035_v0 = vld [vmem:[%s12767_s23 + $0x1a0] ss:$16 sps:$4 sm:$0xff]  }
 0x1a0   : > { %2436 = vmatmul.mubr.bf16.gmra.mxu0 %v12008_v2  ;;  %2227 = vmatmul.mubr.bf16.gmra.mxu1 %v12023_v5  ;;  %v12024_v2 = vld [vmem:[%s12767_s23 + $0x10c] ss:$16 sps:$4 sm:$0xff]   ;;  %v12039_v5 = vld [vmem:[%s12767_s23 + $0x1c4] ss:$16 sps:$4 sm:$0xff]  }
 0x1a1   : > { %9827 = vmatprep.mubr.msk.bf16.mxu0 %vm16626_vm1, %v12012_v53  ;;  %2234 = vmatprep.mubr.bf16.mxu1 %v12027_v25  ;;  %v1460_v53 = vld [vmem:[%s16534_s9 + $0x18] sm:$0xff]  ;;  %v12041_v25 = vld [vmem:[%s12767_s23 + $0x1c0] ss:$16 sps:$4 sm:$0xff]  }
 0x1a2   : > { %11319 = vmatprep.subr.mxu1 %v1460_v53 }
 0x1a3   : > { %11320 = vmatpush3.msra.mxu1 %v1460_v53  ;;  %v12036_v53 = vld [vmem:[%s12767_s23 + $0x14c] ss:$16 sps:$4 sm:$0xff]  }
 0x1a8   : > { %2444 = vmatmul.mubr.bf16.gmra.mxu0 %v12014_v29  ;;  %2235 = vmatmul.mubr.bf16.gmra.mxu1 %v12029_v57  ;;  %v12026_v57 = vld [vmem:[%s12767_s23 + $0x108] ss:$16 sps:$4 sm:$0xff]   ;;  %v12030_v29 = vld [vmem:[%s12767_s23 + $0x12c] ss:$16 sps:$4 sm:$0xff]  }
 0x1a9   : > { %9828 = vmatprep.mubr.msk.bf16.mxu0 %vm16626_vm1, %v12018_v39  ;;  %2242 = vmatprep.mubr.bf16.mxu1 %v12033_v30  ;;  %v12045_v39 = vld [vmem:[%s12767_s23 + $0x1e4] ss:$16 sps:$4 sm:$0xff]  }
 0x1aa   : > { %v1459_v30 = vld [vmem:[%s16534_s9 + $0x10] sm:$0xff] }
 0x1ab   : > { %11321 = vmatprep.subr.mxu1 %v1459_v30 }
 0x1ac   : > { %11322 = vmatpush3.msra.mxu1 %v1459_v30  ;;  %v12042_v30 = vld [vmem:[%s12767_s23 + $0x16c] ss:$16 sps:$4 sm:$0xff]  }
 0x1b0   : > { %2452 = vmatmul.mubr.bf16.gmra.mxu0 %v12020_v54  ;;  %2243 = vmatmul.mubr.bf16.gmra.mxu1 %v12035_v0  ;;  %v1458_v54 = vld [vmem:[%s16534_s9 + $0x8] sm:$0xff] }
 0x1b1   : > { %9829 = vmatprep.mubr.msk.bf16.mxu0 %vm16626_vm1, %v12024_v2  ;;  %2250 = vmatprep.mubr.bf16.mxu1 %v12039_v5  ;;  %v12032_v0 = vld [vmem:[%s12767_s23 + $0x128] ss:$16 sps:$4 sm:$0xff]   ;;  %v12047_v2 = vld [vmem:[%s12767_s23 + $0x1e0] ss:$16 sps:$4 sm:$0xff]  }
 0x1b2   : > { %11323 = vmatprep.subr.mxu1 %v1458_v54  ;;  %v1457_v5 = vld [vmem:[%s16534_s9] sm:$0xff] }
 0x1b3   : > { %11324 = vmatpush3.msra.mxu1 %v1458_v54  ;;  %v12057_v54 = vld [vmem:[%s12767_s23 + $0x224] ss:$16 sps:$4 sm:$0xff]  }
 0x1b4   : > { %11325 = vmatprep.subr.mxu1 %v1457_v5 }
 0x1b5   : > { %11326 = vmatpush3.msra.mxu1 %v1457_v5  ;;  %v12048_v5 = vld [vmem:[%s12767_s23 + $0x18c] ss:$16 sps:$4 sm:$0xff]  }
 0x1b8   : > { %2460 = vmatmul.mubr.bf16.gmra.mxu0 %v12026_v57  ;;  %2251 = vmatmul.mubr.bf16.gmra.mxu1 %v12041_v25  ;;  %v12051_v57 = vld [vmem:[%s12767_s23 + $0x204] ss:$16 sps:$4 sm:$0xff]   ;;  %v16755_v25 = vmov 0  }
 0x1b9   : > { %9830 = vmatprep.mubr.msk.bf16.mxu0 %vm16626_vm1, %v12030_v29  ;;  %2258 = vmatprep.mubr.bf16.mxu1 %v12045_v39  ;;  %v12038_v29 = vld [vmem:[%s12767_s23 + $0x148] ss:$16 sps:$4 sm:$0xff]   ;;  %v12053_v39 = vld [vmem:[%s12767_s23 + $0x200] ss:$16 sps:$4 sm:$0xff]  }
 0x1ba   : > { %3530 = vmatprep.subr.bf16.mxu1 %v16755_v25 }
 0x1c0   : > { %2468 = vmatmul.mubr.bf16.gmra.mxu0 %v12032_v0  ;;  %2259 = vmatmul.mubr.bf16.gmra.mxu1 %v12047_v2  ;;  %v12044_v0 = vld [vmem:[%s12767_s23 + $0x168] ss:$16 sps:$4 sm:$0xff]   ;;  %v12059_v2 = vld [vmem:[%s12767_s23 + $0x220] ss:$16 sps:$4 sm:$0xff]  }
 0x1c1   : > { %9831 = vmatprep.mubr.msk.bf16.mxu0 %vm16626_vm1, %v12036_v53  ;;  %2266 = vmatprep.mubr.bf16.mxu1 %v12051_v57  ;;  %v12063_v53 = vld [vmem:[%s12767_s23 + $0x244] ss:$16 sps:$4 sm:$0xff]   ;;  %v12050_v57 = vld [vmem:[%s12767_s23 + $0x188] ss:$16 sps:$4 sm:$0xff]  }
 0x1c8   : > { %2476 = vmatmul.mubr.bf16.gmra.mxu0 %v12038_v29  ;;  %2267 = vmatmul.mubr.bf16.gmra.mxu1 %v12053_v39  ;;  %v12065_v29 = vld [vmem:[%s12767_s23 + $0x240] ss:$16 sps:$4 sm:$0xff]   ;;  %v12054_v39 = vld [vmem:[%s12767_s23 + $0x1ac] ss:$16 sps:$4 sm:$0xff]  }
 0x1c9   : > { %9832 = vmatprep.mubr.msk.bf16.mxu0 %vm16626_vm1, %v12042_v30  ;;  %2274 = vmatprep.mubr.bf16.mxu1 %v12057_v54  ;;  %v12069_v30 = vld [vmem:[%s12767_s23 + $0x264] ss:$16 sps:$4 sm:$0xff]   ;;  %v12056_v54 = vld [vmem:[%s12767_s23 + $0x1a8] ss:$16 sps:$4 sm:$0xff]  }
 0x1d0   : > { %2484 = vmatmul.mubr.bf16.gmra.mxu0 %v12044_v0  ;;  %2275 = vmatmul.mubr.bf16.gmra.mxu1 %v12059_v2  ;;  %v12071_v0 = vld [vmem:[%s12767_s23 + $0x260] ss:$16 sps:$4 sm:$0xff]   ;;  %v12060_v2 = vld [vmem:[%s12767_s23 + $0x1cc] ss:$16 sps:$4 sm:$0xff]  }
 0x1d1   : > { %9833 = vmatprep.mubr.msk.bf16.mxu0 %vm16626_vm1, %v12048_v5  ;;  %2282 = vmatprep.mubr.bf16.mxu1 %v12063_v53  ;;  %v12075_v5 = vld [vmem:[%s12767_s23 + $0x284] ss:$16 sps:$4 sm:$0xff]   ;;  %v12062_v53 = vld [vmem:[%s12767_s23 + $0x1c8] ss:$16 sps:$4 sm:$0xff]  }
 0x1d8   : > { %2492 = vmatmul.mubr.bf16.gmra.mxu0 %v12050_v57  ;;  %2283 = vmatmul.mubr.bf16.gmra.mxu1 %v12065_v29  ;;  %v12077_v57 = vld [vmem:[%s12767_s23 + $0x280] ss:$16 sps:$4 sm:$0xff]   ;;  %v12066_v29 = vld [vmem:[%s12767_s23 + $0x1ec] ss:$16 sps:$4 sm:$0xff]  }
 0x1d9   : > { %9834 = vmatprep.mubr.msk.bf16.mxu0 %vm16626_vm1, %v12054_v39  ;;  %2290 = vmatprep.mubr.bf16.mxu1 %v12069_v30  ;;  %v12081_v39 = vld [vmem:[%s12767_s23 + $0x2a4] ss:$16 sps:$4 sm:$0xff]   ;;  %v12068_v30 = vld [vmem:[%s12767_s23 + $0x1e8] ss:$16 sps:$4 sm:$0xff]  }
 0x1e0   : > { %2500 = vmatmul.mubr.bf16.gmra.mxu0 %v12056_v54  ;;  %2291 = vmatmul.mubr.bf16.gmra.mxu1 %v12071_v0  ;;  %v12083_v54 = vld [vmem:[%s12767_s23 + $0x2a0] ss:$16 sps:$4 sm:$0xff]   ;;  %v12072_v0 = vld [vmem:[%s12767_s23 + $0x20c] ss:$16 sps:$4 sm:$0xff]  }
 0x1e1   : > { %9835 = vmatprep.mubr.msk.bf16.mxu0 %vm16626_vm1, %v12060_v2  ;;  %2298 = vmatprep.mubr.bf16.mxu1 %v12075_v5  ;;  %v12087_v2 = vld [vmem:[%s12767_s23 + $0x2c4] ss:$16 sps:$4 sm:$0xff]   ;;  %v12074_v5 = vld [vmem:[%s12767_s23 + $0x208] ss:$16 sps:$4 sm:$0xff]  }
 0x1e8   : > { %2508 = vmatmul.mubr.bf16.gmra.mxu0 %v12062_v53  ;;  %2299 = vmatmul.mubr.bf16.gmra.mxu1 %v12077_v57  ;;  %v12089_v53 = vld [vmem:[%s12767_s23 + $0x2c0] ss:$16 sps:$4 sm:$0xff]   ;;  %v12078_v57 = vld [vmem:[%s12767_s23 + $0x22c] ss:$16 sps:$4 sm:$0xff]  }
 0x1e9   : > { %9836 = vmatprep.mubr.msk.bf16.mxu0 %vm16626_vm1, %v12066_v29  ;;  %2306 = vmatprep.mubr.bf16.mxu1 %v12081_v39  ;;  %v12093_v29 = vld [vmem:[%s12767_s23 + $0x2e4] ss:$16 sps:$4 sm:$0xff]   ;;  %v12080_v39 = vld [vmem:[%s12767_s23 + $0x228] ss:$16 sps:$4 sm:$0xff]  }
 0x1f0   : > { %2516 = vmatmul.mubr.bf16.gmra.mxu0 %v12068_v30  ;;  %2307 = vmatmul.mubr.bf16.gmra.mxu1 %v12083_v54  ;;  %v12084_v30 = vld [vmem:[%s12767_s23 + $0x24c] ss:$16 sps:$4 sm:$0xff]   ;;  %v12099_v54 = vld [vmem:[%s12767_s23 + $0x304] ss:$16 sps:$4 sm:$0xff]  }
 0x1f1   : > { %9837 = vmatprep.mubr.msk.bf16.mxu0 %vm16626_vm1, %v12072_v0  ;;  %2314 = vmatprep.mubr.bf16.mxu1 %v12087_v2  ;;  %v12086_v0 = vld [vmem:[%s12767_s23 + $0x248] ss:$16 sps:$4 sm:$0xff]   ;;  %v12101_v2 = vld [vmem:[%s12767_s23 + $0x300] ss:$16 sps:$4 sm:$0xff]  }
 0x1f8   : > { %2524 = vmatmul.mubr.bf16.gmra.mxu0 %v12074_v5  ;;  %2315 = vmatmul.mubr.bf16.gmra.mxu1 %v12089_v53  ;;  %v12090_v5 = vld [vmem:[%s12767_s23 + $0x26c] ss:$16 sps:$4 sm:$0xff]   ;;  %v12105_v53 = vld [vmem:[%s12767_s23 + $0x324] ss:$16 sps:$4 sm:$0xff]  }
 0x1f9   : > { %9838 = vmatprep.mubr.msk.bf16.mxu0 %vm16626_vm1, %v12078_v57  ;;  %2322 = vmatprep.mubr.bf16.mxu1 %v12093_v29 }
 0x200   : > { %2532 = vmatmul.mubr.bf16.gmra.mxu0 %v12080_v39  ;;  %2323 = vmatmul.mubr.bf16.gmra.mxu1 %v12095_v34  ;;  %v12092_v34 = vld [vmem:[%s12767_s23 + $0x268] ss:$16 sps:$4 sm:$0xff]  }
 0x201   : > { %9839 = vmatprep.mubr.msk.bf16.mxu0 %vm16626_vm1, %v12084_v30  ;;  %2330 = vmatprep.mubr.bf16.mxu1 %v12099_v54  ;;  %v12107_v30 = vld [vmem:[%s12767_s23 + $0x320] ss:$16 sps:$4 sm:$0xff]   ;;  %v12096_v54 = vld [vmem:[%s12767_s23 + $0x28c] ss:$16 sps:$4 sm:$0xff]  }
 0x208   : > { %2540 = vmatmul.mubr.bf16.gmra.mxu0 %v12086_v0  ;;  %v2140_v57 = vpop.f32.mrf.mxu1  ;;  %2331 = vmatmul.mubr.bf16.gmra.mxu1 %v12101_v2  ;;  %v12098_v2 = vld [vmem:[%s12767_s23 + $0x288] ss:$16 sps:$4 sm:$0xff]  }
 0x209   : > { %9840 = vmatprep.mubr.msk.bf16.mxu0 %vm16626_vm1, %v12090_v5  ;;  %2338 = vmatprep.mubr.bf16.mxu1 %v12105_v53  ;;  %v12113_v53 = vld [vmem:[%s12767_s23 + $0x340] ss:$16 sps:$4 sm:$0xff]  }
 0x20a   : > { %v2142_v29 = vpop.f32.mrf.mxu1 }
 0x20b   : > { %v12102_v29 = vld [vmem:[%s12767_s23 + $0x2ac] ss:$16 sps:$4 sm:$0xff]  }
 0x20c   : > { %v13233_v39 = vpop.f32.mrf.mxu1 }
 0x20e   : > { %v2145_v8 = vpop.f32.mrf.mxu1 }
 0x210   : > { %2548 = vmatmul.mubr.bf16.gmra.mxu0 %v12092_v34  ;;  %v13238_v3 = vpop.f32.mrf.mxu1  ;;  %2339 = vmatmul.mubr.bf16.gmra.mxu1 %v12107_v30  ;;  %v12104_v34 = vld [vmem:[%s12767_s23 + $0x2a8] ss:$16 sps:$4 sm:$0xff]  }
 0x211   : > { %9841 = vmatprep.mubr.msk.bf16.mxu0 %vm16626_vm1, %v12096_v54  ;;  %2346 = vmatprep.mubr.bf16.mxu1 %v12111_v47  ;;  %v12119_v54 = vld [vmem:[%s12767_s23 + $0x360] ss:$16 sps:$4 sm:$0xff]  }
 0x212   : > { %v2150_v0 = vpop.f32.mrf.mxu1 }
 0x213   : > { %v12108_v0 = vld [vmem:[%s12767_s23 + $0x2cc] ss:$16 sps:$4 sm:$0xff]  }
 0x214   : > { %v13242_v5 = vpop.f32.mrf.mxu1 }
 0x216   : > { %v2153_v62 = vpop.f32.mrf.mxu1 }
 0x218   : > { %2556 = vmatmul.mubr.bf16.gmra.mxu0 %v12098_v2  ;;  %v13247_v8 = vpop.f32.mrf.mxu1  ;;  %2347 = vmatmul.mubr.bf16.gmra.mxu1 %v12113_v53  ;;  %v12110_v53 = vld [vmem:[%s12767_s23 + $0x2c8] ss:$16 sps:$4 sm:$0xff]  }
 0x219   : > { %9842 = vmatprep.mubr.msk.bf16.mxu0 %vm16626_vm1, %v12102_v29  ;;  %2354 = vmatprep.mubr.bf16.mxu1 %v12117_v58  ;;  %v12114_v58 = vld [vmem:[%s12767_s23 + $0x2ec] ss:$16 sps:$4 sm:$0xff]  }
 0x21a   : > { %v2158_v47 = vpop.f32.mrf.mxu1 }
 0x21c   : > { %v13251_v30 = vpop.f32.mrf.mxu1 }
 0x21e   : > { %v2161_v50 = vpop.f32.mrf.mxu1 }
 0x220   : > { %2564 = vmatmul.mubr.bf16.gmra.mxu0 %v12104_v34  ;;  %v13255_v62 = vpop.f32.mrf.mxu1  ;;  %2355 = vmatmul.mubr.bf16.gmra.mxu1 %v12119_v54  ;;  %v12116_v34 = vld [vmem:[%s12767_s23 + $0x2e8] ss:$16 sps:$4 sm:$0xff]   ;;  %v12120_v54 = vld [vmem:[%s12767_s23 + $0x30c] ss:$16 sps:$4 sm:$0xff]  }
 0x221   : > { %9843 = vmatprep.mubr.msk.bf16.mxu0 %vm16626_vm1, %v12108_v0 }
 0x222   : > { %v2166_v2 = vpop.f32.mrf.mxu1 }
 0x224   : > { %v13259_v29 = vpop.f32.mrf.mxu1 }
 0x226   : > { %v2169_v47 = vpop.f32.mrf.mxu1 }
 0x227   : > { %v12123_v47 = vld [vmem:[%s12767_s23 + $0x32c] ss:$16 sps:$4 sm:$0xff]  }
 0x228   : > { %2572 = vmatmul.mubr.bf16.gmra.mxu0 %v12110_v53  ;;  %v13262_v22 = vpop.f32.mrf.mxu1 }
 0x229   : > { %9844 = vmatprep.mubr.msk.bf16.mxu0 %vm16626_vm1, %v12114_v58 }
 0x22a   : > { %v2174_v50 = vpop.f32.mrf.mxu1 }
 0x22c   : > { %v13266_v13 = vpop.f32.mrf.mxu1 }
 0x22e   : > { %v2177_v60 = vpop.f32.mrf.mxu1 }
 0x230   : > { %2580 = vmatmul.mubr.bf16.gmra.mxu0 %v12116_v34  ;;  %v13269_v0 = vpop.f32.mrf.mxu1 }
 0x231   : > { %9845 = vmatprep.mubr.msk.bf16.mxu0 %vm16626_vm1, %v12120_v54  ;;  %v12125_v54 = vld [vmem:[%s12767_s23 + $0x328] ss:$16 sps:$4 sm:$0xff]  }
 0x232   : > { %v2182_v2 = vpop.f32.mrf.mxu1 }
 0x234   : > { %v13273_v53 = vpop.f32.mrf.mxu1 }
 0x236   : > { %v2185_v19 = vpop.f32.mrf.mxu1 }
 0x238   : > { %v2397_v58 = vpop.f32.mrf.mxu0  ;;  %2588 = vmatmul.mubr.bf16.gmra.mxu0 %v12122_v10  ;;  %v13276_v50 = vpop.f32.mrf.mxu1 }
 0x239   : > { %v2398_v37 = vadd.f32 %v2397_v58, %v2140_v57  ;;  %9846 = vmatprep.mubr.msk.bf16.mxu0 %vm16626_vm1, %v12123_v47 }
 0x23a   : > { %v2399_v60 = vpop.f32.mrf.mxu0  ;;  %v2190_v34 = vpop.f32.mrf.mxu1 }
 0x23b   : > { %11327 = vmatprep.mubr.msk.f32.mxu1 %vm16628_vm0, %v2398_v37 }
 0x23c   : > { %v2400_v49 = vpop.f32.mrf.mxu0  ;;  %v13281_v2 = vpop.f32.mrf.mxu1 }
 0x23d   : > { %v2401_v42 = vadd.f32 %v2400_v49, %v13233_v39  ;;  %v12128_v49 = vld [vmem:[%s12767_s23 + $0x348] ss:$16 sps:$4 sm:$0xff]  }
 0x23e   : > { %v2402_v19 = vpop.f32.mrf.mxu0  ;;  %v2193_v10 = vpop.f32.mrf.mxu1 }
 0x23f   : > { %11328 = vmatmul.mubr.msk.f32.vlgmr.msra.gmra.mxu1 %vm16628_vm0, %v2401_v42  ;;  %v12129_v42 = vld [vmem:[%s12767_s23 + $0x36c] ss:$16 sps:$4 sm:$0xff]  }
 0x240   : > { %v2405_v57 = vpop.f32.mrf.mxu0  ;;  %2596 = vmatmul.mubr.bf16.gmra.mxu0 %v12125_v54  ;;  %v13286_v47 = vpop.f32.mrf.mxu1 }
 0x241   : > { %v2406_v58 = vadd.f32 %v2405_v57, %v13238_v3  ;;  %9847 = vmatprep.mubr.msk.bf16.mxu0 %vm16626_vm1, %v12126_v44 }
 0x242   : > { %v2407_v37 = vpop.f32.mrf.mxu0  ;;  %v2198_v60 = vpop.f32.mrf.mxu1 }
 0x243   : > { %11330 = vmatprep.mubr.msk.f32.mxu1 %vm16628_vm0, %v2406_v58  ;;  %v12131_v60 = vld [vmem:[%s12767_s23 + $0x368] ss:$16 sps:$4 sm:$0xff]  }
 0x244   : > { %v2408_v34 = vpop.f32.mrf.mxu0  ;;  %v13292_v39 = vpop.f32.mrf.mxu1 }
 0x245   : > { %v2409_v19 = vadd.f32 %v2408_v34, %v13242_v5 }
 0x246   : > { %v2410_v10 = vpop.f32.mrf.mxu0  ;;  %v2201_v54 = vpop.f32.mrf.mxu1 }
 0x247   : > { %11331 = vmatmul.mubr.msk.f32.gmra.mxu1 %vm16628_vm0, %v2409_v19 }
 0x248   : > { %v2413_v12 = vpop.f32.mrf.mxu0  ;;  %2604 = vmatmul.mubr.bf16.gmra.mxu0 %v12128_v49  ;;  %v13297_v3 = vpop.f32.mrf.mxu1 }
 0x249   : > { %v2414_v44 = vadd.f32 %v2413_v12, %v13247_v8  ;;  %9848 = vmatprep.mubr.msk.bf16.mxu0 %vm16626_vm1, %v12129_v42 }
 0x24a   : > { %v2415_v57 = vpop.f32.mrf.mxu0  ;;  %v2206_v58 = vpop.f32.mrf.mxu1 }
 0x24b   : > { %11333 = vmatprep.mubr.msk.f32.mxu1 %vm16628_vm0, %v2414_v44 }
 0x24c   : > { %v2416_v37 = vpop.f32.mrf.mxu0  ;;  %v13303_v5 = vpop.f32.mrf.mxu1 }
 0x24d   : > { %v2417_v34 = vadd.f32 %v2416_v37, %v13251_v30 }
 0x24e   : > { %v2418_v10 = vpop.f32.mrf.mxu0  ;;  %v2209_v19 = vpop.f32.mrf.mxu1 }
 0x24f   : > { %11334 = vmatmul.mubr.msk.f32.gmra.mxu1 %vm16628_vm0, %v2417_v34 }
 0x250   : > { %v2421_v49 = vpop.f32.mrf.mxu0  ;;  %2612 = vmatmul.mubr.bf16.gmra.mxu0 %v12131_v60  ;;  %v13307_v54 = vpop.f32.mrf.mxu1 }
 0x251   : > { %v2422_v12 = vadd.f32 %v2421_v49, %v13255_v62  ;;  %3305 = vmatprep.mubr.bf16.mxu0 %v12864_v61 }
 0x252   : > { %v2423_v8 = vpop.f32.mrf.mxu0  ;;  %v2214_v42 = vpop.f32.mrf.mxu1 }
 0x253   : > { %11336 = vmatprep.mubr.msk.f32.mxu1 %vm16628_vm0, %v2422_v12 }
 0x254   : > { %v2424_v44 = vpop.f32.mrf.mxu0  ;;  %v13312_v57 = vpop.f32.mrf.mxu1 }
 0x255   : > { %v2425_v30 = vadd.f32 %v2424_v44, %v13259_v29 }
 0x256   : > { %v2426_v58 = vpop.f32.mrf.mxu0  ;;  %v2217_v37 = vpop.f32.mrf.mxu1 }
 0x257   : > { %11337 = vmatmul.mubr.msk.f32.gmra.mxu1 %vm16628_vm0, %v2425_v30 }
 0x258   : > { %v2429_v60 = vpop.f32.mrf.mxu0  ;;  %v13316_v34 = vpop.f32.mrf.mxu1 }
 0x259   : > { %v2430_v62 = vadd.f32 %v2429_v60, %v13262_v22 }
 0x25a   : > { %v2431_v10 = vpop.f32.mrf.mxu0  ;;  %v2222_v61 = vpop.f32.mrf.mxu1 }
 0x25b   : > { %11339 = vmatprep.mubr.msk.f32.mxu1 %vm16628_vm0, %v2430_v62 }
 0x25c   : > { %v2432_v19 = vpop.f32.mrf.mxu0  ;;  %v13320_v49 = vpop.f32.mrf.mxu1 }
 0x25d   : > { %v2433_v12 = vadd.f32 %v2432_v19, %v13266_v13 }
 0x25e   : > { %v2434_v8 = vpop.f32.mrf.mxu0  ;;  %v2225_v29 = vpop.f32.mrf.mxu1 }
 0x25f   : > { %11340 = vmatmul.mubr.msk.f32.gmra.mxu1 %vm16628_vm0, %v2433_v12 }
 0x260   : > { %v2437_v42 = vpop.f32.mrf.mxu0  ;;  %v13324_v44 = vpop.f32.mrf.mxu1 }
 0x261   : > { %v2438_v30 = vadd.f32 %v2437_v42, %v13269_v0 }
 0x262   : > { %v2439_v58 = vpop.f32.mrf.mxu0  ;;  %v2230_v22 = vpop.f32.mrf.mxu1 }
 0x263   : > { %11342 = vmatprep.mubr.msk.f32.mxu1 %vm16628_vm0, %v2438_v30 }
 0x264   : > { %v2440_v37 = vpop.f32.mrf.mxu0  ;;  %v13328_v60 = vpop.f32.mrf.mxu1 }
 0x265   : > { %v2441_v62 = vadd.f32 %v2440_v37, %v13273_v53 }
 0x266   : > { %v2442_v10 = vpop.f32.mrf.mxu0  ;;  %v2233_v13 = vpop.f32.mrf.mxu1 }
 0x267   : > { %11343 = vmatmul.mubr.msk.f32.gmra.mxu1 %vm16628_vm0, %v2441_v62 }
 0x268   : > { %v2445_v61 = vpop.f32.mrf.mxu0  ;;  %v13332_v19 = vpop.f32.mrf.mxu1 }
 0x269   : > { %v2446_v12 = vadd.f32 %v2445_v61, %v13276_v50 }
 0x26a   : > { %v2447_v8 = vpop.f32.mrf.mxu0  ;;  %v2238_v0 = vpop.f32.mrf.mxu1 }
 0x26b   : > { %11345 = vmatprep.mubr.msk.f32.mxu1 %vm16628_vm0, %v2446_v12 }
 0x26c   : > { %v2448_v29 = vpop.f32.mrf.mxu0  ;;  %v13336_v42 = vpop.f32.mrf.mxu1 }
 0x26d   : > { %v2449_v30 = vadd.f32 %v2448_v29, %v13281_v2 }
 0x26e   : > { %v2450_v58 = vpop.f32.mrf.mxu0  ;;  %v2241_v53 = vpop.f32.mrf.mxu1 }
 0x26f   : > { %11346 = vmatmul.mubr.msk.f32.gmra.mxu1 %vm16628_vm0, %v2449_v30 }
 0x270   : > { %v2453_v22 = vpop.f32.mrf.mxu0  ;;  %v13340_v37 = vpop.f32.mrf.mxu1 }
 0x271   : > { %v2454_v62 = vadd.f32 %v2453_v22, %v13286_v47 }
 0x272   : > { %v2455_v10 = vpop.f32.mrf.mxu0  ;;  %v2246_v50 = vpop.f32.mrf.mxu1 }
 0x273   : > { %11348 = vmatprep.mubr.msk.f32.mxu1 %vm16628_vm0, %v2454_v62 }
 0x274   : > { %v2456_v13 = vpop.f32.mrf.mxu0  ;;  %v13344_v61 = vpop.f32.mrf.mxu1 }
 0x275   : > { %v2457_v12 = vadd.f32 %v2456_v13, %v13292_v39 }
 0x276   : > { %v2458_v8 = vpop.f32.mrf.mxu0  ;;  %v2249_v2 = vpop.f32.mrf.mxu1 }
 0x277   : > { %11349 = vmatmul.mubr.msk.f32.gmra.mxu1 %vm16628_vm0, %v2457_v12 }
 0x278   : > { %v2461_v0 = vpop.f32.mrf.mxu0  ;;  %v13348_v29 = vpop.f32.mrf.mxu1 }
 0x279   : > { %v2462_v30 = vadd.f32 %v2461_v0, %v13297_v3 }
 0x27a   : > { %v2463_v58 = vpop.f32.mrf.mxu0  ;;  %v2254_v47 = vpop.f32.mrf.mxu1 }
 0x27b   : > { %11351 = vmatprep.mubr.msk.f32.mxu1 %vm16628_vm0, %v2462_v30 }
 0x27c   : > { %v2464_v53 = vpop.f32.mrf.mxu0  ;;  %v13352_v22 = vpop.f32.mrf.mxu1 }
 0x27d   : > { %v2465_v62 = vadd.f32 %v2464_v53, %v13303_v5 }
 0x27e   : > { %v2466_v10 = vpop.f32.mrf.mxu0  ;;  %v2257_v39 = vpop.f32.mrf.mxu1 }
 0x27f   : > { %11352 = vmatmul.mubr.msk.f32.gmra.mxu1 %vm16628_vm0, %v2465_v62 }
 0x280   : > { %v2469_v50 = vpop.f32.mrf.mxu0  ;;  %v13356_v13 = vpop.f32.mrf.mxu1 }
 0x281   : > { %v2470_v12 = vadd.f32 %v2469_v50, %v13307_v54 }
 0x282   : > { %v2471_v8 = vpop.f32.mrf.mxu0  ;;  %v2262_v3 = vpop.f32.mrf.mxu1 }
 0x283   : > { %11354 = vmatprep.mubr.msk.f32.mxu1 %vm16628_vm0, %v2470_v12 }
 0x284   : > { %v2472_v2 = vpop.f32.mrf.mxu0  ;;  %v13360_v0 = vpop.f32.mrf.mxu1 }
 0x285   : > { %v2473_v30 = vadd.f32 %v2472_v2, %v13312_v57 }
 0x286   : > { %v2474_v58 = vpop.f32.mrf.mxu0  ;;  %v2265_v5 = vpop.f32.mrf.mxu1 }
 0x287   : > { %11355 = vmatmul.mubr.msk.f32.gmra.mxu1 %vm16628_vm0, %v2473_v30 }
 0x288   : > { %v2477_v47 = vpop.f32.mrf.mxu0  ;;  %v13364_v53 = vpop.f32.mrf.mxu1 }
 0x289   : > { %v2478_v62 = vadd.f32 %v2477_v47, %v13316_v34 }
 0x28a   : > { %v2479_v10 = vpop.f32.mrf.mxu0  ;;  %v2270_v54 = vpop.f32.mrf.mxu1 }
 0x28b   : > { %11357 = vmatprep.mubr.msk.f32.mxu1 %vm16628_vm0, %v2478_v62 }
 0x28c   : > { %v2480_v39 = vpop.f32.mrf.mxu0  ;;  %v13368_v50 = vpop.f32.mrf.mxu1 }
 0x28d   : > { %v2481_v12 = vadd.f32 %v2480_v39, %v13320_v49 }
 0x28e   : > { %v2482_v8 = vpop.f32.mrf.mxu0  ;;  %v2273_v57 = vpop.f32.mrf.mxu1 }
 0x28f   : > { %11358 = vmatmul.mubr.msk.f32.gmra.mxu1 %vm16628_vm0, %v2481_v12 }
 0x290   : > { %v2485_v3 = vpop.f32.mrf.mxu0  ;;  %v13372_v2 = vpop.f32.mrf.mxu1 }
 0x291   : > { %v2486_v30 = vadd.f32 %v2485_v3, %v13324_v44 }
 0x292   : > { %v2487_v58 = vpop.f32.mrf.mxu0  ;;  %v2278_v34 = vpop.f32.mrf.mxu1 }
 0x293   : > { %11360 = vmatprep.mubr.msk.f32.mxu1 %vm16628_vm0, %v2486_v30 }
 0x294   : > { %v2488_v5 = vpop.f32.mrf.mxu0  ;;  %v13376_v47 = vpop.f32.mrf.mxu1 }
 0x295   : > { %v2489_v62 = vadd.f32 %v2488_v5, %v13328_v60 }
 0x296   : > { %v2490_v10 = vpop.f32.mrf.mxu0  ;;  %v2281_v49 = vpop.f32.mrf.mxu1 }
 0x297   : > { %11361 = vmatmul.mubr.msk.f32.gmra.mxu1 %vm16628_vm0, %v2489_v62 }
 0x298   : > { %v2493_v54 = vpop.f32.mrf.mxu0  ;;  %v13380_v39 = vpop.f32.mrf.mxu1 }
 0x299   : > { %v2494_v12 = vadd.f32 %v2493_v54, %v13332_v19 }
 0x29a   : > { %v2495_v8 = vpop.f32.mrf.mxu0  ;;  %v2286_v44 = vpop.f32.mrf.mxu1 }
 0x29b   : > { %11363 = vmatprep.mubr.msk.f32.mxu1 %vm16628_vm0, %v2494_v12 }
 0x29c   : > { %v2496_v57 = vpop.f32.mrf.mxu0  ;;  %v13384_v3 = vpop.f32.mrf.mxu1 }
 0x29d   : > { %v2497_v30 = vadd.f32 %v2496_v57, %v13336_v42 }
 0x29e   : > { %v2498_v58 = vpop.f32.mrf.mxu0  ;;  %v2289_v60 = vpop.f32.mrf.mxu1 }
 0x29f   : > { %11364 = vmatmul.mubr.msk.f32.gmra.mxu1 %vm16628_vm0, %v2497_v30 }
 0x2a0   : > { %v2501_v34 = vpop.f32.mrf.mxu0  ;;  %v13388_v5 = vpop.f32.mrf.mxu1 }
 0x2a1   : > { %v2502_v62 = vadd.f32 %v2501_v34, %v13340_v37 }
 0x2a2   : > { %v2503_v10 = vpop.f32.mrf.mxu0  ;;  %v2294_v19 = vpop.f32.mrf.mxu1 }
 0x2a3   : > { %11366 = vmatprep.mubr.msk.f32.mxu1 %vm16628_vm0, %v2502_v62 }
 0x2a4   : > { %v2504_v49 = vpop.f32.mrf.mxu0  ;;  %v13392_v54 = vpop.f32.mrf.mxu1 }
 0x2a5   : > { %v2505_v12 = vadd.f32 %v2504_v49, %v13344_v61 }
 0x2a6   : > { %v2506_v8 = vpop.f32.mrf.mxu0  ;;  %v2297_v42 = vpop.f32.mrf.mxu1 }
 0x2a7   : > { %11367 = vmatmul.mubr.msk.f32.gmra.mxu1 %vm16628_vm0, %v2505_v12 }
 0x2a8   : > { %v2509_v44 = vpop.f32.mrf.mxu0  ;;  %v13396_v57 = vpop.f32.mrf.mxu1 }
 0x2a9   : > { %v2510_v30 = vadd.f32 %v2509_v44, %v13348_v29 }
 0x2aa   : > { %v2511_v58 = vpop.f32.mrf.mxu0  ;;  %v2302_v37 = vpop.f32.mrf.mxu1 }
 0x2ab   : > { %11369 = vmatprep.mubr.msk.f32.mxu1 %vm16628_vm0, %v2510_v30 }
 0x2ac   : > { %v2512_v60 = vpop.f32.mrf.mxu0  ;;  %v13400_v34 = vpop.f32.mrf.mxu1 }
 0x2ad   : > { %v2513_v62 = vadd.f32 %v2512_v60, %v13352_v22 }
 0x2ae   : > { %v2514_v10 = vpop.f32.mrf.mxu0  ;;  %v2305_v61 = vpop.f32.mrf.mxu1 }
 0x2af   : > { %11370 = vmatmul.mubr.msk.f32.gmra.mxu1 %vm16628_vm0, %v2513_v62 }
 0x2b0   : > { %v2517_v19 = vpop.f32.mrf.mxu0  ;;  %v13404_v49 = vpop.f32.mrf.mxu1 }
 0x2b1   : > { %v2518_v12 = vadd.f32 %v2517_v19, %v13356_v13 }
 0x2b2   : > { %v2519_v8 = vpop.f32.mrf.mxu0  ;;  %v2310_v29 = vpop.f32.mrf.mxu1 }
 0x2b3   : > { %11372 = vmatprep.mubr.msk.f32.mxu1 %vm16628_vm0, %v2518_v12 }
 0x2b4   : > { %v2520_v42 = vpop.f32.mrf.mxu0  ;;  %v13408_v44 = vpop.f32.mrf.mxu1 }
 0x2b5   : > { %v2521_v30 = vadd.f32 %v2520_v42, %v13360_v0 }
 0x2b6   : > { %v2522_v58 = vpop.f32.mrf.mxu0  ;;  %v2313_v22 = vpop.f32.mrf.mxu1 }
 0x2b7   : > { %11373 = vmatmul.mubr.msk.f32.gmra.mxu1 %vm16628_vm0, %v2521_v30 }
 0x2b8   : > { %v2525_v37 = vpop.f32.mrf.mxu0  ;;  %v13412_v60 = vpop.f32.mrf.mxu1 }
 0x2b9   : > { %v2526_v62 = vadd.f32 %v2525_v37, %v13364_v53 }
 0x2ba   : > { %v2527_v10 = vpop.f32.mrf.mxu0  ;;  %v2318_v13 = vpop.f32.mrf.mxu1 }
 0x2bb   : > { %11375 = vmatprep.mubr.msk.f32.mxu1 %vm16628_vm0, %v2526_v62 }
 0x2bc   : > { %v2528_v61 = vpop.f32.mrf.mxu0  ;;  %v13416_v19 = vpop.f32.mrf.mxu1 }
 0x2bd   : > { %v2529_v12 = vadd.f32 %v2528_v61, %v13368_v50 }
 0x2be   : > { %v2530_v8 = vpop.f32.mrf.mxu0  ;;  %v2321_v0 = vpop.f32.mrf.mxu1 }
 0x2bf   : > { %11376 = vmatmul.mubr.msk.f32.gmra.mxu1 %vm16628_vm0, %v2529_v12 }
 0x2c0   : > { %v2533_v29 = vpop.f32.mrf.mxu0  ;;  %v13420_v42 = vpop.f32.mrf.mxu1 }
 0x2c1   : > { %v2534_v30 = vadd.f32 %v2533_v29, %v13372_v2 }
 0x2c2   : > { %v2535_v58 = vpop.f32.mrf.mxu0  ;;  %v2326_v53 = vpop.f32.mrf.mxu1 }
 0x2c3   : > { %11378 = vmatprep.mubr.msk.f32.mxu1 %vm16628_vm0, %v2534_v30 }
 0x2c4   : > { %v2536_v22 = vpop.f32.mrf.mxu0  ;;  %v13424_v37 = vpop.f32.mrf.mxu1 }
 0x2c5   : > { %v2537_v62 = vadd.f32 %v2536_v22, %v13376_v47 }
 0x2c6   : > { %v2538_v10 = vpop.f32.mrf.mxu0  ;;  %v2329_v50 = vpop.f32.mrf.mxu1 }
 0x2c7   : > { %11379 = vmatmul.mubr.msk.f32.gmra.mxu1 %vm16628_vm0, %v2537_v62 }
 0x2c8   : > { %v2541_v13 = vpop.f32.mrf.mxu0  ;;  %v13428_v61 = vpop.f32.mrf.mxu1 }
 0x2c9   : > { %v2542_v12 = vadd.f32 %v2541_v13, %v13380_v39 }
 0x2ca   : > { %v2543_v8 = vpop.f32.mrf.mxu0  ;;  %v2334_v2 = vpop.f32.mrf.mxu1 }
 0x2cb   : > { %11381 = vmatprep.mubr.msk.f32.mxu1 %vm16628_vm0, %v2542_v12 }
 0x2cc   : > { %v2544_v0 = vpop.f32.mrf.mxu0  ;;  %v2335_v29 = vpop.f32.mrf.mxu1 }
 0x2cd   : > { %v2545_v30 = vadd.f32 %v2544_v0, %v13384_v3 }
 0x2ce   : > { %v2546_v58 = vpop.f32.mrf.mxu0  ;;  %v2337_v53 = vpop.f32.mrf.mxu1 }
 0x2cf   : > { %11382 = vmatmul.mubr.msk.f32.gmra.mxu1 %vm16628_vm0, %v2545_v30 }
 0x2d0   : > { %v2549_v47 = vpop.f32.mrf.mxu0  ;;  %v2340_v22 = vpop.f32.mrf.mxu1 }
 0x2d1   : > { %v2550_v62 = vadd.f32 %v2549_v47, %v13388_v5 }
 0x2d2   : > { %v2551_v10 = vpop.f32.mrf.mxu0  ;;  %v2342_v50 = vpop.f32.mrf.mxu1 }
 0x2d3   : > { %11384 = vmatprep.mubr.msk.f32.mxu1 %vm16628_vm0, %v2550_v62 }
 0x2d4   : > { %v2552_v39 = vpop.f32.mrf.mxu0  ;;  %v2343_v13 = vpop.f32.mrf.mxu1 }
 0x2d5   : > { %v2553_v12 = vadd.f32 %v2552_v39, %v13392_v54 }
 0x2d6   : > { %v2554_v8 = vpop.f32.mrf.mxu0  ;;  %v2345_v2 = vpop.f32.mrf.mxu1 }
 0x2d7   : > { %11385 = vmatmul.mubr.msk.f32.gmra.mxu1 %vm16628_vm0, %v2553_v12 }
 0x2d8   : > { %v2557_v3 = vpop.f32.mrf.mxu0  ;;  %v2348_v0 = vpop.f32.mrf.mxu1 }
 0x2d9   : > { %v2558_v30 = vadd.f32 %v2557_v3, %v13396_v57 }
 0x2da   : > { %v2559_v58 = vpop.f32.mrf.mxu0  ;;  %v2350_v53 = vpop.f32.mrf.mxu1 }
 0x2db   : > { %11387 = vmatprep.mubr.msk.f32.mxu1 %vm16628_vm0, %v2558_v30 }
 0x2dc   : > { %v2560_v5 = vpop.f32.mrf.mxu0  ;;  %v2351_v47 = vpop.f32.mrf.mxu1 }
 0x2dd   : > { %v2561_v62 = vadd.f32 %v2560_v5, %v13400_v34 }
 0x2de   : > { %v2562_v10 = vpop.f32.mrf.mxu0  ;;  %v2353_v50 = vpop.f32.mrf.mxu1 }
 0x2df   : > { %11388 = vmatmul.mubr.msk.f32.gmra.mxu1 %vm16628_vm0, %v2561_v62 }
 0x2e0   : > { %v2565_v54 = vpop.f32.mrf.mxu0  ;;  %v2356_v39 = vpop.f32.mrf.mxu1 }
 0x2e1   : > { %v2566_v12 = vadd.f32 %v2565_v54, %v13404_v49 }
 0x2e2   : > { %v2567_v8 = vpop.f32.mrf.mxu0  ;;  %v2358_v2 = vpop.f32.mrf.mxu1 }
 0x2e3   : > { %11390 = vmatprep.mubr.msk.f32.mxu1 %vm16628_vm0, %v2566_v12 }
 0x2e4   : > { %v2568_v57 = vpop.f32.mrf.mxu0  ;;  %v2359_v3 = vpop.f32.mrf.mxu1 }
 0x2e5   : > { %v2569_v30 = vadd.f32 %v2568_v57, %v13408_v44 }
 0x2e6   : > { %v2570_v58 = vpop.f32.mrf.mxu0  ;;  %v2361_v53 = vpop.f32.mrf.mxu1 }
 0x2e7   : > { %11391 = vmatmul.mubr.msk.f32.gmra.mxu1 %vm16628_vm0, %v2569_v30 }
 0x2e8   : > { %v2573_v34 = vpop.f32.mrf.mxu0 }
 0x2e9   : > { %v2574_v5 = vadd.f32 %v2573_v34, %v13412_v60 }
 0x2ea   : > { %v2575_v62 = vpop.f32.mrf.mxu0 }
 0x2eb   : > { %11393 = vmatprep.mubr.msk.f32.mxu1 %vm16628_vm0, %v2574_v5 }
 0x2ec   : > { %v2576_v10 = vpop.f32.mrf.mxu0 }
 0x2ed   : > { %v2577_v49 = vadd.f32 %v2576_v10, %v13416_v19 }
 0x2ee   : > { %v2578_v50 = vpop.f32.mrf.mxu0 }
 0x2ef   : > { %11394 = vmatmul.mubr.msk.f32.gmra.mxu1 %vm16628_vm0, %v2577_v49 }
 0x2f0   : > { %v2581_v54 = vpop.f32.mrf.mxu0 }
 0x2f1   : > { %v2582_v12 = vadd.f32 %v2581_v54, %v13420_v42 }
 0x2f2   : > { %v2583_v44 = vpop.f32.mrf.mxu0 }
 0x2f3   : > { %11396 = vmatprep.mubr.msk.f32.mxu1 %vm16628_vm0, %v2582_v12 }
 0x2f4   : > { %v2584_v8 = vpop.f32.mrf.mxu0 }
 0x2f5   : > { %v2585_v2 = vadd.f32 %v2584_v8, %v13424_v37 }
 0x2f6   : > { %v2586_v57 = vpop.f32.mrf.mxu0 }
 0x2f7   : > { %11397 = vmatmul.mubr.msk.f32.gmra.mxu1 %vm16628_vm0, %v2585_v2 }
 0x2f8   : > { %v2589_v60 = vpop.f32.mrf.mxu0 }
 0x2f9   : > { %v2590_v30 = vadd.f32 %v2589_v60, %v13428_v61 }
 0x2fa   : > { %v2591_v58 = vpop.f32.mrf.mxu0 }
 0x2fb   : > { %11399 = vmatprep.mubr.msk.f32.mxu1 %vm16628_vm0, %v2590_v30 }
 0x2fc   : > { %v2592_v19 = vpop.f32.mrf.mxu0 }
 0x2fd   : > { %v2593_v53 = vadd.f32 %v2592_v19, %v2335_v29 }
 0x2fe   : > { %v2594_v34 = vpop.f32.mrf.mxu0 }
 0x2ff   : > { %11400 = vmatmul.mubr.msk.f32.gmra.mxu1 %vm16628_vm0, %v2593_v53  ;;  %v13460_v29 = vpop.f32.mrf.mxu1  ;;  %v12390_v53 = vld [vmem:[%s12767_s23 + $0xc] ss:$16 sps:$4 sm:$0xff]  }
 0x300   : > { %v2597_v42 = vpop.f32.mrf.mxu0 }
 0x301   : > { %v2598_v5 = vadd.f32 %v2597_v42, %v2340_v22  ;;  %v13463_v2 = vpop.f32.mrf.mxu1 }
 0x302   : > { %v2599_v62 = vpop.f32.mrf.mxu0 }
 0x303   : > { %11402 = vmatprep.mubr.msk.f32.mxu1 %vm16628_vm0, %v2598_v5 }
 0x304   : > { %v2600_v37 = vpop.f32.mrf.mxu0 }
 0x305   : > { %v2601_v10 = vadd.f32 %v2600_v37, %v2343_v13 }
 0x306   : > { %v2602_v49 = vpop.f32.mrf.mxu0 }
 0x307   : > { %11403 = vmatmul.mubr.msk.f32.gmra.mxu1 %vm16628_vm0, %v2601_v10  ;;  %v11332_v60 = vpop.f32.mrf.mxu1 }
 0x308   : > { %v2605_v50 = vpop.f32.mrf.mxu0 }
 0x309   : > { %v2606_v61 = vadd.f32 %v2605_v50, %v2348_v0  ;;  %v2864_v19 = vpop.f32.mrf.mxu1 }
 0x30a   : > { %v2607_v54 = vpop.f32.mrf.mxu0 }
 0x30b   : > { %11405 = vmatprep.mubr.msk.f32.mxu1 %vm16628_vm0, %v2606_v61 }
 0x30c   : > { %v2608_v12 = vpop.f32.mrf.mxu0 }
 0x30d   : > { %v2609_v44 = vadd.f32 %v2608_v12, %v2351_v47 }
 0x30e   : > { %v2610_v8 = vpop.f32.mrf.mxu0 }
 0x30f   : > { %11406 = vmatmul.mubr.msk.f32.gmra.mxu1 %vm16628_vm0, %v2609_v44  ;;  %v11335_v47 = vpop.f32.mrf.mxu1 }
 0x310   : > { %v2613_v22 = vpop.f32.mrf.mxu0 }
 0x311   : > { %v2614_v13 = vadd.f32 %v2613_v22, %v2356_v39  ;;  %v2874_v34 = vpop.f32.mrf.mxu1 }
 0x312   : > { %v2615_v57 = vpop.f32.mrf.mxu0 }
 0x313   : > { %11408 = vmatprep.mubr.msk.f32.mxu1 %vm16628_vm0, %v2614_v13 }
 0x314   : > { %v2616_v0 = vpop.f32.mrf.mxu0 }
 0x315   : > { %v2617_v30 = vadd.f32 %v2616_v0, %v2359_v3 }
 0x316   : > { %v2618_v58 = vpop.f32.mrf.mxu0 }
 0x317   : > { %11409 = vmatmul.mubr.msk.f32.gmra.mxu1 %vm16628_vm0, %v2617_v30  ;;  %v11338_v42 = vpop.f32.mrf.mxu1 }
 0x318   : > { %9905 = vmatprep.mubr.msk.bf16.mxu1 %vm16626_vm1, %v12390_v53 }
 0x319   : > { %v2884_v5 = vpop.f32.mrf.mxu1 }
 0x31f   : > { %v11341_v62 = vpop.f32.mrf.mxu1 }
 0x321   : > { %v2894_v37 = vpop.f32.mrf.mxu1 }
 0x327   : > { %v11344_v39 = vpop.f32.mrf.mxu1 }
 0x328   : > { %v3144_v58 = vadd.f32 %v11344_v39, %v12894_v26  ;;  %v3140_v39 = vadd.f32 %v11338_v42, %v12912_v36 }
 0x329   : > { %v2904_v10 = vpop.f32.mrf.mxu1 }
 0x32a   : > { %v3143_v57 = vadd.f32 %v2904_v10, %v12888_v23  ;;  %v3139_v10 = vadd.f32 %v2884_v5, %v12908_v33  ;;  %v3136_v5 = vadd.f32 %v11332_v60, %v12926_v46 }
 0x32f   : > { %v11347_v49 = vpop.f32.mrf.mxu1 }
 0x330   : > { %v3146_v8 = vadd.f32 %v11347_v49, %v12883_v21 }
 0x331   : > { %v2914_v50 = vpop.f32.mrf.mxu1 }
 0x332   : > { %v3145_v12 = vadd.f32 %v2914_v50, %v12877_v18  ;;  %v3202_v53 = vmax.f32 %v3146_v8, 0.0  ;;  %v3200_v18 = vmax.f32 %v3144_v58, 0.0 }
 0x334   : > { %v3201_v0 = vmax.f32 %v3145_v12, 0.0 }
 0x336   : > { %v3251_v50 = vpack.c.bf16 %v3202_v53, %v3201_v0  ;;  %v3192_v53 = vmax.f32 %v3136_v5, 0.0 }
 0x337   : > { %v11350_v61 = vpop.f32.mrf.mxu1 }
 0x338   : > { %v3148_v3 = vadd.f32 %v11350_v61, %v12871_v15  ;;  %v3141_v61 = vadd.f32 %v2894_v37, %v12899_v28  ;;  %v3199_v15 = vmax.f32 %v3143_v57, 0.0  ;;  %v3137_v37 = vadd.f32 %v2874_v34, %v12915_v38 }
 0x339   : > { %v2924_v54 = vpop.f32.mrf.mxu1 }
 0x33a   : > { %v3147_v44 = vadd.f32 %v2924_v54, %v12873_v16  ;;  %v3204_v22 = vmax.f32 %v3148_v3, 0.0  ;;  %v3142_v54 = vadd.f32 %v11341_v62, %v12905_v31  ;;  %v3197_v49 = vmax.f32 %v3141_v61, 0.0 }
 0x33b   : > { %v3250_v3 = vpack.c.bf16 %v3200_v18, %v3199_v15  ;;  %v3138_v62 = vadd.f32 %v11335_v47, %v12919_v41  ;;  %v3135_v15 = vadd.f32 %v2864_v19, %v12922_v43  ;;  %v3193_v18 = vmax.f32 %v3137_v37, 0.0 }
 0x33c   : > { %v3203_v13 = vmax.f32 %v3147_v44, 0.0  ;;  %v3198_v12 = vmax.f32 %v3142_v54, 0.0  ;;  %v3195_v44 = vmax.f32 %v3139_v10, 0.0  ;;  %v3133_v47 = vadd.f32 %v13463_v2, %v12929_v48 }
 0x33d   : > { %v3194_v57 = vmax.f32 %v3138_v62, 0.0  ;;  %v3191_v34 = vmax.f32 %v3135_v15, 0.0  ;;  %v3134_v19 = vadd.f32 %v13460_v29, %v12934_v51 }
 0x33e   : > { %v3252_v30 = vpack.c.bf16 %v3204_v22, %v3203_v13  ;;  %v3249_v8 = vpack.c.bf16 %v3198_v12, %v3197_v49  ;;  %v3196_v22 = vmax.f32 %v3140_v39, 0.0  ;;  %v3189_v60 = vmax.f32 %v3133_v47, 0.0 }
 0x33f   : > { %v13484_v13 = vpop.f32.mrf.mxu1  ;;  %v3246_v61 = vpack.c.bf16 %v3192_v53, %v3191_v34  ;;  %v3190_v54 = vmax.f32 %v3134_v19, 0.0 }
 0x340   : > { %3274 = vmatpush1.bf16.msra.mxu0 %v3252_v30  ;;  %v3248_v42 = vpack.c.bf16 %v3196_v22, %v3195_v44  ;;  %v3247_v30 = vpack.c.bf16 %v3194_v57, %v3193_v18 }
 0x341   : > { %3275 = vmatprep.subr.bf16.mxu0 %v16755_v25  ;;  %v13489_v0 = vpop.f32.mrf.mxu1  ;;  %v3245_v2 = vpack.c.bf16 %v3190_v54, %v3189_v60 }
 0x344   : > { %3276 = vmatpush1.bf16.msra.mxu0 %v3251_v50 }
 0x345   : > { %3277 = vmatprep.subr.bf16.mxu0 %v16755_v25 }
 0x347   : > { %v13494_v58 = vpop.f32.mrf.mxu1 }
 0x348   : > { %3278 = vmatpush1.bf16.msra.mxu0 %v3250_v3 }
 0x349   : > { %3279 = vmatprep.subr.bf16.mxu0 %v16755_v25  ;;  %v2944_v50 = vpop.f32.mrf.mxu1 }
 0x34c   : > { %3280 = vmatpush1.bf16.msra.mxu0 %v3249_v8 }
 0x34d   : > { %3281 = vmatprep.subr.bf16.mxu0 %v16755_v25 }
 0x34f   : > { %v11359_v10 = vpop.f32.mrf.mxu1 }
 0x350   : > { %3282 = vmatpush1.bf16.msra.mxu0 %v3248_v42 }
 0x351   : > { %3283 = vmatprep.subr.bf16.mxu0 %v16755_v25  ;;  %v2954_v49 = vpop.f32.mrf.mxu1 }
 0x354   : > { %3284 = vmatpush1.bf16.msra.mxu0 %v3247_v30 }
 0x355   : > { %3285 = vmatprep.subr.bf16.mxu0 %v16755_v25 }
 0x357   : > { %v11362_v3 = vpop.f32.mrf.mxu1 }
 0x358   : > { %3286 = vmatpush1.bf16.msra.mxu0 %v3246_v61 }
 0x359   : > { %3287 = vmatprep.subr.bf16.mxu0 %v16755_v25  ;;  %v2964_v39 = vpop.f32.mrf.mxu1 }
 0x35c   : > { %3288 = vmatpush1.bf16.msra.mxu0 %v3245_v2 }
 0x35d   : > { %3289 = vmatprep.subr.bf16.mxu0 %v16755_v25 }
 0x35f   : > { %v11365_v29 = vpop.f32.mrf.mxu1 }
 0x361   : > { %v2974_v12 = vpop.f32.mrf.mxu1 }
 0x362   : > { %v3157_v54 = vadd.f32 %v2974_v12, %v12968_v6  ;;  %v3153_v12 = vadd.f32 %v2954_v49, %v12987_v24 }
 0x367   : > { %v11368_v37 = vpop.f32.mrf.mxu1 }
 0x368   : > { %v3160_v60 = vadd.f32 %v11368_v37, %v12963_v4  ;;  %v3156_v37 = vadd.f32 %v11362_v3, %v12983_v14 }
 0x369   : > { %v2984_v44 = vpop.f32.mrf.mxu1 }
 0x36a   : > { %v3159_v30 = vadd.f32 %v2984_v44, %v12957_v1  ;;  %v3155_v44 = vadd.f32 %v2964_v39, %v12979_v11  ;;  %v3151_v39 = vadd.f32 %v2944_v50, %v12996_v32  ;;  %v3150_v50 = vadd.f32 %v13484_v13, %v13010_v45  ;;  %v12391_v13 = vld [vmem:[%s16534_s9 + $0x18] sm:$0xff] }
 0x36c   : > { %v3215_v2 = vmax.f32 %v3159_v30, 0.0  ;;  %v3209_v30 = vmax.f32 %v3153_v12, 0.0  ;;  %v12394_v12 = vld [vmem:[%s16534_s9 + $0x10] sm:$0xff] }
 0x36f   : > { %v11371_v8 = vpop.f32.mrf.mxu1 }
 0x370   : > { %v3162_v57 = vadd.f32 %v11371_v8, %v12952_v63  ;;  %v3213_v8 = vmax.f32 %v3157_v54, 0.0 }
 0x371   : > { %v2994_v62 = vpop.f32.mrf.mxu1 }
 0x372   : > { %v3161_v42 = vadd.f32 %v2994_v62, %v12946_v59  ;;  %v3218_v61 = vmax.f32 %v3162_v57, 0.0 }
 0x374   : > { %v3217_v19 = vmax.f32 %v3161_v42, 0.0 }
 0x376   : > { %v3259_v62 = vpack.c.bf16 %v3218_v61, %v3217_v19  ;;  %v3152_v19 = vadd.f32 %v13494_v58, %v13001_v40 }
 0x377   : > { %v11374_v22 = vpop.f32.mrf.mxu1 }
 0x378   : > { %v3164_v15 = vadd.f32 %v11374_v22, %v12939_v55  ;;  %v3158_v22 = vadd.f32 %v11365_v29, %v12974_v9  ;;  %v3154_v29 = vadd.f32 %v11359_v10, %v12992_v35  ;;  %v3149_v10 = vadd.f32 %v13489_v0, %v13005_v27 }
 0x379   : > { %v3004_v18 = vpop.f32.mrf.mxu1 }
 0x37a   : > { %v3163_v5 = vadd.f32 %v3004_v18, %v12941_v56  ;;  %v3220_v47 = vmax.f32 %v3164_v15, 0.0  ;;  %v3216_v18 = vmax.f32 %v3160_v60, 0.0  ;;  %v3214_v42 = vmax.f32 %v3158_v22, 0.0 }
 0x37b   : > { %v3207_v60 = vmax.f32 %v3151_v39, 0.0  ;;  %v3205_v58 = vmax.f32 %v3149_v10, 0.0  ;;  %v12397_v39 = vld [vmem:[%s12767_s23 + $0x20] ss:$16 sps:$4 sm:$0xff]  }
 0x37c   : > { %v3219_v34 = vmax.f32 %v3163_v5, 0.0  ;;  %v3258_v15 = vpack.c.bf16 %v3216_v18, %v3215_v2  ;;  %v3211_v5 = vmax.f32 %v3155_v44, 0.0  ;;  %v3257_v57 = vpack.c.bf16 %v3214_v42, %v3213_v8  ;;  %v12393_v42 = vld [vmem:[%s12767_s23 + $0x24] ss:$16 sps:$4 sm:$0xff]   ;;  %v12399_v10 = vld [vmem:[%s12767_s23 + $0x40] ss:$16 sps:$4 sm:$0xff]  }
 0x37d   : > { %v3208_v2 = vmax.f32 %v3152_v19, 0.0  ;;  %v3206_v18 = vmax.f32 %v3150_v50, 0.0 }
 0x37e   : > { %v3260_v53 = vpack.c.bf16 %v3220_v47, %v3219_v34  ;;  %v3212_v47 = vmax.f32 %v3156_v37, 0.0  ;;  %v12392_v37 = vld [vmem:[%s12767_s23] ss:$16 sps:$4 sm:$0xff]  }
 0x37f   : > { %v13516_v34 = vpop.f32.mrf.mxu1  ;;  %v3253_v44 = vpack.c.bf16 %v3206_v18, %v3205_v58  ;;  %v12401_v58 = vld [vmem:[%s12767_s23 + $0x60] ss:$16 sps:$4 sm:$0xff]   ;;  %v12402_v18 = vld [vmem:[%s12767_s23 + $0x84] ss:$16 sps:$4 sm:$0xff]  }
 0x380   : > { %3290 = vmatpush2.bf16.msra.mxu0 %v3260_v53  ;;  %v3256_v3 = vpack.c.bf16 %v3212_v47, %v3211_v5  ;;  %v3210_v53 = vmax.f32 %v3154_v29, 0.0  ;;  %v12396_v47 = vld [vmem:[%s16534_s9] sm:$0xff] }
 0x381   : > { %3291 = vmatprep.subr.bf16.mxu0 %v16755_v25  ;;  %v13522_v49 = vpop.f32.mrf.mxu1 }
 0x382   : > { %v3255_v61 = vpack.c.bf16 %v3210_v53, %v3209_v30  ;;  %v12398_v30 = vld [vmem:[%s12767_s23 + $0x44] ss:$16 sps:$4 sm:$0xff]  }
 0x384   : > { %3292 = vmatpush2.bf16.msra.mxu0 %v3259_v62  ;;  %v3254_v62 = vpack.c.bf16 %v3208_v2, %v3207_v60  ;;  %v12400_v60 = vld [vmem:[%s12767_s23 + $0x64] ss:$16 sps:$4 sm:$0xff]  }
 0x385   : > { %3293 = vmatprep.subr.bf16.mxu0 %v16755_v25 }
 0x387   : > { %v13527_v54 = vpop.f32.mrf.mxu1 }
 0x388   : > { %3294 = vmatpush2.bf16.msra.mxu0 %v3258_v15 }
 0x389   : > { %3295 = vmatprep.subr.bf16.mxu0 %v16755_v25  ;;  %v13532_v22 = vpop.f32.mrf.mxu1 }
 0x38c   : > { %3296 = vmatpush2.bf16.msra.mxu0 %v3257_v57  ;;  %v12395_v57 = vld [vmem:[%s16534_s9 + $0x8] sm:$0xff] }
 0x38d   : > { %3297 = vmatprep.subr.bf16.mxu0 %v16755_v25 }
 0x38f   : > { %v13534_v0 = vpop.f32.mrf.mxu1 }
 0x390   : > { %3298 = vmatpush2.bf16.msra.mxu0 %v3256_v3 }
 0x391   : > { %3299 = vmatprep.subr.bf16.mxu0 %v16755_v25  ;;  %v13537_v8 = vpop.f32.mrf.mxu1 }
 0x394   : > { %3300 = vmatpush2.bf16.msra.mxu0 %v3255_v61 }
 0x395   : > { %3301 = vmatprep.subr.bf16.mxu0 %v16755_v25 }
 0x397   : > { %v13542_v15 = vpop.f32.mrf.mxu1 }
 0x398   : > { %3302 = vmatpush2.bf16.msra.mxu0 %v3254_v62 }
 0x399   : > { %3303 = vmatprep.subr.bf16.mxu0 %v16755_v25  ;;  %v3044_v5 = vpop.f32.mrf.mxu1 }
 0x39c   : > { %3304 = vmatpush2.bf16.msra.mxu0 %v3253_v44 }
 0x39d   : > { %11411 = vmatprep.subr.mxu0 %v12391_v13 }
 0x39f   : > { %3306 = vmatmul.mubr.bf16.vlgmr.msra.gmra.mxu0 %v12392_v37  ;;  %v11389_v29 = vpop.f32.mrf.mxu1 }
 0x3a0   : > { %3313 = vmatprep.mubr.bf16.mxu0 %v12393_v42  ;;  %11412 = vmatpush3.msra.mxu0 %v12391_v13 }
 0x3a1   : > { %11413 = vmatprep.subr.mxu0 %v12394_v12  ;;  %v3054_v3 = vpop.f32.mrf.mxu1 }
 0x3a2   : > { %11414 = vmatpush3.msra.mxu0 %v12394_v12 }
 0x3a3   : > { %11415 = vmatprep.subr.mxu0 %v12395_v57 }
 0x3a4   : > { %11416 = vmatpush3.msra.mxu0 %v12395_v57 }
 0x3a5   : > { %11417 = vmatprep.subr.mxu0 %v12396_v47 }
 0x3a6   : > { %11418 = vmatpush3.msra.mxu0 %v12396_v47  ;;  %v16756_v47 = vld [vmem:[#allocation18_spill] sm:$0xff] }
 0x3a7   : > { %3314 = vmatmul.mubr.bf16.gmra.mxu0 %v12397_v39  ;;  %5017 = vmatprep.subr.bf16.mxu0 %v16755_v25  ;;  %v11392_v19 = vpop.f32.mrf.mxu1 }
 0x3a8   : > { %3321 = vmatprep.mubr.bf16.mxu0 %v12398_v30 }
 0x3a9   : > { %v3064_v53 = vpop.f32.mrf.mxu1 }
 0x3aa   : > { %v3175_v39 = vadd.f32 %v3064_v53, %v16756_v47 }
 0x3af   : > { %3322 = vmatmul.mubr.bf16.gmra.mxu0 %v12399_v10  ;;  %v11395_v61 = vpop.f32.mrf.mxu1 }
 0x3b0   : > { %3329 = vmatprep.mubr.bf16.mxu0 %v12400_v60  ;;  %v3178_v42 = vadd.f32 %v11395_v61, %v13029_v7  ;;  %v12403_v60 = vld [vmem:[%s12767_s23 + $0x80] ss:$16 sps:$4 sm:$0xff]   ;;  %v3231_v61 = vmax.f32 %v3175_v39, 0.0  ;;  %v16762_v39 = vld [vmem:[#allocation24_spill] sm:$0xff] }
 0x3b1   : > { %v3074_v50 = vpop.f32.mrf.mxu1 }
 0x3b2   : > { %v3177_v13 = vadd.f32 %v3074_v50, %v13023_v17  ;;  %v16758_v50 = vld [vmem:[#allocation20_spill] sm:$0xff] }
 0x3b4   : > { %v3233_v30 = vmax.f32 %v3177_v13, 0.0 }
 0x3b7   : > { %v11398_v2 = vpop.f32.mrf.mxu1  ;;  %3330 = vmatmul.mubr.bf16.gmra.mxu0 %v12401_v58  ;;  %v16757_v58 = vld [vmem:[#allocation19_spill] sm:$0xff] }
 0x3b8   : > { %v3180_v62 = vadd.f32 %v11398_v2, %v13016_v52  ;;  %3337 = vmatprep.mubr.bf16.mxu0 %v12402_v18  ;;  %v3176_v2 = vadd.f32 %v11392_v19, %v16757_v58  ;;  %v3234_v52 = vmax.f32 %v3178_v42, 0.0  ;;  %v12404_v18 = vld [vmem:[%s12767_s23 + $0xa4] ss:$16 sps:$4 sm:$0xff]   ;;  %v16760_v19 = vld [vmem:[#allocation22_spill] sm:$0xff] }
 0x3b9   : > { %v3084_v44 = vpop.f32.mrf.mxu1  ;;  %v3171_v42 = vadd.f32 %v3044_v5, %v16760_v19 }
 0x3ba   : > { %v3179_v37 = vadd.f32 %v3084_v44, %v13018_v20  ;;  %v3236_v12 = vmax.f32 %v3180_v62, 0.0  ;;  %v3173_v44 = vadd.f32 %v3054_v3, %v16758_v50  ;;  %v3267_v62 = vpack.c.bf16 %v3234_v52, %v3233_v30  ;;  %v12406_v52 = vld [vmem:[%s12767_s23 + $0xc4] ss:$16 sps:$4 sm:$0xff]   ;;  %v12500_v20 = vld [vmem:[%s12767_s23 + $0x328] ss:$16 sps:$4 sm:$0xff]  }
 0x3bb   : > { %v3232_v13 = vmax.f32 %v3176_v2, 0.0  ;;  %v3169_v30 = vadd.f32 %v13537_v8, %v16762_v39  ;;  %v3227_v2 = vmax.f32 %v3171_v42, 0.0  ;;  %v16765_v8 = vld [vmem:[#allocation27_spill] sm:$0xff] }
 0x3bc   : > { %v3235_v57 = vmax.f32 %v3179_v37, 0.0  ;;  %v16759_v37 = vld [vmem:[#allocation21_spill] sm:$0xff]  ;;  %v3168_v42 = vadd.f32 %v13527_v54, %v16765_v8 }
 0x3bd   : > { %v3174_v53 = vadd.f32 %v11389_v29, %v16759_v37  ;;  %v12409_v8 = vld [vmem:[%s12767_s23 + $0xe0] ss:$16 sps:$4 sm:$0xff]  }
 0x3be   : > { %v3268_v10 = vpack.c.bf16 %v3236_v12, %v3235_v57  ;;  %v3229_v57 = vmax.f32 %v3173_v44, 0.0 }
 0x3bf   : > { %3338 = vmatmul.mubr.bf16.gmra.mxu0 %v12403_v60  ;;  %v13573_v12 = vpop.f32.mrf.mxu1  ;;  %v12405_v60 = vld [vmem:[%s12767_s23 + $0xa0] ss:$16 sps:$4 sm:$0xff]   ;;  %v3230_v50 = vmax.f32 %v3174_v53, 0.0 }
 0x3c0   : > { %3531 = vmatpush1.bf16.msra.mxu1 %v3268_v10  ;;  %3345 = vmatprep.mubr.bf16.mxu0 %v12404_v18  ;;  %v3266_v10 = vpack.c.bf16 %v3232_v13, %v3231_v61  ;;  %v16761_v18 = vld [vmem:[#allocation23_spill] sm:$0xff]  ;;  %v16763_v61 = vld [vmem:[#allocation25_spill] sm:$0xff] }
 0x3c1   : > { %3532 = vmatprep.subr.bf16.mxu1 %v16755_v25  ;;  %v3172_v3 = vadd.f32 %v13542_v15, %v16761_v18  ;;  %v3094_v29 = vpop.f32.mrf.mxu1  ;;  %v3265_v5 = vpack.c.bf16 %v3230_v50, %v3229_v57  ;;  %v16764_v15 = vld [vmem:[#allocation26_spill] sm:$0xff]  ;;  %v12407_v18 = vld [vmem:[%s12767_s23 + $0xc0] ss:$16 sps:$4 sm:$0xff]   ;;  %v12408_v57 = vld [vmem:[%s12767_s23 + $0xe4] ss:$16 sps:$4 sm:$0xff]  }
 0x3c2   : > { %v3167_v53 = vadd.f32 %v13532_v22, %v16764_v15 }
 0x3c3   : > { %v3228_v13 = vmax.f32 %v3172_v3, 0.0  ;;  %v16766_v3 = vld [vmem:[#allocation28_spill] sm:$0xff] }
 0x3c4   : > { %3533 = vmatpush1.bf16.msra.mxu1 %v3267_v62  ;;  %v3170_v62 = vadd.f32 %v13534_v0, %v16763_v61  ;;  %v3223_v22 = vmax.f32 %v3167_v53, 0.0  ;;  %v16768_v61 = vld [vmem:[#allocation30_spill] sm:$0xff] }
 0x3c5   : > { %3534 = vmatprep.subr.bf16.mxu1 %v16755_v25 }
 0x3c6   : > { %v3226_v50 = vmax.f32 %v3170_v62, 0.0 }
 0x3c7   : > { %3346 = vmatmul.mubr.bf16.gmra.mxu0 %v12405_v60  ;;  %v11404_v44 = vpop.f32.mrf.mxu1  ;;  %v3264_v60 = vpack.c.bf16 %v3228_v13, %v3227_v2  ;;  %v16767_v2 = vld [vmem:[#allocation29_spill] sm:$0xff]  ;;  %v3224_v13 = vmax.f32 %v3168_v42, 0.0 }
 0x3c8   : > { %3535 = vmatpush1.bf16.msra.mxu1 %v3266_v10  ;;  %3353 = vmatprep.mubr.bf16.mxu0 %v12406_v52  ;;  %v3225_v10 = vmax.f32 %v3169_v30, 0.0 }
 0x3c9   : > { %3536 = vmatprep.subr.bf16.mxu1 %v16755_v25  ;;  %v3104_v52 = vpop.f32.mrf.mxu1 }
 0x3ca   : > { %v3263_v30 = vpack.c.bf16 %v3226_v50, %v3225_v10  ;;  %v16769_v10 = vld [vmem:[#allocation33_spill] sm:$0xff]  ;;  %v16770_v50 = vld [vmem:[#allocation31_spill] sm:$0xff] }
 0x3cc   : > { %3537 = vmatpush1.bf16.msra.mxu1 %v3265_v5  ;;  %v3165_v5 = vadd.f32 %v13522_v49, %v16766_v3  ;;  %v12410_v49 = vld [vmem:[%s12767_s23 + $0x104] ss:$16 sps:$4 sm:$0xff]   ;;  %v12496_v3 = vld [vmem:[%s12767_s23 + $0x2e8] ss:$16 sps:$4 sm:$0xff]  }
 0x3cd   : > { %3538 = vmatprep.subr.bf16.mxu1 %v16755_v25 }
 0x3ce   : > { %v3221_v62 = vmax.f32 %v3165_v5, 0.0 }
 0x3cf   : > { %3354 = vmatmul.mubr.bf16.gmra.mxu0 %v12407_v18  ;;  %v11407_v0 = vpop.f32.mrf.mxu1  ;;  %v3166_v18 = vadd.f32 %v13516_v34, %v16767_v2  ;;  %v16773_v2 = vld [vmem:[#allocation34_spill] sm:$0xff] }
 0x3d0   : > { %3539 = vmatpush1.bf16.msra.mxu1 %v3264_v60  ;;  %3361 = vmatprep.mubr.bf16.mxu0 %v12408_v57  ;;  %v3262_v60 = vpack.c.bf16 %v3224_v13, %v3223_v22  ;;  %v16771_v22 = vld [vmem:[#allocation32_spill] sm:$0xff] }
 0x3d1   : > { %3540 = vmatprep.subr.bf16.mxu1 %v16755_v25  ;;  %v3114_v54 = vpop.f32.mrf.mxu1  ;;  %v3222_v15 = vmax.f32 %v3166_v18, 0.0  ;;  %v16772_v18 = vld [vmem:[#allocation35_spill] sm:$0xff] }
 0x3d2   : > { %v3185_v42 = vadd.f32 %v3114_v54, %v16769_v10  ;;  %v12412_v54 = vld [vmem:[%s12767_s23 + $0x124] ss:$16 sps:$4 sm:$0xff]  }
 0x3d3   : > { %v3261_v34 = vpack.c.bf16 %v3222_v15, %v3221_v62  ;;  %v3184_v15 = vadd.f32 %v11404_v44, %v16773_v2 }
 0x3d4   : > { %3541 = vmatpush1.bf16.msra.mxu1 %v3263_v30  ;;  %v3186_v30 = vadd.f32 %v11407_v0, %v16771_v22 }
 0x3d5   : > { %3542 = vmatprep.subr.bf16.mxu1 %v16755_v25 }
 0x3d6   : > { %v3242_v62 = vmax.f32 %v3186_v30, 0.0  ;;  %v12413_v30 = vld [vmem:[%s12767_s23 + $0x120] ss:$16 sps:$4 sm:$0xff]  }
 0x3d7   : > { %v11410_v57 = vpop.f32.mrf.mxu1  ;;  %3362 = vmatmul.mubr.bf16.gmra.mxu0 %v12409_v8 }
 0x3d8   : > { %v3188_v39 = vadd.f32 %v11410_v57, %v16768_v61  ;;  %3543 = vmatpush1.bf16.msra.mxu1 %v3262_v60  ;;  %3369 = vmatprep.mubr.bf16.mxu0 %v12410_v49  ;;  %v3183_v60 = vadd.f32 %v3104_v52, %v16772_v18  ;;  %v3241_v57 = vmax.f32 %v3185_v42, 0.0  ;;  %v12411_v61 = vld [vmem:[%s12767_s23 + $0x100] ss:$16 sps:$4 sm:$0xff]   ;;  %v3240_v42 = vmax.f32 %v3184_v15, 0.0  ;;  %v12419_v15 = vld [vmem:[%s12767_s23 + $0x28] ss:$16 sps:$4 sm:$0xff]  }
 0x3d9   : > { %v3124_v53 = vpop.f32.mrf.mxu1  ;;  %3544 = vmatprep.subr.bf16.mxu1 %v16755_v25  ;;  %v12492_v18 = vld [vmem:[%s12767_s23 + $0x2a8] ss:$16 sps:$4 sm:$0xff]  }
 0x3da   : > { %v3187_v5 = vadd.f32 %v3124_v53, %v16770_v50  ;;  %v3244_v13 = vmax.f32 %v3188_v39, 0.0  ;;  %v16774_v39 = vld [vmem:[#allocation37_spill] sm:$0xff]  ;;  %v3239_v53 = vmax.f32 %v3183_v60, 0.0  ;;  %v12494_v50 = vld [vmem:[%s12767_s23 + $0x2c8] ss:$16 sps:$4 sm:$0xff]  }
 0x3db   : > { %v3181_v0 = vadd.f32 %v3094_v29, %v16774_v39  ;;  %v12414_v29 = vld [vmem:[%s12767_s23 + $0x144] ss:$16 sps:$4 sm:$0xff]   ;;  %v12416_v60 = vld [vmem:[%s12767_s23 + $0x140] ss:$16 sps:$4 sm:$0xff]   ;;  %v12490_v39 = vld [vmem:[%s12767_s23 + $0x288] ss:$16 sps:$4 sm:$0xff]  }
 0x3dc   : > { %v3243_v8 = vmax.f32 %v3187_v5, 0.0  ;;  %3545 = vmatpush1.bf16.msra.mxu1 %v3261_v34  ;;  %v3271_v34 = vpack.c.bf16 %v3242_v62, %v3241_v57  ;;  %v16775_v5 = vld [vmem:[#allocation36_spill] sm:$0xff]  ;;  %v12420_v62 = vld [vmem:[%s12767_s23 + $0x160] ss:$16 sps:$4 sm:$0xff]  }
 0x3dd   : > { %3554 = vmatprep.subr.bf16.mxu1 %v16755_v25  ;;  %v3182_v52 = vadd.f32 %v13573_v12, %v16775_v5  ;;  %v3237_v44 = vmax.f32 %v3181_v0, 0.0  ;;  %v12417_v57 = vld [vmem:[%s12767_s23 + $0x2c] ss:$16 sps:$4 sm:$0xff]   ;;  %v12422_v0 = vld [vmem:[%s12767_s23 + $0x184] ss:$16 sps:$4 sm:$0xff]  }
 0x3de   : > { %v3272_v49 = vpack.c.bf16 %v3244_v13, %v3243_v8  ;;  %v12415_v8 = vld [vmem:[%s12767_s23 + $0x8] ss:$16 sps:$4 sm:$0xff]  }
 0x3df   : > { %3370 = vmatmul.mubr.bf16.gmra.mxu0 %v12411_v61  ;;  %v3270_v61 = vpack.c.bf16 %v3240_v42, %v3239_v53  ;;  %v3238_v13 = vmax.f32 %v3182_v52, 0.0  ;;  %v12423_v53 = vld [vmem:[%s12767_s23 + $0x48] ss:$16 sps:$4 sm:$0xff]   ;;  %v12425_v52 = vld [vmem:[%s12767_s23 + $0x6c] ss:$16 sps:$4 sm:$0xff]  }
 0x3e0   : > { %3555 = vmatpush2.bf16.msra.mxu1 %v3272_v49  ;;  %3377 = vmatprep.mubr.bf16.mxu0 %v12412_v54  ;;  %v12418_v49 = vld [vmem:[%s12767_s23 + $0x164] ss:$16 sps:$4 sm:$0xff]   ;;  %v12421_v54 = vld [vmem:[%s12767_s23 + $0x4c] ss:$16 sps:$4 sm:$0xff]  }
 0x3e1   : > { %3556 = vmatprep.subr.bf16.mxu1 %v16755_v25  ;;  %v3269_v12 = vpack.c.bf16 %v3238_v13, %v3237_v44  ;;  %v12426_v42 = vld [vmem:[%s12767_s23 + $0x1a4] ss:$16 sps:$4 sm:$0xff]   ;;  %v12427_v44 = vld [vmem:[%s12767_s23 + $0x68] ss:$16 sps:$4 sm:$0xff]  }
 0x3e2   : > { %v12430_v13 = vld [vmem:[%s12767_s23 + $0x1c4] ss:$16 sps:$4 sm:$0xff]  }
 0x3e4   : > { %3557 = vmatpush2.bf16.msra.mxu1 %v3271_v34  ;;  %v12424_v34 = vld [vmem:[%s12767_s23 + $0x180] ss:$16 sps:$4 sm:$0xff]  }
 0x3e5   : > { %3558 = vmatprep.subr.bf16.mxu1 %v16755_v25 }
 0x3e7   : > { %3378 = vmatmul.mubr.bf16.gmra.mxu0 %v12413_v30  ;;  %v12429_v30 = vld [vmem:[%s12767_s23 + $0x8c] ss:$16 sps:$4 sm:$0xff]  }
 0x3e8   : > { %3559 = vmatpush2.bf16.msra.mxu1 %v3270_v61  ;;  %3385 = vmatprep.mubr.bf16.mxu0 %v12414_v29  ;;  %v12428_v61 = vld [vmem:[%s12767_s23 + $0x1a0] ss:$16 sps:$4 sm:$0xff]   ;;  %v12431_v29 = vld [vmem:[%s12767_s23 + $0x88] ss:$16 sps:$4 sm:$0xff]  }
 0x3e9   : > { %3560 = vmatprep.subr.bf16.mxu1 %v16755_v25  ;;  %v12498_v25 = vld [vmem:[%s12767_s23 + $0x308] ss:$16 sps:$4 sm:$0xff]  }
 0x3ec   : > { %3561 = vmatpush2.bf16.msra.mxu1 %v3269_v12  ;;  %v12432_v12 = vld [vmem:[%s12767_s23 + $0x1c0] ss:$16 sps:$4 sm:$0xff]  }
 0x3ef   : > { %3563 = vmatmul.mubr.bf16.vlgmr.msra.gmra.mxu1 %v12415_v8  ;;  %3386 = vmatmul.mubr.bf16.gmra.mxu0 %v12416_v60  ;;  %v12433_v8 = vld [vmem:[%s12767_s23 + $0xac] ss:$16 sps:$4 sm:$0xff]   ;;  %v12434_v60 = vld [vmem:[%s12767_s23 + $0x1e4] ss:$16 sps:$4 sm:$0xff]  }
 0x3f0   : > { %9906 = vmatprep.mubr.msk.bf16.mxu1 %vm16626_vm1, %v12417_v57  ;;  %3393 = vmatprep.mubr.bf16.mxu0 %v12418_v49  ;;  %v12435_v57 = vld [vmem:[%s12767_s23 + $0xa8] ss:$16 sps:$4 sm:$0xff]   ;;  %v12436_v49 = vld [vmem:[%s12767_s23 + $0x1e0] ss:$16 sps:$4 sm:$0xff]  }
 0x3f7   : > { %3571 = vmatmul.mubr.bf16.gmra.mxu1 %v12419_v15  ;;  %3394 = vmatmul.mubr.bf16.gmra.mxu0 %v12420_v62  ;;  %v12437_v15 = vld [vmem:[%s12767_s23 + $0xcc] ss:$16 sps:$4 sm:$0xff]   ;;  %v12438_v62 = vld [vmem:[%s12767_s23 + $0x204] ss:$16 sps:$4 sm:$0xff]  }
 0x3f8   : > { %9907 = vmatprep.mubr.msk.bf16.mxu1 %vm16626_vm1, %v12421_v54  ;;  %3401 = vmatprep.mubr.bf16.mxu0 %v12422_v0  ;;  %v12439_v54 = vld [vmem:[%s12767_s23 + $0xc8] ss:$16 sps:$4 sm:$0xff]   ;;  %v12440_v0 = vld [vmem:[%s12767_s23 + $0x200] ss:$16 sps:$4 sm:$0xff]  }
 0x3ff   : > { %3579 = vmatmul.mubr.bf16.gmra.mxu1 %v12423_v53  ;;  %3402 = vmatmul.mubr.bf16.gmra.mxu0 %v12424_v34  ;;  %v12441_v53 = vld [vmem:[%s12767_s23 + $0xec] ss:$16 sps:$4 sm:$0xff]   ;;  %v12442_v34 = vld [vmem:[%s12767_s23 + $0x224] ss:$16 sps:$4 sm:$0xff]  }
 0x400   : > { %9908 = vmatprep.mubr.msk.bf16.mxu1 %vm16626_vm1, %v12425_v52  ;;  %3409 = vmatprep.mubr.bf16.mxu0 %v12426_v42  ;;  %v12443_v52 = vld [vmem:[%s12767_s23 + $0xe8] ss:$16 sps:$4 sm:$0xff]   ;;  %v12444_v42 = vld [vmem:[%s12767_s23 + $0x220] ss:$16 sps:$4 sm:$0xff]  }
 0x407   : > { %3587 = vmatmul.mubr.bf16.gmra.mxu1 %v12427_v44  ;;  %3410 = vmatmul.mubr.bf16.gmra.mxu0 %v12428_v61  ;;  %v12445_v44 = vld [vmem:[%s12767_s23 + $0x10c] ss:$16 sps:$4 sm:$0xff]   ;;  %v12446_v61 = vld [vmem:[%s12767_s23 + $0x244] ss:$16 sps:$4 sm:$0xff]  }
 0x408   : > { %9909 = vmatprep.mubr.msk.bf16.mxu1 %vm16626_vm1, %v12429_v30  ;;  %3417 = vmatprep.mubr.bf16.mxu0 %v12430_v13  ;;  %v12447_v30 = vld [vmem:[%s12767_s23 + $0x108] ss:$16 sps:$4 sm:$0xff]   ;;  %v12448_v13 = vld [vmem:[%s12767_s23 + $0x240] ss:$16 sps:$4 sm:$0xff]  }
 0x40f   : > { %3595 = vmatmul.mubr.bf16.gmra.mxu1 %v12431_v29  ;;  %3418 = vmatmul.mubr.bf16.gmra.mxu0 %v12432_v12  ;;  %v12449_v29 = vld [vmem:[%s12767_s23 + $0x12c] ss:$16 sps:$4 sm:$0xff]   ;;  %v12450_v12 = vld [vmem:[%s12767_s23 + $0x264] ss:$16 sps:$4 sm:$0xff]  }
 0x410   : > { %9910 = vmatprep.mubr.msk.bf16.mxu1 %vm16626_vm1, %v12433_v8  ;;  %3425 = vmatprep.mubr.bf16.mxu0 %v12434_v60  ;;  %v12451_v8 = vld [vmem:[%s12767_s23 + $0x128] ss:$16 sps:$4 sm:$0xff]   ;;  %v12452_v60 = vld [vmem:[%s12767_s23 + $0x260] ss:$16 sps:$4 sm:$0xff]  }
 0x417   : > { %3603 = vmatmul.mubr.bf16.gmra.mxu1 %v12435_v57  ;;  %3426 = vmatmul.mubr.bf16.gmra.mxu0 %v12436_v49  ;;  %v12453_v57 = vld [vmem:[%s12767_s23 + $0x14c] ss:$16 sps:$4 sm:$0xff]   ;;  %v12454_v49 = vld [vmem:[%s12767_s23 + $0x284] ss:$16 sps:$4 sm:$0xff]  }
 0x418   : > { %9911 = vmatprep.mubr.msk.bf16.mxu1 %vm16626_vm1, %v12437_v15  ;;  %3433 = vmatprep.mubr.bf16.mxu0 %v12438_v62  ;;  %v12455_v15 = vld [vmem:[%s12767_s23 + $0x148] ss:$16 sps:$4 sm:$0xff]   ;;  %v12456_v62 = vld [vmem:[%s12767_s23 + $0x280] ss:$16 sps:$4 sm:$0xff]  }
 0x41f   : > { %3611 = vmatmul.mubr.bf16.gmra.mxu1 %v12439_v54  ;;  %3434 = vmatmul.mubr.bf16.gmra.mxu0 %v12440_v0  ;;  %v12457_v54 = vld [vmem:[%s12767_s23 + $0x16c] ss:$16 sps:$4 sm:$0xff]   ;;  %v12458_v0 = vld [vmem:[%s12767_s23 + $0x2a4] ss:$16 sps:$4 sm:$0xff]  }
 0x420   : > { %9912 = vmatprep.mubr.msk.bf16.mxu1 %vm16626_vm1, %v12441_v53  ;;  %3441 = vmatprep.mubr.bf16.mxu0 %v12442_v34  ;;  %v12459_v53 = vld [vmem:[%s12767_s23 + $0x168] ss:$16 sps:$4 sm:$0xff]   ;;  %v12460_v34 = vld [vmem:[%s12767_s23 + $0x2a0] ss:$16 sps:$4 sm:$0xff]  }
 0x427   : > { %3619 = vmatmul.mubr.bf16.gmra.mxu1 %v12443_v52  ;;  %3442 = vmatmul.mubr.bf16.gmra.mxu0 %v12444_v42  ;;  %v12461_v52 = vld [vmem:[%s12767_s23 + $0x18c] ss:$16 sps:$4 sm:$0xff]   ;;  %v12462_v42 = vld [vmem:[%s12767_s23 + $0x2c4] ss:$16 sps:$4 sm:$0xff]  }
 0x428   : > { %9913 = vmatprep.mubr.msk.bf16.mxu1 %vm16626_vm1, %v12445_v44  ;;  %3449 = vmatprep.mubr.bf16.mxu0 %v12446_v61  ;;  %v12463_v44 = vld [vmem:[%s12767_s23 + $0x188] ss:$16 sps:$4 sm:$0xff]   ;;  %v12464_v61 = vld [vmem:[%s12767_s23 + $0x2c0] ss:$16 sps:$4 sm:$0xff]  }
 0x42f   : > { %3627 = vmatmul.mubr.bf16.gmra.mxu1 %v12447_v30  ;;  %3450 = vmatmul.mubr.bf16.gmra.mxu0 %v12448_v13  ;;  %v12465_v30 = vld [vmem:[%s12767_s23 + $0x1ac] ss:$16 sps:$4 sm:$0xff]   ;;  %v12466_v13 = vld [vmem:[%s12767_s23 + $0x2e4] ss:$16 sps:$4 sm:$0xff]  }
 0x430   : > { %9914 = vmatprep.mubr.msk.bf16.mxu1 %vm16626_vm1, %v12449_v29  ;;  %3457 = vmatprep.mubr.bf16.mxu0 %v12450_v12  ;;  %v12467_v29 = vld [vmem:[%s12767_s23 + $0x1a8] ss:$16 sps:$4 sm:$0xff]   ;;  %v12468_v12 = vld [vmem:[%s12767_s23 + $0x2e0] ss:$16 sps:$4 sm:$0xff]  }
 0x437   : > { %3635 = vmatmul.mubr.bf16.gmra.mxu1 %v12451_v8  ;;  %3458 = vmatmul.mubr.bf16.gmra.mxu0 %v12452_v60  ;;  %v12469_v8 = vld [vmem:[%s12767_s23 + $0x1cc] ss:$16 sps:$4 sm:$0xff]   ;;  %v12470_v60 = vld [vmem:[%s12767_s23 + $0x304] ss:$16 sps:$4 sm:$0xff]  }
 0x438   : > { %9915 = vmatprep.mubr.msk.bf16.mxu1 %vm16626_vm1, %v12453_v57  ;;  %3465 = vmatprep.mubr.bf16.mxu0 %v12454_v49  ;;  %v12471_v57 = vld [vmem:[%s12767_s23 + $0x1c8] ss:$16 sps:$4 sm:$0xff]  }
 0x43f   : > { %3643 = vmatmul.mubr.bf16.gmra.mxu1 %v12455_v15  ;;  %3466 = vmatmul.mubr.bf16.gmra.mxu0 %v12456_v62  ;;  %v12472_v15 = vld [vmem:[%s12767_s23 + $0x300] ss:$16 sps:$4 sm:$0xff]   ;;  %v12473_v62 = vld [vmem:[%s12767_s23 + $0x1ec] ss:$16 sps:$4 sm:$0xff]  }
 0x440   : > { %9916 = vmatprep.mubr.msk.bf16.mxu1 %vm16626_vm1, %v12457_v54  ;;  %3473 = vmatprep.mubr.bf16.mxu0 %v12458_v0  ;;  %v12474_v54 = vld [vmem:[%s12767_s23 + $0x324] ss:$16 sps:$4 sm:$0xff]  }
 0x447   : > { %3651 = vmatmul.mubr.bf16.gmra.mxu1 %v12459_v53  ;;  %3474 = vmatmul.mubr.bf16.gmra.mxu0 %v12460_v34 }
 0x448   : > { %9917 = vmatprep.mubr.msk.bf16.mxu1 %vm16626_vm1, %v12461_v52  ;;  %3481 = vmatprep.mubr.bf16.mxu0 %v12462_v42  ;;  %v12475_v52 = vld [vmem:[%s12767_s23 + $0x1e8] ss:$16 sps:$4 sm:$0xff]  }
 0x44f   : > { %3659 = vmatmul.mubr.bf16.gmra.mxu1 %v12463_v44  ;;  %3482 = vmatmul.mubr.bf16.gmra.mxu0 %v12464_v61  ;;  %v12476_v44 = vld [vmem:[%s12767_s23 + $0x320] ss:$16 sps:$4 sm:$0xff]   ;;  %v12477_v61 = vld [vmem:[%s12767_s23 + $0x20c] ss:$16 sps:$4 sm:$0xff]  }
 0x450   : > { %9918 = vmatprep.mubr.msk.bf16.mxu1 %vm16626_vm1, %v12465_v30  ;;  %3489 = vmatprep.mubr.bf16.mxu0 %v12466_v13  ;;  %v12478_v30 = vld [vmem:[%s12767_s23 + $0x344] ss:$16 sps:$4 sm:$0xff]  }
 0x457   : > { %3667 = vmatmul.mubr.bf16.gmra.mxu1 %v12467_v29  ;;  %3490 = vmatmul.mubr.bf16.gmra.mxu0 %v12468_v12 }
 0x458   : > { %9919 = vmatprep.mubr.msk.bf16.mxu1 %vm16626_vm1, %v12469_v8  ;;  %3497 = vmatprep.mubr.bf16.mxu0 %v12470_v60  ;;  %v12479_v8 = vld [vmem:[%s12767_s23 + $0x208] ss:$16 sps:$4 sm:$0xff]  }
 0x45f   : > { %3675 = vmatmul.mubr.bf16.gmra.mxu1 %v12471_v57  ;;  %v13690_v49 = vpop.f32.mrf.mxu0  ;;  %3498 = vmatmul.mubr.bf16.gmra.mxu0 %v12472_v15  ;;  %v12480_v57 = vld [vmem:[%s12767_s23 + $0x340] ss:$16 sps:$4 sm:$0xff]   ;;  %v12481_v15 = vld [vmem:[%s12767_s23 + $0x22c] ss:$16 sps:$4 sm:$0xff]  }
 0x460   : > { %9920 = vmatprep.mubr.msk.bf16.mxu1 %vm16626_vm1, %v12473_v62  ;;  %3505 = vmatprep.mubr.bf16.mxu0 %v12474_v54  ;;  %v12482_v62 = vld [vmem:[%s12767_s23 + $0x364] ss:$16 sps:$4 sm:$0xff]  }
 0x461   : > { %v3309_v0 = vpop.f32.mrf.mxu0 }
 0x463   : > { %v13696_v53 = vpop.f32.mrf.mxu0 }
 0x465   : > { %v3312_v34 = vpop.f32.mrf.mxu0 }
 0x467   : > { %3683 = vmatmul.mubr.bf16.gmra.mxu1 %v12475_v52  ;;  %v13699_v42 = vpop.f32.mrf.mxu0  ;;  %3506 = vmatmul.mubr.bf16.gmra.mxu0 %v12476_v44  ;;  %v12483_v52 = vld [vmem:[%s12767_s23 + $0x228] ss:$16 sps:$4 sm:$0xff]  }
 0x468   : > { %9921 = vmatprep.mubr.msk.bf16.mxu1 %vm16626_vm1, %v12477_v61  ;;  %3513 = vmatprep.mubr.bf16.mxu0 %v12478_v30  ;;  %v12484_v61 = vld [vmem:[%s12767_s23 + $0x360] ss:$16 sps:$4 sm:$0xff]   ;;  %v12485_v30 = vld [vmem:[%s12767_s23 + $0x24c] ss:$16 sps:$4 sm:$0xff]  }
 0x469   : > { %v3317_v13 = vpop.f32.mrf.mxu0 }
 0x46b   : > { %v13705_v29 = vpop.f32.mrf.mxu0 }
 0x46d   : > { %v3320_v12 = vpop.f32.mrf.mxu0 }
 0x46f   : > { %3691 = vmatmul.mubr.bf16.gmra.mxu1 %v12479_v8  ;;  %v13708_v60 = vpop.f32.mrf.mxu0  ;;  %3514 = vmatmul.mubr.bf16.gmra.mxu0 %v12480_v57  ;;  %v12486_v57 = vld [vmem:[%s12767_s23 + $0x248] ss:$16 sps:$4 sm:$0xff]  }
 0x470   : > { %9922 = vmatprep.mubr.msk.bf16.mxu1 %vm16626_vm1, %v12481_v15  ;;  %3521 = vmatprep.mubr.bf16.mxu0 %v12482_v62  ;;  %v12487_v62 = vld [vmem:[%s12767_s23 + $0x26c] ss:$16 sps:$4 sm:$0xff]  }
 0x471   : > { %v3325_v54 = vpop.f32.mrf.mxu0 }
 0x473   : > { %v13714_v0 = vpop.f32.mrf.mxu0 }
 0x475   : > { %v3328_v34 = vpop.f32.mrf.mxu0 }
 0x477   : > { %3699 = vmatmul.mubr.bf16.gmra.mxu1 %v12483_v52  ;;  %v13717_v44 = vpop.f32.mrf.mxu0  ;;  %3522 = vmatmul.mubr.bf16.gmra.mxu0 %v12484_v61  ;;  %v12488_v61 = vld [vmem:[%s12767_s23 + $0x268] ss:$16 sps:$4 sm:$0xff]  }
 0x478   : > { %9923 = vmatprep.mubr.msk.bf16.mxu1 %vm16626_vm1, %v12485_v30 }
 0x479   : > { %v3333_v13 = vpop.f32.mrf.mxu0 }
 0x47a   : > { %v12489_v13 = vld [vmem:[%s12767_s23 + $0x28c] ss:$16 sps:$4 sm:$0xff]  }
 0x47b   : > { %v13722_v12 = vpop.f32.mrf.mxu0 }
 0x47d   : > { %v3336_v8 = vpop.f32.mrf.mxu0 }
 0x47f   : > { %3707 = vmatmul.mubr.bf16.gmra.mxu1 %v12486_v57  ;;  %v13725_v15 = vpop.f32.mrf.mxu0 }
 0x480   : > { %9924 = vmatprep.mubr.msk.bf16.mxu1 %vm16626_vm1, %v12487_v62 }
 0x481   : > { %v3341_v54 = vpop.f32.mrf.mxu0 }
 0x482   : > { %v12491_v54 = vld [vmem:[%s12767_s23 + $0x2ac] ss:$16 sps:$4 sm:$0xff]  }
 0x483   : > { %v13729_v34 = vpop.f32.mrf.mxu0 }
 0x485   : > { %v3344_v52 = vpop.f32.mrf.mxu0 }
 0x487   : > { %3715 = vmatmul.mubr.bf16.gmra.mxu1 %v12488_v61  ;;  %v13732_v30 = vpop.f32.mrf.mxu0 }
 0x488   : > { %9925 = vmatprep.mubr.msk.bf16.mxu1 %vm16626_vm1, %v12489_v13 }
 0x489   : > { %v3349_v8 = vpop.f32.mrf.mxu0 }
 0x48a   : > { %v12493_v8 = vld [vmem:[%s12767_s23 + $0x2cc] ss:$16 sps:$4 sm:$0xff]  }
 0x48b   : > { %v13736_v57 = vpop.f32.mrf.mxu0 }
 0x48d   : > { %v3352_v5 = vpop.f32.mrf.mxu0 }
 0x48f   : > { %3723 = vmatmul.mubr.bf16.gmra.mxu1 %v12490_v39  ;;  %v13739_v62 = vpop.f32.mrf.mxu0 }
 0x490   : > { %9926 = vmatprep.mubr.msk.bf16.mxu1 %vm16626_vm1, %v12491_v54 }
 0x491   : > { %v3357_v52 = vpop.f32.mrf.mxu0 }
 0x492   : > { %v12495_v52 = vld [vmem:[%s12767_s23 + $0x2ec] ss:$16 sps:$4 sm:$0xff]  }
 0x493   : > { %v13743_v61 = vpop.f32.mrf.mxu0 }
 0x495   : > { %v3360_v2 = vpop.f32.mrf.mxu0 }
 0x497   : > { %3731 = vmatmul.mubr.bf16.gmra.mxu1 %v12492_v18  ;;  %v13746_v13 = vpop.f32.mrf.mxu0 }
 0x498   : > { %9927 = vmatprep.mubr.msk.bf16.mxu1 %vm16626_vm1, %v12493_v8 }
 0x499   : > { %v3365_v39 = vpop.f32.mrf.mxu0 }
 0x49a   : > { %v12497_v39 = vld [vmem:[%s12767_s23 + $0x30c] ss:$16 sps:$4 sm:$0xff]  }
 0x49b   : > { %v13750_v5 = vpop.f32.mrf.mxu0 }
 0x49d   : > { %v3368_v22 = vpop.f32.mrf.mxu0 }
 0x49f   : > { %3739 = vmatmul.mubr.bf16.gmra.mxu1 %v12494_v50  ;;  %v13753_v54 = vpop.f32.mrf.mxu0 }
 0x4a0   : > { %9928 = vmatprep.mubr.msk.bf16.mxu1 %vm16626_vm1, %v12495_v52 }
 0x4a1   : > { %v3373_v2 = vpop.f32.mrf.mxu0 }
 0x4a3   : > { %v13757_v18 = vpop.f32.mrf.mxu0 }
 0x4a5   : > { %v3376_v10 = vpop.f32.mrf.mxu0 }
 0x4a6   : > { %v12499_v10 = vld [vmem:[%s12767_s23 + $0x32c] ss:$16 sps:$4 sm:$0xff]  }
 0x4a7   : > { %3747 = vmatmul.mubr.bf16.gmra.mxu1 %v12496_v3  ;;  %v13760_v8 = vpop.f32.mrf.mxu0 }
 0x4a8   : > { %9929 = vmatprep.mubr.msk.bf16.mxu1 %vm16626_vm1, %v12497_v39 }
 0x4a9   : > { %v3381_v22 = vpop.f32.mrf.mxu0 }
 0x4ab   : > { %v13764_v50 = vpop.f32.mrf.mxu0 }
 0x4ad   : > { %v3384_v19 = vpop.f32.mrf.mxu0 }
 0x4af   : > { %v3564_v37 = vpop.f32.mrf.mxu1  ;;  %3755 = vmatmul.mubr.bf16.gmra.mxu1 %v12498_v25  ;;  %v13767_v52 = vpop.f32.mrf.mxu0 }
 0x4b0   : > { %v3565_v2 = vadd.f32 %v3564_v37, %v13690_v49  ;;  %9930 = vmatprep.mubr.msk.bf16.mxu1 %vm16626_vm1, %v12499_v10 }
 0x4b1   : > { %v3566_v3 = vpop.f32.mrf.mxu1  ;;  %v3389_v58 = vpop.f32.mrf.mxu0 }
 0x4b2   : > { %11419 = vmatprep.mubr.msk.f32.mxu0 %vm16628_vm0, %v3565_v2  ;;  %v12501_v58 = vld [vmem:[%s12767_s23 + $0x34c] ss:$16 sps:$4 sm:$0xff]  }
 0x4b3   : > { %v3567_v39 = vpop.f32.mrf.mxu1  ;;  %v13773_v22 = vpop.f32.mrf.mxu0 }
 0x4b4   : > { %v3568_v19 = vadd.f32 %v3567_v39, %v13696_v53 }
 0x4b5   : > { %v3569_v47 = vpop.f32.mrf.mxu1  ;;  %v3392_v7 = vpop.f32.mrf.mxu0 }
 0x4b6   : > { %11420 = vmatmul.mubr.msk.f32.vlgmr.msra.gmra.mxu0 %vm16628_vm0, %v3568_v19  ;;  %v12502_v19 = vld [vmem:[%s12767_s23 + $0x348] ss:$16 sps:$4 sm:$0xff]  }
 0x4b7   : > { %v3572_v25 = vpop.f32.mrf.mxu1  ;;  %3763 = vmatmul.mubr.bf16.gmra.mxu1 %v12500_v20  ;;  %v13778_v37 = vpop.f32.mrf.mxu0 }
 0x4b8   : > { %v3573_v49 = vadd.f32 %v3572_v25, %v13699_v42  ;;  %9931 = vmatprep.mubr.msk.bf16.mxu1 %vm16626_vm1, %v12501_v58  ;;  %v12503_v58 = vld [vmem:[%s12767_s23 + $0x36c] ss:$16 sps:$4 sm:$0xff]  }
 0x4b9   : > { %v3574_v2 = vpop.f32.mrf.mxu1  ;;  %v3397_v10 = vpop.f32.mrf.mxu0 }
 0x4ba   : > { %11422 = vmatprep.mubr.msk.f32.mxu0 %vm16628_vm0, %v3573_v49 }
 0x4bb   : > { %v3575_v47 = vpop.f32.mrf.mxu1  ;;  %v13784_v7 = vpop.f32.mrf.mxu0 }
 0x4bc   : > { %v3576_v53 = vadd.f32 %v3575_v47, %v13705_v29 }
 0x4bd   : > { %v3577_v3 = vpop.f32.mrf.mxu1  ;;  %v3400_v39 = vpop.f32.mrf.mxu0 }
 0x4be   : > { %11423 = vmatmul.mubr.msk.f32.gmra.mxu0 %vm16628_vm0, %v3576_v53 }
 0x4bf   : > { %v3580_v20 = vpop.f32.mrf.mxu1  ;;  %3771 = vmatmul.mubr.bf16.gmra.mxu1 %v12502_v19  ;;  %v13789_v42 = vpop.f32.mrf.mxu0  ;;  %v12504_v19 = vld [vmem:[%s12767_s23 + $0x368] ss:$16 sps:$4 sm:$0xff]  }
 0x4c0   : > { %v3581_v25 = vadd.f32 %v3580_v20, %v13708_v60  ;;  %9932 = vmatprep.mubr.msk.bf16.mxu1 %vm16626_vm1, %v12503_v58 }
 0x4c1   : > { %v3582_v49 = vpop.f32.mrf.mxu1  ;;  %v3405_v2 = vpop.f32.mrf.mxu0 }
 0x4c2   : > { %11425 = vmatprep.mubr.msk.f32.mxu0 %vm16628_vm0, %v3581_v25 }
 0x4c3   : > { %v3583_v29 = vpop.f32.mrf.mxu1  ;;  %v13795_v10 = vpop.f32.mrf.mxu0 }
 0x4c4   : > { %v3584_v47 = vadd.f32 %v3583_v29, %v13714_v0 }
 0x4c5   : > { %v3585_v53 = vpop.f32.mrf.mxu1  ;;  %v3408_v3 = vpop.f32.mrf.mxu0 }
 0x4c6   : > { %11426 = vmatmul.mubr.msk.f32.gmra.mxu0 %vm16628_vm0, %v3584_v47 }
 0x4c7   : > { %v3588_v39 = vpop.f32.mrf.mxu1  ;;  %3779 = vmatmul.mubr.bf16.gmra.mxu1 %v12504_v19  ;;  %v13800_v60 = vpop.f32.mrf.mxu0 }
 0x4c8   : > { %v3589_v20 = vadd.f32 %v3588_v39, %v13717_v44 }
 0x4c9   : > { %v3590_v58 = vpop.f32.mrf.mxu1  ;;  %v3413_v49 = vpop.f32.mrf.mxu0 }
 0x4ca   : > { %11428 = vmatprep.mubr.msk.f32.mxu0 %vm16628_vm0, %v3589_v20 }
 0x4cb   : > { %v3591_v25 = vpop.f32.mrf.mxu1  ;;  %v13804_v2 = vpop.f32.mrf.mxu0 }
 0x4cc   : > { %v3592_v0 = vadd.f32 %v3591_v25, %v13722_v12 }
 0x4cd   : > { %v3593_v29 = vpop.f32.mrf.mxu1  ;;  %v3416_v53 = vpop.f32.mrf.mxu0 }
 0x4ce   : > { %11429 = vmatmul.mubr.msk.f32.gmra.mxu0 %vm16628_vm0, %v3592_v0 }
 0x4cf   : > { %v3596_v47 = vpop.f32.mrf.mxu1  ;;  %v13808_v3 = vpop.f32.mrf.mxu0 }
 0x4d0   : > { %v3597_v19 = vadd.f32 %v3596_v47, %v13725_v15 }
 0x4d1   : > { %v3598_v17 = vpop.f32.mrf.mxu1  ;;  %v3421_v44 = vpop.f32.mrf.mxu0 }
 0x4d2   : > { %11431 = vmatprep.mubr.msk.f32.mxu0 %vm16628_vm0, %v3597_v19 }
 0x4d3   : > { %v3599_v39 = vpop.f32.mrf.mxu1  ;;  %v13812_v20 = vpop.f32.mrf.mxu0 }
 0x4d4   : > { %v3600_v58 = vadd.f32 %v3599_v39, %v13729_v34 }
 0x4d5   : > { %v3601_v49 = vpop.f32.mrf.mxu1  ;;  %v3424_v12 = vpop.f32.mrf.mxu0 }
 0x4d6   : > { %11432 = vmatmul.mubr.msk.f32.gmra.mxu0 %vm16628_vm0, %v3600_v58 }
 0x4d7   : > { %v3604_v25 = vpop.f32.mrf.mxu1  ;;  %v13816_v0 = vpop.f32.mrf.mxu0 }
 0x4d8   : > { %v3605_v29 = vadd.f32 %v3604_v25, %v13732_v30 }
 0x4d9   : > { %v3606_v53 = vpop.f32.mrf.mxu1  ;;  %v3429_v15 = vpop.f32.mrf.mxu0 }
 0x4da   : > { %11434 = vmatprep.mubr.msk.f32.mxu0 %vm16628_vm0, %v3605_v29 }
 0x4db   : > { %v3607_v17 = vpop.f32.mrf.mxu1  ;;  %v13820_v47 = vpop.f32.mrf.mxu0 }
 0x4dc   : > { %v3608_v19 = vadd.f32 %v3607_v17, %v13736_v57 }
 0x4dd   : > { %v3609_v44 = vpop.f32.mrf.mxu1  ;;  %v3432_v34 = vpop.f32.mrf.mxu0 }
 0x4de   : > { %11435 = vmatmul.mubr.msk.f32.gmra.mxu0 %vm16628_vm0, %v3608_v19 }
 0x4df   : > { %v3612_v39 = vpop.f32.mrf.mxu1  ;;  %v13824_v58 = vpop.f32.mrf.mxu0 }
 0x4e0   : > { %v3613_v49 = vadd.f32 %v3612_v39, %v13739_v62 }
 0x4e1   : > { %v3614_v12 = vpop.f32.mrf.mxu1  ;;  %v3437_v30 = vpop.f32.mrf.mxu0 }
 0x4e2   : > { %11437 = vmatprep.mubr.msk.f32.mxu0 %vm16628_vm0, %v3613_v49 }
 0x4e3   : > { %v3615_v25 = vpop.f32.mrf.mxu1  ;;  %v13828_v29 = vpop.f32.mrf.mxu0 }
 0x4e4   : > { %v3616_v53 = vadd.f32 %v3615_v25, %v13743_v61 }
 0x4e5   : > { %v3617_v15 = vpop.f32.mrf.mxu1  ;;  %v3440_v57 = vpop.f32.mrf.mxu0 }
 0x4e6   : > { %11438 = vmatmul.mubr.msk.f32.gmra.mxu0 %vm16628_vm0, %v3616_v53 }
 0x4e7   : > { %v3620_v17 = vpop.f32.mrf.mxu1  ;;  %v13832_v19 = vpop.f32.mrf.mxu0 }
 0x4e8   : > { %v3621_v44 = vadd.f32 %v3620_v17, %v13746_v13 }
 0x4e9   : > { %v3622_v34 = vpop.f32.mrf.mxu1  ;;  %v3445_v62 = vpop.f32.mrf.mxu0 }
 0x4ea   : > { %11440 = vmatprep.mubr.msk.f32.mxu0 %vm16628_vm0, %v3621_v44 }
 0x4eb   : > { %v3623_v39 = vpop.f32.mrf.mxu1  ;;  %v13836_v49 = vpop.f32.mrf.mxu0 }
 0x4ec   : > { %v3624_v12 = vadd.f32 %v3623_v39, %v13750_v5 }
 0x4ed   : > { %v3625_v30 = vpop.f32.mrf.mxu1  ;;  %v3448_v61 = vpop.f32.mrf.mxu0 }
 0x4ee   : > { %11441 = vmatmul.mubr.msk.f32.gmra.mxu0 %vm16628_vm0, %v3624_v12 }
 0x4ef   : > { %v3628_v25 = vpop.f32.mrf.mxu1  ;;  %v13840_v53 = vpop.f32.mrf.mxu0 }
 0x4f0   : > { %v3629_v15 = vadd.f32 %v3628_v25, %v13753_v54 }
 0x4f1   : > { %v3630_v57 = vpop.f32.mrf.mxu1  ;;  %v3453_v13 = vpop.f32.mrf.mxu0 }
 0x4f2   : > { %11443 = vmatprep.mubr.msk.f32.mxu0 %vm16628_vm0, %v3629_v15 }
 0x4f3   : > { %v3631_v17 = vpop.f32.mrf.mxu1  ;;  %v13844_v44 = vpop.f32.mrf.mxu0 }
 0x4f4   : > { %v3632_v34 = vadd.f32 %v3631_v17, %v13757_v18 }
 0x4f5   : > { %v3633_v62 = vpop.f32.mrf.mxu1  ;;  %v3456_v5 = vpop.f32.mrf.mxu0 }
 0x4f6   : > { %11444 = vmatmul.mubr.msk.f32.gmra.mxu0 %vm16628_vm0, %v3632_v34 }
 0x4f7   : > { %v3636_v39 = vpop.f32.mrf.mxu1  ;;  %v13848_v12 = vpop.f32.mrf.mxu0 }
 0x4f8   : > { %v3637_v30 = vadd.f32 %v3636_v39, %v13760_v8 }
 0x4f9   : > { %v3638_v61 = vpop.f32.mrf.mxu1  ;;  %v3461_v54 = vpop.f32.mrf.mxu0 }
 0x4fa   : > { %11446 = vmatprep.mubr.msk.f32.mxu0 %vm16628_vm0, %v3637_v30 }
 0x4fb   : > { %v3639_v25 = vpop.f32.mrf.mxu1  ;;  %v13852_v15 = vpop.f32.mrf.mxu0 }
 0x4fc   : > { %v3640_v57 = vadd.f32 %v3639_v25, %v13764_v50 }
 0x4fd   : > { %v3641_v13 = vpop.f32.mrf.mxu1  ;;  %v3464_v18 = vpop.f32.mrf.mxu0 }
 0x4fe   : > { %11447 = vmatmul.mubr.msk.f32.gmra.mxu0 %vm16628_vm0, %v3640_v57 }
 0x4ff   : > { %v3644_v17 = vpop.f32.mrf.mxu1  ;;  %v13856_v34 = vpop.f32.mrf.mxu0 }
 0x500   : > { %v3645_v62 = vadd.f32 %v3644_v17, %v13767_v52 }
 0x501   : > { %v3646_v5 = vpop.f32.mrf.mxu1  ;;  %v3469_v8 = vpop.f32.mrf.mxu0 }
 0x502   : > { %11449 = vmatprep.mubr.msk.f32.mxu0 %vm16628_vm0, %v3645_v62 }
 0x503   : > { %v3647_v39 = vpop.f32.mrf.mxu1  ;;  %v13860_v30 = vpop.f32.mrf.mxu0 }
 0x504   : > { %v3648_v61 = vadd.f32 %v3647_v39, %v13773_v22 }
 0x505   : > { %v3649_v54 = vpop.f32.mrf.mxu1  ;;  %v3472_v50 = vpop.f32.mrf.mxu0 }
 0x506   : > { %11450 = vmatmul.mubr.msk.f32.gmra.mxu0 %vm16628_vm0, %v3648_v61 }
 0x507   : > { %v3652_v25 = vpop.f32.mrf.mxu1  ;;  %v13864_v57 = vpop.f32.mrf.mxu0 }
 0x508   : > { %v3653_v13 = vadd.f32 %v3652_v25, %v13778_v37 }
 0x509   : > { %v3654_v18 = vpop.f32.mrf.mxu1  ;;  %v3477_v52 = vpop.f32.mrf.mxu0 }
 0x50a   : > { %11452 = vmatprep.mubr.msk.f32.mxu0 %vm16628_vm0, %v3653_v13 }
 0x50b   : > { %v3655_v17 = vpop.f32.mrf.mxu1  ;;  %v13868_v62 = vpop.f32.mrf.mxu0 }
 0x50c   : > { %v3656_v5 = vadd.f32 %v3655_v17, %v13784_v7 }
 0x50d   : > { %v3657_v8 = vpop.f32.mrf.mxu1  ;;  %v3480_v22 = vpop.f32.mrf.mxu0 }
 0x50e   : > { %11453 = vmatmul.mubr.msk.f32.gmra.mxu0 %vm16628_vm0, %v3656_v5 }
 0x50f   : > { %v3660_v39 = vpop.f32.mrf.mxu1  ;;  %v13872_v61 = vpop.f32.mrf.mxu0 }
 0x510   : > { %v3661_v54 = vadd.f32 %v3660_v39, %v13789_v42 }
 0x511   : > { %v3662_v50 = vpop.f32.mrf.mxu1  ;;  %v3485_v37 = vpop.f32.mrf.mxu0 }
 0x512   : > { %11455 = vmatprep.mubr.msk.f32.mxu0 %vm16628_vm0, %v3661_v54 }
 0x513   : > { %v3663_v25 = vpop.f32.mrf.mxu1  ;;  %v13876_v13 = vpop.f32.mrf.mxu0 }
 0x514   : > { %v3664_v18 = vadd.f32 %v3663_v25, %v13795_v10 }
 0x515   : > { %v3665_v52 = vpop.f32.mrf.mxu1  ;;  %v3488_v7 = vpop.f32.mrf.mxu0 }
 0x516   : > { %11456 = vmatmul.mubr.msk.f32.gmra.mxu0 %vm16628_vm0, %v3664_v18 }
 0x517   : > { %v3668_v17 = vpop.f32.mrf.mxu1  ;;  %v13880_v5 = vpop.f32.mrf.mxu0 }
 0x518   : > { %v3669_v8 = vadd.f32 %v3668_v17, %v13800_v60 }
 0x519   : > { %v3670_v22 = vpop.f32.mrf.mxu1  ;;  %v3493_v42 = vpop.f32.mrf.mxu0 }
 0x51a   : > { %11458 = vmatprep.mubr.msk.f32.mxu0 %vm16628_vm0, %v3669_v8 }
 0x51b   : > { %v3671_v39 = vpop.f32.mrf.mxu1  ;;  %v13884_v54 = vpop.f32.mrf.mxu0 }
 0x51c   : > { %v3672_v50 = vadd.f32 %v3671_v39, %v13804_v2 }
 0x51d   : > { %v3673_v37 = vpop.f32.mrf.mxu1  ;;  %v3496_v10 = vpop.f32.mrf.mxu0 }
 0x51e   : > { %11459 = vmatmul.mubr.msk.f32.gmra.mxu0 %vm16628_vm0, %v3672_v50 }
 0x51f   : > { %v3676_v25 = vpop.f32.mrf.mxu1  ;;  %v13888_v18 = vpop.f32.mrf.mxu0 }
 0x520   : > { %v3677_v52 = vadd.f32 %v3676_v25, %v13808_v3 }
 0x521   : > { %v3678_v7 = vpop.f32.mrf.mxu1  ;;  %v3501_v60 = vpop.f32.mrf.mxu0 }
 0x522   : > { %11461 = vmatprep.mubr.msk.f32.mxu0 %vm16628_vm0, %v3677_v52 }
 0x523   : > { %v3679_v17 = vpop.f32.mrf.mxu1  ;;  %v13892_v8 = vpop.f32.mrf.mxu0 }
 0x524   : > { %v3680_v22 = vadd.f32 %v3679_v17, %v13812_v20 }
 0x525   : > { %v3681_v42 = vpop.f32.mrf.mxu1  ;;  %v3504_v2 = vpop.f32.mrf.mxu0 }
 0x526   : > { %11462 = vmatmul.mubr.msk.f32.gmra.mxu0 %vm16628_vm0, %v3680_v22 }
 0x527   : > { %v3684_v39 = vpop.f32.mrf.mxu1  ;;  %v13896_v50 = vpop.f32.mrf.mxu0 }
 0x528   : > { %v3685_v37 = vadd.f32 %v3684_v39, %v13816_v0 }
 0x529   : > { %v3686_v10 = vpop.f32.mrf.mxu1  ;;  %v3509_v3 = vpop.f32.mrf.mxu0 }
 0x52a   : > { %11464 = vmatprep.mubr.msk.f32.mxu0 %vm16628_vm0, %v3685_v37 }
 0x52b   : > { %v3687_v25 = vpop.f32.mrf.mxu1  ;;  %v13900_v52 = vpop.f32.mrf.mxu0 }
 0x52c   : > { %v3688_v7 = vadd.f32 %v3687_v25, %v13820_v47 }
 0x52d   : > { %v3689_v60 = vpop.f32.mrf.mxu1  ;;  %v3512_v20 = vpop.f32.mrf.mxu0 }
 0x52e   : > { %11465 = vmatmul.mubr.msk.f32.gmra.mxu0 %vm16628_vm0, %v3688_v7 }
 0x52f   : > { %v3692_v17 = vpop.f32.mrf.mxu1  ;;  %v13904_v22 = vpop.f32.mrf.mxu0 }
 0x530   : > { %v3693_v42 = vadd.f32 %v3692_v17, %v13824_v58 }
 0x531   : > { %v3694_v2 = vpop.f32.mrf.mxu1  ;;  %v3517_v0 = vpop.f32.mrf.mxu0 }
 0x532   : > { %11467 = vmatprep.mubr.msk.f32.mxu0 %vm16628_vm0, %v3693_v42 }
 0x533   : > { %v3695_v39 = vpop.f32.mrf.mxu1  ;;  %v13908_v37 = vpop.f32.mrf.mxu0 }
 0x534   : > { %v3696_v10 = vadd.f32 %v3695_v39, %v13828_v29 }
 0x535   : > { %v3697_v3 = vpop.f32.mrf.mxu1  ;;  %v3520_v47 = vpop.f32.mrf.mxu0 }
 0x536   : > { %11468 = vmatmul.mubr.msk.f32.gmra.mxu0 %vm16628_vm0, %v3696_v10 }
 0x537   : > { %v3700_v25 = vpop.f32.mrf.mxu1  ;;  %v13912_v7 = vpop.f32.mrf.mxu0 }
 0x538   : > { %v3701_v60 = vadd.f32 %v3700_v25, %v13832_v19 }
 0x539   : > { %v3702_v20 = vpop.f32.mrf.mxu1  ;;  %v3525_v58 = vpop.f32.mrf.mxu0 }
 0x53a   : > { %11470 = vmatprep.mubr.msk.f32.mxu0 %vm16628_vm0, %v3701_v60 }
 0x53b   : > { %v3703_v17 = vpop.f32.mrf.mxu1  ;;  %v13916_v42 = vpop.f32.mrf.mxu0 }
 0x53c   : > { %v3704_v2 = vadd.f32 %v3703_v17, %v13836_v49 }
 0x53d   : > { %v3705_v0 = vpop.f32.mrf.mxu1  ;;  %v3528_v29 = vpop.f32.mrf.mxu0 }
 0x53e   : > { %11471 = vmatmul.mubr.msk.f32.gmra.mxu0 %vm16628_vm0, %v3704_v2 }
 0x53f   : > { %v3708_v39 = vpop.f32.mrf.mxu1 }
 0x540   : > { %v3709_v10 = vadd.f32 %v3708_v39, %v13840_v53 }
 0x541   : > { %v3710_v3 = vpop.f32.mrf.mxu1 }
 0x542   : > { %11473 = vmatprep.mubr.msk.f32.mxu0 %vm16628_vm0, %v3709_v10 }
 0x543   : > { %v3711_v19 = vpop.f32.mrf.mxu1 }
 0x544   : > { %v3712_v47 = vadd.f32 %v3711_v19, %v13844_v44 }
 0x545   : > { %v3713_v25 = vpop.f32.mrf.mxu1 }
 0x546   : > { %11474 = vmatmul.mubr.msk.f32.gmra.mxu0 %vm16628_vm0, %v3712_v47 }
 0x547   : > { %v3716_v60 = vpop.f32.mrf.mxu1 }
 0x548   : > { %v3717_v20 = vadd.f32 %v3716_v60, %v13848_v12 }
 0x549   : > { %v3718_v49 = vpop.f32.mrf.mxu1 }
 0x54a   : > { %11476 = vmatprep.mubr.msk.f32.mxu0 %vm16628_vm0, %v3717_v20 }
 0x54b   : > { %v3719_v58 = vpop.f32.mrf.mxu1 }
 0x54c   : > { %v3720_v17 = vadd.f32 %v3719_v58, %v13852_v15 }
 0x54d   : > { %v3721_v2 = vpop.f32.mrf.mxu1 }
 0x54e   : > { %11477 = vmatmul.mubr.msk.f32.gmra.mxu0 %vm16628_vm0, %v3720_v17 }
 0x54f   : > { %v3724_v53 = vpop.f32.mrf.mxu1 }
 0x550   : > { %v3725_v0 = vadd.f32 %v3724_v53, %v13856_v34 }
 0x551   : > { %v3726_v29 = vpop.f32.mrf.mxu1 }
 0x552   : > { %11479 = vmatprep.mubr.msk.f32.mxu0 %vm16628_vm0, %v3725_v0 }
 0x553   : > { %v3727_v44 = vpop.f32.mrf.mxu1 }
 0x554   : > { %v3728_v39 = vadd.f32 %v3727_v44, %v13860_v30 }
 0x555   : > { %v3729_v10 = vpop.f32.mrf.mxu1 }
 0x556   : > { %11480 = vmatmul.mubr.msk.f32.gmra.mxu0 %vm16628_vm0, %v3728_v39 }
 0x557   : > { %v3732_v12 = vpop.f32.mrf.mxu1 }
 0x558   : > { %v3733_v3 = vadd.f32 %v3732_v12, %v13864_v57 }
 0x559   : > { %v3734_v19 = vpop.f32.mrf.mxu1 }
 0x55a   : > { %11482 = vmatprep.mubr.msk.f32.mxu0 %vm16628_vm0, %v3733_v3 }
 0x55b   : > { %v3735_v15 = vpop.f32.mrf.mxu1 }
 0x55c   : > { %v3736_v47 = vadd.f32 %v3735_v15, %v13868_v62 }
 0x55d   : > { %v3737_v25 = vpop.f32.mrf.mxu1 }
 0x55e   : > { %11483 = vmatmul.mubr.msk.f32.gmra.mxu0 %vm16628_vm0, %v3736_v47 }
 0x55f   : > { %v3740_v34 = vpop.f32.mrf.mxu1 }
 0x560   : > { %v3741_v60 = vadd.f32 %v3740_v34, %v13872_v61 }
 0x561   : > { %v3742_v20 = vpop.f32.mrf.mxu1 }
 0x562   : > { %11485 = vmatprep.mubr.msk.f32.mxu0 %vm16628_vm0, %v3741_v60 }
 0x563   : > { %v3743_v30 = vpop.f32.mrf.mxu1 }
 0x564   : > { %v3744_v49 = vadd.f32 %v3743_v30, %v13876_v13 }
 0x565   : > { %v3745_v58 = vpop.f32.mrf.mxu1 }
 0x566   : > { %11486 = vmatmul.mubr.msk.f32.gmra.mxu0 %vm16628_vm0, %v3744_v49 }
 0x567   : > { %v3748_v57 = vpop.f32.mrf.mxu1 }
 0x568   : > { %v3749_v17 = vadd.f32 %v3748_v57, %v13880_v5 }
 0x569   : > { %v3750_v2 = vpop.f32.mrf.mxu1 }
 0x56a   : > { %11488 = vmatprep.mubr.msk.f32.mxu0 %vm16628_vm0, %v3749_v17 }
 0x56b   : > { %v3751_v62 = vpop.f32.mrf.mxu1 }
 0x56c   : > { %v3752_v53 = vadd.f32 %v3751_v62, %v13884_v54 }
 0x56d   : > { %v3753_v0 = vpop.f32.mrf.mxu1 }
 0x56e   : > { %11489 = vmatmul.mubr.msk.f32.gmra.mxu0 %vm16628_vm0, %v3752_v53 }
 0x56f   : > { %v3756_v61 = vpop.f32.mrf.mxu1 }
 0x570   : > { %v3757_v29 = vadd.f32 %v3756_v61, %v13888_v18 }
 0x571   : > { %v3758_v44 = vpop.f32.mrf.mxu1 }
 0x572   : > { %11491 = vmatprep.mubr.msk.f32.mxu0 %vm16628_vm0, %v3757_v29 }
 0x573   : > { %v3759_v13 = vpop.f32.mrf.mxu1 }
 0x574   : > { %v3760_v39 = vadd.f32 %v3759_v13, %v13892_v8 }
 0x575   : > { %v3761_v10 = vpop.f32.mrf.mxu1 }
 0x576   : > { %v11421_v5 = vpop.f32.mrf.mxu0  ;;  %11492 = vmatmul.mubr.msk.f32.gmra.mxu0 %vm16628_vm0, %v3760_v39 }
 0x577   : > { %v4301_v12 = vadd.f32 %v11421_v5, %v12934_v51  ;;  %v3764_v3 = vpop.f32.mrf.mxu1 }
 0x578   : > { %v3765_v54 = vadd.f32 %v3764_v3, %v13896_v50  ;;  %v4021_v19 = vpop.f32.mrf.mxu0 }
 0x579   : > { %v4300_v15 = vadd.f32 %v4021_v19, %v12929_v48  ;;  %v3766_v47 = vpop.f32.mrf.mxu1  ;;  %v4357_v18 = vmax.f32 %v4301_v12, 0.0 }
 0x57a   : > { %11494 = vmatprep.mubr.msk.f32.mxu0 %vm16628_vm0, %v3765_v54 }
 0x57b   : > { %v4356_v25 = vmax.f32 %v4300_v15, 0.0  ;;  %v3767_v34 = vpop.f32.mrf.mxu1 }
 0x57c   : > { %v3768_v8 = vadd.f32 %v3767_v34, %v13900_v52 }
 0x57d   : > { %v13953_v60 = vpack.c.bf16 %v4357_v18, %v4356_v25  ;;  %v3769_v20 = vpop.f32.mrf.mxu1 }
 0x57e   : > { %11495 = vmatmul.mubr.msk.f32.gmra.mxu0 %vm16628_vm0, %v3768_v8  ;;  %v13956_v30 = vpop.f32.mrf.mxu0 }
 0x57f   : > { %16776 = vst [vmem:[#allocation38_spill] sm:$0xff] %v13953_v60  ;;  %v3772_v51 = vpop.f32.mrf.mxu1  ;;  %16777 = vst [vmem:[#allocation39_spill] sm:$0xff] %v13956_v30  ;;  %v16781_v60 = vld [vmem:[#allocation12_spill] sm:$0xff] }
 0x580   : > { %v3773_v50 = vadd.f32 %v3772_v51, %v13904_v22  ;;  %v13960_v58 = vpop.f32.mrf.mxu0 }
 0x581   : > { %v3774_v49 = vpop.f32.mrf.mxu1 }
 0x582   : > { %11497 = vmatprep.mubr.msk.f32.mxu0 %vm16628_vm0, %v3773_v50  ;;  %v12134_v50 = vld [vmem:[%s12736_s27 + $0x4] ss:$16 sps:$4 sm:$0xff]  }
 0x583   : > { %v3775_v48 = vpop.f32.mrf.mxu1  ;;  %4888 = vmatprep.mubr.bf16.mxu1 %v12134_v50 }
 0x584   : > { %v3776_v57 = vadd.f32 %v3775_v48, %v13908_v37 }
 0x585   : > { %v3777_v17 = vpop.f32.mrf.mxu1 }
 0x586   : > { %v11427_v52 = vpop.f32.mrf.mxu0  ;;  %11498 = vmatmul.mubr.msk.f32.gmra.mxu0 %vm16628_vm0, %v3776_v57 }
 0x587   : > { %v4305_v2 = vadd.f32 %v11427_v52, %v12919_v41  ;;  %v3780_v62 = vpop.f32.mrf.mxu1  ;;  %v12137_v52 = vld [vmem:[%s12736_s27 + $0xc] ss:$16 sps:$4 sm:$0xff]  }
 0x588   : > { %v3781_v53 = vadd.f32 %v3780_v62, %v13912_v7  ;;  %v4041_v0 = vpop.f32.mrf.mxu0 }
 0x589   : > { %v4304_v22 = vadd.f32 %v4041_v0, %v12915_v38  ;;  %v3782_v61 = vpop.f32.mrf.mxu1  ;;  %v4361_v29 = vmax.f32 %v4305_v2, 0.0 }
 0x58a   : > { %11500 = vmatprep.mubr.msk.f32.mxu0 %vm16628_vm0, %v3781_v53 }
 0x58b   : > { %v4360_v44 = vmax.f32 %v4304_v22, 0.0  ;;  %v3783_v13 = vpop.f32.mrf.mxu1 }
 0x58c   : > { %v3784_v37 = vadd.f32 %v3783_v13, %v13916_v42 }
 0x58d   : > { %v13969_v39 = vpack.c.bf16 %v4361_v29, %v4360_v44  ;;  %v3785_v10 = vpop.f32.mrf.mxu1  ;;  %v16780_v44 = vld [vmem:[#allocation11_spill] sm:$0xff] }
 0x58e   : > { %11501 = vmatmul.mubr.msk.f32.gmra.mxu0 %vm16628_vm0, %v3784_v37  ;;  %v13972_v41 = vpop.f32.mrf.mxu0 }
 0x58f   : > { %16778 = vst [vmem:[#allocation40_spill] sm:$0xff] %v13969_v39  ;;  %10053 = vmatprep.mubr.msk.bf16.mxu0 %vm16626_vm1, %v12137_v52 }
 0x590   : > { %v13974_v5 = vpop.f32.mrf.mxu0 }
 0x596   : > { %v13976_v7 = vpop.f32.mrf.mxu0 }
 0x598   : > { %v4061_v38 = vpop.f32.mrf.mxu0 }
 0x59e   : > { %v11436_v12 = vpop.f32.mrf.mxu0 }
 0x5a0   : > { %v4071_v3 = vpop.f32.mrf.mxu0 }
 0x5a6   : > { %v11439_v54 = vpop.f32.mrf.mxu0 }
 0x5a8   : > { %v4081_v19 = vpop.f32.mrf.mxu0 }
 0x5a9   : > { %v4312_v39 = vadd.f32 %v4081_v19, %v16781_v60 }
 0x5ae   : > { %v11442_v15 = vpop.f32.mrf.mxu0 }
 0x5af   : > { %v4315_v13 = vadd.f32 %v11442_v15, %v16780_v44 }
 0x5b0   : > { %v4091_v42 = vpop.f32.mrf.mxu0 }
 0x5b1   : > { %v4314_v0 = vadd.f32 %v4091_v42, %v12873_v16  ;;  %v4313_v42 = vadd.f32 %v11439_v54, %v12883_v21 }
 0x5b3   : > { %v4370_v52 = vmax.f32 %v4314_v0, 0.0 }
 0x5b6   : > { %v13978_v47 = vpop.f32.mrf.mxu0 }
 0x5b7   : > { %16779 = vst [vmem:[#allocation41_spill] sm:$0xff] %v13978_v47 }
 0x5b8   : > { %v13980_v18 = vpop.f32.mrf.mxu0 }
 0x5be   : > { %v13982_v25 = vpop.f32.mrf.mxu0 }
 0x5c0   : > { %v13984_v34 = vpop.f32.mrf.mxu0 }
 0x5c6   : > { %v13986_v8 = vpop.f32.mrf.mxu0 }
 0x5c8   : > { %v4121_v20 = vpop.f32.mrf.mxu0 }
 0x5ce   : > { %v11454_v51 = vpop.f32.mrf.mxu0 }
 0x5d0   : > { %v4131_v49 = vpop.f32.mrf.mxu0 }
 0x5d6   : > { %v11457_v48 = vpop.f32.mrf.mxu0 }
 0x5d7   : > { %v4325_v21 = vadd.f32 %v11457_v48, %v12974_v9  ;;  %v4306_v9 = vadd.f32 %v13974_v5, %v12908_v33  ;;  %v4318_v33 = vadd.f32 %v13984_v34, %v12996_v32  ;;  %v16782_v34 = vld [vmem:[#allocation39_spill] sm:$0xff] }
 0x5d8   : > { %v4141_v57 = vpop.f32.mrf.mxu0  ;;  %v4303_v44 = vadd.f32 %v16782_v34, %v12926_v46 }
 0x5de   : > { %v11460_v17 = vpop.f32.mrf.mxu0 }
 0x5e0   : > { %v4151_v2 = vpop.f32.mrf.mxu0 }
 0x5e1   : > { %v4326_v47 = vadd.f32 %v4151_v2, %v12957_v1  ;;  %v4311_v1 = vadd.f32 %v11436_v12, %v12894_v26  ;;  %v4369_v2 = vmax.f32 %v4313_v42, 0.0  ;;  %v4323_v26 = vadd.f32 %v11454_v51, %v12983_v14 }
 0x5e2   : > { %v4381_v12 = vmax.f32 %v4325_v21, 0.0 }
 0x5e3   : > { %v4382_v60 = vmax.f32 %v4326_v47, 0.0  ;;  %v4379_v14 = vmax.f32 %v4323_v26, 0.0 }
 0x5e6   : > { %v11463_v62 = vpop.f32.mrf.mxu0 }
 0x5e7   : > { %v4329_v10 = vadd.f32 %v11463_v62, %v12952_v63  ;;  %v4368_v63 = vmax.f32 %v4312_v39, 0.0 }
 0x5e8   : > { %v4161_v53 = vpop.f32.mrf.mxu0 }
 0x5e9   : > { %v4328_v61 = vadd.f32 %v4161_v53, %v12946_v59  ;;  %v4371_v59 = vmax.f32 %v4315_v13, 0.0  ;;  %v4385_v53 = vmax.f32 %v4329_v10, 0.0  ;;  %v16784_v10 = vld [vmem:[#allocation41_spill] sm:$0xff] }
 0x5eb   : > { %v4384_v45 = vmax.f32 %v4328_v61, 0.0  ;;  %v4483_v62 = vpack.c.bf16 %v4371_v59, %v4370_v52  ;;  %v4316_v61 = vadd.f32 %v13980_v18, %v13005_v27  ;;  %v4359_v18 = vmax.f32 %v4303_v44, 0.0  ;;  %v16785_v52 = vld [vmem:[#allocation40_spill] sm:$0xff] }
 0x5ed   : > { %v4490_v19 = vpack.c.bf16 %v4385_v53, %v4384_v45  ;;  %v4367_v45 = vmax.f32 %v4311_v1, 0.0  ;;  %v12132_v53 = vld [vmem:[%s12736_s27] ss:$16 sps:$4 sm:$0xff]   ;;  %v12146_v1 = vld [vmem:[%s12736_s27 + $0x44] ss:$16 sps:$4 sm:$0xff]  }
 0x5ee   : > { %v11466_v22 = vpop.f32.mrf.mxu0 }
 0x5ef   : > { %v4331_v29 = vadd.f32 %v11466_v22, %v12939_v55  ;;  %v4327_v55 = vadd.f32 %v11460_v17, %v12963_v4  ;;  %v4310_v22 = vadd.f32 %v4071_v3, %v12888_v23  ;;  %v4308_v4 = vadd.f32 %v4061_v38, %v12899_v28 }
 0x5f0   : > { %v4171_v37 = vpop.f32.mrf.mxu0  ;;  %v4482_v17 = vpack.c.bf16 %v4369_v2, %v4368_v63  ;;  %v4322_v23 = vadd.f32 %v4131_v49, %v12979_v11  ;;  %v4320_v38 = vadd.f32 %v4121_v20, %v12987_v24  ;;  %v4307_v49 = vadd.f32 %v13972_v41, %v12912_v36  ;;  %v12140_v63 = vld [vmem:[%s12736_s27 + $0x24] ss:$16 sps:$4 sm:$0xff]  }
 0x5f1   : > { %v4330_v50 = vadd.f32 %v4171_v37, %v12941_v56  ;;  %v4387_v30 = vmax.f32 %v4331_v29, 0.0  ;;  %v4324_v56 = vadd.f32 %v4141_v57, %v12968_v6  ;;  %v4383_v54 = vmax.f32 %v4327_v55, 0.0  ;;  %v16783_v37 = vld [vmem:[#allocation13_spill] sm:$0xff] }
 0x5f2   : > { %v4309_v6 = vadd.f32 %v13976_v7, %v12905_v31  ;;  %v4364_v47 = vmax.f32 %v4308_v4, 0.0  ;;  %v4378_v48 = vmax.f32 %v4322_v23, 0.0  ;;  %v4321_v31 = vadd.f32 %v13986_v8, %v12992_v35  ;;  %v12152_v4 = vld [vmem:[%s12736_s27 + $0x64] ss:$16 sps:$4 sm:$0xff]   ;;  %v12150_v23 = vld [vmem:[%s12736_s27 + $0x60] ss:$16 sps:$4 sm:$0xff]  }
 0x5f3   : > { %v4386_v16 = vmax.f32 %v4330_v50, 0.0  ;;  %v4380_v39 = vmax.f32 %v4324_v56, 0.0  ;;  %v4489_v3 = vpack.c.bf16 %v4383_v54, %v4382_v60  ;;  %v4362_v7 = vmax.f32 %v4306_v9, 0.0  ;;  %v12138_v60 = vld [vmem:[%s12736_s27 + $0x20] ss:$16 sps:$4 sm:$0xff]   ;;  %v16788_v9 = vld [vmem:[#allocation16_spill] sm:$0xff] }
 0x5f4   : > { %v4365_v57 = vmax.f32 %v4309_v6, 0.0  ;;  %v4376_v5 = vmax.f32 %v4320_v38, 0.0  ;;  %v4487_v0 = vpack.c.bf16 %v4379_v14, %v4378_v48  ;;  %v4363_v24 = vmax.f32 %v4307_v49, 0.0  ;;  %v12144_v54 = vld [vmem:[%s12736_s27 + $0x40] ss:$16 sps:$4 sm:$0xff]  }
 0x5f5   : > { %v4491_v15 = vpack.c.bf16 %v4387_v30, %v4386_v16  ;;  %v4366_v30 = vmax.f32 %v4310_v22, 0.0  ;;  %v4488_v11 = vpack.c.bf16 %v4381_v12, %v4380_v39  ;;  %v4319_v36 = vadd.f32 %v13982_v25, %v13001_v40  ;;  %v16786_v22 = vld [vmem:[#allocation38_spill] sm:$0xff]  ;;  %v16790_v48 = vld [vmem:[#allocation17_spill] sm:$0xff] }
 0x5f6   : > { %v4480_v51 = vpack.c.bf16 %v4365_v57, %v4364_v47  ;;  %v14019_v20 = vpop.f32.mrf.mxu0  ;;  %v4377_v41 = vmax.f32 %v4321_v31, 0.0  ;;  %v4302_v35 = vadd.f32 %v13960_v58, %v12922_v43  ;;  %v4479_v8 = vpack.c.bf16 %v4363_v24, %v4362_v7  ;;  %v12156_v31 = vld [vmem:[%s12736_s27 + $0x80] ss:$16 sps:$4 sm:$0xff]   ;;  %v12164_v14 = vld [vmem:[%s12736_s27 + $0xa4] ss:$16 sps:$4 sm:$0xff]   ;;  %v16791_v7 = vld [vmem:[#allocation18_spill] sm:$0xff] }
 0x5f7   : > { %10633 = vmatprep.subr.bf16.mxu1 %v4491_v15  ;;  %v4481_v28 = vpack.c.bf16 %v4367_v45, %v4366_v30  ;;  %v4374_v29 = vmax.f32 %v4318_v33, 0.0  ;;  %v4317_v40 = vadd.f32 %v16784_v10, %v16783_v37  ;;  %v4375_v25 = vmax.f32 %v4319_v36, 0.0  ;;  %v16787_v45 = vld [vmem:[#allocation14_spill] sm:$0xff]  ;;  %v12162_v37 = vld [vmem:[%s12736_s27 + $0xa0] ss:$16 sps:$4 sm:$0xff]  }
 0x5f8   : > { %10634 = vmatpush3.bf16.msra.mxu1 %v4483_v62  ;;  %v4486_v32 = vpack.c.bf16 %v4377_v41, %v4376_v5  ;;  %v14029_v13 = vpop.f32.mrf.mxu0  ;;  %v4358_v50 = vmax.f32 %v4302_v35, 0.0  ;;  %v4372_v58 = vmax.f32 %v4316_v61, 0.0  ;;  %v16793_v41 = vmov 0   ;;  %v16794_v35 = vld [vmem:[#allocation20_spill] sm:$0xff] }
 0x5f9   : > { %10635 = vmatprep.subr.bf16.mxu1 %v4490_v19  ;;  %v4485_v27 = vpack.c.bf16 %v4375_v25, %v4374_v29  ;;  %v4373_v16 = vmax.f32 %v4317_v40, 0.0  ;;  %v12170_v40 = vld [vmem:[%s12736_s27 + $0xc4] ss:$16 sps:$4 sm:$0xff]   ;;  %v16796_v25 = vld [vmem:[#allocation22_spill] sm:$0xff] }
 0x5fa   : > { %v4477_v46 = vpack.c.bf16 %v4359_v18, %v4358_v50  ;;  %v16797_v18 = vld [vmem:[#allocation23_spill] sm:$0xff] }
 0x5fb   : > { %v4484_v59 = vpack.c.bf16 %v4373_v16, %v4372_v58 }
 0x5fc   : > { %10636 = vmatpush3.bf16.msra.mxu1 %v4482_v17 }
 0x5fd   : > { %10637 = vmatprep.subr.bf16.mxu1 %v4489_v3  ;;  %v12158_v3 = vld [vmem:[%s12736_s27 + $0x84] ss:$16 sps:$4 sm:$0xff]  }
 0x5fe   : > { %v14033_v43 = vpop.f32.mrf.mxu0 }
 0x600   : > { %10638 = vmatpush3.bf16.msra.mxu1 %v4481_v28  ;;  %v14036_v42 = vpop.f32.mrf.mxu0  ;;  %v16789_v28 = vld [vmem:[#allocation15_spill] sm:$0xff] }
 0x601   : > { %10639 = vmatprep.subr.bf16.mxu1 %v4488_v11 }
 0x604   : > { %10640 = vmatpush3.bf16.msra.mxu1 %v4480_v51 }
 0x605   : > { %10641 = vmatprep.subr.bf16.mxu1 %v4487_v0  ;;  %v16792_v0 = vld [vmem:[#allocation19_spill] sm:$0xff] }
 0x606   : > { %v14038_v55 = vpop.f32.mrf.mxu0 }
 0x608   : > { %10642 = vmatpush3.bf16.msra.mxu1 %v4479_v8  ;;  %v14041_v15 = vpop.f32.mrf.mxu0 }
 0x609   : > { %10643 = vmatprep.subr.bf16.mxu1 %v4486_v32  ;;  %v16795_v32 = vld [vmem:[#allocation21_spill] sm:$0xff] }
 0x60c   : > { %10644 = vmatpush3.bf16.msra.mxu1 %v16785_v52 }
 0x60d   : > { %10645 = vmatprep.subr.bf16.mxu1 %v4485_v27 }
 0x60e   : > { %v11478_v62 = vpop.f32.mrf.mxu0 }
 0x60f   : > { %v4339_v52 = vadd.f32 %v11478_v62, %v16797_v18  ;;  %v12168_v62 = vld [vmem:[%s12736_s27 + $0xc0] ss:$16 sps:$4 sm:$0xff]   ;;  %v16811_v18 = vld [vmem:[#allocation36_spill] sm:$0xff] }
 0x610   : > { %10646 = vmatpush3.bf16.msra.mxu1 %v4477_v46  ;;  %v4211_v56 = vpop.f32.mrf.mxu0 }
 0x611   : > { %10647 = vmatprep.subr.bf16.mxu1 %v4484_v59  ;;  %v4338_v50 = vadd.f32 %v4211_v56, %v16796_v25  ;;  %v16798_v59 = vld [vmem:[#allocation24_spill] sm:$0xff]  ;;  %v16810_v25 = vld [vmem:[#allocation37_spill] sm:$0xff] }
 0x614   : > { %10648 = vmatpush3.bf16.msra.mxu1 %v16786_v22  ;;  %v4394_v22 = vmax.f32 %v4338_v50, 0.0 }
 0x616   : > { %v11481_v19 = vpop.f32.mrf.mxu0 }
 0x617   : > { %4889 = vmatmul.mubr.bf16.vlgmr.msra.gmra.mxu1 %v12132_v53  ;;  %v4341_v34 = vadd.f32 %v11481_v19, %v16795_v32  ;;  %v4336_v53 = vadd.f32 %v14041_v15, %v16798_v59  ;;  %v16801_v15 = vld [vmem:[#allocation27_spill] sm:$0xff] }
 0x618   : > { %4896 = vmatprep.mubr.bf16.mxu1 %v12140_v63  ;;  %v4221_v2 = vpop.f32.mrf.mxu0  ;;  %v12186_v59 = vld [vmem:[%s12736_s27 + $0x120] ss:$16 sps:$4 sm:$0xff]  }
 0x619   : > { %v4340_v8 = vadd.f32 %v4221_v2, %v16794_v35  ;;  %v4397_v16 = vmax.f32 %v4341_v34, 0.0  ;;  %v12176_v2 = vld [vmem:[%s12736_s27 + $0xe4] ss:$16 sps:$4 sm:$0xff]   ;;  %v12180_v35 = vld [vmem:[%s12736_s27 + $0x100] ss:$16 sps:$4 sm:$0xff]  }
 0x61b   : > { %v4396_v58 = vmax.f32 %v4340_v8, 0.0  ;;  %v12188_v8 = vld [vmem:[%s12736_s27 + $0x124] ss:$16 sps:$4 sm:$0xff]  }
 0x61d   : > { %v4496_v63 = vpack.c.bf16 %v4397_v16, %v4396_v58 }
 0x61e   : > { %v11484_v21 = vpop.f32.mrf.mxu0 }
 0x61f   : > { %4897 = vmatmul.mubr.bf16.gmra.mxu1 %v12138_v60  ;;  %v4343_v24 = vadd.f32 %v11484_v21, %v16792_v0  ;;  %v16799_v60 = vld [vmem:[#allocation25_spill] sm:$0xff]  ;;  %v16800_v21 = vld [vmem:[#allocation26_spill] sm:$0xff] }
 0x620   : > { %4904 = vmatprep.mubr.bf16.mxu1 %v12146_v1  ;;  %v4231_v30 = vpop.f32.mrf.mxu0  ;;  %v4337_v19 = vadd.f32 %v14038_v55, %v16799_v60  ;;  %v4395_v1 = vmax.f32 %v4339_v52, 0.0  ;;  %v12135_v60 = vld [vmem:[%s12736_s27 + $0x8] ss:$16 sps:$4 sm:$0xff]  }
 0x621   : > { %v4342_v51 = vadd.f32 %v4231_v30, %v16791_v7  ;;  %v4399_v44 = vmax.f32 %v4343_v24, 0.0 }
 0x622   : > { %v4495_v30 = vpack.c.bf16 %v4395_v1, %v4394_v22  ;;  %v12192_v1 = vld [vmem:[%s12736_s27 + $0x140] ss:$16 sps:$4 sm:$0xff]  }
 0x623   : > { %v4398_v61 = vmax.f32 %v4342_v51, 0.0  ;;  %v16806_v51 = vld [vmem:[#allocation31_spill] sm:$0xff] }
 0x625   : > { %v4497_v27 = vpack.c.bf16 %v4399_v44, %v4398_v61  ;;  %v16808_v61 = vld [vmem:[#allocation35_spill] sm:$0xff]  ;;  %v16809_v44 = vld [vmem:[#allocation34_spill] sm:$0xff] }
 0x626   : > { %v11487_v17 = vpop.f32.mrf.mxu0 }
 0x627   : > { %4905 = vmatmul.mubr.bf16.gmra.mxu1 %v12144_v54  ;;  %v4345_v11 = vadd.f32 %v11487_v17, %v16790_v48  ;;  %v4334_v54 = vadd.f32 %v14036_v42, %v16800_v21  ;;  %v12147_v21 = vld [vmem:[%s12736_s27 + $0x4c] ss:$16 sps:$4 sm:$0xff]  }
 0x628   : > { %4912 = vmatprep.mubr.bf16.mxu1 %v12152_v4  ;;  %v4241_v39 = vpop.f32.mrf.mxu0  ;;  %v4392_v4 = vmax.f32 %v4336_v53, 0.0  ;;  %v12194_v53 = vld [vmem:[%s12736_s27 + $0x144] ss:$16 sps:$4 sm:$0xff]  }
 0x629   : > { %v4344_v47 = vadd.f32 %v4241_v39, %v16788_v9  ;;  %v4401_v36 = vmax.f32 %v4345_v11, 0.0  ;;  %v4393_v39 = vmax.f32 %v4337_v19, 0.0  ;;  %v12141_v19 = vld [vmem:[%s12736_s27 + $0x2c] ss:$16 sps:$4 sm:$0xff]  }
 0x62b   : > { %v4400_v33 = vmax.f32 %v4344_v47, 0.0  ;;  %v4494_v42 = vpack.c.bf16 %v4393_v39, %v4392_v4  ;;  %v12174_v47 = vld [vmem:[%s12736_s27 + $0xe0] ss:$16 sps:$4 sm:$0xff]   ;;  %v12206_v4 = vld [vmem:[%s12736_s27 + $0x184] ss:$16 sps:$4 sm:$0xff]  }
 0x62c   : > { %v12155_v39 = vld [vmem:[%s12736_s27 + $0x68] ss:$16 sps:$4 sm:$0xff]  }
 0x62d   : > { %v4498_v29 = vpack.c.bf16 %v4401_v36, %v4400_v33 }
 0x62e   : > { %v11490_v6 = vpop.f32.mrf.mxu0 }
 0x62f   : > { %v4347_v26 = vadd.f32 %v11490_v6, %v16787_v45  ;;  %4913 = vmatmul.mubr.bf16.gmra.mxu1 %v12150_v23  ;;  %v4335_v23 = vadd.f32 %v14033_v43, %v16801_v15  ;;  %v4390_v45 = vmax.f32 %v4334_v54, 0.0  ;;  %v12198_v54 = vld [vmem:[%s12736_s27 + $0x160] ss:$16 sps:$4 sm:$0xff]  }
 0x630   : > { %v4251_v12 = vpop.f32.mrf.mxu0  ;;  %4920 = vmatprep.mubr.bf16.mxu1 %v12158_v3  ;;  %v16802_v3 = vld [vmem:[#allocation28_spill] sm:$0xff]  ;;  %v12204_v15 = vld [vmem:[%s12736_s27 + $0x180] ss:$16 sps:$4 sm:$0xff]  }
 0x631   : > { %v4346_v38 = vadd.f32 %v4251_v12, %v16789_v28  ;;  %v4403_v49 = vmax.f32 %v4347_v26, 0.0  ;;  %v4332_v6 = vadd.f32 %v14029_v13, %v16802_v3  ;;  %v16803_v26 = vld [vmem:[#allocation29_spill] sm:$0xff]  ;;  %v4391_v9 = vmax.f32 %v4335_v23, 0.0 }
 0x632   : > { %v4333_v12 = vadd.f32 %v14019_v20, %v16803_v26  ;;  %v12182_v28 = vld [vmem:[%s12736_s27 + $0x104] ss:$16 sps:$4 sm:$0xff]   ;;  %v12210_v3 = vld [vmem:[%s12736_s27 + $0x1a0] ss:$16 sps:$4 sm:$0xff]  }
 0x633   : > { %v4402_v57 = vmax.f32 %v4346_v38, 0.0  ;;  %v4388_v38 = vmax.f32 %v4332_v6, 0.0  ;;  %v4493_v48 = vpack.c.bf16 %v4391_v9, %v4390_v45  ;;  %v12212_v23 = vld [vmem:[%s12736_s27 + $0x1a4] ss:$16 sps:$4 sm:$0xff]   ;;  %v12161_v45 = vld [vmem:[%s12736_s27 + $0x88] ss:$16 sps:$4 sm:$0xff]  }
 0x634   : > { %v12218_v6 = vld [vmem:[%s12736_s27 + $0x1c4] ss:$16 sps:$4 sm:$0xff]   ;;  %v12216_v26 = vld [vmem:[%s12736_s27 + $0x1c0] ss:$16 sps:$4 sm:$0xff]   ;;  %v12167_v9 = vld [vmem:[%s12736_s27 + $0xa8] ss:$16 sps:$4 sm:$0xff]  }
 0x635   : > { %v4499_v5 = vpack.c.bf16 %v4403_v49, %v4402_v57  ;;  %v4389_v49 = vmax.f32 %v4333_v12, 0.0  ;;  %v16804_v57 = vld [vmem:[#allocation30_spill] sm:$0xff]  ;;  %v12224_v12 = vld [vmem:[%s12736_s27 + $0x1e4] ss:$16 sps:$4 sm:$0xff]  }
 0x636   : > { %v14063_v10 = vpop.f32.mrf.mxu0 }
 0x637   : > { %5018 = vmatpush1.bf16.msra.mxu0 %v4499_v5  ;;  %4921 = vmatmul.mubr.bf16.gmra.mxu1 %v12156_v31  ;;  %v4492_v20 = vpack.c.bf16 %v4389_v49, %v4388_v38  ;;  %v16807_v5 = vld [vmem:[#allocation32_spill] sm:$0xff]  ;;  %v4349_v52 = vadd.f32 %v14063_v10, %v16811_v18  ;;  %v5215_v10 = vld [vmem:[%s16536_s11 + $0x18] sm:$0xff] }
 0x638   : > { %5019 = vmatprep.subr.bf16.mxu0 %v16793_v41  ;;  %4928 = vmatprep.mubr.bf16.mxu1 %v12164_v14  ;;  %v14069_v46 = vpop.f32.mrf.mxu0  ;;  %v16805_v14 = vld [vmem:[#allocation33_spill] sm:$0xff]  ;;  %v12177_v38 = vld [vmem:[%s12736_s27 + $0xec] ss:$16 sps:$4 sm:$0xff]   ;;  %v12185_v49 = vld [vmem:[%s12736_s27 + $0x108] ss:$16 sps:$4 sm:$0xff]  }
 0x639   : > { %v4348_v50 = vadd.f32 %v14069_v46, %v16810_v25  ;;  %11907 = vmatprep.subr.mxu1 %v5215_v10 }
 0x63a   : > { %11911 = vmatpush3.msra.mxu1 %v5215_v10 }
 0x63b   : > { %5020 = vmatpush1.bf16.msra.mxu0 %v4498_v29  ;;  %v4404_v22 = vmax.f32 %v4348_v50, 0.0 }
 0x63c   : > { %5021 = vmatprep.subr.bf16.mxu0 %v16793_v41 }
 0x63e   : > { %v11496_v56 = vpop.f32.mrf.mxu0 }
 0x63f   : > { %5022 = vmatpush1.bf16.msra.mxu0 %v4497_v27  ;;  %4929 = vmatmul.mubr.bf16.gmra.mxu1 %v12162_v37  ;;  %v4351_v37 = vadd.f32 %v11496_v56, %v16809_v44  ;;  %v4405_v56 = vmax.f32 %v4349_v52, 0.0 }
 0x640   : > { %5023 = vmatprep.subr.bf16.mxu0 %v16793_v41  ;;  %4936 = vmatprep.mubr.bf16.mxu1 %v12170_v40  ;;  %v4271_v17 = vpop.f32.mrf.mxu0 }
 0x641   : > { %v4350_v29 = vadd.f32 %v4271_v17, %v16808_v61  ;;  %v4407_v16 = vmax.f32 %v4351_v37, 0.0  ;;  %v4500_v46 = vpack.c.bf16 %v4405_v56, %v4404_v22  ;;  %v12153_v17 = vld [vmem:[%s12736_s27 + $0x6c] ss:$16 sps:$4 sm:$0xff]   ;;  %v12227_v37 = vld [vmem:[%s12736_s27 + $0x1e8] ss:$16 sps:$4 sm:$0xff]  }
 0x642   : > { %v12219_v61 = vld [vmem:[%s12736_s27 + $0x1cc] ss:$16 sps:$4 sm:$0xff]  }
 0x643   : > { %5024 = vmatpush1.bf16.msra.mxu0 %v4496_v63  ;;  %v4406_v58 = vmax.f32 %v4350_v29, 0.0  ;;  %v12221_v29 = vld [vmem:[%s12736_s27 + $0x1c8] ss:$16 sps:$4 sm:$0xff]  }
 0x644   : > { %5025 = vmatprep.subr.bf16.mxu0 %v16793_v41 }
 0x645   : > { %v4501_v63 = vpack.c.bf16 %v4407_v16, %v4406_v58 }
 0x646   : > { %v11499_v55 = vpop.f32.mrf.mxu0 }
 0x647   : > { %5026 = vmatpush1.bf16.msra.mxu0 %v4495_v30  ;;  %4937 = vmatmul.mubr.bf16.gmra.mxu1 %v12168_v62  ;;  %v4353_v0 = vadd.f32 %v11499_v55, %v16807_v5  ;;  %v12200_v62 = vld [vmem:[%s12736_s27 + $0x164] ss:$16 sps:$4 sm:$0xff]   ;;  %v12149_v30 = vld [vmem:[%s12736_s27 + $0x48] ss:$16 sps:$4 sm:$0xff]   ;;  %v12159_v55 = vld [vmem:[%s12736_s27 + $0x8c] ss:$16 sps:$4 sm:$0xff]  }
 0x648   : > { %5027 = vmatprep.subr.bf16.mxu0 %v16793_v41  ;;  %4944 = vmatprep.mubr.bf16.mxu1 %v12176_v2  ;;  %v4281_v43 = vpop.f32.mrf.mxu0  ;;  %v12143_v2 = vld [vmem:[%s12736_s27 + $0x28] ss:$16 sps:$4 sm:$0xff]   ;;  %v12201_v5 = vld [vmem:[%s12736_s27 + $0x16c] ss:$16 sps:$4 sm:$0xff]  }
 0x649   : > { %v4352_v7 = vadd.f32 %v4281_v43, %v16805_v14  ;;  %v4409_v40 = vmax.f32 %v4353_v0, 0.0  ;;  %v12222_v43 = vld [vmem:[%s12736_s27 + $0x1e0] ss:$16 sps:$4 sm:$0xff]   ;;  %v12203_v0 = vld [vmem:[%s12736_s27 + $0x168] ss:$16 sps:$4 sm:$0xff]  }
 0x64a   : > { %v5212_v14 = vld [vmem:[%s16536_s11] sm:$0xff] }
 0x64b   : > { %5028 = vmatpush1.bf16.msra.mxu0 %v4494_v42  ;;  %v4408_v32 = vmax.f32 %v4352_v7, 0.0  ;;  %v12165_v42 = vld [vmem:[%s12736_s27 + $0xac] ss:$16 sps:$4 sm:$0xff]  }
 0x64c   : > { %5029 = vmatprep.subr.bf16.mxu0 %v16793_v41  ;;  %v12195_v7 = vld [vmem:[%s12736_s27 + $0x14c] ss:$16 sps:$4 sm:$0xff]  }
 0x64d   : > { %v4502_v27 = vpack.c.bf16 %v4409_v40, %v4408_v32  ;;  %v12225_v32 = vld [vmem:[%s12736_s27 + $0x1ec] ss:$16 sps:$4 sm:$0xff]  }
 0x64e   : > { %v11502_v11 = vpop.f32.mrf.mxu0 }
 0x64f   : > { %v4355_v13 = vadd.f32 %v11502_v11, %v16804_v57  ;;  %5030 = vmatpush1.bf16.msra.mxu0 %v4493_v48  ;;  %4945 = vmatmul.mubr.bf16.gmra.mxu1 %v12174_v47  ;;  %v12171_v47 = vld [vmem:[%s12736_s27 + $0xcc] ss:$16 sps:$4 sm:$0xff]   ;;  %v12179_v48 = vld [vmem:[%s12736_s27 + $0xe8] ss:$16 sps:$4 sm:$0xff]  }
 0x650   : > { %v4291_v31 = vpop.f32.mrf.mxu0  ;;  %5031 = vmatprep.subr.bf16.mxu0 %v16793_v41  ;;  %4952 = vmatprep.mubr.bf16.mxu1 %v12182_v28  ;;  %v12173_v28 = vld [vmem:[%s12736_s27 + $0xc8] ss:$16 sps:$4 sm:$0xff]   ;;  %v12183_v11 = vld [vmem:[%s12736_s27 + $0x10c] ss:$16 sps:$4 sm:$0xff]  }
 0x651   : > { %v4354_v33 = vadd.f32 %v4291_v31, %v16806_v51  ;;  %v4411_v24 = vmax.f32 %v4355_v13, 0.0  ;;  %v12189_v57 = vld [vmem:[%s12736_s27 + $0x12c] ss:$16 sps:$4 sm:$0xff]   ;;  %v5214_v13 = vld [vmem:[%s16536_s11 + $0x10] sm:$0xff] }
 0x652   : > { %v5213_v31 = vld [vmem:[%s16536_s11 + $0x8] sm:$0xff]  ;;  %11908 = vmatprep.subr.mxu1 %v5214_v13 }
 0x653   : > { %v4410_v36 = vmax.f32 %v4354_v33, 0.0  ;;  %5032 = vmatpush1.bf16.msra.mxu0 %v4492_v20  ;;  %11912 = vmatpush3.msra.mxu1 %v5214_v13  ;;  %v12191_v20 = vld [vmem:[%s12736_s27 + $0x128] ss:$16 sps:$4 sm:$0xff]  }
 0x654   : > { %5041 = vmatprep.subr.bf16.mxu0 %v16793_v41  ;;  %11909 = vmatprep.subr.mxu1 %v5213_v31  ;;  %v14165_v51 = vld [vmem:[%s16535_s10 + $0x8] sm:$0xff] }
 0x655   : > { %v4503_v34 = vpack.c.bf16 %v4411_v24, %v4410_v36  ;;  %11913 = vmatpush3.msra.mxu1 %v5213_v31  ;;  %v12197_v33 = vld [vmem:[%s12736_s27 + $0x148] ss:$16 sps:$4 sm:$0xff]   ;;  %v12207_v24 = vld [vmem:[%s12736_s27 + $0x18c] ss:$16 sps:$4 sm:$0xff]  }
 0x656   : > { %11910 = vmatprep.subr.mxu1 %v5212_v14  ;;  %v12209_v36 = vld [vmem:[%s12736_s27 + $0x188] ss:$16 sps:$4 sm:$0xff]  }
 0x657   : > { %5042 = vmatpush2.bf16.msra.mxu0 %v4503_v34  ;;  %4953 = vmatmul.mubr.bf16.gmra.mxu1 %v12180_v35  ;;  %v12213_v35 = vld [vmem:[%s12736_s27 + $0x1ac] ss:$16 sps:$4 sm:$0xff]  }
 0x658   : > { %5043 = vmatprep.subr.bf16.mxu0 %v16793_v41  ;;  %4960 = vmatprep.mubr.bf16.mxu1 %v12188_v8  ;;  %v12215_v8 = vld [vmem:[%s12736_s27 + $0x1a8] ss:$16 sps:$4 sm:$0xff]   ;;  %s14234_s27 = sshll.u32 %s12726_s22, 8 }
 0x659   : > { %11914 = vmatpush3.msra.mxu1 %v5212_v14  ;;  %s14242_s29 = scalar_lea.vmem %s16812_s21, %s14234_s27  ;;  %s14583_s23 = scalar_lea.vmem %s16529_s4, %s14234_s27 }
 0x65a   : > { %s14591_s30 = scalar_lea.vmem %s16530_s5, %s14234_s27  ;;  %s12569_s21 = smov [#allocation2]  }
 0x65b   : > { %5044 = vmatpush2.bf16.msra.mxu0 %v4502_v27 }
 0x65c   : > { %5045 = vmatprep.subr.bf16.mxu0 %v16793_v41 }
 0x65f   : > { %5046 = vmatpush2.bf16.msra.mxu0 %v4501_v63  ;;  %4961 = vmatmul.mubr.bf16.gmra.mxu1 %v12186_v59 }
 0x660   : > { %5047 = vmatprep.subr.bf16.mxu0 %v16793_v41  ;;  %4968 = vmatprep.mubr.bf16.mxu1 %v12194_v53 }
 0x663   : > { %5048 = vmatpush2.bf16.msra.mxu0 %v4500_v46 }
 0x664   : > { %11503 = vmatprep.subr.mxu0 %v5215_v10 }
 0x666   : > { %5050 = vmatmul.mubr.bf16.vlgmr.msra.gmra.mxu0 %v12135_v60 }
 0x667   : > { %10054 = vmatprep.mubr.msk.bf16.mxu0 %vm16626_vm1, %v12141_v19  ;;  %4969 = vmatmul.mubr.bf16.gmra.mxu1 %v12192_v1 }
 0x668   : > { %4976 = vmatprep.mubr.bf16.mxu1 %v12200_v62  ;;  %11504 = vmatpush3.msra.mxu0 %v5215_v10 }
 0x669   : > { %11505 = vmatprep.subr.mxu0 %v5214_v13 }
 0x66a   : > { %11506 = vmatpush3.msra.mxu0 %v5214_v13 }
 0x66b   : > { %11507 = vmatprep.subr.mxu0 %v5213_v31 }
 0x66c   : > { %11508 = vmatpush3.msra.mxu0 %v5213_v31  ;;  %v5179_v31 = vld [vmem:[%s14242_s29 + $0x8] sm:$0xff] }
 0x66d   : > { %11509 = vmatprep.subr.mxu0 %v5212_v14 }
 0x66e   : > { %5058 = vmatmul.mubr.bf16.gmra.mxu0 %v12143_v2 }
 0x66f   : > { %10055 = vmatprep.mubr.msk.bf16.mxu0 %vm16626_vm1, %v12147_v21  ;;  %4977 = vmatmul.mubr.bf16.gmra.mxu1 %v12198_v54 }
 0x670   : > { %4984 = vmatprep.mubr.bf16.mxu1 %v12206_v4  ;;  %11510 = vmatpush3.msra.mxu0 %v5212_v14 }
 0x671   : > { %11559 = vmatprep.subr.mxu0 %v14165_v51 }
 0x676   : > { %5066 = vmatmul.mubr.bf16.gmra.mxu0 %v12149_v30 }
 0x677   : > { %10056 = vmatprep.mubr.msk.bf16.mxu0 %vm16626_vm1, %v12153_v17  ;;  %4985 = vmatmul.mubr.bf16.gmra.mxu1 %v12204_v15 }
 0x678   : > { %4992 = vmatprep.mubr.bf16.mxu1 %v12212_v23 }
 0x67e   : > { %5074 = vmatmul.mubr.bf16.gmra.mxu0 %v12155_v39 }
 0x67f   : > { %10057 = vmatprep.mubr.msk.bf16.mxu0 %vm16626_vm1, %v12159_v55  ;;  %4993 = vmatmul.mubr.bf16.gmra.mxu1 %v12210_v3 }
 0x680   : > { %5000 = vmatprep.mubr.bf16.mxu1 %v12218_v6 }
 0x686   : > { %5082 = vmatmul.mubr.bf16.gmra.mxu0 %v12161_v45 }
 0x687   : > { %10058 = vmatprep.mubr.msk.bf16.mxu0 %vm16626_vm1, %v12165_v42  ;;  %5001 = vmatmul.mubr.bf16.gmra.mxu1 %v12216_v26 }
 0x688   : > { %5008 = vmatprep.mubr.bf16.mxu1 %v12224_v12 }
 0x68e   : > { %5090 = vmatmul.mubr.bf16.gmra.mxu0 %v12167_v9 }
 0x68f   : > { %10059 = vmatprep.mubr.msk.bf16.mxu0 %vm16626_vm1, %v12171_v47  ;;  %5009 = vmatmul.mubr.bf16.gmra.mxu1 %v12222_v43 }
 0x696   : > { %5098 = vmatmul.mubr.bf16.gmra.mxu0 %v12173_v28 }
 0x697   : > { %10060 = vmatprep.mubr.msk.bf16.mxu0 %vm16626_vm1, %v12177_v38 }
 0x69e   : > { %5106 = vmatmul.mubr.bf16.gmra.mxu0 %v12179_v48  ;;  %v5178_v48 = vld [vmem:[%s14242_s29] sm:$0xff] }
 0x69f   : > { %10061 = vmatprep.mubr.msk.bf16.mxu0 %vm16626_vm1, %v12183_v11 }
 0x6a6   : > { %5114 = vmatmul.mubr.bf16.gmra.mxu0 %v12185_v49  ;;  %v5210_v49 = vld [vmem:[%s16535_s10] sm:$0xff] }
 0x6a7   : > { %10062 = vmatprep.mubr.msk.bf16.mxu0 %vm16626_vm1, %v12189_v57 }
 0x6ae   : > { %5122 = vmatmul.mubr.bf16.gmra.mxu0 %v12191_v20 }
 0x6af   : > { %10063 = vmatprep.mubr.msk.bf16.mxu0 %vm16626_vm1, %v12195_v7  ;;  %v5180_v7 = vld [vmem:[%s14242_s29 + $0x10] sm:$0xff] }
 0x6b6   : > { %5130 = vmatmul.mubr.bf16.gmra.mxu0 %v12197_v33 }
 0x6b7   : > { %10064 = vmatprep.mubr.msk.bf16.mxu0 %vm16626_vm1, %v12201_v5 }
 0x6be   : > { %5138 = vmatmul.mubr.bf16.gmra.mxu0 %v12203_v0 }
 0x6bf   : > { %10065 = vmatprep.mubr.msk.bf16.mxu0 %vm16626_vm1, %v12207_v24 }
 0x6c6   : > { %5146 = vmatmul.mubr.bf16.gmra.mxu0 %v12209_v36 }
 0x6c7   : > { %10066 = vmatprep.mubr.msk.bf16.mxu0 %vm16626_vm1, %v12213_v35  ;;  %v5182_v35 = vld [vmem:[%s14242_s29 + $0x20] sm:$0xff] }
 0x6ce   : > { %5154 = vmatmul.mubr.bf16.gmra.mxu0 %v12215_v8 }
 0x6cf   : > { %10067 = vmatprep.mubr.msk.bf16.mxu0 %vm16626_vm1, %v12219_v61 }
 0x6d6   : > { %5162 = vmatmul.mubr.bf16.gmra.mxu0 %v12221_v29 }
 0x6d7   : > { %10068 = vmatprep.mubr.msk.bf16.mxu0 %vm16626_vm1, %v12225_v32  ;;  %v10649_v34 = vpop.f32.mrf.mxu1 }
 0x6d9   : > { %v10650_v44 = vpop.f32.mrf.mxu1 }
 0x6da   : > { %v10651_v45 = vadd.f32 %v10650_v44, %v10649_v34  ;;  %v5183_v34 = vld [vmem:[%s14242_s29 + $0x28] sm:$0xff] }
 0x6db   : > { %v10652_v40 = vpop.f32.mrf.mxu1 }
 0x6dd   : > { %v10653_v25 = vpop.f32.mrf.mxu1 }
 0x6de   : > { %5170 = vmatmul.mubr.bf16.gmra.mxu0 %v12227_v37  ;;  %v10654_v47 = vadd.f32 %v10653_v25, %v10652_v40  ;;  %v5184_v37 = vld [vmem:[%s14242_s29 + $0x30] sm:$0xff] }
 0x6df   : > { %v10655_v50 = vpop.f32.mrf.mxu1 }
 0x6e1   : > { %v10656_v58 = vpop.f32.mrf.mxu1 }
 0x6e2   : > { %v10657_v57 = vadd.f32 %v10656_v58, %v10655_v50 }
 0x6e3   : > { %v10658_v27 = vpop.f32.mrf.mxu1 }
 0x6e5   : > { %v10659_v18 = vpop.f32.mrf.mxu1 }
 0x6e6   : > { %v10660_v5 = vadd.f32 %v10659_v18, %v10658_v27  ;;  %v5185_v27 = vld [vmem:[%s14242_s29 + $0x38] sm:$0xff] }
 0x6e7   : > { %v14185_v52 = vpop.f32.mrf.mxu1 }
 0x6e9   : > { %v10662_v16 = vpop.f32.mrf.mxu1 }
 0x6ea   : > { %v10663_v61 = vadd.f32 %v10662_v16, %v14185_v52  ;;  %v5186_v52 = vld [vmem:[%s14242_s29 + $0x40] sm:$0xff] }
 0x6eb   : > { %v14187_v59 = vpop.f32.mrf.mxu1 }
 0x6ed   : > { %v14189_v53 = vpop.f32.mrf.mxu1 }
 0x6ee   : > { %v10666_v25 = vadd.f32 %v14189_v53, %v14187_v59 }
 0x6ef   : > { %v14191_v22 = vpop.f32.mrf.mxu1 }
 0x6f1   : > { %v14193_v63 = vpop.f32.mrf.mxu1 }
 0x6f3   : > { %v14195_v56 = vpop.f32.mrf.mxu1 }
 0x6f5   : > { %v14197_v10 = vpop.f32.mrf.mxu1 }
 0x6f7   : > { %v14199_v46 = vpop.f32.mrf.mxu1 }
 0x6f9   : > { %v14201_v60 = vpop.f32.mrf.mxu1 }
 0x6fb   : > { %v14203_v19 = vpop.f32.mrf.mxu1 }
 0x6fd   : > { %v14205_v1 = vpop.f32.mrf.mxu1 }
 0x6ff   : > { %v14207_v62 = vpop.f32.mrf.mxu1 }
 0x701   : > { %v14209_v2 = vpop.f32.mrf.mxu1 }
 0x703   : > { %v14211_v21 = vpop.f32.mrf.mxu1 }
 0x705   : > { %v14213_v54 = vpop.f32.mrf.mxu1 }
 0x707   : > { %v14215_v4 = vpop.f32.mrf.mxu1 }
 0x709   : > { %v14217_v30 = vpop.f32.mrf.mxu1 }
 0x70b   : > { %v14219_v17 = vpop.f32.mrf.mxu1 }
 0x70d   : > { %v14221_v15 = vpop.f32.mrf.mxu1 }
 0x70f   : > { %v14223_v23 = vpop.f32.mrf.mxu1 }
 0x711   : > { %v14225_v39 = vpop.f32.mrf.mxu1 }
 0x713   : > { %v14227_v55 = vpop.f32.mrf.mxu1 }
 0x715   : > { %v14229_v3 = vpop.f32.mrf.mxu1 }
 0x717   : > { %v14231_v6 = vpop.f32.mrf.mxu1 }
 0x719   : > { %v14236_v26 = vpop.f32.mrf.mxu1 }
 0x71b   : > { %v14245_v28 = vpop.f32.mrf.mxu1 }
 0x71d   : > { %v14255_v20 = vpop.f32.mrf.mxu1 }
 0x71f   : > { %v14262_v24 = vpop.f32.mrf.mxu1 }
 0x721   : > { %v14268_v32 = vpop.f32.mrf.mxu1 }
 0x723   : > { %v14277_v58 = vpop.f32.mrf.mxu1 }
 0x725   : > { %v14286_v53 = vpop.f32.mrf.mxu1 }
 0x726   : > { %v5051_v42 = vpop.f32.mrf.mxu0 }
 0x727   : > { %v5052_v12 = vadd.f32 %v10651_v45, %v5051_v42  ;;  %v10669_v45 = vadd.f32 %v14193_v63, %v14191_v22  ;;  %v5187_v42 = vld [vmem:[%s14242_s29 + $0x48] sm:$0xff]  ;;  %v14295_v63 = vpop.f32.mrf.mxu1 }
 0x728   : > { %v5053_v9 = vpop.f32.mrf.mxu0 }
 0x729   : > { %11511 = vmatprep.mubr.msk.f32.mxu0 %vm16628_vm0, %v5052_v12  ;;  %v5188_v9 = vld [vmem:[%s14242_s29 + $0x50] sm:$0xff] }
 0x72a   : > { %v5054_v43 = vpop.f32.mrf.mxu0 }
 0x72b   : > { %v5055_v38 = vadd.f32 %v10654_v47, %v5054_v43  ;;  %v10672_v43 = vadd.f32 %v14197_v10, %v14195_v56  ;;  %v14304_v10 = vpop.f32.mrf.mxu1 }
 0x72c   : > { %v5056_v11 = vpop.f32.mrf.mxu0 }
 0x72d   : > { %11512 = vmatmul.mubr.msk.f32.vlgmr.msra.gmra.mxu0 %vm16628_vm0, %v5055_v38  ;;  %v5189_v38 = vld [vmem:[%s14242_s29 + $0x58] sm:$0xff]  ;;  %v5190_v11 = vld [vmem:[%s14242_s29 + $0x60] sm:$0xff] }
 0x72e   : > { %v5059_v13 = vpop.f32.mrf.mxu0  ;;  %11560 = vmatpush3.msra.mxu0 %v14165_v51  ;;  %11563 = vmatprep.mubr.msk.f32.mxu0 %vm5537_vm2, %v5178_v48  ;;  %v5181_v51 = vld [vmem:[%s14242_s29 + $0x18] sm:$0xff] }
 0x72f   : > { %v5060_v14 = vadd.f32 %v10657_v57, %v5059_v13  ;;  %11561 = vmatprep.subr.mxu0 %v5210_v49  ;;  %v10675_v57 = vadd.f32 %v14201_v60, %v14199_v46  ;;  %v5191_v13 = vld [vmem:[%s14242_s29 + $0x68] sm:$0xff]  ;;  %v14313_v60 = vpop.f32.mrf.mxu1 }
 0x730   : > { %v5061_v33 = vpop.f32.mrf.mxu0  ;;  %11562 = vmatpush3.msra.mxu0 %v5210_v49 }
 0x731   : > { %11564 = vmatmul.mubr.msk.f32.vlgmr.msra.gmra.mxu0 %vm5537_vm2, %v5179_v31  ;;  %11514 = vmatprep.mubr.msk.f32.mxu1 %vm16628_vm0, %v5060_v14  ;;  %v5192_v14 = vld [vmem:[%s14242_s29 + $0x70] sm:$0xff]  ;;  %v10678_v33 = vadd.f32 %v14205_v1, %v14203_v19  ;;  %v14322_v1 = vpop.f32.mrf.mxu1 }
 0x732   : > { %v5062_v0 = vpop.f32.mrf.mxu0  ;;  %11566 = vmatprep.mubr.msk.f32.mxu0 %vm5537_vm2, %v5180_v7 }
 0x733   : > { %v5063_v36 = vadd.f32 %v10660_v5, %v5062_v0  ;;  %v5193_v5 = vld [vmem:[%s14242_s29 + $0x78] sm:$0xff] }
 0x734   : > { %v5064_v8 = vpop.f32.mrf.mxu0 }
 0x735   : > { %11515 = vmatmul.mubr.msk.f32.vlgmr.msra.gmra.mxu1 %vm16628_vm0, %v5063_v36  ;;  %11567 = vmatmul.mubr.msk.f32.gmra.mxu0 %vm5537_vm2, %v5181_v51  ;;  %v5194_v51 = vld [vmem:[%s14242_s29 + $0x80] sm:$0xff]  ;;  %v5195_v8 = vld [vmem:[%s14242_s29 + $0x88] sm:$0xff] }
 0x736   : > { %v5067_v29 = vpop.f32.mrf.mxu0  ;;  %11569 = vmatprep.mubr.msk.f32.mxu0 %vm5537_vm2, %v5182_v35  ;;  %v10681_v35 = vadd.f32 %v14209_v2, %v14207_v62  ;;  %v14331_v2 = vpop.f32.mrf.mxu1 }
 0x737   : > { %v5068_v44 = vadd.f32 %v10663_v61, %v5067_v29  ;;  %v5196_v29 = vld [vmem:[%s14242_s29 + $0x90] sm:$0xff] }
 0x738   : > { %v5069_v40 = vpop.f32.mrf.mxu0 }
 0x739   : > { %11517 = vmatprep.mubr.msk.f32.mxu1 %vm16628_vm0, %v5068_v44  ;;  %11570 = vmatmul.mubr.msk.f32.gmra.mxu0 %vm5537_vm2, %v5183_v34  ;;  %v10684_v44 = vadd.f32 %v14213_v54, %v14211_v21  ;;  %v14340_v54 = vpop.f32.mrf.mxu1 }
 0x73a   : > { %v5070_v50 = vpop.f32.mrf.mxu0  ;;  %11572 = vmatprep.mubr.msk.f32.mxu0 %vm5537_vm2, %v5184_v37  ;;  %v5197_v37 = vld [vmem:[%s14242_s29 + $0x98] sm:$0xff] }
 0x73b   : > { %v5071_v18 = vadd.f32 %v10666_v25, %v5070_v50  ;;  %v5198_v25 = vld [vmem:[%s14242_s29 + $0xa0] sm:$0xff] }
 0x73c   : > { %v5072_v16 = vpop.f32.mrf.mxu0 }
 0x73d   : > { %11518 = vmatmul.mubr.msk.f32.gmra.mxu1 %vm16628_vm0, %v5071_v18  ;;  %11573 = vmatmul.mubr.msk.f32.gmra.mxu0 %vm5537_vm2, %v5185_v27  ;;  %v10687_v27 = vadd.f32 %v14217_v30, %v14215_v4  ;;  %v5199_v18 = vld [vmem:[%s14242_s29 + $0xa8] sm:$0xff]  ;;  %v5200_v16 = vld [vmem:[%s14242_s29 + $0xb0] sm:$0xff]  ;;  %v14349_v30 = vpop.f32.mrf.mxu1 }
 0x73e   : > { %v5075_v59 = vpop.f32.mrf.mxu0  ;;  %11575 = vmatprep.mubr.msk.f32.mxu0 %vm5537_vm2, %v5186_v52 }
 0x73f   : > { %v5076_v12 = vadd.f32 %v10669_v45, %v5075_v59  ;;  %v10690_v59 = vadd.f32 %v14221_v15, %v14219_v17  ;;  %v14358_v15 = vpop.f32.mrf.mxu1 }
 0x740   : > { %v5077_v47 = vpop.f32.mrf.mxu0 }
 0x741   : > { %11520 = vmatprep.mubr.msk.f32.mxu1 %vm16628_vm0, %v5076_v12  ;;  %11576 = vmatmul.mubr.msk.f32.gmra.mxu0 %vm5537_vm2, %v5187_v42  ;;  %v5201_v42 = vld [vmem:[%s14242_s29 + $0xb8] sm:$0xff] }
 0x742   : > { %v5078_v22 = vpop.f32.mrf.mxu0  ;;  %11578 = vmatprep.mubr.msk.f32.mxu0 %vm5537_vm2, %v5188_v9  ;;  %v5202_v9 = vld [vmem:[%s14242_s29 + $0xc0] sm:$0xff] }
 0x743   : > { %v5079_v48 = vadd.f32 %v10672_v43, %v5078_v22  ;;  %v10693_v43 = vadd.f32 %v14225_v39, %v14223_v23  ;;  %v5203_v22 = vld [vmem:[%s14242_s29 + $0xc8] sm:$0xff]  ;;  %v14367_v39 = vpop.f32.mrf.mxu1 }
 0x744   : > { %v5080_v49 = vpop.f32.mrf.mxu0 }
 0x745   : > { %11521 = vmatmul.mubr.msk.f32.gmra.mxu1 %vm16628_vm0, %v5079_v48  ;;  %11579 = vmatmul.mubr.msk.f32.gmra.mxu0 %vm5537_vm2, %v5189_v38  ;;  %v5204_v48 = vld [vmem:[%s14242_s29 + $0xd0] sm:$0xff]  ;;  %v10696_v49 = vadd.f32 %v14229_v3, %v14227_v55  ;;  %v14376_v3 = vpop.f32.mrf.mxu1 }
 0x746   : > { %v5083_v56 = vpop.f32.mrf.mxu0  ;;  %11581 = vmatprep.mubr.msk.f32.mxu0 %vm5537_vm2, %v5190_v11 }
 0x747   : > { %v5084_v31 = vadd.f32 %v10675_v57, %v5083_v56  ;;  %v5205_v57 = vld [vmem:[%s14242_s29 + $0xd8] sm:$0xff] }
 0x748   : > { %v5085_v7 = vpop.f32.mrf.mxu0 }
 0x749   : > { %11523 = vmatprep.mubr.msk.f32.mxu1 %vm16628_vm0, %v5084_v31  ;;  %11582 = vmatmul.mubr.msk.f32.gmra.mxu0 %vm5537_vm2, %v5191_v13  ;;  %v5206_v13 = vld [vmem:[%s14242_s29 + $0xe0] sm:$0xff]  ;;  %v5207_v7 = vld [vmem:[%s14242_s29 + $0xe8] sm:$0xff] }
 0x74a   : > { %v5086_v46 = vpop.f32.mrf.mxu0  ;;  %11584 = vmatprep.mubr.msk.f32.mxu0 %vm5537_vm2, %v5192_v14  ;;  %v10699_v14 = vadd.f32 %v14236_v26, %v14231_v6  ;;  %v10724_v26 = vpop.f32.mrf.mxu1 }
 0x74b   : > { %v5087_v0 = vadd.f32 %v10678_v33, %v5086_v46  ;;  %v5208_v46 = vld [vmem:[%s14242_s29 + $0xf0] sm:$0xff] }
 0x74c   : > { %v5088_v36 = vpop.f32.mrf.mxu0 }
 0x74d   : > { %11524 = vmatmul.mubr.msk.f32.gmra.mxu1 %vm16628_vm0, %v5087_v0  ;;  %11585 = vmatmul.mubr.msk.f32.gmra.mxu0 %vm5537_vm2, %v5193_v5  ;;  %v10702_v0 = vadd.f32 %v14255_v20, %v14245_v28  ;;  %v10725_v28 = vpop.f32.mrf.mxu1 }
 0x74e   : > { %v5091_v19 = vpop.f32.mrf.mxu0  ;;  %11587 = vmatprep.mubr.msk.f32.mxu0 %vm5537_vm2, %v5194_v51  ;;  %v5209_v51 = vld [vmem:[%s14242_s29 + $0xf8] sm:$0xff]  ;;  %s667_s29 = sand.u32 1, %s12557_s28  }
 0x74f   : > { %v5092_v61 = vadd.f32 %v10681_v35, %v5091_v19  ;;  %v10705_v19 = vadd.f32 %v14268_v32, %v14262_v24  ;;  %s9640_s27 = sshll.u32 %s667_s29, 8  ;;  %s16485_s0 = scalar_lea.sflag [#allocation3], %s667_s29 }
 0x750   : > { %v5093_v34 = vpop.f32.mrf.mxu0  ;;  %s16354_s24 = scalar_lea.vmem [#allocation2], %s9640_s27 }
 0x751   : > { %11526 = vmatprep.mubr.msk.f32.mxu1 %vm16628_vm0, %v5092_v61  ;;  %11588 = vmatmul.mubr.msk.f32.gmra.mxu0 %vm5537_vm2, %v5195_v8  ;;  %s9493_s26 = sshll.u32 %s16354_s24, 4  ;;  %s16479_s26 = int_to_ptr.vmem [resolvable:$true] %s9493_s26 }
 0x752   : > { %v5094_v62 = vpop.f32.mrf.mxu0  ;;  %11590 = vmatprep.mubr.msk.f32.mxu0 %vm5537_vm2, %v5196_v29  ;;  %v10708_v29 = vadd.f32 %v14286_v53, %v14277_v58 }
 0x753   : > { %v5095_v40 = vadd.f32 %v10684_v44, %v5094_v62  ;;  %v10727_v44 = vpop.f32.mrf.mxu1  ;;  %v5930_v62 = vld [vmem:[%s16537_s12 + $0x18] sm:$0xff] }
 0x754   : > { %v5096_v50 = vpop.f32.mrf.mxu0  ;;  %11611 = vmatprep.subr.mxu1 %v5930_v62 }
 0x755   : > { %11527 = vmatmul.mubr.msk.f32.gmra.mxu1 %vm16628_vm0, %v5095_v40  ;;  %11591 = vmatmul.mubr.msk.f32.gmra.mxu0 %vm5537_vm2, %v5197_v37  ;;  %v5929_v37 = vld [vmem:[%s16537_s12 + $0x10] sm:$0xff]  ;;  %v10711_v40 = vadd.f32 %v14304_v10, %v14295_v63  ;;  %v10728_v53 = vpop.f32.mrf.mxu1  ;;  %v10714_v63 = vadd.f32 %v14322_v1, %v14313_v60  ;;  %v10720_v60 = vadd.f32 %v14358_v15, %v14349_v30 }
 0x756   : > { %v5099_v21 = vpop.f32.mrf.mxu0  ;;  %11593 = vmatprep.mubr.msk.f32.mxu0 %vm5537_vm2, %v5198_v25  ;;  %11612 = vmatpush3.msra.mxu1 %v5930_v62  ;;  %v5928_v25 = vld [vmem:[%s16537_s12 + $0x8] sm:$0xff] }
 0x757   : > { %v5100_v52 = vadd.f32 %v10687_v27, %v5099_v21  ;;  %11613 = vmatprep.subr.mxu1 %v5929_v37  ;;  %v5927_v21 = vld [vmem:[%s16537_s12] sm:$0xff] }
 0x758   : > { %v5101_v45 = vpop.f32.mrf.mxu0  ;;  %11614 = vmatpush3.msra.mxu1 %v5929_v37  ;;  %v6294_v37 = vld [vmem:[%s16538_s13 + $0x30] sm:$0xff] }
 0x759   : > { %11529 = vmatprep.mubr.msk.f32.mxu1 %vm16628_vm0, %v5100_v52  ;;  %11594 = vmatmul.mubr.msk.f32.gmra.mxu0 %vm5537_vm2, %v5199_v18  ;;  %v10730_v18 = vpop.f32.mrf.mxu1  ;;  %v10717_v45 = vadd.f32 %v14340_v54, %v14331_v2 }
 0x75a   : > { %v5102_v4 = vpop.f32.mrf.mxu0  ;;  %11596 = vmatprep.mubr.msk.f32.mxu0 %vm5537_vm2, %v5200_v16  ;;  %11615 = vmatprep.subr.mxu1 %v5928_v25 }
 0x75b   : > { %v5103_v12 = vadd.f32 %v10690_v59, %v5102_v4  ;;  %11616 = vmatpush3.msra.mxu1 %v5928_v25  ;;  %v10731_v4 = vpop.f32.mrf.mxu1  ;;  %v6290_v25 = vld [vmem:[%s16538_s13 + $0x10] sm:$0xff] }
 0x75c   : > { %v5104_v47 = vpop.f32.mrf.mxu0  ;;  %11617 = vmatprep.subr.mxu1 %v5927_v21 }
 0x75d   : > { %11530 = vmatmul.mubr.msk.f32.gmra.mxu1 %vm16628_vm0, %v5103_v12  ;;  %11597 = vmatmul.mubr.msk.f32.gmra.mxu0 %vm5537_vm2, %v5201_v42 }
 0x75e   : > { %v5107_v17 = vpop.f32.mrf.mxu0  ;;  %11599 = vmatprep.mubr.msk.f32.mxu0 %vm5537_vm2, %v5202_v9  ;;  %11618 = vmatpush3.msra.mxu1 %v5927_v21  ;;  %v10733_v9 = vpop.f32.mrf.mxu1  ;;  %v6288_v21 = vld [vmem:[%s16538_s13] sm:$0xff] }
 0x75f   : > { %v5108_v38 = vadd.f32 %v10693_v43, %v5107_v17  ;;  %v10723_v17 = vadd.f32 %v14376_v3, %v14367_v39 }
 0x760   : > { %v5109_v11 = vpop.f32.mrf.mxu0  ;;  %v10734_v54 = vpop.f32.mrf.mxu1 }
 0x761   : > { %11532 = vmatprep.mubr.msk.f32.mxu1 %vm16628_vm0, %v5108_v38  ;;  %11600 = vmatmul.mubr.msk.f32.gmra.mxu0 %vm5537_vm2, %v5203_v22 }
 0x762   : > { %v5110_v23 = vpop.f32.mrf.mxu0  ;;  %11602 = vmatprep.mubr.msk.f32.mxu0 %vm5537_vm2, %v5204_v48  ;;  %v10726_v48 = vadd.f32 %v10725_v28, %v10724_v26  ;;  %v10736_v30 = vpop.f32.mrf.mxu1 }
 0x763   : > { %v5111_v56 = vadd.f32 %v10696_v49, %v5110_v23  ;;  %v10729_v23 = vadd.f32 %v10728_v53, %v10727_v44  ;;  %v6291_v53 = vld [vmem:[%s16538_s13 + $0x18] sm:$0xff] }
 0x764   : > { %v5112_v31 = vpop.f32.mrf.mxu0 }
 0x765   : > { %11533 = vmatmul.mubr.msk.f32.gmra.mxu1 %vm16628_vm0, %v5111_v56  ;;  %11603 = vmatmul.mubr.msk.f32.gmra.mxu0 %vm5537_vm2, %v5205_v57  ;;  %v10737_v56 = vpop.f32.mrf.mxu1  ;;  %v10732_v31 = vadd.f32 %v10731_v4, %v10730_v18 }
 0x766   : > { %v5115_v55 = vpop.f32.mrf.mxu0  ;;  %11605 = vmatprep.mubr.msk.f32.mxu0 %vm5537_vm2, %v5206_v13  ;;  %v10738_v26 = vadd.f32 %v10737_v56, %v10736_v30 }
 0x767   : > { %v5116_v33 = vadd.f32 %v10699_v14, %v5115_v55  ;;  %v10739_v55 = vpop.f32.mrf.mxu1 }
 0x768   : > { %v5117_v5 = vpop.f32.mrf.mxu0 }
 0x769   : > { %11535 = vmatprep.mubr.msk.f32.mxu1 %vm16628_vm0, %v5116_v33  ;;  %11606 = vmatmul.mubr.msk.f32.gmra.mxu0 %vm5537_vm2, %v5207_v7  ;;  %v10735_v33 = vadd.f32 %v10734_v54, %v10733_v9  ;;  %v10740_v5 = vpop.f32.mrf.mxu1 }
 0x76a   : > { %v5118_v6 = vpop.f32.mrf.mxu0  ;;  %11608 = vmatprep.mubr.msk.f32.mxu0 %vm5537_vm2, %v5208_v46 }
 0x76b   : > { %v5119_v36 = vadd.f32 %v10702_v0, %v5118_v6 }
 0x76c   : > { %v5120_v35 = vpop.f32.mrf.mxu0 }
 0x76d   : > { %11536 = vmatmul.mubr.msk.f32.gmra.mxu1 %vm16628_vm0, %v5119_v36  ;;  %11609 = vmatmul.mubr.msk.f32.gmra.mxu0 %vm5537_vm2, %v5209_v51  ;;  %v10742_v36 = vpop.f32.mrf.mxu1 }
 0x76e   : > { %v5123_v8 = vpop.f32.mrf.mxu0 }
 0x76f   : > { %v5124_v20 = vadd.f32 %v10705_v19, %v5123_v8  ;;  %v10741_v8 = vadd.f32 %v10740_v5, %v10739_v55 }
 0x770   : > { %v5125_v61 = vpop.f32.mrf.mxu0 }
 0x771   : > { %11538 = vmatprep.mubr.msk.f32.mxu1 %vm16628_vm0, %v5124_v20  ;;  %v10743_v20 = vpop.f32.mrf.mxu1 }
 0x772   : > { %v5126_v34 = vpop.f32.mrf.mxu0 }
 0x773   : > { %v5127_v24 = vadd.f32 %v10708_v29, %v5126_v34  ;;  %v10744_v34 = vadd.f32 %v10743_v20, %v10742_v36 }
 0x774   : > { %v5128_v32 = vpop.f32.mrf.mxu0 }
 0x775   : > { %11539 = vmatmul.mubr.msk.f32.gmra.mxu1 %vm16628_vm0, %v5127_v24  ;;  %v6295_v32 = vld [vmem:[%s16538_s13 + $0x38] sm:$0xff] }
 0x776   : > { %v5131_v58 = vpop.f32.mrf.mxu0  ;;  %11667 = vmatprep.subr.mxu0 %v6295_v32 }
 0x777   : > { %v5132_v50 = vadd.f32 %v10711_v40, %v5131_v58  ;;  %11668 = vmatpush3.msra.mxu0 %v6295_v32  ;;  %v6293_v40 = vld [vmem:[%s16538_s13 + $0x28] sm:$0xff]  ;;  %v6292_v58 = vld [vmem:[%s16538_s13 + $0x20] sm:$0xff] }
 0x778   : > { %v5133_v27 = vpop.f32.mrf.mxu0  ;;  %11669 = vmatprep.subr.mxu0 %v6294_v37 }
 0x779   : > { %11541 = vmatprep.mubr.msk.f32.mxu1 %vm16628_vm0, %v5132_v50  ;;  %11670 = vmatpush3.msra.mxu0 %v6294_v37  ;;  %v6289_v50 = vld [vmem:[%s16538_s13 + $0x8] sm:$0xff] }
 0x77a   : > { %v5134_v10 = vpop.f32.mrf.mxu0  ;;  %11671 = vmatprep.subr.mxu0 %v6293_v40 }
 0x77b   : > { %v5135_v52 = vadd.f32 %v10714_v63, %v5134_v10  ;;  %11672 = vmatpush3.msra.mxu0 %v6293_v40  ;;  %v14456_v10 = vld [vmem:[%s16542_s17] ss:$0 sm:$0xff] }
 0x77c   : > { %v5136_v16 = vpop.f32.mrf.mxu0  ;;  %11673 = vmatprep.subr.mxu0 %v6292_v58 }
 0x77d   : > { %11542 = vmatmul.mubr.msk.f32.gmra.mxu1 %vm16628_vm0, %v5135_v52  ;;  %11674 = vmatpush3.msra.mxu0 %v6292_v58 }
 0x77e   : > { %v5139_v59 = vpop.f32.mrf.mxu0  ;;  %11675 = vmatprep.subr.mxu0 %v6291_v53 }
 0x77f   : > { %v5140_v42 = vadd.f32 %v10717_v45, %v5139_v59  ;;  %11676 = vmatpush3.msra.mxu0 %v6291_v53 }
 0x780   : > { %v5141_v12 = vpop.f32.mrf.mxu0  ;;  %11677 = vmatprep.subr.mxu0 %v6290_v25 }
 0x781   : > { %11544 = vmatprep.mubr.msk.f32.mxu1 %vm16628_vm0, %v5140_v42  ;;  %11678 = vmatpush3.msra.mxu0 %v6290_v25 }
 0x782   : > { %v5142_v1 = vpop.f32.mrf.mxu0  ;;  %11679 = vmatprep.subr.mxu0 %v6289_v50 }
 0x783   : > { %v5143_v47 = vadd.f32 %v10720_v60, %v5142_v1  ;;  %11680 = vmatpush3.msra.mxu0 %v6289_v50 }
 0x784   : > { %v5144_v43 = vpop.f32.mrf.mxu0  ;;  %11681 = vmatprep.subr.mxu0 %v6288_v21 }
 0x785   : > { %11545 = vmatmul.mubr.msk.f32.gmra.mxu1 %vm16628_vm0, %v5143_v47  ;;  %11682 = vmatpush3.msra.mxu0 %v6288_v21 }
 0x786   : > { %v5147_v2 = vpop.f32.mrf.mxu0 }
 0x787   : > { %v5148_v22 = vadd.f32 %v10723_v17, %v5147_v2 }
 0x788   : > { %v5149_v38 = vpop.f32.mrf.mxu0 }
 0x789   : > { %11547 = vmatprep.mubr.msk.f32.mxu1 %vm16628_vm0, %v5148_v22 }
 0x78a   : > { %v5150_v11 = vpop.f32.mrf.mxu0 }
 0x78b   : > { %v5151_v15 = vadd.f32 %v10726_v48, %v5150_v11 }
 0x78c   : > { %v5152_v49 = vpop.f32.mrf.mxu0 }
 0x78d   : > { %11548 = vmatmul.mubr.msk.f32.gmra.mxu1 %vm16628_vm0, %v5151_v15 }
 0x78e   : > { %v5155_v57 = vpop.f32.mrf.mxu0 }
 0x78f   : > { %v5156_v13 = vadd.f32 %v10729_v23, %v5155_v57 }
 0x790   : > { %v5157_v39 = vpop.f32.mrf.mxu0 }
 0x791   : > { %11550 = vmatprep.mubr.msk.f32.mxu1 %vm16628_vm0, %v5156_v13 }
 0x792   : > { %v5158_v14 = vpop.f32.mrf.mxu0 }
 0x793   : > { %v5159_v3 = vadd.f32 %v10732_v31, %v5158_v14 }
 0x794   : > { %v5160_v7 = vpop.f32.mrf.mxu0 }
 0x795   : > { %11551 = vmatmul.mubr.msk.f32.gmra.mxu1 %vm16628_vm0, %v5159_v3 }
 0x796   : > { %v5163_v46 = vpop.f32.mrf.mxu0 }
 0x797   : > { %v5164_v0 = vadd.f32 %v10735_v33, %v5163_v46 }
 0x798   : > { %v5165_v6 = vpop.f32.mrf.mxu0 }
 0x799   : > { %11553 = vmatprep.mubr.msk.f32.mxu1 %vm16628_vm0, %v5164_v0 }
 0x79a   : > { %v5166_v51 = vpop.f32.mrf.mxu0 }
 0x79b   : > { %v5167_v35 = vadd.f32 %v10738_v26, %v5166_v51 }
 0x79c   : > { %v5168_v19 = vpop.f32.mrf.mxu0 }
 0x79d   : > { %11554 = vmatmul.mubr.msk.f32.gmra.mxu1 %vm16628_vm0, %v5167_v35 }
 0x79e   : > { %v5171_v28 = vpop.f32.mrf.mxu0 }
 0x79f   : > { %v5172_v61 = vadd.f32 %v10741_v8, %v5171_v28 }
 0x7a0   : > { %v5173_v29 = vpop.f32.mrf.mxu0 }
 0x7a1   : > { %11556 = vmatprep.mubr.msk.f32.mxu1 %vm16628_vm0, %v5172_v61 }
 0x7a2   : > { %v5174_v44 = vpop.f32.mrf.mxu0 }
 0x7a3   : > { %v5175_v62 = vadd.f32 %v10744_v34, %v5174_v44 }
 0x7a4   : > { %v5176_v24 = vpop.f32.mrf.mxu0 }
 0x7a5   : > { %11557 = vmatmul.mubr.msk.f32.gmra.mxu1 %vm16628_vm0, %v5175_v62 }
 0x7ed   : > { %v11513_v27 = vpop.f32.mrf.mxu0 }
 0x7ef   : > { %v5378_v63 = vpop.f32.mrf.mxu0 }
 0x7f1   : > { %v11565_v18 = vpop.f32.mrf.mxu0 }
 0x7f2   : > { %v5706_v52 = vadd.f32 %v11565_v18, %v11513_v27 }
 0x7f3   : > { %v5700_v16 = vpop.f32.mrf.mxu0 }
 0x7f4   : > { %v5864_v45 = vadd.f32 %v14456_v10, %v5706_v52  ;;  %v5701_v59 = vadd.f32 %v5700_v16, %v5378_v63 }
 0x7f5   : > { %v11516_v4 = vpop.f32.mrf.mxu1  ;;  %v11568_v42 = vpop.f32.mrf.mxu0 }
 0x7f6   : > { %v5863_v12 = vadd.f32 %v14456_v10, %v5701_v59  ;;  %v5716_v60 = vadd.f32 %v11568_v42, %v11516_v4  ;;  %v5896_v47 = vmax.f32 %v5864_v45, 0.0 }
 0x7f7   : > { %v5388_v1 = vpop.f32.mrf.mxu1  ;;  %v5710_v9 = vpop.f32.mrf.mxu0 }
 0x7f8   : > { %v5895_v43 = vmax.f32 %v5863_v12, 0.0  ;;  %v5866_v17 = vadd.f32 %v14456_v10, %v5716_v60  ;;  %v5711_v2 = vadd.f32 %v5710_v9, %v5388_v1 }
 0x7f9   : > { %v11571_v54 = vpop.f32.mrf.mxu0 }
 0x7fa   : > { %v14461_v22 = vpack.c.bf16 %v5896_v47, %v5895_v43  ;;  %11619 = vmatprep.mubr.msk.f32.mxu1 %vm16628_vm0, %v5895_v43  ;;  %v5865_v38 = vadd.f32 %v14456_v10, %v5711_v2  ;;  %v5898_v48 = vmax.f32 %v5866_v17, 0.0 }
 0x7fb   : > { %11620 = vmatmul.mubr.msk.f32.vlgmr.msra.gmra.mxu1 %vm16628_vm0, %v5896_v47  ;;  %v5720_v15 = vpop.f32.mrf.mxu0 }
 0x7fc   : > { %v5897_v11 = vmax.f32 %v5865_v38, 0.0 }
 0x7fd   : > { %v11519_v30 = vpop.f32.mrf.mxu1  ;;  %v11574_v39 = vpop.f32.mrf.mxu0 }
 0x7fe   : > { %v14466_v49 = vpack.c.bf16 %v5898_v48, %v5897_v11  ;;  %v5726_v23 = vadd.f32 %v11571_v54, %v11519_v30  ;;  %11622 = vmatprep.mubr.msk.f32.mxu1 %vm16628_vm0, %v5897_v11 }
 0x7ff   : > { %v5398_v57 = vpop.f32.mrf.mxu1  ;;  %11623 = vmatmul.mubr.msk.f32.gmra.mxu1 %vm16628_vm0, %v5898_v48  ;;  %v5730_v7 = vpop.f32.mrf.mxu0 }
 0x800   : > { %v5868_v56 = vadd.f32 %v14456_v10, %v5726_v23  ;;  %v5721_v13 = vadd.f32 %v5720_v15, %v5398_v57 }
 0x801   : > { %v11577_v26 = vpop.f32.mrf.mxu0 }
 0x802   : > { %v5867_v31 = vadd.f32 %v14456_v10, %v5721_v13  ;;  %v5900_v14 = vmax.f32 %v5868_v56, 0.0 }
 0x803   : > { %v5740_v8 = vpop.f32.mrf.mxu0 }
 0x804   : > { %v5899_v55 = vmax.f32 %v5867_v31, 0.0 }
 0x805   : > { %v11522_v3 = vpop.f32.mrf.mxu1  ;;  %v11580_v44 = vpop.f32.mrf.mxu0 }
 0x806   : > { %v14472_v33 = vpack.c.bf16 %v5900_v14, %v5899_v55  ;;  %v5736_v46 = vadd.f32 %v11574_v39, %v11522_v3  ;;  %11625 = vmatprep.mubr.msk.f32.mxu1 %vm16628_vm0, %v5899_v55 }
 0x807   : > { %v5408_v5 = vpop.f32.mrf.mxu1  ;;  %11626 = vmatmul.mubr.msk.f32.gmra.mxu1 %vm16628_vm0, %v5900_v14  ;;  %v5750_v40 = vpop.f32.mrf.mxu0 }
 0x808   : > { %v5870_v0 = vadd.f32 %v14456_v10, %v5736_v46  ;;  %v5731_v6 = vadd.f32 %v5730_v7, %v5408_v5 }
 0x809   : > { %v11583_v21 = vpop.f32.mrf.mxu0 }
 0x80a   : > { %v5869_v51 = vadd.f32 %v14456_v10, %v5731_v6  ;;  %v5902_v36 = vmax.f32 %v5870_v0, 0.0 }
 0x80b   : > { %v5760_v45 = vpop.f32.mrf.mxu0 }
 0x80c   : > { %v5901_v35 = vmax.f32 %v5869_v51, 0.0 }
 0x80d   : > { %v11525_v19 = vpop.f32.mrf.mxu1  ;;  %v11586_v1 = vpop.f32.mrf.mxu0 }
 0x80e   : > { %v14478_v28 = vpack.c.bf16 %v5902_v36, %v5901_v35  ;;  %v5746_v20 = vadd.f32 %v11577_v26, %v11525_v19  ;;  %11628 = vmatprep.mubr.msk.f32.mxu1 %vm16628_vm0, %v5901_v35 }
 0x80f   : > { %v5418_v61 = vpop.f32.mrf.mxu1  ;;  %11629 = vmatmul.mubr.msk.f32.gmra.mxu1 %vm16628_vm0, %v5902_v36  ;;  %v5770_v2 = vpop.f32.mrf.mxu0 }
 0x810   : > { %v5872_v29 = vadd.f32 %v14456_v10, %v5746_v20  ;;  %v5741_v34 = vadd.f32 %v5740_v8, %v5418_v61 }
 0x811   : > { %v11589_v15 = vpop.f32.mrf.mxu0 }
 0x812   : > { %v5871_v62 = vadd.f32 %v14456_v10, %v5741_v34  ;;  %v5904_v24 = vmax.f32 %v5872_v29, 0.0 }
 0x813   : > { %v5780_v39 = vpop.f32.mrf.mxu0 }
 0x814   : > { %v5903_v32 = vmax.f32 %v5871_v62, 0.0 }
 0x815   : > { %v11528_v37 = vpop.f32.mrf.mxu1  ;;  %v11592_v46 = vpop.f32.mrf.mxu0 }
 0x816   : > { %v14484_v58 = vpack.c.bf16 %v5904_v24, %v5903_v32  ;;  %v5756_v53 = vadd.f32 %v11580_v44, %v11528_v37  ;;  %11631 = vmatprep.mubr.msk.f32.mxu1 %vm16628_vm0, %v5903_v32 }
 0x817   : > { %v5428_v25 = vpop.f32.mrf.mxu1  ;;  %11632 = vmatmul.mubr.msk.f32.gmra.mxu1 %vm16628_vm0, %v5904_v24  ;;  %v5790_v51 = vpop.f32.mrf.mxu0 }
 0x818   : > { %v5874_v50 = vadd.f32 %v14456_v10, %v5756_v53  ;;  %v5751_v27 = vadd.f32 %v5750_v40, %v5428_v25 }
 0x819   : > { %v11595_v61 = vpop.f32.mrf.mxu0 }
 0x81a   : > { %v5873_v63 = vadd.f32 %v14456_v10, %v5751_v27  ;;  %v5906_v18 = vmax.f32 %v5874_v50, 0.0 }
 0x81b   : > { %v5800_v24 = vpop.f32.mrf.mxu0 }
 0x81c   : > { %v5905_v52 = vmax.f32 %v5873_v63, 0.0 }
 0x81d   : > { %v11531_v16 = vpop.f32.mrf.mxu1  ;;  %v11598_v50 = vpop.f32.mrf.mxu0 }
 0x81e   : > { %v14490_v59 = vpack.c.bf16 %v5906_v18, %v5905_v52  ;;  %v5766_v4 = vadd.f32 %v11583_v21, %v11531_v16  ;;  %11634 = vmatprep.mubr.msk.f32.mxu1 %vm16628_vm0, %v5905_v52 }
 0x81f   : > { %v5438_v42 = vpop.f32.mrf.mxu1  ;;  %11635 = vmatmul.mubr.msk.f32.gmra.mxu1 %vm16628_vm0, %v5906_v18  ;;  %v5810_v52 = vpop.f32.mrf.mxu0 }
 0x820   : > { %v5876_v12 = vadd.f32 %v14456_v10, %v5766_v4  ;;  %v5761_v60 = vadd.f32 %v5760_v45, %v5438_v42 }
 0x822   : > { %v5875_v9 = vadd.f32 %v14456_v10, %v5761_v60  ;;  %v5908_v47 = vmax.f32 %v5876_v12, 0.0  ;;  %v11601_v12 = vpop.f32.mrf.mxu0 }
 0x824   : > { %v5907_v43 = vmax.f32 %v5875_v9, 0.0 }
 0x825   : > { %v11534_v17 = vpop.f32.mrf.mxu1 }
 0x826   : > { %v14496_v54 = vpack.c.bf16 %v5908_v47, %v5907_v43  ;;  %v5776_v38 = vadd.f32 %v11586_v1, %v11534_v17  ;;  %11637 = vmatprep.mubr.msk.f32.mxu1 %vm16628_vm0, %v5907_v43  ;;  %v5820_v43 = vpop.f32.mrf.mxu0 }
 0x827   : > { %v5448_v48 = vpop.f32.mrf.mxu1  ;;  %11638 = vmatmul.mubr.msk.f32.gmra.mxu1 %vm16628_vm0, %v5908_v47 }
 0x828   : > { %v5878_v11 = vadd.f32 %v14456_v10, %v5776_v38  ;;  %v5771_v30 = vadd.f32 %v5770_v2, %v5448_v48 }
 0x82a   : > { %v5877_v23 = vadd.f32 %v14456_v10, %v5771_v30  ;;  %v5910_v57 = vmax.f32 %v5878_v11, 0.0  ;;  %v11604_v11 = vpop.f32.mrf.mxu0 }
 0x82c   : > { %v5909_v56 = vmax.f32 %v5877_v23, 0.0 }
 0x82d   : > { %v11537_v13 = vpop.f32.mrf.mxu1 }
 0x82e   : > { %v14502_v31 = vpack.c.bf16 %v5910_v57, %v5909_v56  ;;  %v5786_v14 = vadd.f32 %v11589_v15, %v11537_v13  ;;  %11640 = vmatprep.mubr.msk.f32.mxu1 %vm16628_vm0, %v5909_v56  ;;  %v5830_v56 = vpop.f32.mrf.mxu0 }
 0x82f   : > { %v5458_v55 = vpop.f32.mrf.mxu1  ;;  %11641 = vmatmul.mubr.msk.f32.gmra.mxu1 %vm16628_vm0, %v5910_v57 }
 0x830   : > { %v5880_v3 = vadd.f32 %v14456_v10, %v5786_v14  ;;  %v5781_v7 = vadd.f32 %v5780_v39, %v5458_v55 }
 0x832   : > { %v5879_v5 = vadd.f32 %v14456_v10, %v5781_v7  ;;  %v5912_v0 = vmax.f32 %v5880_v3, 0.0  ;;  %v11607_v3 = vpop.f32.mrf.mxu0 }
 0x834   : > { %v5911_v6 = vmax.f32 %v5879_v5, 0.0 }
 0x835   : > { %v11540_v26 = vpop.f32.mrf.mxu1 }
 0x836   : > { %v5796_v36 = vadd.f32 %v11592_v46, %v11540_v26  ;;  %11643 = vmatprep.mubr.msk.f32.mxu1 %vm16628_vm0, %v5911_v6  ;;  %v14509_v35 = vpack.c.bf16 %v5912_v0, %v5911_v6  ;;  %v5840_v6 = vpop.f32.mrf.mxu0 }
 0x837   : > { %v5468_v19 = vpop.f32.mrf.mxu1  ;;  %11644 = vmatmul.mubr.msk.f32.gmra.mxu1 %vm16628_vm0, %v5912_v0 }
 0x838   : > { %v5882_v8 = vadd.f32 %v14456_v10, %v5796_v36  ;;  %v5791_v20 = vadd.f32 %v5790_v51, %v5468_v19 }
 0x83a   : > { %v5881_v29 = vadd.f32 %v14456_v10, %v5791_v20  ;;  %v5914_v34 = vmax.f32 %v5882_v8, 0.0  ;;  %v11610_v20 = vpop.f32.mrf.mxu0 }
 0x83c   : > { %v5913_v44 = vmax.f32 %v5881_v29, 0.0 }
 0x83d   : > { %v11543_v62 = vpop.f32.mrf.mxu1 }
 0x83e   : > { %v5806_v32 = vadd.f32 %v11595_v61, %v11543_v62  ;;  %11646 = vmatprep.mubr.msk.f32.mxu1 %vm16628_vm0, %v5913_v44  ;;  %v14515_v37 = vpack.c.bf16 %v5914_v34, %v5913_v44 }
 0x83f   : > { %v5478_v40 = vpop.f32.mrf.mxu1  ;;  %11647 = vmatmul.mubr.msk.f32.gmra.mxu1 %vm16628_vm0, %v5914_v34 }
 0x840   : > { %v5801_v53 = vadd.f32 %v5800_v24, %v5478_v40  ;;  %v14519_v25 = vadd.f32 %v14456_v10, %v5806_v32  ;;  %v5850_v24 = vpop.f32.mrf.mxu0 }
 0x842   : > { %v14522_v27 = vadd.f32 %v14456_v10, %v5801_v53  ;;  %v5916_v63 = vmax.f32 %v14519_v25, 0.0  ;;  %v12230_v25 = vld [vmem:[%s14583_s23 + $0x4] ss:$8 sps:$4 sm:$0xff]  }
 0x844   : > { %v5915_v21 = vmax.f32 %v14522_v27, 0.0  ;;  %v12228_v27 = vld [vmem:[%s14583_s23] ss:$8 sps:$4 sm:$0xff]  }
 0x845   : > { %v11546_v18 = vpop.f32.mrf.mxu1 }
 0x846   : > { %v5816_v16 = vadd.f32 %v11598_v50, %v11546_v18  ;;  %11649 = vmatprep.mubr.msk.f32.mxu1 %vm16628_vm0, %v5915_v21 }
 0x847   : > { %v5488_v45 = vpop.f32.mrf.mxu1  ;;  %11650 = vmatmul.mubr.msk.f32.gmra.mxu1 %vm16628_vm0, %v5916_v63 }
 0x848   : > { %v5811_v4 = vadd.f32 %v5810_v52, %v5488_v45  ;;  %v14533_v42 = vadd.f32 %v14456_v10, %v5816_v16 }
 0x84a   : > { %v14536_v60 = vadd.f32 %v14456_v10, %v5811_v4  ;;  %v5918_v9 = vmax.f32 %v14533_v42, 0.0  ;;  %v14570_v42 = vpack.c.bf16 %v5916_v63, %v5915_v21  ;;  %v14596_v21 = vld [vmem:[%s16542_s17 + $0x1] ss:$0 sm:$0xff]  ;;  %v12236_v63 = vld [vmem:[%s14583_s23 + $0x14] ss:$8 sps:$4 sm:$0xff]  }
 0x84c   : > { %v5917_v1 = vmax.f32 %v14536_v60, 0.0 }
 0x84d   : > { %v11549_v47 = vpop.f32.mrf.mxu1 }
 0x84e   : > { %v5826_v17 = vadd.f32 %v11601_v12, %v11549_v47  ;;  %11652 = vmatprep.mubr.msk.f32.mxu1 %vm16628_vm0, %v5917_v1  ;;  %v12234_v12 = vld [vmem:[%s14583_s23 + $0x10] ss:$8 sps:$4 sm:$0xff]  }
 0x84f   : > { %v5498_v2 = vpop.f32.mrf.mxu1  ;;  %11653 = vmatmul.mubr.msk.f32.gmra.mxu1 %vm16628_vm0, %v5918_v9 }
 0x850   : > { %v5821_v38 = vadd.f32 %v5820_v43, %v5498_v2  ;;  %v5888_v48 = vadd.f32 %v14456_v10, %v5826_v17 }
 0x852   : > { %v5887_v30 = vadd.f32 %v14456_v10, %v5821_v38  ;;  %v5920_v23 = vmax.f32 %v5888_v48, 0.0 }
 0x854   : > { %v5919_v15 = vmax.f32 %v5887_v30, 0.0 }
 0x855   : > { %v11552_v57 = vpop.f32.mrf.mxu1 }
 0x856   : > { %v5836_v13 = vadd.f32 %v11604_v11, %v11552_v57  ;;  %11655 = vmatprep.mubr.msk.f32.mxu1 %vm16628_vm0, %v5919_v15  ;;  %v7586_v4 = vpack.c.bf16 %v5920_v23, %v5919_v15  ;;  %v12242_v11 = vld [vmem:[%s14583_s23 + $0x24] ss:$8 sps:$4 sm:$0xff]   ;;  %v12240_v15 = vld [vmem:[%s14583_s23 + $0x20] ss:$8 sps:$4 sm:$0xff]  }
 0x857   : > { %v5508_v39 = vpop.f32.mrf.mxu1  ;;  %11656 = vmatmul.mubr.msk.f32.gmra.mxu1 %vm16628_vm0, %v5920_v23 }
 0x858   : > { %v5831_v14 = vadd.f32 %v5830_v56, %v5508_v39  ;;  %v5890_v55 = vadd.f32 %v14456_v10, %v5836_v13 }
 0x85a   : > { %v5889_v7 = vadd.f32 %v14456_v10, %v5831_v14  ;;  %v5922_v5 = vmax.f32 %v5890_v55, 0.0  ;;  %v12248_v14 = vld [vmem:[%s14583_s23 + $0x34] ss:$8 sps:$4 sm:$0xff]  }
 0x85c   : > { %v5921_v46 = vmax.f32 %v5889_v7, 0.0 }
 0x85d   : > { %v11555_v0 = vpop.f32.mrf.mxu1 }
 0x85e   : > { %v5846_v26 = vadd.f32 %v11607_v3, %v11555_v0  ;;  %11658 = vmatprep.mubr.msk.f32.mxu1 %vm16628_vm0, %v5921_v46  ;;  %v7587_v45 = vpack.c.bf16 %v5922_v5, %v5921_v46  ;;  %v12254_v0 = vld [vmem:[%s14583_s23 + $0x44] ss:$8 sps:$4 sm:$0xff]  }
 0x85f   : > { %v5518_v51 = vpop.f32.mrf.mxu1  ;;  %11659 = vmatmul.mubr.msk.f32.gmra.mxu1 %vm16628_vm0, %v5922_v5 }
 0x860   : > { %v5841_v36 = vadd.f32 %v5840_v6, %v5518_v51  ;;  %v5892_v19 = vadd.f32 %v14456_v10, %v5846_v26 }
 0x862   : > { %v5891_v8 = vadd.f32 %v14456_v10, %v5841_v36  ;;  %v5924_v29 = vmax.f32 %v5892_v19, 0.0 }
 0x864   : > { %v5923_v61 = vmax.f32 %v5891_v8, 0.0  ;;  %v12260_v8 = vld [vmem:[%s14583_s23 + $0x54] ss:$8 sps:$4 sm:$0xff]  }
 0x865   : > { %v11558_v34 = vpop.f32.mrf.mxu1 }
 0x866   : > { %v5856_v44 = vadd.f32 %v11610_v20, %v11558_v34  ;;  %11661 = vmatprep.mubr.msk.f32.mxu1 %vm16628_vm0, %v5923_v61  ;;  %v7588_v16 = vpack.c.bf16 %v5924_v29, %v5923_v61  ;;  %v12258_v20 = vld [vmem:[%s14583_s23 + $0x50] ss:$8 sps:$4 sm:$0xff]  }
 0x867   : > { %v5528_v62 = vpop.f32.mrf.mxu1  ;;  %11662 = vmatmul.mubr.msk.f32.gmra.mxu1 %vm16628_vm0, %v5924_v29 }
 0x868   : > { %v5894_v32 = vadd.f32 %v14456_v10, %v5856_v44  ;;  %v5851_v40 = vadd.f32 %v5850_v24, %v5528_v62  ;;  %v12266_v44 = vld [vmem:[%s14583_s23 + $0x64] ss:$8 sps:$4 sm:$0xff]   ;;  %v12264_v62 = vld [vmem:[%s14583_s23 + $0x60] ss:$8 sps:$4 sm:$0xff]  }
 0x86a   : > { %v5893_v53 = vadd.f32 %v14456_v10, %v5851_v40  ;;  %v5926_v50 = vmax.f32 %v5894_v32, 0.0  ;;  %v7585_v10 = vpack.c.bf16 %v5918_v9, %v5917_v1 }
 0x86c   : > { %v5925_v18 = vmax.f32 %v5893_v53, 0.0  ;;  %v12272_v53 = vld [vmem:[%s14583_s23 + $0x74] ss:$8 sps:$4 sm:$0xff]  }
 0x86e   : > { %11664 = vmatprep.mubr.msk.f32.mxu1 %vm16628_vm0, %v5925_v18  ;;  %v7589_v52 = vpack.c.bf16 %v5926_v50, %v5925_v18  ;;  %v12270_v18 = vld [vmem:[%s14583_s23 + $0x70] ss:$8 sps:$4 sm:$0xff]  }
 0x86f   : > { %11665 = vmatmul.mubr.msk.f32.gmra.mxu1 %vm16628_vm0, %v5926_v50 }
 0x870   : > { %10891 = vmatprep.subr.bf16.mxu1 %v7589_v52  ;;  %11003 = vmatprep.subr.bf16.mxu0 %v7589_v52 }
 0x871   : > { %10892 = vmatpush3.bf16.msra.mxu1 %v14502_v31  ;;  %7814 = vmatprep.mubr.bf16.mxu1 %v12230_v25 }
 0x872   : > { %10893 = vmatprep.subr.bf16.mxu1 %v7588_v16 }
 0x875   : > { %10894 = vmatpush3.bf16.msra.mxu1 %v14496_v54 }
 0x876   : > { %10895 = vmatprep.subr.bf16.mxu1 %v7587_v45 }
 0x879   : > { %10896 = vmatpush3.bf16.msra.mxu1 %v14490_v59 }
 0x87a   : > { %10897 = vmatprep.subr.bf16.mxu1 %v7586_v4 }
 0x87d   : > { %10898 = vmatpush3.bf16.msra.mxu1 %v14484_v58 }
 0x87e   : > { %10899 = vmatprep.subr.bf16.mxu1 %v7585_v10 }
 0x881   : > { %10900 = vmatpush3.bf16.msra.mxu1 %v14478_v28 }
 0x882   : > { %10901 = vmatprep.subr.bf16.mxu1 %v14570_v42 }
 0x885   : > { %10902 = vmatpush3.bf16.msra.mxu1 %v14472_v33 }
 0x886   : > { %10903 = vmatprep.subr.bf16.mxu1 %v14515_v37 }
 0x889   : > { %10904 = vmatpush3.bf16.msra.mxu1 %v14466_v49 }
 0x88a   : > { %10905 = vmatprep.subr.bf16.mxu1 %v14509_v35 }
 0x88d   : > { %10906 = vmatpush3.bf16.msra.mxu1 %v14461_v22 }
 0x890   : > { %7815 = vmatmul.mubr.bf16.vlgmr.msra.gmra.mxu1 %v12228_v27  ;;  %v12276_v27 = vld [vmem:[%s14583_s23 + $0x80] ss:$8 sps:$4 sm:$0xff]  }
 0x891   : > { %7822 = vmatprep.mubr.bf16.mxu1 %v12236_v63 }
 0x898   : > { %7823 = vmatmul.mubr.bf16.gmra.mxu1 %v12234_v12 }
 0x899   : > { %7830 = vmatprep.mubr.bf16.mxu1 %v12242_v11 }
 0x8a0   : > { %7831 = vmatmul.mubr.bf16.gmra.mxu1 %v12240_v15  ;;  %v12290_v15 = vld [vmem:[%s14583_s23 + $0xa4] ss:$8 sps:$4 sm:$0xff]  }
 0x8a1   : > { %7838 = vmatprep.mubr.bf16.mxu1 %v12248_v14 }
 0x8bb   : > { %v11621_v60 = vpop.f32.mrf.mxu1 }
 0x8bc   : > { %v6103_v1 = vadd.f32 %v11621_v60, %v14596_v21 }
 0x8bd   : > { %v6097_v9 = vpop.f32.mrf.mxu1 }
 0x8be   : > { %v6098_v47 = vadd.f32 %v14596_v21, %v6097_v9  ;;  %v6257_v2 = vmax.f32 %v6103_v1, 0.0 }
 0x8bf   : > { %v11624_v43 = vpop.f32.mrf.mxu1 }
 0x8c0   : > { %v6256_v17 = vmax.f32 %v6098_v47, 0.0  ;;  %v6113_v38 = vadd.f32 %v11624_v43, %v14596_v21  ;;  %v12284_v47 = vld [vmem:[%s14583_s23 + $0x94] ss:$8 sps:$4 sm:$0xff]  }
 0x8c1   : > { %v6107_v48 = vpop.f32.mrf.mxu1 }
 0x8c2   : > { %11683 = vmatprep.mubr.msk.f32.mxu0 %vm16626_vm1, %v6256_v17  ;;  %v6108_v30 = vadd.f32 %v14596_v21, %v6107_v48  ;;  %v6259_v57 = vmax.f32 %v6113_v38, 0.0  ;;  %v12282_v17 = vld [vmem:[%s14583_s23 + $0x90] ss:$8 sps:$4 sm:$0xff]  }
 0x8c3   : > { %11684 = vmatmul.mubr.msk.f32.vlgmr.msra.gmra.mxu0 %vm16626_vm1, %v6257_v2 }
 0x8c4   : > { %11004 = vmatpush3.bf16.msra.mxu0 %v14502_v31  ;;  %v6258_v23 = vmax.f32 %v6108_v30, 0.0  ;;  %v12246_v31 = vld [vmem:[%s14583_s23 + $0x30] ss:$8 sps:$4 sm:$0xff]  }
 0x8c5   : > { %11005 = vmatprep.subr.bf16.mxu0 %v7588_v16  ;;  %7839 = vmatmul.mubr.bf16.gmra.mxu1 %v12246_v31 }
 0x8c6   : > { %11686 = vmatprep.mubr.msk.f32.mxu0 %vm16626_vm1, %v6258_v23  ;;  %7846 = vmatprep.mubr.bf16.mxu1 %v12254_v0 }
 0x8c7   : > { %v11627_v56 = vpop.f32.mrf.mxu1  ;;  %11687 = vmatmul.mubr.msk.f32.gmra.mxu0 %vm16626_vm1, %v6259_v57  ;;  %v12288_v57 = vld [vmem:[%s14583_s23 + $0xa0] ss:$8 sps:$4 sm:$0xff]  }
 0x8c8   : > { %11006 = vmatpush3.bf16.msra.mxu0 %v14496_v54  ;;  %v6123_v13 = vadd.f32 %v11627_v56, %v14596_v21 }
 0x8c9   : > { %11007 = vmatprep.subr.bf16.mxu0 %v7587_v45  ;;  %v6117_v39 = vpop.f32.mrf.mxu1 }
 0x8ca   : > { %v6118_v55 = vadd.f32 %v14596_v21, %v6117_v39  ;;  %v6261_v7 = vmax.f32 %v6123_v13, 0.0  ;;  %v12568_v39 = vmov 3  }
 0x8cb   : > { %11961 = vset.pattern.permute.xlu1 %v12568_v39  ;;  %11960 = vset.pattern.permute.xlu0 %v12568_v39  ;;  %v12281_v39 = vld [vmem:[%s14591_s30 + $0x84] ss:$8 sps:$4 sm:$0xff]  }
 0x8cc   : > { %11008 = vmatpush3.bf16.msra.mxu0 %v14490_v59  ;;  %v6260_v3 = vmax.f32 %v6118_v55, 0.0  ;;  %v12252_v59 = vld [vmem:[%s14583_s23 + $0x40] ss:$8 sps:$4 sm:$0xff]  }
 0x8cd   : > { %11009 = vmatprep.subr.bf16.mxu0 %v7586_v4  ;;  %7847 = vmatmul.mubr.bf16.gmra.mxu1 %v12252_v59 }
 0x8ce   : > { %11689 = vmatprep.mubr.msk.f32.mxu0 %vm16626_vm1, %v6260_v3  ;;  %7854 = vmatprep.mubr.bf16.mxu1 %v12260_v8  ;;  %v12296_v3 = vld [vmem:[%s14583_s23 + $0xb4] ss:$8 sps:$4 sm:$0xff]  }
 0x8cf   : > { %v11630_v54 = vpop.f32.mrf.mxu1  ;;  %11690 = vmatmul.mubr.msk.f32.gmra.mxu0 %vm16626_vm1, %v6261_v7 }
 0x8d0   : > { %11010 = vmatpush3.bf16.msra.mxu0 %v14484_v58  ;;  %v6133_v46 = vadd.f32 %v11630_v54, %v14596_v21  ;;  %v12294_v54 = vld [vmem:[%s14583_s23 + $0xb0] ss:$8 sps:$4 sm:$0xff]  }
 0x8d1   : > { %11011 = vmatprep.subr.bf16.mxu0 %v7585_v10  ;;  %v6127_v5 = vpop.f32.mrf.mxu1 }
 0x8d2   : > { %v6128_v6 = vadd.f32 %v14596_v21, %v6127_v5  ;;  %v6263_v51 = vmax.f32 %v6133_v46, 0.0 }
 0x8d4   : > { %11012 = vmatpush3.bf16.msra.mxu0 %v14478_v28  ;;  %v6262_v26 = vmax.f32 %v6128_v6, 0.0 }
 0x8d5   : > { %11013 = vmatprep.subr.bf16.mxu0 %v14570_v42  ;;  %7855 = vmatmul.mubr.bf16.gmra.mxu1 %v12258_v20  ;;  %v12278_v42 = vld [vmem:[%s14583_s23 + $0x84] ss:$8 sps:$4 sm:$0xff]  }
 0x8d6   : > { %11692 = vmatprep.mubr.msk.f32.mxu0 %vm16626_vm1, %v6262_v26  ;;  %7862 = vmatprep.mubr.bf16.mxu1 %v12266_v44  ;;  %v12302_v26 = vld [vmem:[%s14583_s23 + $0xc4] ss:$8 sps:$4 sm:$0xff]  }
 0x8d7   : > { %v11633_v58 = vpop.f32.mrf.mxu1  ;;  %11693 = vmatmul.mubr.msk.f32.gmra.mxu0 %vm16626_vm1, %v6263_v51 }
 0x8d8   : > { %11014 = vmatpush3.bf16.msra.mxu0 %v14472_v33  ;;  %v6143_v36 = vadd.f32 %v11633_v58, %v14596_v21  ;;  %v12300_v58 = vld [vmem:[%s14583_s23 + $0xc0] ss:$8 sps:$4 sm:$0xff]  }
 0x8d9   : > { %11015 = vmatprep.subr.bf16.mxu0 %v14515_v37  ;;  %v6137_v19 = vpop.f32.mrf.mxu1 }
 0x8da   : > { %v6138_v28 = vadd.f32 %v14596_v21, %v6137_v19  ;;  %v6265_v29 = vmax.f32 %v6143_v36, 0.0 }
 0x8dc   : > { %11016 = vmatpush3.bf16.msra.mxu0 %v14466_v49  ;;  %v6264_v61 = vmax.f32 %v6138_v28, 0.0 }
 0x8dd   : > { %11017 = vmatprep.subr.bf16.mxu0 %v14509_v35  ;;  %7863 = vmatmul.mubr.bf16.gmra.mxu1 %v12264_v62 }
 0x8de   : > { %11695 = vmatprep.mubr.msk.f32.mxu0 %vm16626_vm1, %v6264_v61  ;;  %7870 = vmatprep.mubr.bf16.mxu1 %v12272_v53  ;;  %v12308_v61 = vld [vmem:[%s14583_s23 + $0xd4] ss:$8 sps:$4 sm:$0xff]  }
 0x8df   : > { %v11636_v33 = vpop.f32.mrf.mxu1  ;;  %11696 = vmatmul.mubr.msk.f32.gmra.mxu0 %vm16626_vm1, %v6265_v29 }
 0x8e0   : > { %11018 = vmatpush3.bf16.msra.mxu0 %v14461_v22  ;;  %v6153_v37 = vadd.f32 %v11636_v33, %v14596_v21  ;;  %v12306_v33 = vld [vmem:[%s14583_s23 + $0xd0] ss:$8 sps:$4 sm:$0xff]  }
 0x8e1   : > { %v6147_v34 = vpop.f32.mrf.mxu1 }
 0x8e2   : > { %v6148_v49 = vadd.f32 %v14596_v21, %v6147_v34  ;;  %v6267_v35 = vmax.f32 %v6153_v37, 0.0 }
 0x8e4   : > { %v6266_v24 = vmax.f32 %v6148_v49, 0.0 }
 0x8e5   : > { %7871 = vmatmul.mubr.bf16.gmra.mxu1 %v12270_v18 }
 0x8e6   : > { %11698 = vmatprep.mubr.msk.f32.mxu0 %vm16626_vm1, %v6266_v24  ;;  %7878 = vmatprep.mubr.bf16.mxu1 %v12278_v42  ;;  %v12314_v24 = vld [vmem:[%s14583_s23 + $0xe4] ss:$8 sps:$4 sm:$0xff]  }
 0x8e7   : > { %v11639_v32 = vpop.f32.mrf.mxu1  ;;  %11699 = vmatmul.mubr.msk.f32.gmra.mxu0 %vm16626_vm1, %v6267_v35 }
 0x8e8   : > { %v6163_v22 = vadd.f32 %v11639_v32, %v14596_v21  ;;  %v12312_v32 = vld [vmem:[%s14583_s23 + $0xe0] ss:$8 sps:$4 sm:$0xff]  }
 0x8e9   : > { %v6157_v40 = vpop.f32.mrf.mxu1 }
 0x8ea   : > { %v6158_v50 = vadd.f32 %v14596_v21, %v6157_v40  ;;  %v6269_v16 = vmax.f32 %v6163_v22, 0.0 }
 0x8ec   : > { %v6268_v52 = vmax.f32 %v6158_v50, 0.0 }
 0x8ed   : > { %7879 = vmatmul.mubr.bf16.gmra.mxu1 %v12276_v27 }
 0x8ee   : > { %11701 = vmatprep.mubr.msk.f32.mxu0 %vm16626_vm1, %v6268_v52  ;;  %7886 = vmatprep.mubr.bf16.mxu1 %v12284_v47  ;;  %v12320_v52 = vld [vmem:[%s14583_s23 + $0xf4] ss:$8 sps:$4 sm:$0xff]  }
 0x8ef   : > { %v11642_v45 = vpop.f32.mrf.mxu1  ;;  %11702 = vmatmul.mubr.msk.f32.gmra.mxu0 %vm16626_vm1, %v6269_v16  ;;  %v12239_v47 = vld [vmem:[%s14591_s30 + $0x14] ss:$8 sps:$4 sm:$0xff]  }
 0x8f0   : > { %v6173_v4 = vadd.f32 %v11642_v45, %v14596_v21  ;;  %v12318_v45 = vld [vmem:[%s14583_s23 + $0xf0] ss:$8 sps:$4 sm:$0xff]   ;;  %s17256_s23 = sld [smem:[#allocation86_spill]] }
 0x8f1   : > { %v6167_v10 = vpop.f32.mrf.mxu1 }
 0x8f2   : > { %v6168_v25 = vadd.f32 %v14596_v21, %v6167_v10  ;;  %v6271_v12 = vmax.f32 %v6173_v4, 0.0 }
 0x8f4   : > { %v6270_v63 = vmax.f32 %v6168_v25, 0.0 }
 0x8f5   : > { %7887 = vmatmul.mubr.bf16.gmra.mxu1 %v12282_v17  ;;  %v12243_v17 = vld [vmem:[%s14591_s30 + $0x20] ss:$8 sps:$4 sm:$0xff]  }
 0x8f6   : > { %11704 = vmatprep.mubr.msk.f32.mxu0 %vm16626_vm1, %v6270_v63  ;;  %7894 = vmatprep.mubr.bf16.mxu1 %v12290_v15  ;;  %v12261_v15 = vld [vmem:[%s14591_s30 + $0x50] ss:$8 sps:$4 sm:$0xff]  }
 0x8f7   : > { %v11645_v60 = vpop.f32.mrf.mxu1  ;;  %11705 = vmatmul.mubr.msk.f32.gmra.mxu0 %vm16626_vm1, %v6271_v12 }
 0x8f8   : > { %v6183_v1 = vadd.f32 %v11645_v60, %v14596_v21  ;;  %v12233_v60 = vld [vmem:[%s14591_s30 + $0x4] ss:$8 sps:$4 sm:$0xff]  }
 0x8f9   : > { %v6177_v9 = vpop.f32.mrf.mxu1 }
 0x8fa   : > { %v6178_v43 = vadd.f32 %v14596_v21, %v6177_v9  ;;  %v6273_v38 = vmax.f32 %v6183_v1, 0.0  ;;  %v12231_v9 = vld [vmem:[%s14591_s30] ss:$8 sps:$4 sm:$0xff]  }
 0x8fc   : > { %v6272_v2 = vmax.f32 %v6178_v43, 0.0  ;;  %v12237_v43 = vld [vmem:[%s14591_s30 + $0x10] ss:$8 sps:$4 sm:$0xff]  }
 0x8fd   : > { %7895 = vmatmul.mubr.bf16.gmra.mxu1 %v12288_v57  ;;  %v12267_v57 = vld [vmem:[%s14591_s30 + $0x60] ss:$8 sps:$4 sm:$0xff]  }
 0x8fe   : > { %11707 = vmatprep.mubr.msk.f32.mxu0 %vm16626_vm1, %v6272_v2  ;;  %7902 = vmatprep.mubr.bf16.mxu1 %v12296_v3  ;;  %v12251_v2 = vld [vmem:[%s14591_s30 + $0x34] ss:$8 sps:$4 sm:$0xff]  }
 0x8ff   : > { %v11648_v48 = vpop.f32.mrf.mxu1  ;;  %11708 = vmatmul.mubr.msk.f32.gmra.mxu0 %vm16626_vm1, %v6273_v38  ;;  %v12249_v38 = vld [vmem:[%s14591_s30 + $0x30] ss:$8 sps:$4 sm:$0xff]  }
 0x900   : > { %v6193_v11 = vadd.f32 %v11648_v48, %v14596_v21  ;;  %v12257_v48 = vld [vmem:[%s14591_s30 + $0x44] ss:$8 sps:$4 sm:$0xff]   ;;  %v8298_v3 = vld [vmem:[%s16539_s14 + $0x10] sm:$0xff] }
 0x901   : > { %v6187_v30 = vpop.f32.mrf.mxu1 }
 0x902   : > { %v6188_v23 = vadd.f32 %v14596_v21, %v6187_v30  ;;  %v6275_v13 = vmax.f32 %v6193_v11, 0.0  ;;  %v12255_v11 = vld [vmem:[%s14591_s30 + $0x40] ss:$8 sps:$4 sm:$0xff]   ;;  %v12263_v30 = vld [vmem:[%s14591_s30 + $0x54] ss:$8 sps:$4 sm:$0xff]  }
 0x904   : > { %v6274_v56 = vmax.f32 %v6188_v23, 0.0  ;;  %v12269_v23 = vld [vmem:[%s14591_s30 + $0x64] ss:$8 sps:$4 sm:$0xff]  }
 0x905   : > { %7903 = vmatmul.mubr.bf16.gmra.mxu1 %v12294_v54  ;;  %v12287_v54 = vld [vmem:[%s14591_s30 + $0x94] ss:$8 sps:$4 sm:$0xff]  }
 0x906   : > { %11710 = vmatprep.mubr.msk.f32.mxu0 %vm16626_vm1, %v6274_v56  ;;  %7910 = vmatprep.mubr.bf16.mxu1 %v12302_v26  ;;  %v12275_v56 = vld [vmem:[%s14591_s30 + $0x74] ss:$8 sps:$4 sm:$0xff]  }
 0x907   : > { %v11651_v14 = vpop.f32.mrf.mxu1  ;;  %11711 = vmatmul.mubr.msk.f32.gmra.mxu0 %vm16626_vm1, %v6275_v13  ;;  %v12273_v13 = vld [vmem:[%s14591_s30 + $0x70] ss:$8 sps:$4 sm:$0xff]  }
 0x908   : > { %v6203_v55 = vadd.f32 %v11651_v14, %v14596_v21 }
 0x909   : > { %v6197_v31 = vpop.f32.mrf.mxu1 }
 0x90a   : > { %v6198_v7 = vadd.f32 %v14596_v21, %v6197_v31  ;;  %v6277_v5 = vmax.f32 %v6203_v55, 0.0  ;;  %v8299_v55 = vld [vmem:[%s16539_s14 + $0x18] sm:$0xff] }
 0x90b   : > { %11787 = vmatprep.subr.mxu0 %v8299_v55 }
 0x90c   : > { %v6276_v46 = vmax.f32 %v6198_v7, 0.0  ;;  %v12279_v7 = vld [vmem:[%s14591_s30 + $0x80] ss:$8 sps:$4 sm:$0xff]  }
 0x90d   : > { %7911 = vmatmul.mubr.bf16.gmra.mxu1 %v12300_v58 }
 0x90e   : > { %11713 = vmatprep.mubr.msk.f32.mxu0 %vm16626_vm1, %v6276_v46  ;;  %7918 = vmatprep.mubr.bf16.mxu1 %v12308_v61  ;;  %v8300_v61 = vld [vmem:[%s16540_s15] sm:$0xff] }
 0x90f   : > { %v11654_v0 = vpop.f32.mrf.mxu1  ;;  %11714 = vmatmul.mubr.msk.f32.gmra.mxu0 %vm16626_vm1, %v6277_v5  ;;  %v8297_v5 = vld [vmem:[%s16539_s14 + $0x8] sm:$0xff] }
 0x910   : > { %v6213_v6 = vadd.f32 %v11654_v0, %v14596_v21 }
 0x911   : > { %v6207_v59 = vpop.f32.mrf.mxu1 }
 0x912   : > { %v6208_v51 = vadd.f32 %v14596_v21, %v6207_v59  ;;  %v6279_v19 = vmax.f32 %v6213_v6, 0.0  ;;  %v8296_v6 = vld [vmem:[%s16539_s14] sm:$0xff]  ;;  %v8303_v59 = vld [vmem:[%s16540_s15 + $0x18] sm:$0xff] }
 0x913   : > { %11731 = vmatprep.subr.mxu1 %v8303_v59 }
 0x914   : > { %v6278_v36 = vmax.f32 %v6208_v51, 0.0  ;;  %11732 = vmatpush3.msra.mxu1 %v8303_v59  ;;  %v8302_v51 = vld [vmem:[%s16540_s15 + $0x10] sm:$0xff] }
 0x915   : > { %7919 = vmatmul.mubr.bf16.gmra.mxu1 %v12306_v33  ;;  %11733 = vmatprep.subr.mxu1 %v8302_v51  ;;  %v12323_v59 = vld [vmem:[%s14591_s30 + $0xf4] ss:$8 sps:$4 sm:$0xff]  }
 0x916   : > { %11716 = vmatprep.mubr.msk.f32.mxu0 %vm16626_vm1, %v6278_v36  ;;  %7926 = vmatprep.mubr.bf16.mxu1 %v12314_v24  ;;  %v12285_v36 = vld [vmem:[%s14591_s30 + $0x90] ss:$8 sps:$4 sm:$0xff]  }
 0x917   : > { %v11657_v8 = vpop.f32.mrf.mxu1  ;;  %11717 = vmatmul.mubr.msk.f32.gmra.mxu0 %vm16626_vm1, %v6279_v19  ;;  %v8301_v19 = vld [vmem:[%s16540_s15 + $0x8] sm:$0xff]  ;;  %11734 = vmatpush3.msra.mxu1 %v8302_v51 }
 0x918   : > { %v6223_v28 = vadd.f32 %v11657_v8, %v14596_v21  ;;  %v12293_v8 = vld [vmem:[%s14591_s30 + $0xa4] ss:$8 sps:$4 sm:$0xff]   ;;  %11735 = vmatprep.subr.mxu1 %v8301_v19 }
 0x919   : > { %v6217_v20 = vpop.f32.mrf.mxu1  ;;  %11736 = vmatpush3.msra.mxu1 %v8301_v19 }
 0x91a   : > { %v6218_v29 = vadd.f32 %v14596_v21, %v6217_v20  ;;  %v6281_v34 = vmax.f32 %v6223_v28, 0.0  ;;  %v14762_v20 = vld [vmem:[%s16542_s17 + $0x2] ss:$0 sm:$0xff]  ;;  %11737 = vmatprep.subr.mxu1 %v8300_v61 }
 0x91b   : > { %11738 = vmatpush3.msra.mxu1 %v8300_v61 }
 0x91c   : > { %v6280_v37 = vmax.f32 %v6218_v29, 0.0 }
 0x91d   : > { %7927 = vmatmul.mubr.bf16.gmra.mxu1 %v12312_v32 }
 0x91e   : > { %11719 = vmatprep.mubr.msk.f32.mxu0 %vm16626_vm1, %v6280_v37  ;;  %7934 = vmatprep.mubr.bf16.mxu1 %v12320_v52 }
 0x91f   : > { %v11660_v44 = vpop.f32.mrf.mxu1  ;;  %11720 = vmatmul.mubr.msk.f32.gmra.mxu0 %vm16626_vm1, %v6281_v34 }
 0x920   : > { %v6233_v49 = vadd.f32 %v11660_v44, %v14596_v21 }
 0x921   : > { %v6227_v62 = vpop.f32.mrf.mxu1 }
 0x922   : > { %v6228_v35 = vadd.f32 %v14596_v21, %v6227_v62  ;;  %v6283_v40 = vmax.f32 %v6233_v49, 0.0  ;;  %v12291_v62 = vld [vmem:[%s14591_s30 + $0xa0] ss:$8 sps:$4 sm:$0xff]  }
 0x924   : > { %v6282_v22 = vmax.f32 %v6228_v35, 0.0  ;;  %v12299_v35 = vld [vmem:[%s14591_s30 + $0xb4] ss:$8 sps:$4 sm:$0xff]  }
 0x925   : > { %7935 = vmatmul.mubr.bf16.gmra.mxu1 %v12318_v45  ;;  %v12297_v45 = vld [vmem:[%s14591_s30 + $0xb0] ss:$8 sps:$4 sm:$0xff]  }
 0x926   : > { %11722 = vmatprep.mubr.msk.f32.mxu0 %vm16626_vm1, %v6282_v22 }
 0x927   : > { %v11663_v53 = vpop.f32.mrf.mxu1  ;;  %11723 = vmatmul.mubr.msk.f32.gmra.mxu0 %vm16626_vm1, %v6283_v40 }
 0x928   : > { %v6243_v50 = vadd.f32 %v11663_v53, %v14596_v21 }
 0x929   : > { %v6237_v18 = vpop.f32.mrf.mxu1 }
 0x92a   : > { %v6238_v16 = vadd.f32 %v14596_v21, %v6237_v18  ;;  %v6285_v10 = vmax.f32 %v6243_v50, 0.0 }
 0x92c   : > { %v6284_v4 = vmax.f32 %v6238_v16, 0.0 }
 0x92e   : > { %11725 = vmatprep.mubr.msk.f32.mxu0 %vm16626_vm1, %v6284_v4 }
 0x92f   : > { %v11666_v42 = vpop.f32.mrf.mxu1  ;;  %11726 = vmatmul.mubr.msk.f32.gmra.mxu0 %vm16626_vm1, %v6285_v10  ;;  %v12305_v10 = vld [vmem:[%s14591_s30 + $0xc4] ss:$8 sps:$4 sm:$0xff]  }
 0x930   : > { %v6253_v25 = vadd.f32 %v11666_v42, %v14596_v21 }
 0x931   : > { %v6247_v27 = vpop.f32.mrf.mxu1 }
 0x932   : > { %v6248_v63 = vadd.f32 %v14596_v21, %v6247_v27  ;;  %v6287_v1 = vmax.f32 %v6253_v25, 0.0  ;;  %v12245_v21 = vld [vmem:[%s14591_s30 + $0x24] ss:$8 sps:$4 sm:$0xff]  }
 0x934   : > { %v6286_v12 = vmax.f32 %v6248_v63, 0.0 }
 0x936   : > { %11728 = vmatprep.mubr.msk.f32.mxu0 %vm16626_vm1, %v6286_v12 }
 0x937   : > { %11729 = vmatmul.mubr.msk.f32.gmra.mxu0 %vm16626_vm1, %v6287_v1 }
 0x938   : > { %8167 = vmatprep.mubr.bf16.mxu0 %v12233_v60 }
 0x93b   : > { %8168 = vmatmul.mubr.bf16.vlgmr.msra.gmra.mxu0 %v12231_v9  ;;  %v12303_v9 = vld [vmem:[%s14591_s30 + $0xc0] ss:$8 sps:$4 sm:$0xff]  }
 0x93c   : > { %8175 = vmatprep.mubr.bf16.mxu0 %v12239_v47  ;;  %11788 = vmatpush3.msra.mxu0 %v8299_v55 }
 0x93d   : > { %11789 = vmatprep.subr.mxu0 %v8298_v3 }
 0x93e   : > { %11790 = vmatpush3.msra.mxu0 %v8298_v3 }
 0x93f   : > { %11791 = vmatprep.subr.mxu0 %v8297_v5 }
 0x940   : > { %11792 = vmatpush3.msra.mxu0 %v8297_v5  ;;  %v12315_v5 = vld [vmem:[%s14591_s30 + $0xe0] ss:$8 sps:$4 sm:$0xff]  }
 0x941   : > { %11793 = vmatprep.subr.mxu0 %v8296_v6 }
 0x942   : > { %11794 = vmatpush3.msra.mxu0 %v8296_v6 }
 0x943   : > { %8176 = vmatmul.mubr.bf16.gmra.mxu0 %v12237_v43  ;;  %v12311_v43 = vld [vmem:[%s14591_s30 + $0xd4] ss:$8 sps:$4 sm:$0xff]  }
 0x944   : > { %8183 = vmatprep.mubr.bf16.mxu0 %v12245_v21 }
 0x94b   : > { %8184 = vmatmul.mubr.bf16.gmra.mxu0 %v12243_v17 }
 0x94c   : > { %8191 = vmatprep.mubr.bf16.mxu0 %v12251_v2 }
 0x950   : > { %v14720_v14 = vpop.f32.mrf.mxu1 }
 0x952   : > { %v14725_v31 = vpop.f32.mrf.mxu1 }
 0x953   : > { %8192 = vmatmul.mubr.bf16.gmra.mxu0 %v12249_v38 }
 0x954   : > { %8199 = vmatprep.mubr.bf16.mxu0 %v12257_v48  ;;  %v14732_v46 = vpop.f32.mrf.mxu1 }
 0x956   : > { %v14737_v0 = vpop.f32.mrf.mxu1 }
 0x958   : > { %v14745_v26 = vpop.f32.mrf.mxu1 }
 0x95a   : > { %v14750_v58 = vpop.f32.mrf.mxu1 }
 0x95b   : > { %8200 = vmatmul.mubr.bf16.gmra.mxu0 %v12255_v11 }
 0x95c   : > { %8207 = vmatprep.mubr.bf16.mxu0 %v12263_v30  ;;  %v14757_v28 = vpop.f32.mrf.mxu1 }
 0x95e   : > { %v14767_v29 = vpop.f32.mrf.mxu1 }
 0x960   : > { %v14772_v34 = vpop.f32.mrf.mxu1 }
 0x962   : > { %v14775_v49 = vpop.f32.mrf.mxu1 }
 0x963   : > { %8208 = vmatmul.mubr.bf16.gmra.mxu0 %v12261_v15  ;;  %v12309_v15 = vld [vmem:[%s14591_s30 + $0xd0] ss:$8 sps:$4 sm:$0xff]  }
 0x964   : > { %8215 = vmatprep.mubr.bf16.mxu0 %v12269_v23  ;;  %v14785_v40 = vpop.f32.mrf.mxu1 }
 0x966   : > { %v14789_v50 = vpop.f32.mrf.mxu1 }
 0x96b   : > { %8216 = vmatmul.mubr.bf16.gmra.mxu0 %v12267_v57  ;;  %v12317_v57 = vld [vmem:[%s14591_s30 + $0xe4] ss:$8 sps:$4 sm:$0xff]  }
 0x96c   : > { %8223 = vmatprep.mubr.bf16.mxu0 %v12275_v56 }
 0x973   : > { %8224 = vmatmul.mubr.bf16.gmra.mxu0 %v12273_v13 }
 0x974   : > { %8231 = vmatprep.mubr.bf16.mxu0 %v12281_v39 }
 0x97b   : > { %8232 = vmatmul.mubr.bf16.gmra.mxu0 %v12279_v7 }
 0x97c   : > { %8239 = vmatprep.mubr.bf16.mxu0 %v12287_v54 }
 0x983   : > { %8240 = vmatmul.mubr.bf16.gmra.mxu0 %v12285_v36  ;;  %v11685_v33 = vpop.f32.mrf.mxu0 }
 0x984   : > { %8247 = vmatprep.mubr.bf16.mxu0 %v12293_v8  ;;  %v14770_v37 = vadd.f32 %v11685_v33, %v14762_v20 }
 0x985   : > { %v6462_v44 = vpop.f32.mrf.mxu0  ;;  %v14794_v52 = vpop.f32.mrf.mxu1 }
 0x986   : > { %16813 = vst [vmem:[#allocation11_spill] sm:$0xff] %v14770_v37  ;;  %6724 = vperm.xlu0 %11960, %v14770_v37   ;;  %v14780_v32 = vadd.f32 %v14762_v20, %v6462_v44 }
 0x987   : > { %v11688_v24 = vpop.f32.mrf.mxu0  ;;  %v14797_v16 = vpop.f32.mrf.mxu1 }
 0x988   : > { %16814 = vst [vmem:[#allocation12_spill] sm:$0xff] %v14780_v32  ;;  %v14783_v22 = vadd.f32 %v11688_v24, %v14762_v20 }
 0x989   : > { %v6472_v53 = vpop.f32.mrf.mxu0  ;;  %v14804_v25 = vpop.f32.mrf.mxu1 }
 0x98a   : > { %16815 = vst [vmem:[#allocation39_spill] sm:$0xff] %v14783_v22  ;;  %6734 = vperm.xlu1 %11961, %v14783_v22   ;;  %6719 = vperm.xlu0 %11960, %v14780_v32   ;;  %v14792_v18 = vadd.f32 %v14762_v20, %v6472_v53  ;;  %v10909_v53 = vadd.f32 %v14725_v31, %v14720_v14 }
 0x98b   : > { %8248 = vmatmul.mubr.bf16.gmra.mxu0 %v12291_v62  ;;  %v14810_v12 = vpop.f32.mrf.mxu1  ;;  %v12321_v62 = vld [vmem:[%s14591_s30 + $0xf0] ss:$8 sps:$4 sm:$0xff]   ;;  %v10912_v31 = vadd.f32 %v14737_v0, %v14732_v46  ;;  %v10918_v46 = vadd.f32 %v14767_v29, %v14757_v28  ;;  %v10921_v0 = vadd.f32 %v14775_v49, %v14772_v34  ;;  %v10927_v28 = vadd.f32 %v14797_v16, %v14794_v52  ;;  %s10372_s30 = sshll.u32 %s12726_s22, 7 }
 0x98c   : > { %8255 = vmatprep.mubr.bf16.mxu0 %v12299_v35  ;;  %16816 = vst [vmem:[#allocation13_spill] sm:$0xff] %v14792_v18  ;;  %s15111_s1 = scalar_lea.vmem %s16531_s6, %s10372_s30  ;;  %s707_s30 = scalar_lea.vmem %s16532_s7, %s12726_s22 }
 0x98d   : > { %v14813_v60 = vpop.f32.mrf.mxu1  ;;  %s12505_s22 = scalar_lea.vmem %s16479_s26, 4096 }
 0x98e   : > { %6729 = vperm.xlu1 %11961, %v14792_v18   ;;  %p12506_p11 = scmp.ne.s32.totalorder %s16479_s26, %s12505_s22 }
 0x98f   : > { %v11691_v4 = vpop.f32.mrf.mxu0  ;;  %v14815_v1 = vpop.f32.mrf.mxu1 }
 0x990   : > { %v14802_v42 = vadd.f32 %v11691_v4, %v14762_v20  ;;  %p12507_p12 = pnand %p12506_p11, %p12705_p5 }
 0x991   : > { %v6482_v27 = vpop.f32.mrf.mxu0  ;;  %v14822_v17 = vpop.f32.mrf.mxu1 }
 0x992   : > { %16817 = vst [vmem:[#allocation41_spill] sm:$0xff] %v14802_v42  ;;  %v14807_v63 = vadd.f32 %v14762_v20, %v6482_v27  ;;  %6744 = vperm.xlu1 %11961, %v14802_v42   ;;  %p12508_p13 = pneg %p12507_p12 }
 0x993   : > { %8256 = vmatmul.mubr.bf16.gmra.mxu0 %v12297_v45  ;;  %v14828_v48 = vpop.f32.mrf.mxu1 }
 0x994   : > { %16818 = vst [vmem:[#allocation40_spill] sm:$0xff] %v14807_v63  ;;  %8263 = vmatprep.mubr.bf16.mxu0 %v12305_v10  ;;  %6739 = vperm.xlu0 %11960, %v14807_v63  }
 0x995   : > { %v14831_v11 = vpop.f32.mrf.mxu1 }
 0x997   : > { %v11694_v47 = vpop.f32.mrf.mxu0  ;;  %v14833_v30 = vpop.f32.mrf.mxu1 }
 0x998   : > { %v14820_v21 = vadd.f32 %v11694_v47, %v14762_v20 }
 0x999   : > { %v6492_v2 = vpop.f32.mrf.mxu0  ;;  %v14840_v13 = vpop.f32.mrf.mxu1 }
 0x99a   : > { %16819 = vst [vmem:[#allocation38_spill] sm:$0xff] %v14820_v21  ;;  %v14825_v38 = vadd.f32 %v14762_v20, %v6492_v2  ;;  %6754 = vperm.xlu1 %11961, %v14820_v21   ;;  %v10915_v2 = vadd.f32 %v14750_v58, %v14745_v26 }
 0x99b   : > { %8264 = vmatmul.mubr.bf16.gmra.mxu0 %v12303_v9  ;;  %v14846_v3 = vpop.f32.mrf.mxu1 }
 0x99c   : > { %16820 = vst [vmem:[#allocation14_spill] sm:$0xff] %v14825_v38  ;;  %8271 = vmatprep.mubr.bf16.mxu0 %v12311_v43  ;;  %6749 = vperm.xlu0 %11960, %v14825_v38  }
 0x99d   : > { %v14849_v7 = vpop.f32.mrf.mxu1 }
 0x99f   : > { %v11697_v23 = vpop.f32.mrf.mxu0  ;;  %v14851_v54 = vpop.f32.mrf.mxu1 }
 0x9a0   : > { %v14838_v56 = vadd.f32 %v11697_v23, %v14762_v20 }
 0x9a1   : > { %v6502_v39 = vpop.f32.mrf.mxu0  ;;  %v14858_v36 = vpop.f32.mrf.mxu1 }
 0x9a2   : > { %16821 = vst [vmem:[#allocation16_spill] sm:$0xff] %v14838_v56  ;;  %v14843_v55 = vadd.f32 %v14762_v20, %v6502_v39  ;;  %6764 = vperm.xlu1 %11961, %v14838_v56  }
 0x9a3   : > { %8272 = vmatmul.mubr.bf16.gmra.mxu0 %v12309_v15  ;;  %v14864_v61 = vpop.f32.mrf.mxu1 }
 0x9a4   : > { %16822 = vst [vmem:[#allocation15_spill] sm:$0xff] %v14843_v55  ;;  %8279 = vmatprep.mubr.bf16.mxu0 %v12317_v57  ;;  %6759 = vperm.xlu0 %11960, %v14843_v55  }
 0x9a5   : > { %v14867_v33 = vpop.f32.mrf.mxu1 }
 0x9a7   : > { %v11700_v6 = vpop.f32.mrf.mxu0  ;;  %v14869_v44 = vpop.f32.mrf.mxu1 }
 0x9a8   : > { %v14856_v51 = vadd.f32 %v11700_v6, %v14762_v20  ;;  %v10924_v6 = vadd.f32 %v14789_v50, %v14785_v40  ;;  %v10930_v40 = vadd.f32 %v14810_v12, %v14804_v25  ;;  %v10933_v50 = vadd.f32 %v14815_v1, %v14813_v60 }
 0x9a9   : > { %v6512_v19 = vpop.f32.mrf.mxu0  ;;  %v14877_v45 = vpop.f32.mrf.mxu1  ;;  %v10939_v25 = vadd.f32 %v14833_v30, %v14831_v11 }
 0x9aa   : > { %16823 = vst [vmem:[#allocation17_spill] sm:$0xff] %v14856_v51  ;;  %v14861_v8 = vadd.f32 %v14762_v20, %v6512_v19  ;;  %6774 = vperm.xlu1 %11961, %v14856_v51  }
 0x9ab   : > { %8280 = vmatmul.mubr.bf16.gmra.mxu0 %v12315_v5  ;;  %v14883_v27 = vpop.f32.mrf.mxu1 }
 0x9ac   : > { %16824 = vst [vmem:[#allocation18_spill] sm:$0xff] %v14861_v8  ;;  %8287 = vmatprep.mubr.bf16.mxu0 %v12323_v59  ;;  %6769 = vperm.xlu0 %11960, %v14861_v8  }
 0x9ad   : > { %v14887_v9 = vpop.f32.mrf.mxu1 }
 0x9af   : > { %v11703_v24 = vpop.f32.mrf.mxu0  ;;  %v14889_v47 = vpop.f32.mrf.mxu1 }
 0x9b0   : > { %v14873_v35 = vadd.f32 %v11703_v24, %v14762_v20  ;;  %v10936_v24 = vadd.f32 %v14828_v48, %v14822_v17  ;;  %v10942_v17 = vadd.f32 %v14846_v3, %v14840_v13  ;;  %v10945_v48 = vadd.f32 %v14851_v54, %v14849_v7 }
 0x9b1   : > { %v6522_v4 = vpop.f32.mrf.mxu0  ;;  %v14898_v15 = vpop.f32.mrf.mxu1  ;;  %v10951_v13 = vadd.f32 %v14869_v44, %v14867_v33 }
 0x9b2   : > { %16825 = vst [vmem:[#allocation19_spill] sm:$0xff] %v14873_v35  ;;  %v14880_v10 = vadd.f32 %v14762_v20, %v6522_v4  ;;  %6784 = vperm.xlu1 %11961, %v14873_v35  }
 0x9b3   : > { %8288 = vmatmul.mubr.bf16.gmra.mxu0 %v12321_v62  ;;  %v14904_v39 = vpop.f32.mrf.mxu1 }
 0x9b4   : > { %16826 = vst [vmem:[#allocation20_spill] sm:$0xff] %v14880_v10  ;;  %6779 = vperm.xlu0 %11960, %v14880_v10   ;;  %11795 = vmatprep.mubr.msk.f32.mxu0 %vm16628_vm0, %v10909_v53 }
 0x9b5   : > { %v10961_v26 = vpop.f32.mrf.mxu1 }
 0x9b7   : > { %v11706_v14 = vpop.f32.mrf.mxu0  ;;  %v10962_v58 = vpop.f32.mrf.mxu1 }
 0x9b8   : > { %v14894_v43 = vadd.f32 %v11706_v14, %v14762_v20 }
 0x9b9   : > { %v6532_v23 = vpop.f32.mrf.mxu0  ;;  %v10964_v29 = vpop.f32.mrf.mxu1 }
 0x9ba   : > { %16827 = vst [vmem:[#allocation21_spill] sm:$0xff] %v14894_v43  ;;  %v14901_v57 = vadd.f32 %v14762_v20, %v6532_v23  ;;  %6794 = vperm.xlu1 %11961, %v14894_v43  }
 0x9bb   : > { %11796 = vmatmul.mubr.msk.f32.vlgmr.msra.gmra.mxu0 %vm16628_vm0, %v10912_v31  ;;  %v10965_v49 = vpop.f32.mrf.mxu1  ;;  %v10948_v31 = vadd.f32 %v14864_v61, %v14858_v36  ;;  %v10954_v36 = vadd.f32 %v14883_v27, %v14877_v45  ;;  %v10957_v61 = vadd.f32 %v14889_v47, %v14887_v9  ;;  %v10963_v45 = vadd.f32 %v10962_v58, %v10961_v26 }
 0x9bc   : > { %16828 = vst [vmem:[#allocation22_spill] sm:$0xff] %v14901_v57  ;;  %6789 = vperm.xlu0 %11960, %v14901_v57   ;;  %11798 = vmatprep.mubr.msk.f32.mxu0 %vm16628_vm0, %v10915_v2  ;;  %v10966_v47 = vadd.f32 %v10965_v49, %v10964_v29 }
 0x9bd   : > { %v10967_v52 = vpop.f32.mrf.mxu1 }
 0x9bf   : > { %v11709_v5 = vpop.f32.mrf.mxu0  ;;  %11799 = vmatmul.mubr.msk.f32.gmra.mxu0 %vm16628_vm0, %v10918_v46  ;;  %v10968_v16 = vpop.f32.mrf.mxu1 }
 0x9c0   : > { %v14917_v59 = vadd.f32 %v11709_v5, %v14762_v20  ;;  %11801 = vmatprep.mubr.msk.f32.mxu0 %vm16628_vm0, %v10921_v0  ;;  %v10960_v0 = vadd.f32 %v14904_v39, %v14898_v15  ;;  %v10969_v15 = vadd.f32 %v10968_v16, %v10967_v52 }
 0x9c1   : > { %v6542_v19 = vpop.f32.mrf.mxu0  ;;  %v10970_v12 = vpop.f32.mrf.mxu1 }
 0x9c2   : > { %16829 = vst [vmem:[#allocation23_spill] sm:$0xff] %v14917_v59  ;;  %v14923_v34 = vadd.f32 %v14762_v20, %v6542_v19  ;;  %6804 = vperm.xlu1 %11961, %v14917_v59  }
 0x9c3   : > { %11802 = vmatmul.mubr.msk.f32.gmra.mxu0 %vm16628_vm0, %v10924_v6  ;;  %v10971_v1 = vpop.f32.mrf.mxu1 }
 0x9c4   : > { %16830 = vst [vmem:[#allocation24_spill] sm:$0xff] %v14923_v34  ;;  %6799 = vperm.xlu0 %11960, %v14923_v34   ;;  %11804 = vmatprep.mubr.msk.f32.mxu0 %vm16628_vm0, %v10927_v28  ;;  %v10972_v26 = vadd.f32 %v10971_v1, %v10970_v12 }
 0x9c5   : > { %v10973_v11 = vpop.f32.mrf.mxu1 }
 0x9c7   : > { %v11712_v62 = vpop.f32.mrf.mxu0  ;;  %11805 = vmatmul.mubr.msk.f32.gmra.mxu0 %vm16628_vm0, %v10930_v40  ;;  %v10974_v30 = vpop.f32.mrf.mxu1 }
 0x9c8   : > { %v14937_v53 = vadd.f32 %v11712_v62, %v14762_v20  ;;  %11807 = vmatprep.mubr.msk.f32.mxu0 %vm16628_vm0, %v10933_v50  ;;  %v10975_v50 = vadd.f32 %v10974_v30, %v10973_v11 }
 0x9c9   : > { %v6552_v4 = vpop.f32.mrf.mxu0  ;;  %v10976_v3 = vpop.f32.mrf.mxu1 }
 0x9ca   : > { %16831 = vst [vmem:[#allocation25_spill] sm:$0xff] %v14937_v53  ;;  %v14943_v60 = vadd.f32 %v14762_v20, %v6552_v4  ;;  %6814 = vperm.xlu1 %11961, %v14937_v53  }
 0x9cb   : > { %11808 = vmatmul.mubr.msk.f32.gmra.mxu0 %vm16628_vm0, %v10936_v24  ;;  %v10977_v54 = vpop.f32.mrf.mxu1 }
 0x9cc   : > { %16832 = vst [vmem:[#allocation26_spill] sm:$0xff] %v14943_v60  ;;  %6809 = vperm.xlu0 %11960, %v14943_v60   ;;  %11810 = vmatprep.mubr.msk.f32.mxu0 %vm16628_vm0, %v10939_v25  ;;  %v10978_v52 = vadd.f32 %v10977_v54, %v10976_v3 }
 0x9cd   : > { %v10979_v33 = vpop.f32.mrf.mxu1 }
 0x9cf   : > { %v11715_v14 = vpop.f32.mrf.mxu0  ;;  %11811 = vmatmul.mubr.msk.f32.gmra.mxu0 %vm16628_vm0, %v10942_v17  ;;  %v10980_v44 = vpop.f32.mrf.mxu1 }
 0x9d0   : > { %v14957_v2 = vadd.f32 %v11715_v14, %v14762_v20  ;;  %11813 = vmatprep.mubr.msk.f32.mxu0 %vm16628_vm0, %v10945_v48  ;;  %v10981_v16 = vadd.f32 %v10980_v44, %v10979_v33 }
 0x9d1   : > { %v6562_v23 = vpop.f32.mrf.mxu0  ;;  %v10982_v27 = vpop.f32.mrf.mxu1 }
 0x9d2   : > { %16833 = vst [vmem:[#allocation27_spill] sm:$0xff] %v14957_v2  ;;  %v14963_v7 = vadd.f32 %v14762_v20, %v6562_v23  ;;  %6824 = vperm.xlu1 %11961, %v14957_v2  }
 0x9d3   : > { %11814 = vmatmul.mubr.msk.f32.gmra.mxu0 %vm16628_vm0, %v10948_v31  ;;  %v10983_v9 = vpop.f32.mrf.mxu1 }
 0x9d4   : > { %16834 = vst [vmem:[#allocation28_spill] sm:$0xff] %v14963_v7  ;;  %6819 = vperm.xlu0 %11960, %v14963_v7   ;;  %11816 = vmatprep.mubr.msk.f32.mxu0 %vm16628_vm0, %v10951_v13  ;;  %v10984_v1 = vadd.f32 %v10983_v9, %v10982_v27 }
 0x9d5   : > { %v10985_v39 = vpop.f32.mrf.mxu1 }
 0x9d7   : > { %v11718_v46 = vpop.f32.mrf.mxu0  ;;  %11817 = vmatmul.mubr.msk.f32.gmra.mxu0 %vm16628_vm0, %v10954_v36  ;;  %v10986_v19 = vpop.f32.mrf.mxu1 }
 0x9d8   : > { %v14977_v5 = vadd.f32 %v11718_v46, %v14762_v20  ;;  %11819 = vmatprep.mubr.msk.f32.mxu0 %vm16628_vm0, %v10957_v61  ;;  %v10987_v48 = vadd.f32 %v10986_v19, %v10985_v39 }
 0x9d9   : > { %v6572_v6 = vpop.f32.mrf.mxu0  ;;  %v10988_v62 = vpop.f32.mrf.mxu1 }
 0x9da   : > { %16835 = vst [vmem:[#allocation29_spill] sm:$0xff] %v14977_v5  ;;  %v14981_v28 = vadd.f32 %v14762_v20, %v6572_v6  ;;  %6834 = vperm.xlu1 %11961, %v14977_v5  }
 0x9db   : > { %11820 = vmatmul.mubr.msk.f32.gmra.mxu0 %vm16628_vm0, %v10960_v0  ;;  %v10989_v49 = vpop.f32.mrf.mxu1 }
 0x9dc   : > { %16836 = vst [vmem:[#allocation30_spill] sm:$0xff] %v14981_v28  ;;  %6829 = vperm.xlu0 %11960, %v14981_v28   ;;  %11822 = vmatprep.mubr.msk.f32.mxu0 %vm16628_vm0, %v10963_v45  ;;  %v10990_v13 = vadd.f32 %v10989_v49, %v10988_v62 }
 0x9dd   : > { %v10991_v25 = vpop.f32.mrf.mxu1 }
 0x9df   : > { %v11721_v40 = vpop.f32.mrf.mxu0  ;;  %11823 = vmatmul.mubr.msk.f32.gmra.mxu0 %vm16628_vm0, %v10966_v47  ;;  %v10992_v12 = vpop.f32.mrf.mxu1 }
 0x9e0   : > { %v14989_v58 = vadd.f32 %v11721_v40, %v14762_v20  ;;  %11825 = vmatprep.mubr.msk.f32.mxu0 %vm16628_vm0, %v10969_v15  ;;  %v10993_v3 = vadd.f32 %v10992_v12, %v10991_v25 }
 0x9e1   : > { %v6582_v24 = vpop.f32.mrf.mxu0  ;;  %v10994_v11 = vpop.f32.mrf.mxu1 }
 0x9e2   : > { %16837 = vst [vmem:[#allocation33_spill] sm:$0xff] %v14989_v58  ;;  %v14993_v29 = vadd.f32 %v14762_v20, %v6582_v24  ;;  %6844 = vperm.xlu1 %11961, %v14989_v58  }
 0x9e3   : > { %11826 = vmatmul.mubr.msk.f32.gmra.mxu0 %vm16628_vm0, %v10972_v26  ;;  %v10995_v31 = vpop.f32.mrf.mxu1 }
 0x9e4   : > { %16838 = vst [vmem:[#allocation31_spill] sm:$0xff] %v14993_v29  ;;  %6839 = vperm.xlu0 %11960, %v14993_v29   ;;  %11828 = vmatprep.mubr.msk.f32.mxu0 %vm16628_vm0, %v10975_v50  ;;  %v10996_v36 = vadd.f32 %v10995_v31, %v10994_v11 }
 0x9e5   : > { %v10997_v23 = vpop.f32.mrf.mxu1 }
 0x9e7   : > { %v11724_v4 = vpop.f32.mrf.mxu0  ;;  %11829 = vmatmul.mubr.msk.f32.gmra.mxu0 %vm16628_vm0, %v10978_v52  ;;  %v10998_v44 = vpop.f32.mrf.mxu1 }
 0x9e8   : > { %v15001_v17 = vadd.f32 %v11724_v4, %v14762_v20  ;;  %11831 = vmatprep.mubr.msk.f32.mxu0 %vm16628_vm0, %v10981_v16  ;;  %v10999_v0 = vadd.f32 %v10998_v44, %v10997_v23 }
 0x9e9   : > { %v6592_v30 = vpop.f32.mrf.mxu0 }
 0x9ea   : > { %16839 = vst [vmem:[#allocation32_spill] sm:$0xff] %v15001_v17  ;;  %v15005_v14 = vadd.f32 %v14762_v20, %v6592_v30  ;;  %6854 = vperm.xlu1 %11961, %v15001_v17  }
 0x9eb   : > { %11832 = vmatmul.mubr.msk.f32.gmra.mxu0 %vm16628_vm0, %v10984_v1 }
 0x9ec   : > { %16840 = vst [vmem:[#allocation35_spill] sm:$0xff] %v15005_v14  ;;  %6849 = vperm.xlu0 %11960, %v15005_v14   ;;  %11834 = vmatprep.mubr.msk.f32.mxu0 %vm16628_vm0, %v10987_v48  ;;  %v11000_v48 = vpop.f32.mrf.mxu1 }
 0x9ef   : > { %v11727_v54 = vpop.f32.mrf.mxu0  ;;  %11835 = vmatmul.mubr.msk.f32.gmra.mxu0 %vm16628_vm0, %v10990_v13  ;;  %v11001_v13 = vpop.f32.mrf.mxu1 }
 0x9f0   : > { %v15013_v61 = vadd.f32 %v11727_v54, %v14762_v20  ;;  %11837 = vmatprep.mubr.msk.f32.mxu0 %vm16628_vm0, %v10993_v3  ;;  %v11002_v23 = vadd.f32 %v11001_v13, %v11000_v48 }
 0x9f1   : > { %v6602_v33 = vpop.f32.mrf.mxu0 }
 0x9f2   : > { %16841 = vst [vmem:[#allocation34_spill] sm:$0xff] %v15013_v61  ;;  %v15017_v46 = vadd.f32 %v14762_v20, %v6602_v33  ;;  %6864 = vperm.xlu1 %11961, %v15013_v61  }
 0x9f3   : > { %11838 = vmatmul.mubr.msk.f32.gmra.mxu0 %vm16628_vm0, %v10996_v36 }
 0x9f4   : > { %16842 = vst [vmem:[#allocation37_spill] sm:$0xff] %v15017_v46  ;;  %6859 = vperm.xlu0 %11960, %v15017_v46   ;;  %11840 = vmatprep.mubr.msk.f32.mxu0 %vm16628_vm0, %v10999_v0 }
 0x9f7   : > { %v11730_v45 = vpop.f32.mrf.mxu0  ;;  %11841 = vmatmul.mubr.msk.f32.gmra.mxu0 %vm16628_vm0, %v11002_v23 }
 0x9f8   : > { %v15024_v27 = vadd.f32 %v11730_v45, %v14762_v20 }
 0x9f9   : > { %v6612_v6 = vpop.f32.mrf.mxu0 }
 0x9fa   : > { %16843 = vst [vmem:[#allocation36_spill] sm:$0xff] %v15024_v27  ;;  %v15027_v9 = vadd.f32 %v14762_v20, %v6612_v6  ;;  %6874 = vperm.xlu1 %11961, %v15024_v27  }
 0x9fb   : > { %v11019_v47 = vpop.f32.mrf.mxu0 }
 0x9fc   : > { %16844 = vst [vmem:[#allocation42_spill] sm:$0xff] %v15027_v9  ;;  %6869 = vperm.xlu0 %11960, %v15027_v9  }
 0x9fd   : > { %v11020_v15 = vpop.f32.mrf.mxu0 }
 0x9fe   : > { %v11021_v39 = vadd.f32 %v11020_v15, %v11019_v47  ;;  %11963 = vset.pattern.permute.xlu1 %v16793_v41 }
 0x9ff   : > { %v11022_v19 = vpop.f32.mrf.mxu0  ;;  %7214 = vperm.xlu1 %11963, %v14770_v37  }
 0xa00   : > { %11962 = vset.pattern.permute.xlu0 %v16793_v41  ;;  %11739 = vmatprep.mubr.msk.f32.mxu1 %vm16628_vm0, %v11021_v39 }
 0xa01   : > { %v11023_v40 = vpop.f32.mrf.mxu0  ;;  %7210 = vperm.xlu0 %11962, %v14780_v32  }
 0xa02   : > { %v11024_v20 = vadd.f32 %v11023_v40, %v11022_v19 }
 0xa03   : > { %v11025_v26 = vpop.f32.mrf.mxu0  ;;  %7218 = vperm.xlu1 %11963, %v14792_v18  }
 0xa04   : > { %11740 = vmatmul.mubr.msk.f32.vlgmr.msra.gmra.mxu1 %vm16628_vm0, %v11024_v20 }
 0xa05   : > { %v11026_v50 = vpop.f32.mrf.mxu0  ;;  %7222 = vperm.xlu0 %11962, %v14783_v22   ;;  %v15323_v22 = vld [vmem:[%s15111_s1 + $0x78] sm:$0xff]  }
 0xa06   : > { %v11027_v62 = vadd.f32 %v11026_v50, %v11025_v26  ;;  %16924 = vst [vmem:[#allocation71_spill] sm:$0xff] %v15323_v22 }
 0xa07   : > { %v11028_v24 = vpop.f32.mrf.mxu0  ;;  %7226 = vperm.xlu1 %11963, %v14807_v63  }
 0xa08   : > { %11742 = vmatprep.mubr.msk.f32.mxu1 %vm16628_vm0, %v11027_v62 }
 0xa09   : > { %v11029_v41 = vpop.f32.mrf.mxu0  ;;  %7230 = vperm.xlu0 %11962, %v14802_v42   ;;  %v15304_v42 = vld [vmem:[%s15111_s1 + $0x70] sm:$0xff]  }
 0xa0a   : > { %v11030_v49 = vadd.f32 %v11029_v41, %v11028_v24  ;;  %16919 = vst [vmem:[#allocation69_spill] sm:$0xff] %v15304_v42 }
 0xa0b   : > { %v11031_v52 = vpop.f32.mrf.mxu0  ;;  %7234 = vperm.xlu1 %11963, %v14825_v38   ;;  %v16916_v38 = vmov 0 }
 0xa0c   : > { %11743 = vmatmul.mubr.msk.f32.gmra.mxu1 %vm16628_vm0, %v11030_v49 }
 0xa0d   : > { %v11032_v16 = vpop.f32.mrf.mxu0  ;;  %7238 = vperm.xlu0 %11962, %v14820_v21  }
 0xa0e   : > { %v11033_v25 = vadd.f32 %v11032_v16, %v11031_v52 }
 0xa0f   : > { %v11034_v12 = vpop.f32.mrf.mxu0  ;;  %7242 = vperm.xlu1 %11963, %v14843_v55   ;;  %v16908_v55 = vmov 0 }
 0xa10   : > { %11745 = vmatprep.mubr.msk.f32.mxu1 %vm16628_vm0, %v11033_v25  ;;  %v15075_v25 = vpop.permute.xlu0 %6724 }
 0xa11   : > { %v11035_v4 = vpop.f32.mrf.mxu0  ;;  %7246 = vperm.xlu0 %11962, %v14838_v56   ;;  %v16912_v56 = vmov 0 }
 0xa12   : > { %v11036_v1 = vadd.f32 %v11035_v4, %v11034_v12  ;;  %v15078_v4 = vpop.permute.xlu1 %6734 }
 0xa13   : > { %v11037_v11 = vpop.f32.mrf.mxu0  ;;  %7250 = vperm.xlu1 %11963, %v14861_v8  }
 0xa14   : > { %11746 = vmatmul.mubr.msk.f32.gmra.mxu1 %vm16628_vm0, %v11036_v1 }
 0xa15   : > { %v11038_v30 = vpop.f32.mrf.mxu0  ;;  %7254 = vperm.xlu0 %11962, %v14856_v51   ;;  %v15280_v51 = vld [vmem:[%s15111_s1 + $0x68] sm:$0xff]  }
 0xa16   : > { %v11039_v31 = vadd.f32 %v11038_v30, %v11037_v11  ;;  %16906 = vst [vmem:[#allocation65_spill] sm:$0xff] %v15280_v51 }
 0xa17   : > { %v11040_v3 = vpop.f32.mrf.mxu0  ;;  %7258 = vperm.xlu1 %11963, %v14880_v10   ;;  %v16903_v10 = vmov 0 }
 0xa18   : > { %11748 = vmatprep.mubr.msk.f32.mxu1 %vm16628_vm0, %v11039_v31  ;;  %v15083_v31 = vpop.permute.xlu0 %6719 }
 0xa19   : > { %v11041_v54 = vpop.f32.mrf.mxu0  ;;  %7262 = vperm.xlu0 %11962, %v14873_v35  }
 0xa1a   : > { %v11042_v36 = vadd.f32 %v11041_v54, %v11040_v3  ;;  %v15086_v3 = vpop.permute.xlu1 %6729 }
 0xa1b   : > { %v11043_v33 = vpop.f32.mrf.mxu0  ;;  %7266 = vperm.xlu1 %11963, %v14901_v57   ;;  %v16894_v57 = vmov 0 }
 0xa1c   : > { %11749 = vmatmul.mubr.msk.f32.gmra.mxu1 %vm16628_vm0, %v11042_v36 }
 0xa1d   : > { %v11044_v44 = vpop.f32.mrf.mxu0  ;;  %7270 = vperm.xlu0 %11962, %v14894_v43   ;;  %v16899_v43 = vmov 0 }
 0xa1e   : > { %v11045_v0 = vadd.f32 %v11044_v44, %v11043_v33  ;;  %v15090_v33 = vpop.permute.xlu0 %6739 }
 0xa1f   : > { %v11046_v45 = vpop.f32.mrf.mxu0  ;;  %7274 = vperm.xlu1 %11963, %v14923_v34   ;;  %v16890_v34 = vmov 0 }
 0xa20   : > { %11751 = vmatprep.mubr.msk.f32.mxu1 %vm16628_vm0, %v11045_v0  ;;  %v15093_v0 = vpop.permute.xlu1 %6744 }
 0xa21   : > { %v11047_v6 = vpop.f32.mrf.mxu0  ;;  %7278 = vperm.xlu0 %11962, %v14917_v59  }
 0xa22   : > { %v11048_v47 = vadd.f32 %v11047_v6, %v11046_v45 }
 0xa23   : > { %v11049_v15 = vpop.f32.mrf.mxu0  ;;  %7282 = vperm.xlu1 %11963, %v14943_v60   ;;  %v16882_v60 = vmov 0 }
 0xa24   : > { %11752 = vmatmul.mubr.msk.f32.gmra.mxu1 %vm16628_vm0, %v11048_v47  ;;  %v15095_v47 = vpop.permute.xlu0 %6749 }
 0xa25   : > { %v11050_v39 = vpop.f32.mrf.mxu0  ;;  %7286 = vperm.xlu0 %11962, %v14937_v53   ;;  %v16886_v53 = vmov 0 }
 0xa26   : > { %v11051_v19 = vadd.f32 %v11050_v39, %v11049_v15  ;;  %v15098_v39 = vpop.permute.xlu1 %6754 }
 0xa27   : > { %v11052_v40 = vpop.f32.mrf.mxu0  ;;  %7290 = vperm.xlu1 %11963, %v14963_v7   ;;  %v16872_v7 = vmov 0 }
 0xa28   : > { %11754 = vmatprep.mubr.msk.f32.mxu1 %vm16628_vm0, %v11051_v19 }
 0xa29   : > { %v11053_v20 = vpop.f32.mrf.mxu0  ;;  %7294 = vperm.xlu0 %11962, %v14957_v2   ;;  %v15233_v2 = vld [vmem:[%s15111_s1 + $0x58] sm:$0xff]  }
 0xa2a   : > { %v11054_v26 = vadd.f32 %v11053_v20, %v11052_v40  ;;  %v15100_v20 = vpop.permute.xlu0 %6759  ;;  %16880 = vst [vmem:[#allocation57_spill] sm:$0xff] %v15233_v2 }
 0xa2b   : > { %v11055_v50 = vpop.f32.mrf.mxu0  ;;  %7298 = vperm.xlu1 %11963, %v14981_v28   ;;  %v15206_v28 = vld [vmem:[%s15111_s1 + $0x48] sm:$0xff]  }
 0xa2c   : > { %11755 = vmatmul.mubr.msk.f32.gmra.mxu1 %vm16628_vm0, %v11054_v26  ;;  %16866 = vst [vmem:[#allocation52_spill] sm:$0xff] %v15206_v28  ;;  %v16930_v37 = vunpack.c.l.bf16 %v15206_v28 }
 0xa2d   : > { %v11056_v62 = vpop.f32.mrf.mxu0  ;;  %7302 = vperm.xlu0 %11962, %v14977_v5  }
 0xa2e   : > { %v11057_v24 = vadd.f32 %v11056_v62, %v11055_v50  ;;  %v15104_v50 = vpop.permute.xlu1 %6764 }
 0xa2f   : > { %v11058_v41 = vpop.f32.mrf.mxu0  ;;  %7306 = vperm.xlu1 %11963, %v14993_v29   ;;  %v16863_v29 = vmov 0 }
 0xa30   : > { %11757 = vmatprep.mubr.msk.f32.mxu1 %vm16628_vm0, %v11057_v24 }
 0xa31   : > { %v11059_v49 = vpop.f32.mrf.mxu0  ;;  %7310 = vperm.xlu0 %11962, %v14989_v58  }
 0xa32   : > { %v11060_v52 = vadd.f32 %v11059_v49, %v11058_v41  ;;  %v15106_v41 = vpop.permute.xlu0 %6769 }
 0xa33   : > { %v11061_v16 = vpop.f32.mrf.mxu0  ;;  %7314 = vperm.xlu1 %11963, %v15005_v14  }
 0xa34   : > { %11758 = vmatmul.mubr.msk.f32.gmra.mxu1 %vm16628_vm0, %v11060_v52  ;;  %v15114_v52 = vpop.permute.xlu1 %6774 }
 0xa35   : > { %v11062_v12 = vpop.f32.mrf.mxu0  ;;  %7318 = vperm.xlu0 %11962, %v15001_v17  }
 0xa36   : > { %v11063_v1 = vadd.f32 %v11062_v12, %v11061_v16  ;;  %v15117_v12 = vld [vmem:[%s15111_s1 + $0x8] sm:$0xff]  }
 0xa37   : > { %v11064_v48 = vpop.f32.mrf.mxu0  ;;  %7322 = vperm.xlu1 %11963, %v15017_v46   ;;  %v15174_v46 = vld [vmem:[%s15111_s1 + $0x38] sm:$0xff]  }
 0xa38   : > { %11760 = vmatprep.mubr.msk.f32.mxu1 %vm16628_vm0, %v11063_v1  ;;  %v15120_v1 = vld [vmem:[%s15111_s1] sm:$0xff]   ;;  %16856 = vst [vmem:[#allocation48_spill] sm:$0xff] %v15174_v46 }
 0xa39   : > { %v11065_v11 = vpop.f32.mrf.mxu0  ;;  %7326 = vperm.xlu0 %11962, %v15013_v61   ;;  %v15177_v61 = vld [vmem:[%s15111_s1 + $0x40] sm:$0xff]  }
 0xa3a   : > { %v11066_v30 = vadd.f32 %v11065_v11, %v11064_v48  ;;  %v15122_v11 = vpop.permute.xlu0 %6779  ;;  %16857 = vst [vmem:[#allocation49_spill] sm:$0xff] %v15177_v61  ;;  %v16915_v35 = vunpack.c.h.bf16 %v15177_v61  ;;  %v16920_v18 = vunpack.c.l.bf16 %v15177_v61  ;;  %v16934_v61 = vmov 0 }
 0xa3b   : > { %v11067_v13 = vpop.f32.mrf.mxu0  ;;  %7330 = vperm.xlu1 %11963, %v15027_v9   ;;  %v16859_v9 = vmov 0 }
 0xa3c   : > { %11761 = vmatmul.mubr.msk.f32.gmra.mxu1 %vm16628_vm0, %v11066_v30 }
 0xa3d   : > { %v11068_v23 = vpop.f32.mrf.mxu0  ;;  %7334 = vperm.xlu0 %11962, %v15024_v27   ;;  %v16858_v27 = vunpack.c.l.bf16 %v15117_v12 }
 0xa3e   : > { %v11069_v54 = vadd.f32 %v11068_v23, %v11067_v13  ;;  %v15125_v13 = vpop.permute.xlu1 %6784  ;;  %v16601_v23 = vunpack.c.h.bf16 %v15117_v12 }
 0xa3f   : > { %v11070_v36 = vpop.f32.mrf.mxu0  ;;  %vm15188_vm6 = vcmp.gt.f32.partialorder %v16858_v27, 0.0  ;;  %v15230_v27 = vld [vmem:[%s15111_s1 + $0x50] sm:$0xff]  }
 0xa40   : > { %11763 = vmatprep.mubr.msk.f32.mxu1 %vm16628_vm0, %v11069_v54  ;;  %v16605_v54 = vunpack.c.h.bf16 %v15120_v1  ;;  %vm15151_vm3 = vcmp.gt.f32.partialorder %v16601_v23, 0.0  ;;  %v16860_v9 = vsel %vm15188_vm6, 4294967295, %v16859_v9  ;;  %16879 = vst [vmem:[#allocation56_spill] sm:$0xff] %v15230_v27 }
 0xa41   : > { %v11071_v44 = vpop.f32.mrf.mxu0  ;;  %16861 = vst [vmem:[#allocation50_spill] sm:$0xff] %v16860_v9 }
 0xa42   : > { %v11072_v45 = vadd.f32 %v11071_v44, %v11070_v36  ;;  %v15130_v36 = vld [vmem:[%s15111_s1 + $0x10] sm:$0xff]   ;;  %vm15157_vm4 = vcmp.gt.f32.partialorder %v16605_v54, 0.0 }
 0xa43   : > { %v11073_v6 = vpop.f32.mrf.mxu0  ;;  %v16862_v17 = vunpack.c.h.bf16 %v15130_v36  ;;  %v16867_v5 = vunpack.c.l.bf16 %v15130_v36 }
 0xa44   : > { %11764 = vmatmul.mubr.msk.f32.gmra.mxu1 %vm16628_vm0, %v11072_v45  ;;  %v16608_v45 = vunpack.c.l.bf16 %v15120_v1 }
 0xa45   : > { %v11074_v15 = vpop.f32.mrf.mxu0  ;;  %vm15194_vm7 = vcmp.gt.f32.partialorder %v16862_v17, 0.0  ;;  %vm15210_vm8 = vcmp.gt.f32.partialorder %v16867_v5, 0.0 }
 0xa46   : > { %v11075_v19 = vadd.f32 %v11074_v15, %v11073_v6  ;;  %v15133_v15 = vpop.permute.xlu0 %6789  ;;  %vm15166_vm5 = vcmp.gt.f32.partialorder %v16608_v45, 0.0  ;;  %v16864_v29 = vsel %vm15194_vm7, 4294967295, %v16863_v29 }
 0xa47   : > { %v11076_v40 = vpop.f32.mrf.mxu0  ;;  %16865 = vst [vmem:[#allocation51_spill] sm:$0xff] %v16864_v29  ;;  %v15341_v21 = vsel %vm15166_vm5, %v15083_v31, -1e+30  ;;  %v16938_v29 = vunpack.c.l.bf16 %v15230_v27 }
 0xa48   : > { %11766 = vmatprep.mubr.msk.f32.mxu1 %vm16628_vm0, %v11075_v19  ;;  %v15136_v19 = vld [vmem:[%s15111_s1 + $0x18] sm:$0xff]  }
 0xa49   : > { %v11077_v26 = vpop.f32.mrf.mxu0  ;;  %v16871_v23 = vunpack.c.h.bf16 %v15136_v19 }
 0xa4a   : > { %v11078_v62 = vadd.f32 %v11077_v26, %v11076_v40  ;;  %v16853_v40 = vmov 0  ;;  %v15179_v14 = vpop.permute.xlu0 %6799 }
 0xa4b   : > { %v11079_v24 = vpop.f32.mrf.mxu0  ;;  %v16854_v40 = vsel %vm15166_vm5, 4294967295, %v16853_v40  ;;  %vm15216_vm9 = vcmp.gt.f32.partialorder %v16871_v23, 0.0  ;;  %vm15401_vm5 = vcmp.gt.f32.partialorder %v16938_v29, 0.0 }
 0xa4c   : > { %11767 = vmatmul.mubr.msk.f32.gmra.mxu1 %vm16628_vm0, %v11078_v62  ;;  %v15142_v62 = vld [vmem:[%s15111_s1 + $0x20] sm:$0xff]   ;;  %16855 = vst [vmem:[#allocation47_spill] sm:$0xff] %v16854_v40  ;;  %v16873_v7 = vsel %vm15216_vm9, 4294967295, %v16872_v7  ;;  %v16950_v40 = vunpack.c.l.bf16 %v15233_v2 }
 0xa4d   : > { %v11080_v49 = vpop.f32.mrf.mxu0  ;;  %16874 = vst [vmem:[#allocation54_spill] sm:$0xff] %v16873_v7  ;;  %v16881_v23 = vunpack.c.h.bf16 %v15142_v62 }
 0xa4e   : > { %v11081_v16 = vadd.f32 %v11080_v49, %v11079_v24  ;;  %v15145_v24 = vld [vmem:[%s15111_s1 + $0x28] sm:$0xff]   ;;  %v15227_v5 = vpop.permute.xlu0 %6809 }
 0xa4f   : > { %v11082_v48 = vpop.f32.mrf.mxu0  ;;  %16845 = vst [vmem:[#allocation43_spill] sm:$0xff] %v15145_v24  ;;  %vm15237_vm11 = vcmp.gt.f32.partialorder %v16881_v23, 0.0  ;;  %v16889_v17 = vunpack.c.h.bf16 %v15145_v24  ;;  %v16893_v59 = vunpack.c.l.bf16 %v15145_v24  ;;  %v15261_v23 = vld [vmem:[%s15111_s1 + $0x60] sm:$0xff]   ;;  %v16959_v24 = vmov 0 }
 0xa50   : > { %11769 = vmatprep.mubr.msk.f32.mxu1 %vm16628_vm0, %v11081_v16  ;;  %v15147_v16 = vpop.permute.xlu1 %6794  ;;  %v16883_v60 = vsel %vm15237_vm11, 4294967295, %v16882_v60  ;;  %16897 = vst [vmem:[#allocation62_spill] sm:$0xff] %v15261_v23 }
 0xa51   : > { %v11083_v30 = vpop.f32.mrf.mxu0  ;;  %16884 = vst [vmem:[#allocation58_spill] sm:$0xff] %v16883_v60  ;;  %vm15249_vm13 = vcmp.gt.f32.partialorder %v16889_v17, 0.0  ;;  %vm15255_vm14 = vcmp.gt.f32.partialorder %v16893_v59, 0.0 }
 0xa52   : > { %v11084_v44 = vadd.f32 %v11083_v30, %v11082_v48  ;;  %v16846_v48 = vmov 0  ;;  %v16849_v30 = vmov 0  ;;  %v16891_v34 = vsel %vm15249_vm13, 4294967295, %v16890_v34 }
 0xa53   : > { %v11085_v6 = vpop.f32.mrf.mxu0  ;;  %v16847_v48 = vsel %vm15151_vm3, 4294967295, %v16846_v48  ;;  %v16850_v30 = vsel %vm15157_vm4, 4294967295, %v16849_v30  ;;  %16892 = vst [vmem:[#allocation60_spill] sm:$0xff] %v16891_v34  ;;  %v16895_v57 = vsel %vm15255_vm14, 4294967295, %v16894_v57  ;;  %v16954_v34 = vmov 0 }
 0xa54   : > { %11770 = vmatmul.mubr.msk.f32.gmra.mxu1 %vm16628_vm0, %v11084_v44  ;;  %16848 = vst [vmem:[#allocation44_spill] sm:$0xff] %v16847_v48  ;;  %16851 = vst [vmem:[#allocation45_spill] sm:$0xff] %v16850_v30  ;;  %v15162_v44 = vld [vmem:[%s15111_s1 + $0x30] sm:$0xff]   ;;  %v16942_v48 = vunpack.c.h.bf16 %v15233_v2  ;;  %s12509_s1 = sshll.u32 %s12569_s21, 4  ;;  %s12510_s1 = int_to_ptr.vmem [resolvable:$false] %s12509_s1 }
 0xa55   : > { %v11086_v49 = vpop.f32.mrf.mxu0  ;;  %16852 = vst [vmem:[#allocation46_spill] sm:$0xff] %v15162_v44  ;;  %16896 = vst [vmem:[#allocation61_spill] sm:$0xff] %v16895_v57  ;;  %v16902_v17 = vunpack.c.l.bf16 %v15162_v44  ;;  %s12511_s18 = scalar_lea.vmem %s12510_s1, 8192  ;;  %p12512_p0 = scmp.lt.s32.totalorder %s16479_s26, %s12510_s1 }
 0xa56   : > { %v11087_v26 = vadd.f32 %v11086_v49, %v11085_v6  ;;  %v16868_v49 = vmov 0  ;;  %v16875_v6 = vunpack.c.l.bf16 %v15136_v19  ;;  %p12513_p1 = scmp.lt.s32.totalorder %s12511_s18, %s12505_s22 }
 0xa57   : > { %v11088_v54 = vpop.f32.mrf.mxu0  ;;  %v16869_v49 = vsel %vm15210_vm8, 4294967295, %v16868_v49  ;;  %vm15271_vm2 = vcmp.gt.f32.partialorder %v16902_v17, 0.0  ;;  %v16911_v17 = vunpack.c.l.bf16 %v15174_v46 }
 0xa58   : > { %11772 = vmatprep.mubr.msk.f32.mxu1 %vm16628_vm0, %v11087_v26  ;;  %v15200_v26 = vpop.permute.xlu1 %6804  ;;  %16870 = vst [vmem:[#allocation53_spill] sm:$0xff] %v16869_v49  ;;  %vm15222_vm10 = vcmp.gt.f32.partialorder %v16875_v6, 0.0  ;;  %v16885_v6 = vunpack.c.l.bf16 %v15142_v62  ;;  %v16904_v10 = vsel %vm15271_vm2, 4294967295, %v16903_v10  ;;  %vm15296_vm2 = vcmp.gt.f32.partialorder %v16915_v35, 0.0  ;;  %v9021_v49 = vld [vmem:[%s16541_s16 + $0x38] sm:$0xff]  ;;  %p12514_p2 = por %p12513_p1, %p12512_p0 }
 0xa59   : > { %v11089_v45 = vpop.f32.mrf.mxu0  ;;  %16905 = vst [vmem:[#allocation64_spill] sm:$0xff] %v16904_v10  ;;  %v16917_v38 = vsel %vm15296_vm2, 4294967295, %v16916_v38  ;;  %v16921_v35 = vmov 0  ;;  %11843 = vmatprep.subr.mxu1 %v9021_v49 }
 0xa5a   : > { %v11090_v58 = vadd.f32 %v11089_v45, %v11088_v54  ;;  %v16876_v54 = vmov 0  ;;  %vm15243_vm12 = vcmp.gt.f32.partialorder %v16885_v6, 0.0  ;;  %v16898_v6 = vunpack.c.h.bf16 %v15162_v44  ;;  %16918 = vst [vmem:[#allocation68_spill] sm:$0xff] %v16917_v38  ;;  %11844 = vmatpush3.msra.mxu1 %v9021_v49  ;;  %v9019_v49 = vld [vmem:[%s16541_s16 + $0x28] sm:$0xff]  ;;  %p12515_p3 = pnand %p12514_p2, %p12508_p13 }
 0xa5b   : > { %v16877_v54 = vsel %vm15222_vm10, 4294967295, %v16876_v54  ;;  %v11091_v45 = vpop.f32.mrf.mxu0  ;;  %v16887_v53 = vsel %vm15243_vm12, 4294967295, %v16886_v53  ;;  %v15431_v30 = vsel %vm15243_vm12, %v15100_v20, -1e+30  ;;  %v16951_v44 = vmov 0 }
 0xa5c   : > { %16878 = vst [vmem:[#allocation55_spill] sm:$0xff] %v16877_v54  ;;  %16888 = vst [vmem:[#allocation59_spill] sm:$0xff] %v16887_v53  ;;  %11773 = vmatmul.mubr.msk.f32.gmra.mxu1 %vm16628_vm0, %v11090_v58  ;;  %vm15265_vm15 = vcmp.gt.f32.partialorder %v16898_v6, 0.0  ;;  %v15276_v8 = vpop.permute.xlu1 %6814  ;;  %v16907_v6 = vunpack.c.h.bf16 %v15174_v46  ;;  %vm15290_vm0 = vcmp.gt.f32.partialorder %v16911_v17, 0.0  ;;  %v15309_v17 = vsel %vm15157_vm4, %v15075_v25, -1e+30 }
 0xa5d   : > { %v16900_v43 = vsel %vm15265_vm15, 4294967295, %v16899_v43  ;;  %v11092_v59 = vpop.f32.mrf.mxu0  ;;  %v16913_v56 = vsel %vm15290_vm0, 4294967295, %v16912_v56  ;;  %vm15313_vm0 = vcmp.gt.f32.partialorder %v16920_v18, 0.0  ;;  %v15328_v25 = vsel %vm15151_vm3, %v15078_v4, -1e+30 }
 0xa5e   : > { %16901 = vst [vmem:[#allocation63_spill] sm:$0xff] %v16900_v43  ;;  %vm15284_vm1 = vcmp.gt.f32.partialorder %v16907_v6, 0.0  ;;  %16914 = vst [vmem:[#allocation67_spill] sm:$0xff] %v16913_v56  ;;  %v11093_v58 = vadd.f32 %v11092_v59, %v11091_v45  ;;  %v16922_v35 = vsel %vm15313_vm0, 4294967295, %v16921_v35  ;;  %v15317_v59 = vpop.permute.xlu0 %6819  ;;  %v15333_v18 = vsel %vm15194_vm7, %v15093_v0, -1e+30 }
 0xa5f   : > { %v16909_v55 = vsel %vm15284_vm1, 4294967295, %v16908_v55  ;;  %16923 = vst [vmem:[#allocation70_spill] sm:$0xff] %v16922_v35  ;;  %v11094_v45 = vpop.f32.mrf.mxu0  ;;  %vm16925_vm4 = vcmask 261120   ;;  %v15346_v4 = vsel %vm15210_vm8, %v15090_v33, -1e+30  ;;  %vm16929_vm7 = vcmask 261120  }
 0xa60   : > { %16910 = vst [vmem:[#allocation66_spill] sm:$0xff] %v16909_v55  ;;  %11775 = vmatprep.mubr.msk.f32.mxu1 %vm16925_vm4, %v11093_v58  ;;  %v15351_v0 = vsel %vm15216_vm9, %v15098_v39, -1e+30  ;;  %v16926_v58 = vunpack.c.h.bf16 %v15206_v28  ;;  %v15359_v32 = vpop.permute.xlu1 %6824  ;;  %v15364_v33 = vsel %vm16929_vm7, %v15309_v17, -inf  ;;  %vm15368_vm8 = vcmp.gt.f32.partialorder %v16930_v37, 0.0  ;;  %vm16937_vm3 = vmmov %vm16929_vm7 }
 0xa61   : > { %v11095_v63 = vpop.f32.mrf.mxu0  ;;  %v15385_v37 = vsel %vm16929_vm7, %v15328_v25, -inf  ;;  %v16939_v28 = vmov 0  ;;  %vm15407_vm7 = vcmp.gt.f32.partialorder %v16942_v48, 0.0  ;;  %v9020_v48 = vld [vmem:[%s16541_s16 + $0x30] sm:$0xff]  ;;  %v15436_v46 = vsel %vm15249_vm13, %v15114_v52, -1e+30 }
 0xa62   : > { %vm15355_vm4 = vcmp.gt.f32.partialorder %v16926_v58, 0.0  ;;  %v11096_v7 = vadd.f32 %v11095_v63, %v11094_v45  ;;  %v16933_v58 = vunpack.c.h.bf16 %v15230_v27  ;;  %v15390_v63 = vsel %vm15188_vm6, %v15086_v3, -1e+30  ;;  %v15411_v9 = vpop.permute.xlu0 %6829  ;;  %vm16946_vm6 = vmmov %vm16937_vm3  ;;  %16948 = vst [vmem:[#allocation74_spill] sm:$0xff] %v15436_v46  ;;  %11845 = vmatprep.subr.mxu1 %v9020_v48 }
 0xa63   : > { %v6915_v45 = vsel %vm16937_vm3, %v15333_v18, -inf  ;;  %v11097_v31 = vpop.f32.mrf.mxu0  ;;  %v16940_v28 = vsel %vm15401_vm5, 4294967295, %v16939_v28  ;;  %v16943_v3 = vmov 0  ;;  %v6919_v29 = vsel %vm16946_vm6, %v15351_v0, -inf  ;;  %vm16947_vm5 = vmmov %vm16937_vm3  ;;  %11846 = vmatpush3.msra.mxu1 %v9020_v48  ;;  %v9018_v48 = vld [vmem:[%s16541_s16 + $0x20] sm:$0xff] }
 0xa64   : > { %vm15374_vm9 = vcmp.gt.f32.partialorder %v16933_v58, 0.0  ;;  %v15397_v58 = vsel %vm15222_vm10, %v15095_v47, -1e+30  ;;  %16941 = vst [vmem:[#allocation73_spill] sm:$0xff] %v16940_v28  ;;  %v16944_v3 = vsel %vm15407_vm7, 4294967295, %v16943_v3  ;;  %v6909_v47 = vsel %vm16937_vm3, %v15341_v21, -inf  ;;  %vm16945_vm10 = vmmov %vm16937_vm3  ;;  %11776 = vmatmul.mubr.msk.f32.gmra.mxu1 %vm16947_vm5, %v11096_v7  ;;  %v15443_v60 = vpop.permute.xlu1 %6834  ;;  %11847 = vmatprep.subr.mxu1 %v9019_v49 }
 0xa65   : > { %v16935_v61 = vsel %vm15374_vm9, 4294967295, %v16934_v61  ;;  %v6913_v54 = vsel %vm16945_vm10, %v15346_v4, -inf  ;;  %v15422_v27 = vsel %vm15237_vm11, %v15104_v50, -1e+30  ;;  %v15441_v50 = vsel %vm15255_vm14, %v15106_v41, -1e+30  ;;  %v11098_v7 = vpop.f32.mrf.mxu0  ;;  %vm16957_vm10 = vmmov %vm16937_vm3  ;;  %11848 = vmatpush3.msra.mxu1 %v9019_v49 }
 0xa66   : > { %16936 = vst [vmem:[#allocation72_spill] sm:$0xff] %v16935_v61  ;;  %16949 = vst [vmem:[#allocation75_spill] sm:$0xff] %v15441_v50  ;;  %vm15447_vm5 = vcmp.gt.f32.partialorder %v16950_v40, 0.0  ;;  %v16953_v20 = vunpack.c.l.bf16 %v15261_v23  ;;  %v6911_v41 = vsel %vm16957_vm10, %v15390_v63, -inf  ;;  %v6916_v57 = vmax.f32 %v15364_v33, %v6915_v45  ;;  %v15480_v45 = vpop.permute.xlu0 %6839  ;;  %11849 = vmatprep.subr.mxu1 %v9018_v48 }
 0xa67   : > { %v16952_v44 = vsel %vm15447_vm5, 4294967295, %v16951_v44  ;;  %v6917_v40 = vsel %vm16937_vm3, %v15397_v58, -inf  ;;  %v11099_v2 = vadd.f32 %v11098_v7, %v11097_v31  ;;  %v16958_v53 = vunpack.c.h.bf16 %v15261_v23  ;;  %vm16962_vm10 = vmmov %vm16937_vm3  ;;  %11850 = vmatpush3.msra.mxu1 %v9018_v48 }
 0xa68   : > { %vm15453_vm6 = vcmp.gt.f32.partialorder %v16953_v20, 0.0  ;;  %v6914_v20 = vmax.f32 %v6909_v47, %v6913_v54  ;;  %v6920_v52 = vmax.f32 %v15385_v37, %v6919_v29  ;;  %v6923_v33 = vsel %vm16962_vm10, %v15422_v27, -inf }
 0xa69   : > { %v16955_v34 = vsel %vm15453_vm6, 4294967295, %v16954_v34  ;;  %vm15465_vm13 = vcmp.gt.f32.partialorder %v16958_v53, 0.0  ;;  %v15478_v31 = vsel %vm15265_vm15, %v15125_v13, -1e+30  ;;  %v11100_v53 = vpop.f32.mrf.mxu0  ;;  %v16963_v7 = vunpack.c.h.bf16 %v15280_v51 }
 0xa6a   : > { %16956 = vst [vmem:[#allocation76_spill] sm:$0xff] %v16955_v34  ;;  %v16960_v24 = vsel %vm15465_vm13, 4294967295, %v16959_v24  ;;  %v16964_v23 = vmov 0  ;;  %v16967_v54 = vunpack.c.l.bf16 %v15280_v51  ;;  %v16968_v37 = vmov 0 }
 0xa6b   : > { %16961 = vst [vmem:[#allocation77_spill] sm:$0xff] %v16960_v24  ;;  %vm15484_vm3 = vcmp.gt.f32.partialorder %v16963_v7, 0.0  ;;  %v16971_v47 = vunpack.c.l.bf16 %v15304_v42  ;;  %v16972_v13 = vmov 0  ;;  %vm16975_vm15 = vcmask 261120  }
 0xa6c   : > { %v16965_v23 = vsel %vm15484_vm3, 4294967295, %v16964_v23  ;;  %vm15490_vm14 = vcmp.gt.f32.partialorder %v16967_v54, 0.0  ;;  %v6921_v29 = vsel %vm16975_vm15, %v15431_v30, -inf  ;;  %vm16976_vm11 = vmmov %vm16975_vm15  ;;  %vm16978_vm3 = vnez %v16904_v10  ;;  %v6845_v10 = vpop.permute.xlu1 %6844 }
 0xa6d   : > { %16966 = vst [vmem:[#allocation78_spill] sm:$0xff] %v16965_v23  ;;  %v16969_v37 = vsel %vm15490_vm14, 4294967295, %v16968_v37  ;;  %vm15496_vm10 = vcmp.gt.f32.partialorder %v16971_v47, 0.0  ;;  %v6927_v7 = vsel %vm16976_vm11, %v15436_v46, -inf  ;;  %vm16977_vm12 = vmmov %vm16976_vm11  ;;  %v15509_v54 = vsel %vm16978_vm3, %v15122_v11, -1e+30  ;;  %v11101_v11 = vpop.f32.mrf.mxu0 }
 0xa6e   : > { %16970 = vst [vmem:[#allocation79_spill] sm:$0xff] %v16969_v37  ;;  %v16973_v13 = vsel %vm15496_vm10, 4294967295, %v16972_v13  ;;  %v6925_v51 = vsel %vm16977_vm12, %v15441_v50, -inf  ;;  %vm16979_vm14 = vmmov %vm16976_vm11  ;;  %v6918_v47 = vmax.f32 %v6911_v41, %v6917_v40  ;;  %v15518_v43 = vsel %vm15284_vm1, %v15147_v16, -1e+30 }
 0xa6f   : > { %16974 = vst [vmem:[#allocation80_spill] sm:$0xff] %v16973_v13  ;;  %11778 = vmatprep.mubr.msk.f32.mxu1 %vm16979_vm14, %v11099_v2  ;;  %vm16980_vm11 = vnez %v16913_v56  ;;  %v15528_v2 = vsel %vm15296_vm2, %v15200_v26, -1e+30  ;;  %v16981_v50 = vunpack.c.h.bf16 %v15304_v42  ;;  %v16982_v41 = vmov 0  ;;  %v9017_v42 = vld [vmem:[%s16541_s16 + $0x18] sm:$0xff]  ;;  %vm16985_vm15 = vmmov %vm16979_vm14  ;;  %v11103_v49 = vpop.f32.mrf.mxu0 }
 0xa70   : > { %v15523_v46 = vsel %vm16980_vm11, %v15133_v15, -1e+30  ;;  %v6924_v16 = vmax.f32 %v6916_v57, %v6923_v33  ;;  %v6931_v40 = vsel %vm16979_vm14, %v15478_v31, -inf  ;;  %v15541_v15 = vsel %vm15313_vm0, %v15179_v14, -1e+30  ;;  %v6850_v33 = vpop.permute.xlu0 %6849  ;;  %vm16990_vm2 = vmmov %vm16985_vm15  ;;  %11851 = vmatprep.subr.mxu1 %v9017_v42 }
 0xa71   : > { %vm15532_vm12 = vcmp.gt.f32.partialorder %v16981_v50, 0.0  ;;  %v11102_v26 = vadd.f32 %v11101_v11, %v11100_v53  ;;  %v6922_v50 = vmax.f32 %v6914_v20, %v6921_v29  ;;  %v6928_v38 = vmax.f32 %v6920_v52, %v6927_v7  ;;  %vm16991_vm0 = vmmov %vm16990_vm2  ;;  %v11104_v48 = vpop.f32.mrf.mxu0  ;;  %11852 = vmatpush3.msra.mxu1 %v9017_v42 }
 0xa72   : > { %v16983_v41 = vsel %vm15532_vm12, 4294967295, %v16982_v41  ;;  %v6926_v55 = vmax.f32 %v6918_v47, %v6925_v51  ;;  %v6929_v57 = vsel %vm16985_vm15, %v15509_v54, -inf  ;;  %v16986_v56 = vunpack.c.h.bf16 %v15323_v22  ;;  %vm16992_vm1 = vmmov %vm16991_vm0  ;;  %v6855_v47 = vpop.permute.xlu1 %6854 }
 0xa73   : > { %16984 = vst [vmem:[#allocation81_spill] sm:$0xff] %v16983_v41  ;;  %v16987_v35 = vmov 0  ;;  %v6935_v14 = vsel %vm16990_vm2, %v15518_v43, -inf  ;;  %v6933_v20 = vsel %vm16991_vm0, %v15523_v46, -inf  ;;  %v6939_v51 = vsel %vm16992_vm1, %v15528_v2, -inf  ;;  %vm16993_vm15 = vmmov %vm16991_vm0 }
 0xa74   : > { %vm15550_vm14 = vcmp.gt.f32.partialorder %v16986_v56, 0.0  ;;  %v15563_v52 = vsel %vm15355_vm4, %v15276_v8, -1e+30  ;;  %11779 = vmatmul.mubr.msk.f32.gmra.mxu1 %vm16993_vm15, %v11102_v26  ;;  %v9016_v56 = vld [vmem:[%s16541_s16 + $0x10] sm:$0xff]  ;;  %v6932_v53 = vmax.f32 %v6924_v16, %v6931_v40  ;;  %vm16994_vm2 = vmmov %vm16991_vm0  ;;  %v15574_v7 = vsel %vm15368_vm8, %v15227_v5, -1e+30 }
 0xa75   : > { %v16988_v35 = vsel %vm15550_vm14, 4294967295, %v16987_v35  ;;  %v6937_v29 = vsel %vm16994_vm2, %v15541_v15, -inf  ;;  %v15579_v8 = vsel %vm15374_vm9, %v15359_v32, -1e+30  ;;  %v16995_v11 = vunpack.c.l.bf16 %v15323_v22  ;;  %11853 = vmatprep.subr.mxu1 %v9016_v56  ;;  %vm16999_vm15 = vmmov %vm16994_vm2 }
 0xa76   : > { %16989 = vst [vmem:[#allocation82_spill] sm:$0xff] %v16988_v35  ;;  %v6930_v16 = vmax.f32 %v6922_v50, %v6929_v57  ;;  %vm16998_vm1 = vnez %v16940_v28  ;;  %v15595_v32 = vsel %vm15407_vm7, %v15443_v60, -1e+30  ;;  %v11105_v40 = vadd.f32 %v11104_v48, %v11103_v49  ;;  %v11106_v57 = vpop.f32.mrf.mxu0  ;;  %11854 = vmatpush3.msra.mxu1 %v9016_v56  ;;  %vm17000_vm7 = vmmov %vm16994_vm2  ;;  %v6865_v56 = vpop.permute.xlu1 %6864 }
 0xa77   : > { %vm15583_vm0 = vcmp.gt.f32.partialorder %v16995_v11, 0.0  ;;  %v15590_v5 = vsel %vm16998_vm1, %v15317_v59, -1e+30  ;;  %v9015_v11 = vld [vmem:[%s16541_s16 + $0x8] sm:$0xff]  ;;  %v6936_v22 = vmax.f32 %v6928_v38, %v6935_v14  ;;  %v6934_v61 = vmax.f32 %v6926_v55, %v6933_v20  ;;  %v6860_v59 = vpop.permute.xlu0 %6859  ;;  %v9014_v55 = vld [vmem:[%s16541_s16] sm:$0xff] }
 0xa78   : > { %v6940_v42 = vmax.f32 %v6932_v53, %v6939_v51  ;;  %v6943_v50 = vsel %vm16999_vm15, %v15563_v52, -inf  ;;  %v6938_v28 = vmax.f32 %v6930_v16, %v6937_v29  ;;  %v6941_v60 = vsel %vm16994_vm2, %v15574_v7, -inf  ;;  %11781 = vmatprep.mubr.msk.f32.mxu1 %vm17000_vm7, %v11105_v40  ;;  %11855 = vmatprep.subr.mxu1 %v9015_v11  ;;  %vm17001_vm15 = vmmov %vm16994_vm2  ;;  %v11107_v51 = vpop.f32.mrf.mxu0 }
 0xa79   : > { %v15607_v49 = vsel %vm15447_vm5, %v15411_v9, -1e+30  ;;  %v15612_v38 = vsel %vm15453_vm6, %v15480_v45, -1e+30  ;;  %v6947_v14 = vsel %vm17001_vm15, %v15579_v8, -inf  ;;  %v6945_v20 = vsel %vm16994_vm2, %v15590_v5, -inf  ;;  %vm17002_vm5 = vmmov %vm16994_vm2  ;;  %11856 = vmatpush3.msra.mxu1 %v9015_v11 }
 0xa7a   : > { %v6951_v9 = vsel %vm17002_vm5, %v15595_v32, -inf  ;;  %v15626_v45 = vsel %vm15465_vm13, %v6845_v10, -1e+30  ;;  %vm17003_vm7 = vnez %v16965_v23  ;;  %vm17004_vm6 = vnez %v16969_v37  ;;  %11857 = vmatprep.subr.mxu1 %v9014_v55  ;;  %vm17005_vm5 = vmmov %vm16994_vm2 }
 0xa7b   : > { %v15630_v53 = vsel %vm17003_vm7, %v6855_v47, -1e+30  ;;  %v15634_v29 = vsel %vm17004_vm6, %v6850_v33, -1e+30  ;;  %v11108_v48 = vadd.f32 %v11107_v51, %v11106_v57  ;;  %v15638_v16 = vsel %vm15496_vm10, %v6860_v59, -1e+30  ;;  %vm17006_vm15 = vmmov %vm16994_vm2  ;;  %v11109_v47 = vpop.f32.mrf.mxu0  ;;  %11858 = vmatpush3.msra.mxu1 %v9014_v55  ;;  %v6875_v59 = vpop.permute.xlu1 %6874 }
 0xa7c   : > { %v6944_v40 = vmax.f32 %v6936_v22, %v6943_v50  ;;  %v6942_v10 = vmax.f32 %v6934_v61, %v6941_v60  ;;  %v6949_v24 = vsel %vm17005_vm5, %v15607_v49, -inf  ;;  %v6953_v11 = vsel %vm17006_vm15, %v15612_v38, -inf  ;;  %vm17007_vm10 = vmmov %vm16994_vm2 }
 0xa7d   : > { %v6948_v23 = vmax.f32 %v6940_v42, %v6947_v14  ;;  %v6946_v37 = vmax.f32 %v6938_v28, %v6945_v20  ;;  %v6955_v33 = vsel %vm16994_vm2, %v15626_v45, -inf  ;;  %v15648_v57 = vsel %vm15532_vm12, %v6865_v56, -1e+30  ;;  %11782 = vmatmul.mubr.msk.f32.gmra.mxu1 %vm17007_vm10, %v11108_v48  ;;  %vm17008_vm7 = vmmov %vm16994_vm2  ;;  %v11110_v28 = vpop.f32.mrf.mxu0 }
 0xa7e   : > { %v6952_v22 = vmax.f32 %v6944_v40, %v6951_v9  ;;  %v6959_v61 = vsel %vm17008_vm7, %v15630_v53, -inf  ;;  %vm17009_vm5 = vmmov %vm16994_vm2  ;;  %v6950_v60 = vmax.f32 %v6942_v10, %v6949_v24  ;;  %v11111_v14 = vadd.f32 %v11110_v28, %v11109_v47  ;;  %v6870_v40 = vpop.permute.xlu0 %6869 }
 0xa7f   : > { %v6957_v50 = vsel %vm17009_vm5, %v15634_v29, -inf  ;;  %vm17010_vm15 = vmmov %vm16994_vm2  ;;  %v6954_v55 = vmax.f32 %v6946_v37, %v6953_v11  ;;  %v15659_v20 = vsel %vm15550_vm14, %v6875_v59, -1e+30  ;;  %v6956_v51 = vmax.f32 %v6948_v23, %v6955_v33  ;;  %v11112_v48 = vpop.f32.mrf.mxu0  ;;  %v7215_v28 = vpop.permute.xlu1 %7214 }
 0xa80   : > { %v6961_v42 = vsel %vm17010_vm15, %v15638_v16, -inf  ;;  %vm17011_vm10 = vmmov %vm16994_vm2  ;;  %v6960_v41 = vmax.f32 %v6952_v22, %v6959_v61  ;;  %v6958_v13 = vmax.f32 %v6950_v60, %v6957_v50  ;;  %v15667_v24 = vsel %vm15583_vm0, %v6870_v40, -1e+30  ;;  %11784 = vmatprep.mubr.msk.f32.mxu1 %vm16994_vm2, %v11111_v14 }
 0xa81   : > { %v6963_v9 = vsel %vm17011_vm10, %v15648_v57, -inf  ;;  %vm17012_vm7 = vmmov %vm16994_vm2  ;;  %v6962_v34 = vmax.f32 %v6954_v55, %v6961_v42  ;;  %v11113_v37 = vpop.f32.mrf.mxu0  ;;  %v17014_v59 = vunpack.c.h.bf16 %v15120_v1  ;;  %v17016_v60 = vunpack.c.l.bf16 %v15120_v1 }
 0xa82   : > { %v6967_v56 = vsel %vm17012_vm7, %v15659_v20, -inf  ;;  %vm17013_vm5 = vmmov %vm16994_vm2  ;;  %v6964_v10 = vmax.f32 %v6956_v51, %v6963_v9  ;;  %v11114_v33 = vadd.f32 %v11113_v37, %v11112_v48  ;;  %v7211_v42 = vpop.permute.xlu0 %7210  ;;  %v17019_v9 = vunpack.c.l.bf16 %v15117_v12 }
 0xa83   : > { %v6965_v23 = vsel %vm17013_vm5, %v15667_v24, -inf  ;;  %v6968_v11 = vmax.f32 %v6960_v41, %v6967_v56  ;;  %v7338_v22 = vmul.f32 %v17014_v59, %v7215_v28  ;;  %vm17015_vm15 = vmmov %vm16994_vm2  ;;  %v7337_v55 = vmul.f32 %v17016_v60, %v7211_v42  ;;  %v7219_v40 = vpop.permute.xlu1 %7218 }
 0xa84   : > { %v6966_v47 = vmax.f32 %v6958_v13, %v6965_v23  ;;  %v6969_v61 = vmax.f32 %v6962_v34, %v6964_v10  ;;  %11785 = vmatmul.mubr.msk.f32.gmra.mxu1 %vm17015_vm15, %v11114_v33  ;;  %vm17017_vm10 = vmmov %vm16994_vm2  ;;  %v7339_v56 = vmul.f32 %v17019_v9, %v7219_v40  ;;  %v17020_v1 = vunpack.c.h.bf16 %v15117_v12 }
 0xa85   : > { %v7370_v35 = vsel %vm17017_vm10, %v7338_v22, 0.0  ;;  %vm17018_vm7 = vmmov %vm16994_vm2 }
 0xa86   : > { %v6970_v50 = vmax.f32 %v6966_v47, %v6968_v11  ;;  %v7369_v41 = vsel %vm17018_vm7, %v7337_v55, 0.0  ;;  %v7223_v48 = vpop.permute.xlu0 %7222  ;;  %v7372_v10 = vsel %vm16994_vm2, %v7339_v56, 0.0  ;;  %vm17021_vm5 = vmmov %vm16994_vm2 }
 0xa87   : > { %v7371_v51 = vadd.f32 %v7370_v35, %v7369_v41  ;;  %v7227_v23 = vpop.permute.xlu1 %7226  ;;  %v7340_v11 = vmul.f32 %v17020_v1, %v7223_v48  ;;  %v17022_v35 = vunpack.c.l.bf16 %v15130_v36  ;;  %vm17023_vm15 = vmmov %vm16994_vm2 }
 0xa88   : > { %v6971_v14 = vmax.f32 %v6969_v61, %v6970_v50  ;;  %vm17026_vm10 = vmmov %vm16994_vm2 }
 0xa89   : > { %v7373_v28 = vadd.f32 %v7372_v10, %v7371_v51  ;;  %v7374_v22 = vsel %vm17021_vm5, %v7340_v11, 0.0  ;;  %v7341_v61 = vmul.f32 %v17022_v35, %v7227_v23  ;;  %v17025_v51 = vunpack.c.l.bf16 %v15136_v19  ;;  %vm17027_vm7 = vmmov %vm16994_vm2 }
 0xa8a   : > { %v6972_v13 = vrot.slane %v6971_v14, 4  ;;  %v7231_v33 = vpop.permute.xlu0 %7230  ;;  %vm17033_vm5 = vmmov %vm16994_vm2 }
 0xa8b   : > { %v7235_v50 = vpop.permute.xlu1 %7234  ;;  %v7375_v42 = vadd.f32 %v7374_v22, %v7373_v28  ;;  %v7376_v55 = vsel %vm17023_vm15, %v7341_v61, 0.0  ;;  %vm17034_vm15 = vmmov %vm16994_vm2 }
 0xa8c   : > { %v6973_v34 = vmax.f32 %v6971_v14, %v6972_v13  ;;  %v17024_v14 = vunpack.c.h.bf16 %v15130_v36  ;;  %v7343_v9 = vmul.f32 %v17025_v51, %v7235_v50  ;;  %v17030_v51 = vunpack.c.h.bf16 %v15142_v62 }
 0xa8d   : > { %v7377_v13 = vadd.f32 %v7376_v55, %v7375_v42 }
 0xa8e   : > { %v6974_v37 = vrot.slane %v6973_v34, 2  ;;  %v7342_v40 = vmul.f32 %v17024_v14, %v7231_v33  ;;  %v7239_v12 = vpop.permute.xlu0 %7238  ;;  %v17029_v14 = vunpack.c.l.bf16 %v15142_v62 }
 0xa8f   : > { %v7243_v41 = vpop.permute.xlu1 %7242 }
 0xa90   : > { %v6975_v47 = vmax.f32 %v6973_v34, %v6974_v37  ;;  %v7378_v23 = vsel %vm17026_vm10, %v7342_v40, 0.0  ;;  %v7345_v40 = vmul.f32 %v17029_v14, %v7243_v41  ;;  %vm17038_vm10 = vmmov %vm16994_vm2 }
 0xa91   : > { %v7379_v11 = vadd.f32 %v7378_v23, %v7377_v13 }
 0xa92   : > { %v6976_v59 = vrot.slane %v6975_v47, 1  ;;  %v7247_v10 = vpop.permute.xlu0 %7246  ;;  %v7384_v62 = vsel %vm17033_vm5, %v7345_v40, 0.0 }
 0xa94   : > { %v15687_v60 = vmax.f32 %v6975_v47, %v6976_v59  ;;  %v7251_v59 = vpop.permute.xlu1 %7250 }
 0xa96   : > { %v6978_v56 = vsub.f32 %v15341_v21, %v15687_v60  ;;  %v6979_v48 = vsub.f32 %v15309_v17, %v15687_v60  ;;  %v6980_v34 = vsub.f32 %v15390_v63, %v15687_v60  ;;  %v6981_v36 = vsub.f32 %v15328_v25, %v15687_v60  ;;  %v7255_v42 = vpop.permute.xlu0 %7254 }
 0xa97   : > { %v6982_v37 = vsub.f32 %v15346_v4, %v15687_v60  ;;  %v6983_v1 = vsub.f32 %v15333_v18, %v15687_v60  ;;  %v7380_v21 = vsel %vm17027_vm7, %v7343_v9, 0.0  ;;  %v17028_v63 = vunpack.c.h.bf16 %v15136_v19  ;;  %vm17041_vm7 = vmmov %vm16994_vm2 }
 0xa98   : > { %v7010_v47 = vmul.f32 1.442695, %v6978_v56  ;;  %v7012_v17 = vmul.f32 1.442695, %v6979_v48  ;;  %v7014_v33 = vmul.f32 1.442695, %v6980_v34  ;;  %v6984_v25 = vsub.f32 %v15397_v58, %v15687_v60 }
 0xa99   : > { %v7344_v28 = vmul.f32 %v17028_v63, %v7239_v12  ;;  %v7016_v22 = vmul.f32 1.442695, %v6981_v36  ;;  %v7018_v4 = vmul.f32 1.442695, %v6982_v37  ;;  %v6985_v35 = vsub.f32 %v15351_v0, %v15687_v60  ;;  %v7259_v0 = vpop.permute.xlu1 %7258  ;;  %v17031_v56 = vld [vmem:[#allocation75_spill] sm:$0xff] }
 0xa9a   : > { %12324 = vpow2.f32 %v7010_v47  ;;  %v7020_v18 = vmul.f32 1.442695, %v6983_v1  ;;  %v7381_v61 = vadd.f32 %v7380_v21, %v7379_v11  ;;  %v6986_v19 = vsub.f32 %v15431_v30, %v15687_v60  ;;  %v17032_v30 = vld [vmem:[#allocation74_spill] sm:$0xff]  ;;  %v17035_v21 = vld [vmem:[#allocation43_spill] sm:$0xff] }
 0xa9b   : > { %12326 = vpow2.f32 %v7012_v17  ;;  %v7382_v50 = vsel %vm16994_vm2, %v7344_v28, 0.0  ;;  %v7022_v55 = vmul.f32 1.442695, %v6984_v25  ;;  %v6987_v58 = vsub.f32 %v15422_v27, %v15687_v60 }
 0xa9c   : > { %12328 = vpow2.f32 %v7014_v33  ;;  %v7024_v12 = vmul.f32 1.442695, %v6985_v35  ;;  %v7383_v13 = vadd.f32 %v7382_v50, %v7381_v61  ;;  %v7346_v9 = vmul.f32 %v17030_v51, %v7247_v10  ;;  %v7263_v10 = vpop.permute.xlu0 %7262  ;;  %v17045_v51 = vld [vmem:[#allocation48_spill] sm:$0xff] }
 0xa9d   : > { %12330 = vpow2.f32 %v7016_v22  ;;  %v6988_v48 = vsub.f32 %v17031_v56, %v15687_v60  ;;  %v6989_v34 = vsub.f32 %v17032_v30, %v15687_v60  ;;  %v6990_v27 = vsub.f32 %v15509_v54, %v15687_v60  ;;  %v7267_v28 = vpop.permute.xlu1 %7266 }
 0xa9e   : > { %12332 = vpow2.f32 %v7018_v4  ;;  %v7026_v23 = vmul.f32 1.442695, %v6986_v19  ;;  %v6991_v41 = vsub.f32 %v15478_v31, %v15687_v60  ;;  %v6992_v36 = vsub.f32 %v15523_v46, %v15687_v60  ;;  %v17039_v4 = vld [vmem:[#allocation46_spill] sm:$0xff] }
 0xa9f   : > { %12334 = vpow2.f32 %v7020_v18  ;;  %v7028_v37 = vmul.f32 1.442695, %v6987_v58  ;;  %v7385_v1 = vadd.f32 %v7384_v62, %v7383_v13  ;;  %v7386_v11 = vsel %vm17034_vm15, %v7346_v9, 0.0  ;;  %vm17049_vm15 = vmmov %vm17041_vm7 }
 0xaa0   : > { %12336 = vpow2.f32 %v7022_v55  ;;  %v17036_v47 = vunpack.c.l.bf16 %v17035_v21  ;;  %v6993_v54 = vsub.f32 %v15518_v43, %v15687_v60  ;;  %v6994_v31 = vsub.f32 %v15541_v15, %v15687_v60 }
 0xaa1   : > { %12338 = vpow2.f32 %v7024_v12  ;;  %v7030_v33 = vmul.f32 1.442695, %v6988_v48  ;;  %v17037_v46 = vunpack.c.h.bf16 %v17035_v21  ;;  %v7387_v25 = vadd.f32 %v7386_v11, %v7385_v1  ;;  %v17043_v12 = vld [vmem:[#allocation47_spill] sm:$0xff]  ;;  %v7271_v48 = vpop.permute.xlu0 %7270  ;;  %v17051_v11 = vld [vmem:[#allocation50_spill] sm:$0xff] }
 0xaa2   : > { %v7347_v17 = vmul.f32 %v17036_v47, %v7251_v59  ;;  %12340 = vpow2.f32 %v7026_v23  ;;  %v17040_v35 = vunpack.c.l.bf16 %v17039_v4  ;;  %v6995_v59 = vsub.f32 %v15528_v2, %v15687_v60 }
 0xaa3   : > { %v7348_v63 = vmul.f32 %v17037_v46, %v7255_v42  ;;  %v6996_v43 = vsub.f32 %v15574_v7, %v15687_v60  ;;  %v7032_v61 = vmul.f32 1.442695, %v6989_v34  ;;  %v6997_v42 = vsub.f32 %v15563_v52, %v15687_v60  ;;  %v17047_v34 = vld [vmem:[#allocation45_spill] sm:$0xff]  ;;  %v17054_v46 = vld [vmem:[#allocation44_spill] sm:$0xff] }
 0xaa4   : > { %v7388_v22 = vsel %vm17038_vm10, %v7347_v17, 0.0  ;;  %v7349_v18 = vmul.f32 %v17040_v35, %v7259_v0  ;;  %12342 = vpow2.f32 %v7028_v37  ;;  %v17042_v58 = vunpack.c.h.bf16 %v17039_v4  ;;  %vm17050_vm10 = vmmov %vm17041_vm7  ;;  %v7275_v17 = vpop.permute.xlu1 %7274 }
 0xaa5   : > { %v7390_v50 = vsel %vm17041_vm7, %v7348_v63, 0.0  ;;  %v7389_v55 = vadd.f32 %v7388_v22, %v7387_v25  ;;  %12344 = vpow2.f32 %v7030_v33  ;;  %v7034_v0 = vmul.f32 1.442695, %v6990_v27 }
 0xaa6   : > { %v7350_v14 = vmul.f32 %v17042_v58, %v7263_v10  ;;  %vm17044_vm2 = vnez %v17043_v12  ;;  %v17046_v9 = vunpack.c.l.bf16 %v17045_v51  ;;  %vm17048_vm5 = vnez %v17047_v34 }
 0xaa7   : > { %v12325_v19 = vpop.eup %12324  ;;  %v7391_v62 = vadd.f32 %v7390_v50, %v7389_v55  ;;  %v7392_v10 = vsel %vm17050_vm10, %v7349_v18, 0.0  ;;  %12346 = vpow2.f32 %v7032_v61  ;;  %v7036_v1 = vmul.f32 1.442695, %v6991_v41 }
 0xaa8   : > { %v12327_v40 = vpop.eup %12326  ;;  %v15757_v13 = vsel %vm17044_vm2, %v12325_v19, 0.0  ;;  %v7351_v56 = vmul.f32 %v17046_v9, %v7267_v28  ;;  %vm17052_vm7 = vnez %v17051_v11  ;;  %vm17053_vm2 = vmmov %vm17050_vm10  ;;  %v17057_v22 = vunpack.c.h.bf16 %v17045_v51  ;;  %v17059_v19 = vld [vmem:[#allocation53_spill] sm:$0xff]  ;;  %v7279_v9 = vpop.permute.xlu0 %7278 }
 0xaa9   : > { %v12329_v30 = vpop.eup %12328  ;;  %v15763_v23 = vsel %vm17048_vm5, %v12327_v40, 0.0  ;;  %v7106_v37 = vsel %vm17049_vm15, %v15757_v13, 0.0  ;;  %vm17055_vm5 = vnez %v17054_v46  ;;  %vm17056_vm15 = vmmov %vm17053_vm2  ;;  %v6998_v35 = vsub.f32 %v15590_v5, %v15687_v60  ;;  %v7283_v11 = vpop.permute.xlu1 %7282 }
 0xaaa   : > { %v12331_v27 = vpop.eup %12330  ;;  %v15770_v21 = vsel %vm17052_vm7, %v12329_v30, 0.0  ;;  %v7107_v47 = vsel %vm17053_vm2, %v15763_v23, 0.0  ;;  %v7394_v25 = vsel %vm17056_vm15, %v7350_v14, 0.0  ;;  %v7352_v4 = vmul.f32 %v17057_v22, %v7271_v48  ;;  %vm17058_vm10 = vmmov %vm17053_vm2  ;;  %v17062_v48 = vld [vmem:[#allocation51_spill] sm:$0xff] }
 0xaab   : > { %v12333_v33 = vpop.eup %12332  ;;  %v15776_v63 = vsel %vm17055_vm5, %v12331_v27, 0.0  ;;  %v7108_v28 = vadd.f32 %v7107_v47, %v7106_v37  ;;  %v7038_v18 = vmul.f32 1.442695, %v6992_v36  ;;  %v7109_v61 = vsel %vm17058_vm10, %v15770_v21, 0.0  ;;  %vm17061_vm5 = vmmov %vm17053_vm2  ;;  %v17068_v47 = vld [vmem:[#allocation55_spill] sm:$0xff] }
 0xaac   : > { %v12335_v41 = vpop.eup %12334  ;;  %v7393_v50 = vadd.f32 %v7392_v10, %v7391_v62  ;;  %12348 = vpow2.f32 %v7034_v0  ;;  %vm17060_vm7 = vnez %v17059_v19  ;;  %v7396_v14 = vsel %vm17053_vm2, %v7351_v56, 0.0  ;;  %vm17064_vm10 = vmmov %vm17053_vm2  ;;  %v17066_v62 = vld [vmem:[#allocation49_spill] sm:$0xff]  ;;  %v7287_v2 = vpop.permute.xlu0 %7286 }
 0xaad   : > { %v15787_v55 = vsel %vm17060_vm7, %v12333_v33, 0.0  ;;  %v7110_v58 = vadd.f32 %v7109_v61, %v7108_v28  ;;  %v12337_v40 = vpop.eup %12336  ;;  %v6999_v12 = vsub.f32 %v15579_v8, %v15687_v60  ;;  %v7040_v51 = vmul.f32 1.442695, %v6993_v54  ;;  %vm17065_vm7 = vmmov %vm17053_vm2 }
 0xaae   : > { %v7111_v5 = vsel %vm17061_vm5, %v15776_v63, 0.0  ;;  %v7395_v36 = vadd.f32 %v7394_v25, %v7393_v50  ;;  %12350 = vpow2.f32 %v7036_v1  ;;  %vm17063_vm15 = vnez %v17062_v48  ;;  %v12339_v37 = vpop.eup %12338 }
 0xaaf   : > { %v15796_v0 = vsel %vm17063_vm15, %v12335_v41, 0.0  ;;  %v7112_v30 = vadd.f32 %v7111_v5, %v7110_v58  ;;  %v7398_v34 = vsel %vm17064_vm10, %v7352_v4, 0.0  ;;  %v7000_v56 = vsub.f32 %v15607_v49, %v15687_v60  ;;  %v12341_v28 = vpop.eup %12340  ;;  %vm17072_vm10 = vmmov %vm17061_vm5 }
 0xab0   : > { %v7113_v8 = vsel %vm17065_vm7, %v15787_v55, 0.0  ;;  %v7397_v54 = vadd.f32 %v7396_v14, %v7395_v36  ;;  %v17067_v10 = vunpack.c.l.bf16 %v17066_v62  ;;  %12352 = vpow2.f32 %v7038_v18  ;;  %vm17073_vm7 = vmmov %vm17061_vm5  ;;  %v17075_v14 = vld [vmem:[#allocation59_spill] sm:$0xff] }
 0xab1   : > { %v7042_v1 = vmul.f32 1.442695, %v6994_v31  ;;  %vm17069_vm2 = vnez %v17068_v47  ;;  %v7114_v46 = vadd.f32 %v7113_v8, %v7112_v30  ;;  %v7001_v49 = vsub.f32 %v15595_v32, %v15687_v60  ;;  %v17070_v31 = vld [vmem:[#allocation54_spill] sm:$0xff]  ;;  %v12343_v18 = vpop.eup %12342 }
 0xab2   : > { %v7353_v27 = vmul.f32 %v17067_v10, %v7275_v17  ;;  %v15810_v33 = vsel %vm17069_vm2, %v12337_v40, 0.0  ;;  %v7002_v25 = vsub.f32 %v15612_v38, %v15687_v60  ;;  %v7115_v17 = vsel %vm17061_vm5, %v15796_v0, 0.0  ;;  %v17077_v30 = vld [vmem:[#allocation58_spill] sm:$0xff] }
 0xab3   : > { %v7399_v22 = vadd.f32 %v7398_v34, %v7397_v54  ;;  %12354 = vpow2.f32 %v7040_v51  ;;  %v7044_v15 = vmul.f32 1.442695, %v6995_v59  ;;  %vm17071_vm15 = vnez %v17070_v31  ;;  %v12345_v59 = vpop.eup %12344  ;;  %v7295_v31 = vpop.permute.xlu0 %7294 }
 0xab4   : > { %v15823_v4 = vsel %vm17071_vm15, %v12339_v37, 0.0  ;;  %v7116_v41 = vadd.f32 %v7115_v17, %v7114_v46  ;;  %v7046_v32 = vmul.f32 1.442695, %v6996_v43  ;;  %v7117_v38 = vsel %vm17072_vm10, %v15810_v33, 0.0  ;;  %v12347_v48 = vpop.eup %12346  ;;  %vm17079_vm10 = vmmov %vm17061_vm5  ;;  %v17083_v17 = vld [vmem:[#allocation52_spill] sm:$0xff] }
 0xab5   : > { %v7400_v61 = vsel %vm17073_vm7, %v7353_v27, 0.0  ;;  %v17074_v50 = vunpack.c.h.bf16 %v17066_v62  ;;  %v7003_v58 = vsub.f32 %v15626_v45, %v15687_v60  ;;  %12356 = vpow2.f32 %v7042_v1  ;;  %vm17080_vm7 = vmmov %vm17061_vm5  ;;  %v17081_v1 = vld [vmem:[#allocation61_spill] sm:$0xff] }
 0xab6   : > { %vm17076_vm2 = vnez %v17075_v14  ;;  %v7118_v7 = vadd.f32 %v7117_v38, %v7116_v41  ;;  %v7004_v43 = vsub.f32 %v15634_v29, %v15687_v60  ;;  %v7005_v51 = vsub.f32 %v15630_v53, %v15687_v60  ;;  %v17085_v41 = vld [vmem:[#allocation60_spill] sm:$0xff] }
 0xab7   : > { %v7354_v19 = vmul.f32 %v17074_v50, %v7279_v9  ;;  %v15837_v40 = vsel %vm17076_vm2, %v12341_v28, 0.0  ;;  %v7119_v5 = vsel %vm17061_vm5, %v15823_v4, 0.0  ;;  %v7401_v36 = vadd.f32 %v7400_v61, %v7399_v22  ;;  %v7291_v9 = vpop.permute.xlu1 %7290 }
 0xab8   : > { %12358 = vpow2.f32 %v7044_v15  ;;  %v7048_v45 = vmul.f32 1.442695, %v6997_v42  ;;  %vm17078_vm15 = vnez %v17077_v30  ;;  %v7120_v37 = vadd.f32 %v7119_v5, %v7118_v7 }
 0xab9   : > { %v15850_v34 = vsel %vm17078_vm15, %v12343_v18, 0.0  ;;  %12360 = vpow2.f32 %v7046_v32  ;;  %v7050_v8 = vmul.f32 1.442695, %v6998_v35  ;;  %v7121_v54 = vsel %vm17079_vm10, %v15837_v40, 0.0  ;;  %v12349_v47 = vpop.eup %12348  ;;  %vm17088_vm10 = vmmov %vm17061_vm5 }
 0xaba   : > { %v7402_v62 = vsel %vm17080_vm7, %v7354_v19, 0.0  ;;  %v7006_v10 = vsub.f32 %v15638_v16, %v15687_v60  ;;  %v7052_v27 = vmul.f32 1.442695, %v6999_v12  ;;  %vm17082_vm2 = vnez %v17081_v1  ;;  %vm17089_vm7 = vmmov %vm17061_vm5  ;;  %v17090_v19 = vld [vmem:[#allocation56_spill] sm:$0xff] }
 0xabb   : > { %v15859_v52 = vsel %vm17082_vm2, %v12345_v59, 0.0  ;;  %v7122_v42 = vadd.f32 %v7121_v54, %v7120_v37  ;;  %v7054_v46 = vmul.f32 1.442695, %v7000_v56  ;;  %v7123_v28 = vsel %vm17061_vm5, %v15850_v34, 0.0  ;;  %v12351_v61 = vpop.eup %12350  ;;  %v7299_v14 = vpop.permute.xlu1 %7298  ;;  %vm17093_vm2 = vmmov %vm17061_vm5 }
 0xabc   : > { %v7403_v35 = vadd.f32 %v7402_v62, %v7401_v36  ;;  %v17084_v22 = vunpack.c.l.bf16 %v17083_v17  ;;  %12362 = vpow2.f32 %v7048_v45  ;;  %vm17086_vm15 = vnez %v17085_v41  ;;  %vm17094_vm5 = vmmov %vm17093_vm2  ;;  %v17096_v62 = vld [vmem:[#allocation63_spill] sm:$0xff] }
 0xabd   : > { %v15867_v18 = vsel %vm17086_vm15, %v12347_v48, 0.0  ;;  %v7124_v12 = vadd.f32 %v7123_v28, %v7122_v42  ;;  %v17087_v32 = vunpack.c.h.bf16 %v17083_v17  ;;  %12364 = vpow2.f32 %v7050_v8  ;;  %v12353_v30 = vpop.eup %12352  ;;  %vm17095_vm15 = vmmov %vm17093_vm2 }
 0xabe   : > { %v7355_v15 = vmul.f32 %v17084_v22, %v7283_v11  ;;  %v7125_v56 = vsel %vm17088_vm10, %v15859_v52, 0.0  ;;  %v17091_v59 = vunpack.c.l.bf16 %v17090_v19  ;;  %v7056_v7 = vmul.f32 1.442695, %v7001_v49 }
 0xabf   : > { %v7356_v38 = vmul.f32 %v17087_v32, %v7287_v2  ;;  %v15878_v36 = vsel %vm16978_vm3, %v12349_v47, 0.0  ;;  %v7126_v48 = vadd.f32 %v7125_v56, %v7124_v12  ;;  %v7058_v2 = vmul.f32 1.442695, %v7002_v25  ;;  %vm17098_vm3 = vmmov %vm17093_vm2 }
 0xac0   : > { %v7404_v50 = vsel %vm17089_vm7, %v7355_v15, 0.0  ;;  %v7357_v11 = vmul.f32 %v17091_v59, %v7291_v9  ;;  %v7127_v37 = vsel %vm17093_vm2, %v15867_v18, 0.0  ;;  %12366 = vpow2.f32 %v7052_v27  ;;  %v12355_v42 = vpop.eup %12354  ;;  %v7303_v15 = vpop.permute.xlu0 %7302  ;;  %vm17103_vm7 = vmmov %vm17093_vm2  ;;  %v17105_v59 = vld [vmem:[#allocation66_spill] sm:$0xff] }
 0xac1   : > { %v7405_v45 = vadd.f32 %v7404_v50, %v7403_v35  ;;  %v7406_v8 = vsel %vm17094_vm5, %v7356_v38, 0.0  ;;  %vm17097_vm10 = vnez %v17096_v62  ;;  %v7128_v49 = vadd.f32 %v7127_v37, %v7126_v48  ;;  %v17100_v35 = vld [vmem:[#allocation57_spill] sm:$0xff]  ;;  %vm17104_vm5 = vmmov %vm17093_vm2 }
 0xac2   : > { %v7408_v54 = vsel %vm17095_vm15, %v7357_v11, 0.0  ;;  %v15886_v9 = vsel %vm17097_vm10, %v12351_v61, 0.0  ;;  %12368 = vpow2.f32 %v7054_v46  ;;  %v7129_v47 = vsel %vm17098_vm3, %v15878_v36, 0.0  ;;  %v12357_v46 = vpop.eup %12356  ;;  %vm17113_vm3 = vmmov %vm17093_vm2 }
 0xac3   : > { %v7407_v1 = vadd.f32 %v7406_v8, %v7405_v45  ;;  %v17099_v25 = vunpack.c.h.bf16 %v17090_v19  ;;  %v17101_v17 = vunpack.c.l.bf16 %v17100_v35  ;;  %v7007_v27 = vsub.f32 %v15648_v57, %v15687_v60  ;;  %v7307_v19 = vpop.permute.xlu1 %7306 }
 0xac4   : > { %v15898_v12 = vsel %vm16980_vm11, %v12353_v30, 0.0  ;;  %v7130_v32 = vadd.f32 %v7129_v47, %v7128_v49  ;;  %v7060_v61 = vmul.f32 1.442695, %v7003_v58  ;;  %v7131_v56 = vsel %vm17103_vm7, %v15886_v9, 0.0  ;;  %vm17107_vm11 = vmmov %vm17093_vm2  ;;  %v17111_v49 = vld [vmem:[#allocation62_spill] sm:$0xff] }
 0xac5   : > { %v7358_v28 = vmul.f32 %v17099_v25, %v7295_v31  ;;  %v7359_v22 = vmul.f32 %v17101_v17, %v7299_v14  ;;  %v7409_v38 = vadd.f32 %v7408_v54, %v7407_v1  ;;  %12370 = vpow2.f32 %v7056_v7  ;;  %v12359_v5 = vpop.eup %12358  ;;  %v17109_v7 = vld [vmem:[#allocation70_spill] sm:$0xff]  ;;  %vm17114_vm7 = vmmov %vm17093_vm2  ;;  %v7311_v25 = vpop.permute.xlu0 %7310 }
 0xac6   : > { %vm17106_vm15 = vnez %v17105_v59  ;;  %v7132_v11 = vadd.f32 %v7131_v56, %v7130_v32  ;;  %12372 = vpow2.f32 %v7058_v2  ;;  %v7062_v58 = vmul.f32 1.442695, %v7004_v43  ;;  %v12361_v37 = vpop.eup %12360  ;;  %v11741_v32 = vpop.f32.mrf.mxu1 }
 0xac7   : > { %v7410_v31 = vsel %vm17093_vm2, %v7358_v28, 0.0  ;;  %v7412_v50 = vsel %vm17104_vm5, %v7359_v22, 0.0  ;;  %v15906_v57 = vsel %vm17106_vm15, %v12355_v42, 0.0  ;;  %v7133_v48 = vsel %vm17107_vm11, %v15898_v12, 0.0  ;;  %v11797_v22 = vpop.f32.mrf.mxu0  ;;  %vm17117_vm5 = vmmov %vm17113_vm3 }
 0xac8   : > { %v7411_v14 = vadd.f32 %v7410_v31, %v7409_v38  ;;  %v17108_v45 = vunpack.c.h.bf16 %v17100_v35  ;;  %vm17110_vm10 = vnez %v17109_v7  ;;  %v7134_v54 = vadd.f32 %v7133_v48, %v7132_v11  ;;  %v17115_v35 = vld [vmem:[#allocation68_spill] sm:$0xff]  ;;  %vm17118_vm15 = vmmov %vm17113_vm3  ;;  %v8466_v59 = vpop.f32.mrf.mxu1 }
 0xac9   : > { %v15917_v8 = vsel %vm17110_vm10, %v12357_v46, 0.0  ;;  %v17112_v1 = vunpack.c.l.bf16 %v17111_v49  ;;  %v7008_v29 = vsub.f32 %v15667_v24, %v15687_v60  ;;  %v7064_v43 = vmul.f32 1.442695, %v7005_v51  ;;  %vm17121_vm11 = vmmov %vm17113_vm3 }
 0xaca   : > { %v7360_v30 = vmul.f32 %v17108_v45, %v7303_v15  ;;  %v7413_v62 = vadd.f32 %v7412_v50, %v7411_v14  ;;  %v7135_v42 = vsel %vm17113_vm3, %v15906_v57, 0.0  ;;  %12374 = vpow2.f32 %v7060_v61  ;;  %v12363_v15 = vpop.eup %12362  ;;  %v15958_v14 = vld [vmem:[%s16542_s17 + $0x3] ss:$0 sm:$0xff]  ;;  %vm17126_vm10 = vmmov %vm17113_vm3 }
 0xacb   : > { %v7361_v2 = vmul.f32 %v17112_v1, %v7307_v19  ;;  %v7066_v28 = vmul.f32 1.442695, %v7006_v10  ;;  %vm17116_vm2 = vnez %v17115_v35  ;;  %v7136_v24 = vadd.f32 %v7135_v42, %v7134_v54  ;;  %v12365_v38 = vpop.eup %12364  ;;  %v7315_v19 = vpop.permute.xlu1 %7314 }
 0xacc   : > { %v7414_v47 = vsel %vm17114_vm7, %v7360_v30, 0.0  ;;  %v15934_v17 = vsel %vm17116_vm2, %v12359_v5, 0.0  ;;  %12376 = vpow2.f32 %v7062_v58  ;;  %v15938_v53 = vsel %vm15368_vm8, %v12361_v37, 0.0  ;;  %vm17120_vm8 = vmmov %vm17113_vm3  ;;  %v17136_v58 = vld [vmem:[#allocation76_spill] sm:$0xff] }
 0xacd   : > { %v7137_v51 = vsel %vm17117_vm5, %v15917_v8, 0.0  ;;  %v7415_v41 = vadd.f32 %v7414_v47, %v7413_v62  ;;  %v7009_v16 = vsub.f32 %v15659_v20, %v15687_v60  ;;  %v7416_v46 = vsel %vm17118_vm15, %v7361_v2, 0.0  ;;  %v12367_v5 = vpop.eup %12366 }
 0xace   : > { %v7138_v10 = vadd.f32 %v7137_v51, %v7136_v24  ;;  %v17119_v61 = vunpack.c.h.bf16 %v17111_v49  ;;  %12378 = vpow2.f32 %v7064_v43  ;;  %v7068_v31 = vmul.f32 1.442695, %v7007_v27  ;;  %v8787_v27 = vpop.f32.mrf.mxu0  ;;  %v17124_v49 = vld [vmem:[#allocation65_spill] sm:$0xff] }
 0xacf   : > { %v7070_v39 = vmul.f32 1.442695, %v7008_v29  ;;  %v7139_v50 = vsel %vm17120_vm8, %v15934_v17, 0.0  ;;  %12380 = vpow2.f32 %v7066_v28  ;;  %v15951_v11 = vsel %vm15355_vm4, %v12363_v15, 0.0  ;;  %v12369_v37 = vpop.eup %12368  ;;  %vm17123_vm4 = vmmov %vm17113_vm3  ;;  %v7319_v29 = vpop.permute.xlu0 %7318 }
 0xad0   : > { %v7362_v56 = vmul.f32 %v17119_v61, %v7311_v25  ;;  %v7140_v20 = vadd.f32 %v7139_v50, %v7138_v10  ;;  %v7141_v60 = vsel %vm17121_vm11, %v15938_v53, 0.0  ;;  %v15962_v48 = vsel %vm16998_vm1, %v12365_v38, 0.0  ;;  %v11800_v43 = vpop.f32.mrf.mxu0  ;;  %vm17128_vm1 = vmmov %vm17113_vm3  ;;  %v11744_v10 = vpop.f32.mrf.mxu1 }
 0xad1   : > { %v7417_v45 = vadd.f32 %v7416_v46, %v7415_v41  ;;  %v8793_v30 = vadd.f32 %v11797_v22, %v11741_v32  ;;  %v8788_v6 = vadd.f32 %v8787_v27, %v8466_v59  ;;  %v7072_v7 = vmul.f32 1.442695, %v7009_v16  ;;  %vm17131_vm7 = vmmov %vm17128_vm1  ;;  %v7323_v59 = vpop.permute.xlu1 %7322 }
 0xad2   : > { %v7142_v54 = vadd.f32 %v7141_v60, %v7140_v20  ;;  %v7418_v62 = vsel %vm17123_vm4, %v7362_v56, 0.0  ;;  %v17125_v1 = vunpack.c.l.bf16 %v17124_v49  ;;  %12382 = vpow2.f32 %v7068_v31  ;;  %v12371_v15 = vpop.eup %12370  ;;  %v8797_v50 = vpop.f32.mrf.mxu0  ;;  %vm17138_vm11 = vmmov %vm17128_vm1 }
 0xad3   : > { %v7143_v42 = vsel %vm17126_vm10, %v15951_v11, 0.0  ;;  %v8951_v47 = vadd.f32 %v15958_v14, %v8793_v30  ;;  %v8950_v25 = vadd.f32 %v15958_v14, %v8788_v6  ;;  %12384 = vpow2.f32 %v7070_v39  ;;  %v12373_v46 = vpop.eup %12372  ;;  %vm17139_vm4 = vmmov %vm17128_vm1 }
 0xad4   : > { %v7363_v2 = vmul.f32 %v17125_v1, %v7315_v19  ;;  %v15973_v35 = vsel %vm15374_vm9, %v12367_v5, 0.0  ;;  %v7144_v24 = vadd.f32 %v7143_v42, %v7142_v54  ;;  %v7145_v22 = vsel %vm17128_vm1, %v15962_v48, 0.0  ;;  %vm17132_vm9 = vmmov %vm17128_vm1  ;;  %v7327_v42 = vpop.permute.xlu0 %7326 }
 0xad5   : > { %vm17129_vm3 = vnez %v16952_v44  ;;  %v7419_v41 = vadd.f32 %v7418_v62, %v7417_v45  ;;  %v17130_v32 = vunpack.c.h.bf16 %v17124_v49  ;;  %v8982_v16 = vmax.f32 %v8950_v25, 0.0  ;;  %v8476_v44 = vpop.f32.mrf.mxu1  ;;  %v17140_v62 = vld [vmem:[#allocation69_spill] sm:$0xff]  ;;  %vm17142_vm10 = vmmov %vm17128_vm1 }
 0xad6   : > { %v15979_v51 = vsel %vm17129_vm3, %v12369_v37, 0.0  ;;  %v7146_v61 = vadd.f32 %v7145_v22, %v7144_v24  ;;  %v7420_v56 = vsel %vm17131_vm7, %v7363_v2, 0.0  ;;  %v8983_v31 = vmax.f32 %v8951_v47, 0.0  ;;  %vm17145_vm3 = vmmov %vm17128_vm1 }
 0xad7   : > { %v7364_v38 = vmul.f32 %v17130_v32, %v7319_v29  ;;  %v8803_v39 = vadd.f32 %v11800_v43, %v11744_v10  ;;  %v7147_v19 = vsel %vm17132_vm9, %v15973_v35, 0.0  ;;  %vm17133_vm2 = vcmask 523264   ;;  %v12375_v5 = vpop.eup %12374  ;;  %v11803_v29 = vpop.f32.mrf.mxu0  ;;  %vm17148_vm7 = vmmov %vm17128_vm1 }
 0xad8   : > { %11859 = vmatprep.mubr.msk.f32.mxu1 %vm17133_vm2, %v8982_v16  ;;  %12386 = vpow2.f32 %v7072_v7  ;;  %vm17134_vm5 = vnez %v16944_v3  ;;  %v7148_v60 = vadd.f32 %v7147_v19, %v7146_v61  ;;  %v8798_v27 = vadd.f32 %v8797_v50, %v8476_v44  ;;  %vm17135_vm15 = vmmov %vm17133_vm2  ;;  %v7331_v44 = vpop.permute.xlu1 %7330 }
 0xad9   : > { %v15989_v20 = vsel %vm17134_vm5, %v12371_v15, 0.0  ;;  %11860 = vmatmul.mubr.msk.f32.vlgmr.msra.gmra.mxu1 %vm17135_vm15, %v8983_v31  ;;  %vm17137_vm8 = vnez %v17136_v58  ;;  %v7149_v30 = vsel %vm17138_vm11, %v15979_v51, 0.0  ;;  %v7421_v6 = vadd.f32 %v7420_v56, %v7419_v41  ;;  %v12377_v7 = vpop.eup %12376  ;;  %v8807_v19 = vpop.f32.mrf.mxu0  ;;  %vm17154_vm5 = vmmov %vm17128_vm1 }
 0xada   : > { %v15994_v45 = vsel %vm17137_vm8, %v12373_v46, 0.0  ;;  %v8953_v37 = vadd.f32 %v15958_v14, %v8803_v39  ;;  %v7150_v54 = vadd.f32 %v7149_v30, %v7148_v60  ;;  %v7422_v3 = vsel %vm17139_vm4, %v7364_v38, 0.0  ;;  %v11747_v46 = vpop.f32.mrf.mxu1  ;;  %vm17155_vm15 = vmmov %vm17128_vm1 }
 0xadb   : > { %v17141_v49 = vunpack.c.l.bf16 %v17140_v62  ;;  %v8952_v2 = vadd.f32 %v15958_v14, %v8798_v27  ;;  %v7151_v43 = vsel %vm17142_vm10, %v15989_v20, 0.0  ;;  %v12379_v47 = vpop.eup %12378  ;;  %v16007_v28 = vsel %vm15465_vm13, %v12375_v5, 0.0  ;;  %vm17147_vm13 = vmmov %vm17133_vm2  ;;  %v17150_v5 = vld [vmem:[#allocation78_spill] sm:$0xff] }
 0xadc   : > { %v7152_v24 = vadd.f32 %v7151_v43, %v7150_v54  ;;  %v12381_v15 = vpop.eup %12380  ;;  %v16011_v32 = vsel %vm17004_vm6, %v12377_v7, 0.0  ;;  %v7153_v38 = vsel %vm17128_vm1, %v15994_v45, 0.0  ;;  %v7423_v16 = vadd.f32 %v7422_v3, %v7421_v6  ;;  %v8486_v60 = vpop.f32.mrf.mxu1  ;;  %vm17149_vm6 = vmmov %vm17133_vm2  ;;  %v17152_v7 = vld [vmem:[#allocation80_spill] sm:$0xff] }
 0xadd   : > { %v7365_v1 = vmul.f32 %v17141_v49, %v7323_v59  ;;  %v8984_v22 = vmax.f32 %v8952_v2, 0.0  ;;  %v8985_v10 = vmax.f32 %v8953_v37, 0.0  ;;  %v17146_v31 = vunpack.c.h.bf16 %v17140_v62  ;;  %vm17158_vm8 = vmmov %vm17128_vm1 }
 0xade   : > { %v7154_v61 = vadd.f32 %v7153_v38, %v7152_v24  ;;  %v8813_v50 = vadd.f32 %v11803_v29, %v11747_v46  ;;  %v7155_v59 = vsel %vm17148_vm7, %v16007_v28, 0.0  ;;  %vm17151_vm9 = vnez %v17150_v5  ;;  %v17156_v29 = vld [vmem:[#allocation71_spill] sm:$0xff]  ;;  %v7335_v24 = vpop.permute.xlu0 %7334  ;;  %vm17160_vm11 = vmmov %vm17128_vm1 }
 0xadf   : > { %v7424_v56 = vsel %vm17145_vm3, %v7365_v1, 0.0  ;;  %v7366_v39 = vmul.f32 %v17146_v31, %v7327_v42  ;;  %11862 = vmatprep.mubr.msk.f32.mxu1 %vm17147_vm13, %v8984_v22  ;;  %v12383_v27 = vpop.eup %12382  ;;  %v16024_v58 = vsel %vm17151_vm9, %v12379_v47, 0.0  ;;  %v8808_v6 = vadd.f32 %v8807_v19, %v8486_v60  ;;  %v11806_v22 = vpop.f32.mrf.mxu0  ;;  %vm17161_vm4 = vmmov %vm17128_vm1 }
 0xae0   : > { %11863 = vmatmul.mubr.msk.f32.gmra.mxu1 %vm17149_vm6, %v8985_v10  ;;  %v7156_v30 = vadd.f32 %v7155_v59, %v7154_v61  ;;  %v12385_v37 = vpop.eup %12384  ;;  %vm17153_vm2 = vnez %v17152_v7  ;;  %v7157_v3 = vsel %vm17154_vm5, %v16011_v32, 0.0  ;;  %v7425_v62 = vadd.f32 %v7424_v56, %v7423_v16  ;;  %vm17164_vm10 = vmmov %vm17128_vm1 }
 0xae1   : > { %v16028_v54 = vsel %vm17153_vm2, %v12381_v15, 0.0  ;;  %v8955_v49 = vadd.f32 %v15958_v14, %v8813_v50  ;;  %v7426_v2 = vsel %vm17155_vm15, %v7366_v39, 0.0  ;;  %v17157_v43 = vunpack.c.l.bf16 %v17156_v29  ;;  %v11750_v39 = vpop.f32.mrf.mxu1  ;;  %v8817_v5 = vpop.f32.mrf.mxu0  ;;  %vm17167_vm3 = vmmov %vm17128_vm1 }
 0xae2   : > { %v7158_v1 = vadd.f32 %v7157_v3, %v7156_v30  ;;  %v8954_v47 = vadd.f32 %v15958_v14, %v8808_v6  ;;  %v7159_v25 = vsel %vm17158_vm8, %v16024_v58, 0.0  ;;  %v16041_v41 = vsel %vm15532_vm12, %v12383_v27, 0.0  ;;  %vm17163_vm12 = vmmov %vm17149_vm6 }
 0xae3   : > { %v7367_v42 = vmul.f32 %v17157_v43, %v7331_v44  ;;  %v16045_v46 = vsel %vm15583_vm0, %v12385_v37, 0.0  ;;  %v7161_v61 = vsel %vm17160_vm11, %v16028_v54, 0.0  ;;  %v7427_v56 = vadd.f32 %v7426_v2, %v7425_v62  ;;  %v8496_v27 = vpop.f32.mrf.mxu1  ;;  %vm17165_vm0 = vmmov %vm17149_vm6 }
 0xae4   : > { %v7160_v38 = vadd.f32 %v7159_v25, %v7158_v1  ;;  %v8986_v16 = vmax.f32 %v8954_v47, 0.0  ;;  %v8987_v31 = vmax.f32 %v8955_v49, 0.0  ;;  %v17162_v59 = vunpack.c.h.bf16 %v17156_v29  ;;  %vm17168_vm13 = vmmov %vm17128_vm1 }
 0xae5   : > { %v12387_v10 = vpop.eup %12386  ;;  %v7428_v19 = vsel %vm17161_vm4, %v7367_v42, 0.0  ;;  %v8823_v60 = vadd.f32 %v11806_v22, %v11750_v39  ;;  %v7163_v26 = vsel %vm17164_vm10, %v16041_v41, 0.0  ;;  %v8818_v7 = vadd.f32 %v8817_v5, %v8496_v27  ;;  %v11809_v42 = vpop.f32.mrf.mxu0  ;;  %vm17170_vm7 = vmmov %vm17165_vm0 }
 0xae6   : > { %v7162_v50 = vadd.f32 %v7161_v61, %v7160_v38  ;;  %v7368_v44 = vmul.f32 %v17162_v59, %v7335_v24  ;;  %11865 = vmatprep.mubr.msk.f32.mxu1 %vm17163_vm12, %v8986_v16  ;;  %v16058_v6 = vsel %vm15550_vm14, %v12387_v10, 0.0  ;;  %v7165_v3 = vsel %vm17128_vm1, %v16045_v46, 0.0  ;;  %v11753_v15 = vpop.f32.mrf.mxu1  ;;  %vm17169_vm14 = vmmov %vm17165_vm0 }
 0xae7   : > { %11866 = vmatmul.mubr.msk.f32.gmra.mxu1 %vm17165_vm0, %v8987_v31  ;;  %v7429_v62 = vadd.f32 %v7428_v19, %v7427_v56  ;;  %v8957_v49 = vadd.f32 %v15958_v14, %v8823_v60  ;;  %v8956_v29 = vadd.f32 %v15958_v14, %v8818_v7  ;;  %v7167_v43 = vsel %vm17168_vm13, %v16058_v6, 0.0  ;;  %v8827_v61 = vpop.f32.mrf.mxu0  ;;  %vm17171_vm6 = vmmov %vm17165_vm0 }
 0xae8   : > { %v7164_v37 = vadd.f32 %v7163_v26, %v7162_v50  ;;  %v7430_v2 = vsel %vm17167_vm3, %v7368_v44, 0.0  ;;  %v8833_v16 = vadd.f32 %v11809_v42, %v11753_v15  ;;  %v8506_v10 = vpop.f32.mrf.mxu1  ;;  %vm17172_vm9 = vmmov %vm17165_vm0 }
 0xae9   : > { %v8988_v25 = vmax.f32 %v8956_v29, 0.0  ;;  %v7431_v24 = vadd.f32 %v7430_v2, %v7429_v62  ;;  %v8989_v22 = vmax.f32 %v8957_v49, 0.0  ;;  %v8828_v31 = vadd.f32 %v8827_v61, %v8506_v10  ;;  %v11812_v44 = vpop.f32.mrf.mxu0  ;;  %vm17173_vm2 = vmmov %vm17165_vm0 }
 0xaea   : > { %v7166_v1 = vadd.f32 %v7165_v3, %v7164_v37  ;;  %v8959_v50 = vadd.f32 %v15958_v14, %v8833_v16  ;;  %vm17174_vm5 = vmmov %vm17165_vm0 }
 0xaeb   : > { %11868 = vmatprep.mubr.msk.f32.mxu1 %vm17169_vm14, %v8988_v25  ;;  %v7432_v39 = vrot.slane %v7431_v24, 4  ;;  %v8958_v59 = vadd.f32 %v15958_v14, %v8828_v31  ;;  %v8837_v62 = vpop.f32.mrf.mxu0  ;;  %vm17175_vm15 = vmmov %vm17165_vm0 }
 0xaec   : > { %v7168_v47 = vadd.f32 %v7167_v43, %v7166_v1  ;;  %11869 = vmatmul.mubr.msk.f32.gmra.mxu1 %vm17170_vm7, %v8989_v22  ;;  %v8991_v5 = vmax.f32 %v8959_v50, 0.0  ;;  %v11756_v30 = vpop.f32.mrf.mxu1  ;;  %vm17176_vm8 = vmmov %vm17165_vm0 }
 0xaed   : > { %v8990_v26 = vmax.f32 %v8958_v59, 0.0  ;;  %v7433_v27 = vadd.f32 %v7432_v39, %v7431_v24  ;;  %v8843_v7 = vadd.f32 %v11812_v44, %v11756_v30  ;;  %vm17177_vm11 = vmmov %vm17128_vm1 }
 0xaee   : > { %v7169_v38 = vrot.slane %v7168_v47, 4  ;;  %v8516_v3 = vpop.f32.mrf.mxu1  ;;  %vm17178_vm4 = vmmov %vm17128_vm1 }
 0xaef   : > { %11871 = vmatprep.mubr.msk.f32.mxu1 %vm17171_vm6, %v8990_v26  ;;  %v8838_v1 = vadd.f32 %v8837_v62, %v8516_v3  ;;  %v7434_v2 = vrot.slane %v7433_v27, 2  ;;  %v8961_v29 = vadd.f32 %v15958_v14, %v8843_v7  ;;  %v7438_v26 = vld [vmem:[%s707_s30] sm:$0x1]  ;;  %vm17179_vm12 = vmmov %vm17165_vm0  ;;  %s16477_s30 = scalar_lea.hbm %s17256_s23, %s10373_s25 }
 0xaf0   : > { %v7170_v56 = vadd.f32 %v7169_v38, %v7168_v47  ;;  %11872 = vmatmul.mubr.msk.f32.gmra.mxu1 %vm17172_vm9, %v8991_v5  ;;  %v11815_v47 = vpop.f32.mrf.mxu0  ;;  %vm17180_vm10 = vmmov %vm17165_vm0 }
 0xaf1   : > { %v8960_v42 = vadd.f32 %v15958_v14, %v8838_v1  ;;  %v7435_v24 = vadd.f32 %v7434_v2, %v7433_v27  ;;  %v8993_v22 = vmax.f32 %v8961_v29, 0.0  ;;  %vm17181_vm0 = vmmov %vm17128_vm1 }
 0xaf2   : > { %v7171_v19 = vrot.slane %v7170_v56, 2  ;;  %v8847_v10 = vpop.f32.mrf.mxu0  ;;  %vm17182_vm1 = vmmov %vm17181_vm0 }
 0xaf3   : > { %v8992_v25 = vmax.f32 %v8960_v42, 0.0  ;;  %v7436_v31 = vrot.slane %v7435_v24, 1  ;;  %vm17183_vm3 = vmmov %vm17173_vm2 }
 0xaf4   : > { %v7172_v60 = vadd.f32 %v7171_v19, %v7170_v56  ;;  %v11759_v15 = vpop.f32.mrf.mxu1  ;;  %v7441_v56 = vlaneseq  ;;  %v11818_v5 = vpop.f32.mrf.mxu0  ;;  %vm17184_vm13 = vmmov %vm17173_vm2 }
 0xaf5   : > { %v8853_v38 = vadd.f32 %v11815_v47, %v11759_v15  ;;  %11874 = vmatprep.mubr.msk.f32.mxu1 %vm17173_vm2, %v8992_v25  ;;  %v7437_v44 = vadd.f32 %v7436_v31, %v7435_v24  ;;  %vm17185_vm14 = vmmov %vm17181_vm0 }
 0xaf6   : > { %v7173_v37 = vrot.slane %v7172_v60, 1  ;;  %v8526_v16 = vpop.f32.mrf.mxu1  ;;  %11875 = vmatmul.mubr.msk.f32.gmra.mxu1 %vm17174_vm5, %v8993_v22  ;;  %v7442_v59 = vshrl.u32 %v7441_v56, 7  ;;  %v8857_v1 = vpop.f32.mrf.mxu0  ;;  %vm17186_vm7 = vmmov %vm17181_vm0 }
 0xaf7   : > { %v8848_v61 = vadd.f32 %v8847_v10, %v8526_v16  ;;  %v8963_v39 = vadd.f32 %v15958_v14, %v8853_v38  ;;  %v7439_v7 = vsub.f32 %v7438_v26, %v7437_v44  ;;  %vm17187_vm6 = vmmov %vm17173_vm2 }
 0xaf8   : > { %v7174_v49 = vadd.f32 %v7173_v37, %v7172_v60  ;;  %v7443_v37 = vsub.s32 0, %v7442_v59  ;;  %v11821_v25 = vpop.f32.mrf.mxu0  ;;  %vm17188_vm9 = vmmov %vm17173_vm2 }
 0xaf9   : > { %v8962_v50 = vadd.f32 %v15958_v14, %v8848_v61  ;;  %v8995_v60 = vmax.f32 %v8963_v39, 0.0  ;;  %vm17189_vm2 = vmmov %vm17181_vm0 }
 0xafa   : > { %v7175_v43 = vmax.f32 %v7174_v49, 1e-30  ;;  %v16093_v29 = vrot.slane %v7439_v7, %v7443_v37  ;;  %vm17190_vm5 = vmmov %vm17181_vm0 }
 0xafb   : > { %v8994_v19 = vmax.f32 %v8962_v50, 0.0 }
 0xafc   : > { %12388 = vrcp.f32 %v7175_v43  ;;  %v11762_v27 = vpop.f32.mrf.mxu1 }
 0xafd   : > { %11877 = vmatprep.mubr.msk.f32.mxu1 %vm17175_vm15, %v8994_v19  ;;  %v8863_v3 = vadd.f32 %v11818_v5, %v11762_v27  ;;  %vm17191_vm15 = vmmov %vm17181_vm0 }
 0xafe   : > { %11878 = vmatmul.mubr.msk.f32.gmra.mxu1 %vm17176_vm8, %v8995_v60  ;;  %v8536_v49 = vpop.f32.mrf.mxu1  ;;  %vm17192_vm8 = vmmov %vm17181_vm0 }
 0xaff   : > { %v8965_v43 = vadd.f32 %v15958_v14, %v8863_v3  ;;  %v8858_v42 = vadd.f32 %v8857_v1, %v8536_v49 }
 0xb01   : > { %v8997_v44 = vmax.f32 %v8965_v43, 0.0 }
 0xb04   : > { %v11765_v47 = vpop.f32.mrf.mxu1 }
 0xb05   : > { %v8873_v56 = vadd.f32 %v11821_v25, %v11765_v47 }
 0xb06   : > { %v8546_v10 = vpop.f32.mrf.mxu1 }
 0xb07   : > { %v8967_v60 = vadd.f32 %v15958_v14, %v8873_v56 }
 0xb09   : > { %v16085_v30 = vpop.eup %12388 }
 0xb0a   : > { %v16089_v62 = vmul.f32 %v16085_v30, %v16045_v46  ;;  %v7177_v2 = vmul.f32 %v16085_v30, %v15757_v13  ;;  %v7178_v24 = vmul.f32 %v16085_v30, %v15763_v23  ;;  %v7179_v22 = vmul.f32 %v16085_v30, %v15770_v21 }
 0xb0b   : > { %v7180_v46 = vmul.f32 %v16085_v30, %v15776_v63  ;;  %v7181_v15 = vmul.f32 %v16085_v30, %v15787_v55  ;;  %v7182_v13 = vmul.f32 %v16085_v30, %v15796_v0  ;;  %v7183_v38 = vmul.f32 %v16085_v30, %v15810_v33 }
 0xb0c   : > { %v7184_v16 = vmul.f32 %v16085_v30, %v15823_v4  ;;  %v7185_v23 = vmul.f32 %v16085_v30, %v15837_v40  ;;  %v7186_v21 = vmul.f32 %v16085_v30, %v15850_v34  ;;  %v7187_v63 = vmul.f32 %v16085_v30, %v15859_v52  ;;  %v8867_v52 = vpop.f32.mrf.mxu0  ;;  %v11768_v27 = vpop.f32.mrf.mxu1 }
 0xb0d   : > { %v7188_v55 = vmul.f32 %v16085_v30, %v15867_v18  ;;  %v7189_v0 = vmul.f32 %v16085_v30, %v15878_v36  ;;  %v7190_v33 = vmul.f32 %v16085_v30, %v15886_v9  ;;  %v7191_v4 = vmul.f32 %v16085_v30, %v15898_v12 }
 0xb0e   : > { %v16126_v40 = vmul.f32 %v16085_v30, %v15906_v57  ;;  %v16130_v34 = vmul.f32 %v16085_v30, %v15917_v8  ;;  %v16134_v18 = vmul.f32 %v16085_v30, %v15934_v17  ;;  %v8964_v36 = vadd.f32 %v15958_v14, %v8858_v42  ;;  %v11824_v39 = vpop.f32.mrf.mxu0 }
 0xb0f   : > { %v7447_v9 = vmul.f32 %v16093_v29, %v7178_v24  ;;  %v7446_v61 = vmul.f32 %v16093_v29, %v7177_v2  ;;  %v7448_v12 = vmul.f32 %v16093_v29, %v7179_v22  ;;  %v7449_v57 = vmul.f32 %v16093_v29, %v7180_v46  ;;  %v8556_v2 = vpop.f32.mrf.mxu1 }
 0xb10   : > { %v8868_v31 = vadd.f32 %v8867_v52, %v8546_v10  ;;  %v8996_v8 = vmax.f32 %v8964_v36, 0.0  ;;  %v7450_v17 = vmul.f32 %v16093_v29, %v7181_v15  ;;  %v7195_v59 = vmul.f32 %v16085_v30, %v15938_v53  ;;  %v8877_v43 = vpop.f32.mrf.mxu0 }
 0xb11   : > { %v7481_v50 = vsel %vm17177_vm11, %v7447_v9, 0.0  ;;  %v7478_v19 = vsel %vm17178_vm4, %v7446_v61, 0.0  ;;  %v7196_v5 = vmul.f32 %v16085_v30, %v15951_v11  ;;  %v7451_v37 = vmul.f32 %v16093_v29, %v7182_v13  ;;  %vm17193_vm11 = vmmov %vm17183_vm3 }
 0xb12   : > { %7482 = vadd.xlane.f32.xlu0 %v7481_v50  ;;  %7479 = vadd.xlane.f32.xlu1 %v7478_v19  ;;  %v8966_v26 = vadd.f32 %v15958_v14, %v8868_v31  ;;  %v7452_v7 = vmul.f32 %v16093_v29, %v7183_v38  ;;  %v7453_v3 = vmul.f32 %v16093_v29, %v7184_v16  ;;  %v7484_v47 = vsel %vm17181_vm0, %v7448_v12, 0.0  ;;  %v11827_v10 = vpop.f32.mrf.mxu0  ;;  %vm17194_vm4 = vmmov %vm17183_vm3 }
 0xb13   : > { %11880 = vmatprep.mubr.msk.f32.mxu1 %vm17179_vm12, %v8996_v8  ;;  %v7197_v53 = vmul.f32 %v16085_v30, %v15962_v48  ;;  %v8883_v1 = vadd.f32 %v11824_v39, %v11768_v27  ;;  %v7454_v42 = vmul.f32 %v16093_v29, %v7185_v23  ;;  %v7198_v11 = vmul.f32 %v16085_v30, %v15973_v35  ;;  %vm17195_vm12 = vmmov %vm17181_vm0 }
 0xb14   : > { %v8998_v49 = vmax.f32 %v8966_v26, 0.0  ;;  %11881 = vmatmul.mubr.msk.f32.gmra.mxu1 %vm17180_vm10, %v8997_v44  ;;  %v7487_v25 = vsel %vm17182_vm1, %v7449_v57, 0.0  ;;  %v8878_v24 = vadd.f32 %v8877_v43, %v8556_v2  ;;  %v8999_v22 = vmax.f32 %v8967_v60, 0.0  ;;  %v11771_v36 = vpop.f32.mrf.mxu1  ;;  %v8887_v31 = vpop.f32.mrf.mxu0  ;;  %vm17196_vm10 = vmmov %vm17181_vm0 }
 0xb15   : > { %v8969_v48 = vadd.f32 %v15958_v14, %v8883_v1  ;;  %v7455_v46 = vmul.f32 %v16093_v29, %v7186_v21  ;;  %v16165_v15 = vmul.f32 %v16093_v29, %v7187_v63  ;;  %v16170_v35 = vmul.f32 %v16093_v29, %v7188_v55  ;;  %vm17197_vm1 = vmmov %vm17181_vm0 }
 0xb16   : > { %7485 = vadd.xlane.f32.xlu0 %v7484_v47  ;;  %7488 = vadd.xlane.f32.xlu1 %v7487_v25  ;;  %v8968_v13 = vadd.f32 %v15958_v14, %v8878_v24  ;;  %v16173_v38 = vmul.f32 %v16093_v29, %v7189_v0  ;;  %v16176_v16 = vmul.f32 %v16093_v29, %v7190_v33  ;;  %v7490_v33 = vsel %vm17185_vm14, %v7450_v17, 0.0  ;;  %v8566_v56 = vpop.f32.mrf.mxu1  ;;  %v11830_v26 = vpop.f32.mrf.mxu0  ;;  %vm17199_vm14 = vmmov %vm17181_vm0 }
 0xb17   : > { %11883 = vmatprep.mubr.msk.f32.mxu1 %vm17183_vm3, %v8998_v49  ;;  %v7199_v23 = vmul.f32 %v16085_v30, %v15979_v51  ;;  %v7200_v21 = vmul.f32 %v16085_v30, %v15989_v20  ;;  %v7201_v63 = vmul.f32 %v16085_v30, %v15994_v45  ;;  %v16186_v55 = vmul.f32 %v16093_v29, %v7191_v4 }
 0xb18   : > { %11884 = vmatmul.mubr.msk.f32.gmra.mxu1 %vm17184_vm13, %v8999_v22  ;;  %v7202_v0 = vmul.f32 %v16085_v30, %v16007_v28  ;;  %v7493_v52 = vsel %vm17186_vm7, %v7451_v37, 0.0  ;;  %v9000_v51 = vmax.f32 %v8968_v13, 0.0  ;;  %v9001_v20 = vmax.f32 %v8969_v48, 0.0  ;;  %vm17198_vm13 = vmmov %vm17183_vm3 }
 0xb19   : > { %v16194_v45 = vmul.f32 %v16093_v29, %v16126_v40  ;;  %v16198_v4 = vmul.f32 %v16093_v29, %v16130_v34  ;;  %v16202_v28 = vmul.f32 %v16093_v29, %v16134_v18  ;;  %v8893_v9 = vadd.f32 %v11827_v10, %v11771_v36  ;;  %vm17200_vm7 = vmmov %vm17181_vm0 }
 0xb1a   : > { %7491 = vadd.xlane.f32.xlu0 %v7490_v33  ;;  %7494 = vadd.xlane.f32.xlu1 %v7493_v52  ;;  %v16206_v61 = vmul.f32 %v16093_v29, %v7195_v59  ;;  %v16209_v12 = vmul.f32 %v16093_v29, %v7196_v5  ;;  %v16212_v40 = vmul.f32 %v16093_v29, %v7197_v53  ;;  %v7496_v50 = vsel %vm17189_vm2, %v7452_v7, 0.0  ;;  %vm17203_vm2 = vmmov %vm17183_vm3 }
 0xb1b   : > { %11886 = vmatprep.mubr.msk.f32.mxu1 %vm17187_vm6, %v9000_v51  ;;  %v7203_v34 = vmul.f32 %v16085_v30, %v16011_v32  ;;  %v7204_v57 = vmul.f32 %v16085_v30, %v16024_v58  ;;  %v7205_v18 = vmul.f32 %v16085_v30, %v16028_v54  ;;  %v16222_v39 = vmul.f32 %v16093_v29, %v7198_v11  ;;  %v8897_v11 = vpop.f32.mrf.mxu0  ;;  %vm17201_vm6 = vmmov %vm17181_vm0 }
 0xb1c   : > { %11887 = vmatmul.mubr.msk.f32.gmra.mxu1 %vm17188_vm9, %v9001_v20  ;;  %v7206_v8 = vmul.f32 %v16085_v30, %v16041_v41  ;;  %v7499_v32 = vsel %vm17190_vm5, %v7453_v3, 0.0  ;;  %v8888_v19 = vadd.f32 %v8887_v31, %v8566_v56  ;;  %v8971_v58 = vadd.f32 %v15958_v14, %v8893_v9  ;;  %v11774_v53 = vpop.f32.mrf.mxu1  ;;  %vm17202_vm9 = vmmov %vm17181_vm0 }
 0xb1d   : > { %v16230_v54 = vmul.f32 %v16093_v29, %v7199_v23  ;;  %v16233_v17 = vmul.f32 %v16093_v29, %v7200_v21  ;;  %v7208_v59 = vmul.f32 %v16085_v30, %v16058_v6  ;;  %v16239_v44 = vmul.f32 %v16093_v29, %v7201_v63  ;;  %v11833_v48 = vpop.f32.mrf.mxu0  ;;  %vm17204_vm5 = vmmov %vm17203_vm2 }
 0xb1e   : > { %7497 = vadd.xlane.f32.xlu0 %v7496_v50  ;;  %7500 = vadd.xlane.f32.xlu1 %v7499_v32  ;;  %v8970_v41 = vadd.f32 %v15958_v14, %v8888_v19  ;;  %v16242_v60 = vmul.f32 %v16093_v29, %v7202_v0  ;;  %v16245_v27 = vmul.f32 %v16093_v29, %v7203_v34  ;;  %v7502_v37 = vsel %vm17191_vm15, %v7454_v42, 0.0  ;;  %v8576_v42 = vpop.f32.mrf.mxu1  ;;  %vm17205_vm15 = vmmov %vm17181_vm0 }
 0xb1f   : > { %v16248_v5 = vmul.f32 %v16093_v29, %v7204_v57  ;;  %v7505_v7 = vsel %vm17192_vm8, %v7455_v46, 0.0  ;;  %v16253_v30 = vmul.f32 %v16093_v29, %v7205_v18  ;;  %v9003_v3 = vmax.f32 %v8971_v58, 0.0  ;;  %v8907_v63 = vpop.f32.mrf.mxu0  ;;  %vm17206_vm8 = vmmov %vm17181_vm0 }
 0xb20   : > { %v9002_v6 = vmax.f32 %v8970_v41, 0.0  ;;  %v16256_v49 = vmul.f32 %v16093_v29, %v7206_v8  ;;  %v16260_v1 = vmul.f32 %v16093_v29, %v16089_v62  ;;  %v8903_v2 = vadd.f32 %v11830_v26, %v11774_v53 }
 0xb21   : > { %v16264_v43 = vmul.f32 %v16093_v29, %v7208_v59  ;;  %v7508_v47 = vsel %vm17195_vm12, %v16165_v15, 0.0  ;;  %v7511_v25 = vsel %vm17196_vm10, %v16170_v35, 0.0  ;;  %v8898_v24 = vadd.f32 %v8897_v11, %v8576_v42  ;;  %v11836_v52 = vpop.f32.mrf.mxu0  ;;  %vm17209_vm12 = vmmov %vm17203_vm2 }
 0xb22   : > { %7503 = vadd.xlane.f32.xlu0 %v7502_v37  ;;  %7506 = vadd.xlane.f32.xlu1 %v7505_v7  ;;  %v8973_v62 = vadd.f32 %v15958_v14, %v8903_v2  ;;  %v7514_v29 = vsel %vm17181_vm0, %v16173_v38, 0.0  ;;  %v7517_v46 = vsel %vm17197_vm1, %v16176_v16, 0.0  ;;  %v7520_v10 = vsel %vm17199_vm14, %v16186_v55, 0.0  ;;  %vm17210_vm10 = vmmov %vm17203_vm2 }
 0xb23   : > { %11889 = vmatprep.mubr.msk.f32.mxu1 %vm17193_vm11, %v9002_v6  ;;  %v8972_v22 = vadd.f32 %v15958_v14, %v8898_v24  ;;  %v7523_v38 = vsel %vm17200_vm7, %v16194_v45, 0.0  ;;  %v7526_v51 = vsel %vm17201_vm6, %v16198_v4, 0.0  ;;  %v7529_v20 = vsel %vm17202_vm9, %v16202_v28, 0.0  ;;  %v8917_v57 = vpop.f32.mrf.mxu0  ;;  %vm17207_vm11 = vmmov %vm17181_vm0 }
 0xb24   : > { %11890 = vmatmul.mubr.msk.f32.gmra.mxu1 %vm17194_vm4, %v9003_v3  ;;  %v9005_v15 = vmax.f32 %v8973_v62, 0.0  ;;  %v11777_v23 = vpop.f32.mrf.mxu1  ;;  %v7532_v18 = vsel %vm17205_vm15, %v16206_v61, 0.0  ;;  %v7535_v4 = vsel %vm17206_vm8, %v16209_v12, 0.0  ;;  %v7538_v50 = vsel %vm17207_vm11, %v16212_v40, 0.0  ;;  %vm17208_vm4 = vmmov %vm17181_vm0 }
 0xb25   : > { %v9004_v13 = vmax.f32 %v8972_v22, 0.0  ;;  %v8913_v35 = vadd.f32 %v11833_v48, %v11777_v23  ;;  %v11839_v8 = vpop.f32.mrf.mxu0  ;;  %v7541_v32 = vsel %vm17208_vm4, %v16222_v39, 0.0  ;;  %v7544_v26 = vsel %vm17181_vm0, %v16230_v54, 0.0  ;;  %vm17211_vm1 = vmmov %vm17181_vm0 }
 0xb26   : > { %7509 = vadd.xlane.f32.xlu0 %v7508_v47  ;;  %7512 = vadd.xlane.f32.xlu1 %v7511_v25  ;;  %v8586_v21 = vpop.f32.mrf.mxu1  ;;  %v7547_v40 = vsel %vm17211_vm1, %v16233_v17, 0.0  ;;  %vm17214_vm14 = vmmov %vm17203_vm2 }
 0xb27   : > { %11892 = vmatprep.mubr.msk.f32.mxu1 %vm17183_vm3, %v9004_v13  ;;  %v8908_v0 = vadd.f32 %v8907_v63, %v8586_v21  ;;  %v8975_v16 = vadd.f32 %v15958_v14, %v8913_v35  ;;  %v8927_v41 = vpop.f32.mrf.mxu0  ;;  %vm17212_vm3 = vmmov %vm17181_vm0  ;;  %v17225_v35 = vld [vmem:[#allocation12_spill] sm:$0xff] }
 0xb28   : > { %11893 = vmatmul.mubr.msk.f32.gmra.mxu1 %vm17198_vm13, %v9005_v15  ;;  %v7550_v3 = vsel %vm17212_vm3, %v16239_v44, 0.0  ;;  %vm17213_vm13 = vmmov %vm17181_vm0 }
 0xb29   : > { %v8974_v33 = vadd.f32 %v15958_v14, %v8908_v0  ;;  %v9007_v55 = vmax.f32 %v8975_v16, 0.0  ;;  %v11842_v6 = vpop.f32.mrf.mxu0  ;;  %v7553_v53 = vsel %vm17213_vm13, %v16242_v60, 0.0  ;;  %vm17215_vm7 = vmmov %vm17203_vm2 }
 0xb2a   : > { %7515 = vadd.xlane.f32.xlu0 %v7514_v29  ;;  %7518 = vadd.xlane.f32.xlu1 %v7517_v46  ;;  %vm17216_vm6 = vmmov %vm17181_vm0 }
 0xb2b   : > { %v9006_v36 = vmax.f32 %v8974_v33, 0.0  ;;  %v8937_v47 = vpop.f32.mrf.mxu0  ;;  %v7556_v25 = vsel %vm17216_vm6, %v16245_v27, 0.0  ;;  %vm17217_vm9 = vmmov %vm17181_vm0 }
 0xb2c   : > { %v7559_v44 = vsel %vm17217_vm9, %v16248_v5, 0.0  ;;  %vm17220_vm15 = vmmov %vm17215_vm7 }
 0xb2d   : > { %11895 = vmatprep.mubr.msk.f32.mxu1 %vm17203_vm2, %v9006_v36  ;;  %vm17218_vm2 = vmmov %vm17181_vm0 }
 0xb2e   : > { %7521 = vadd.xlane.f32.xlu0 %v7520_v10  ;;  %7524 = vadd.xlane.f32.xlu1 %v7523_v38  ;;  %v7562_v22 = vsel %vm17218_vm2, %v16253_v30, 0.0  ;;  %vm17221_vm8 = vmmov %vm17215_vm7  ;;  %v16334_v30 = vld [vmem:[%s16542_s17 + $0x4] ss:$0 sm:$0xff] }
 0xb2f   : > { %11896 = vmatmul.mubr.msk.f32.gmra.mxu1 %vm17204_vm5, %v9007_v55  ;;  %vm17219_vm5 = vmmov %vm17181_vm0 }
 0xb30   : > { %v7565_v48 = vsel %vm17219_vm5, %v16256_v49, 0.0  ;;  %vm17222_vm11 = vmmov %vm17181_vm0 }
 0xb31   : > { %v7568_v5 = vsel %vm17222_vm11, %v16260_v1, 0.0  ;;  %vm17223_vm4 = vmmov %vm17181_vm0  ;;  %v16342_v1 = vld [vmem:[%s16542_s17 + $0x5] ss:$0 sm:$0xff] }
 0xb32   : > { %7527 = vadd.xlane.f32.xlu0 %v7526_v51  ;;  %7530 = vadd.xlane.f32.xlu1 %v7529_v20 }
 0xb34   : > { %v11780_v9 = vpop.f32.mrf.mxu1 }
 0xb35   : > { %v8923_v45 = vadd.f32 %v11836_v52, %v11780_v9  ;;  %v17226_v9 = vld [vmem:[#allocation39_spill] sm:$0xff] }
 0xb36   : > { %v8596_v34 = vpop.f32.mrf.mxu1  ;;  %7533 = vadd.xlane.f32.xlu0 %v7532_v18  ;;  %7536 = vadd.xlane.f32.xlu1 %v7535_v4  ;;  %v17227_v4 = vld [vmem:[#allocation13_spill] sm:$0xff] }
 0xb37   : > { %v8918_v56 = vadd.f32 %v8917_v57, %v8596_v34  ;;  %v8977_v28 = vadd.f32 %v15958_v14, %v8923_v45 }
 0xb39   : > { %v8976_v31 = vadd.f32 %v15958_v14, %v8918_v56  ;;  %v9009_v61 = vmax.f32 %v8977_v28, 0.0 }
 0xb3a   : > { %7539 = vadd.xlane.f32.xlu0 %v7538_v50  ;;  %7542 = vadd.xlane.f32.xlu1 %v7541_v32 }
 0xb3b   : > { %v9008_v19 = vmax.f32 %v8976_v31, 0.0 }
 0xb3d   : > { %v11783_v58 = vpop.f32.mrf.mxu1  ;;  %11898 = vmatprep.mubr.msk.f32.mxu1 %vm17209_vm12, %v9008_v19 }
 0xb3e   : > { %v8933_v12 = vadd.f32 %v11839_v8, %v11783_v58  ;;  %11899 = vmatmul.mubr.msk.f32.gmra.mxu1 %vm17210_vm10, %v9009_v61  ;;  %7545 = vadd.xlane.f32.xlu0 %v7544_v26 }
 0xb3f   : > { %v8606_v59 = vpop.f32.mrf.mxu1  ;;  %7548 = vadd.xlane.f32.xlu1 %v7547_v40 }
 0xb40   : > { %v8928_v37 = vadd.f32 %v8927_v41, %v8606_v59  ;;  %v8979_v39 = vadd.f32 %v15958_v14, %v8933_v12  ;;  %v17228_v12 = vld [vmem:[#allocation41_spill] sm:$0xff] }
 0xb42   : > { %v8978_v7 = vadd.f32 %v15958_v14, %v8928_v37  ;;  %7551 = vadd.xlane.f32.xlu0 %v7550_v3  ;;  %v9011_v54 = vmax.f32 %v8979_v39, 0.0  ;;  %v17229_v37 = vld [vmem:[#allocation40_spill] sm:$0xff] }
 0xb43   : > { %7554 = vadd.xlane.f32.xlu1 %v7553_v53 }
 0xb44   : > { %v9010_v2 = vmax.f32 %v8978_v7, 0.0  ;;  %v11786_v42 = vpop.f32.mrf.mxu1 }
 0xb45   : > { %v8943_v17 = vadd.f32 %v11842_v6, %v11786_v42 }
 0xb46   : > { %11901 = vmatprep.mubr.msk.f32.mxu1 %vm17214_vm14, %v9010_v2  ;;  %v8616_v11 = vpop.f32.mrf.mxu1  ;;  %7557 = vadd.xlane.f32.xlu0 %v7556_v25 }
 0xb47   : > { %11902 = vmatmul.mubr.msk.f32.gmra.mxu1 %vm17215_vm7, %v9011_v54  ;;  %v8938_v24 = vadd.f32 %v8937_v47, %v8616_v11  ;;  %7560 = vadd.xlane.f32.xlu1 %v7559_v44  ;;  %v8981_v60 = vadd.f32 %v15958_v14, %v8943_v17  ;;  %v17230_v17 = vld [vmem:[#allocation38_spill] sm:$0xff] }
 0xb49   : > { %v8980_v62 = vadd.f32 %v15958_v14, %v8938_v24  ;;  %v9013_v27 = vmax.f32 %v8981_v60, 0.0  ;;  %v7571_v14 = vsel %vm17223_vm4, %v16264_v43, 0.0  ;;  %v17224_v43 = vld [vmem:[#allocation11_spill] sm:$0xff]  ;;  %v17231_v24 = vld [vmem:[#allocation14_spill] sm:$0xff] }
 0xb4a   : > { %7563 = vadd.xlane.f32.xlu0 %v7562_v22 }
 0xb4b   : > { %v9012_v29 = vmax.f32 %v8980_v62, 0.0  ;;  %7566 = vadd.xlane.f32.xlu1 %v7565_v48 }
 0xb4d   : > { %11904 = vmatprep.mubr.msk.f32.mxu1 %vm17220_vm15, %v9012_v29 }
 0xb4e   : > { %11905 = vmatmul.mubr.msk.f32.gmra.mxu1 %vm17221_vm8, %v9013_v27  ;;  %7569 = vadd.xlane.f32.xlu0 %v7568_v5 }
 0xb4f   : > { %7572 = vadd.xlane.f32.xlu1 %v7571_v14 }
 0xb99   : > { %v11861_v49 = vpop.f32.mrf.mxu1 }
 0xb9a   : > { %v9194_v46 = vadd.f32 %v11861_v49, %v16334_v30  ;;  %v17232_v49 = vld [vmem:[#allocation16_spill] sm:$0xff] }
 0xb9b   : > { %v9188_v13 = vpop.f32.mrf.mxu1  ;;  %v7483_v63 = vpop.xlane.xlu0 %7482 }
 0xb9c   : > { %v9189_v15 = vadd.f32 %v16334_v30, %v9188_v13  ;;  %v9348_v23 = vadd.f32 %v9194_v46, %v17224_v43  ;;  %v7480_v10 = vpop.xlane.xlu1 %7479  ;;  %v9384_v38 = vmul.f32 %v16342_v1, %v7483_v63 }
 0xb9d   : > { %v9383_v0 = vmul.f32 %v16342_v1, %v7480_v10 }
 0xb9e   : > { %v9347_v21 = vadd.f32 %v9189_v15, %v17225_v35  ;;  %v9416_v52 = vadd.f32 %v9384_v38, %v9348_v23  ;;  %v17233_v23 = vld [vmem:[#allocation15_spill] sm:$0xff] }
 0xb9f   : > { %v7486_v36 = vpop.xlane.xlu0 %7485 }
 0xba0   : > { %v11864_v16 = vpop.f32.mrf.mxu1  ;;  %v9415_v51 = vadd.f32 %v9383_v0, %v9347_v21  ;;  %v7489_v55 = vpop.xlane.xlu1 %7488  ;;  %9448 = vst [vmem:[%s16354_s24 + $0x8] sm:$0xff] %v9416_v52  ;;  %v9385_v18 = vmul.f32 %v16342_v1, %v7486_v36  ;;  %v17234_v52 = vld [vmem:[#allocation17_spill] sm:$0xff] }
 0xba1   : > { %v9204_v33 = vadd.f32 %v11864_v16, %v16334_v30  ;;  %v9386_v57 = vmul.f32 %v16342_v1, %v7489_v55 }
 0xba2   : > { %v9198_v20 = vpop.f32.mrf.mxu1  ;;  %9447 = vst [vmem:[%s16354_s24] sm:$0xff] %v9415_v51 }
 0xba3   : > { %v9350_v45 = vadd.f32 %v9204_v33, %v17226_v9  ;;  %v9199_v34 = vadd.f32 %v16334_v30, %v9198_v20  ;;  %v7492_v19 = vpop.xlane.xlu0 %7491  ;;  %v17235_v9 = vld [vmem:[#allocation18_spill] sm:$0xff] }
 0xba4   : > { %v7495_v8 = vpop.xlane.xlu1 %7494  ;;  %v9387_v26 = vmul.f32 %v16342_v1, %v7492_v19 }
 0xba5   : > { %v9349_v56 = vadd.f32 %v9199_v34, %v17227_v4  ;;  %v9418_v28 = vadd.f32 %v9386_v57, %v9350_v45  ;;  %v9388_v58 = vmul.f32 %v16342_v1, %v7495_v8  ;;  %v17236_v8 = vld [vmem:[#allocation19_spill] sm:$0xff] }
 0xba7   : > { %v9417_v31 = vadd.f32 %v9385_v18, %v9349_v56  ;;  %9450 = vst [vmem:[%s16354_s24 + $0x18] sm:$0xff] %v9418_v28  ;;  %v11867_v50 = vpop.f32.mrf.mxu1  ;;  %v7498_v2 = vpop.xlane.xlu0 %7497 }
 0xba8   : > { %v9214_v32 = vadd.f32 %v11867_v50, %v16334_v30  ;;  %v7501_v6 = vpop.xlane.xlu1 %7500  ;;  %v9389_v25 = vmul.f32 %v16342_v1, %v7498_v2 }
 0xba9   : > { %9449 = vst [vmem:[%s16354_s24 + $0x10] sm:$0xff] %v9417_v31  ;;  %v9208_v61 = vpop.f32.mrf.mxu1  ;;  %v9390_v42 = vmul.f32 %v16342_v1, %v7501_v6 }
 0xbaa   : > { %v9352_v59 = vadd.f32 %v9214_v32, %v17228_v12  ;;  %v9209_v41 = vadd.f32 %v16334_v30, %v9208_v61 }
 0xbab   : > { %v7504_v27 = vpop.xlane.xlu0 %7503 }
 0xbac   : > { %v9420_v40 = vadd.f32 %v9388_v58, %v9352_v59  ;;  %v9351_v39 = vadd.f32 %v9209_v41, %v17229_v37  ;;  %v11870_v3 = vpop.f32.mrf.mxu1  ;;  %v7507_v22 = vpop.xlane.xlu1 %7506  ;;  %v9391_v15 = vmul.f32 %v16342_v1, %v7504_v27  ;;  %v17237_v58 = vld [vmem:[#allocation20_spill] sm:$0xff] }
 0xbad   : > { %v9224_v53 = vadd.f32 %v11870_v3, %v16334_v30  ;;  %v9392_v14 = vmul.f32 %v16342_v1, %v7507_v22  ;;  %v17238_v3 = vld [vmem:[#allocation21_spill] sm:$0xff]  ;;  %v17240_v22 = vld [vmem:[#allocation23_spill] sm:$0xff] }
 0xbae   : > { %9452 = vst [vmem:[%s16354_s24 + $0x28] sm:$0xff] %v9420_v40  ;;  %v9419_v7 = vadd.f32 %v9387_v26, %v9351_v39  ;;  %v9218_v54 = vpop.f32.mrf.mxu1 }
 0xbaf   : > { %v9354_v11 = vadd.f32 %v9224_v53, %v17230_v17  ;;  %v9219_v47 = vadd.f32 %v16334_v30, %v9218_v54  ;;  %v7510_v0 = vpop.xlane.xlu0 %7509 }
 0xbb0   : > { %9451 = vst [vmem:[%s16354_s24 + $0x20] sm:$0xff] %v9419_v7  ;;  %v11873_v48 = vpop.f32.mrf.mxu1  ;;  %v7513_v63 = vpop.xlane.xlu1 %7512  ;;  %v9393_v36 = vmul.f32 %v16342_v1, %v7510_v0 }
 0xbb1   : > { %v9422_v44 = vadd.f32 %v9390_v42, %v9354_v11  ;;  %v9353_v60 = vadd.f32 %v9219_v47, %v17231_v24  ;;  %v9234_v29 = vadd.f32 %v11873_v48, %v16334_v30  ;;  %v9394_v33 = vmul.f32 %v16342_v1, %v7513_v63  ;;  %v17239_v47 = vld [vmem:[#allocation22_spill] sm:$0xff]  ;;  %v17242_v63 = vld [vmem:[#allocation25_spill] sm:$0xff] }
 0xbb2   : > { %v9228_v5 = vpop.f32.mrf.mxu1 }
 0xbb3   : > { %9454 = vst [vmem:[%s16354_s24 + $0x38] sm:$0xff] %v9422_v44  ;;  %v9421_v62 = vadd.f32 %v9389_v25, %v9353_v60  ;;  %v9356_v46 = vadd.f32 %v9234_v29, %v17232_v49  ;;  %v9229_v13 = vadd.f32 %v16334_v30, %v9228_v5  ;;  %v7516_v56 = vpop.xlane.xlu0 %7515 }
 0xbb4   : > { %v7519_v57 = vpop.xlane.xlu1 %7518  ;;  %v9395_v19 = vmul.f32 %v16342_v1, %v7516_v56 }
 0xbb5   : > { %9453 = vst [vmem:[%s16354_s24 + $0x30] sm:$0xff] %v9421_v62  ;;  %v9424_v43 = vadd.f32 %v9392_v14, %v9356_v46  ;;  %v9355_v35 = vadd.f32 %v9229_v13, %v17233_v23  ;;  %v9396_v31 = vmul.f32 %v16342_v1, %v7519_v57  ;;  %v17241_v46 = vld [vmem:[#allocation24_spill] sm:$0xff]  ;;  %v17244_v57 = vld [vmem:[#allocation27_spill] sm:$0xff] }
 0xbb6   : > { %v11876_v10 = vpop.f32.mrf.mxu1 }
 0xbb7   : > { %9456 = vst [vmem:[%s16354_s24 + $0x48] sm:$0xff] %v9424_v43  ;;  %v9423_v21 = vadd.f32 %v9391_v15, %v9355_v35  ;;  %v9244_v38 = vadd.f32 %v11876_v10, %v16334_v30  ;;  %v7522_v26 = vpop.xlane.xlu0 %7521 }
 0xbb8   : > { %v9238_v16 = vpop.f32.mrf.mxu1  ;;  %v7525_v41 = vpop.xlane.xlu1 %7524  ;;  %v9397_v17 = vmul.f32 %v16342_v1, %v7522_v26 }
 0xbb9   : > { %9455 = vst [vmem:[%s16354_s24 + $0x40] sm:$0xff] %v9423_v21  ;;  %v9358_v51 = vadd.f32 %v9244_v38, %v17234_v52  ;;  %v9239_v20 = vadd.f32 %v16334_v30, %v9238_v16  ;;  %v9398_v6 = vmul.f32 %v16342_v1, %v7525_v41  ;;  %v17246_v41 = vld [vmem:[#allocation29_spill] sm:$0xff] }
 0xbbb   : > { %v9426_v55 = vadd.f32 %v9394_v33, %v9358_v51  ;;  %v9357_v45 = vadd.f32 %v9239_v20, %v17235_v9  ;;  %v7528_v54 = vpop.xlane.xlu0 %7527  ;;  %v17243_v33 = vld [vmem:[#allocation26_spill] sm:$0xff] }
 0xbbc   : > { %v7531_v39 = vpop.xlane.xlu1 %7530  ;;  %v9399_v14 = vmul.f32 %v16342_v1, %v7528_v54 }
 0xbbd   : > { %9458 = vst [vmem:[%s16354_s24 + $0x58] sm:$0xff] %v9426_v55  ;;  %v9425_v34 = vadd.f32 %v9393_v36, %v9357_v45  ;;  %v9400_v60 = vmul.f32 %v16342_v1, %v7531_v39 }
 0xbbe   : > { %v11879_v18 = vpop.f32.mrf.mxu1 }
 0xbbf   : > { %9457 = vst [vmem:[%s16354_s24 + $0x50] sm:$0xff] %v9425_v34  ;;  %v9254_v4 = vadd.f32 %v11879_v18, %v16334_v30  ;;  %v7534_v43 = vpop.xlane.xlu0 %7533 }
 0xbc0   : > { %v9248_v28 = vpop.f32.mrf.mxu1  ;;  %v7537_v27 = vpop.xlane.xlu1 %7536  ;;  %v9401_v0 = vmul.f32 %v16342_v1, %v7534_v43 }
 0xbc1   : > { %v9360_v50 = vadd.f32 %v9254_v4, %v17236_v8  ;;  %v9249_v32 = vadd.f32 %v16334_v30, %v9248_v28  ;;  %v9402_v35 = vmul.f32 %v16342_v1, %v7537_v27 }
 0xbc3   : > { %v9428_v61 = vadd.f32 %v9396_v31, %v9360_v50  ;;  %v9359_v12 = vadd.f32 %v9249_v32, %v17237_v58  ;;  %v7540_v9 = vpop.xlane.xlu0 %7539  ;;  %v17245_v31 = vld [vmem:[#allocation28_spill] sm:$0xff] }
 0xbc4   : > { %v7543_v20 = vpop.xlane.xlu1 %7542  ;;  %v9403_v56 = vmul.f32 %v16342_v1, %v7540_v9 }
 0xbc5   : > { %9460 = vst [vmem:[%s16354_s24 + $0x68] sm:$0xff] %v9428_v61  ;;  %v9427_v59 = vadd.f32 %v9395_v19, %v9359_v12  ;;  %v9404_v34 = vmul.f32 %v16342_v1, %v7543_v20  ;;  %v17252_v20 = vld [vmem:[#allocation34_spill] sm:$0xff] }
 0xbc7   : > { %9459 = vst [vmem:[%s16354_s24 + $0x60] sm:$0xff] %v9427_v59  ;;  %v7546_v58 = vpop.xlane.xlu0 %7545 }
 0xbc8   : > { %v7549_v32 = vpop.xlane.xlu1 %7548 }
 0xbc9   : > { %v9406_v59 = vmul.f32 %v16342_v1, %v7549_v32  ;;  %v17254_v32 = vld [vmem:[#allocation36_spill] sm:$0xff] }
 0xbd4   : > { %v11882_v40 = vpop.f32.mrf.mxu1 }
 0xbd5   : > { %v9264_v37 = vadd.f32 %v11882_v40, %v16334_v30 }
 0xbd6   : > { %v9258_v7 = vpop.f32.mrf.mxu1 }
 0xbd7   : > { %v9362_v53 = vadd.f32 %v9264_v37, %v17238_v3  ;;  %v9259_v2 = vadd.f32 %v16334_v30, %v9258_v7  ;;  %v9405_v37 = vmul.f32 %v16342_v1, %v7546_v58  ;;  %v17247_v7 = vld [vmem:[#allocation30_spill] sm:$0xff] }
 0xbd8   : > { %v11885_v42 = vpop.f32.mrf.mxu1 }
 0xbd9   : > { %v9430_v11 = vadd.f32 %v9398_v6, %v9362_v53  ;;  %v9361_v25 = vadd.f32 %v9259_v2, %v17239_v47  ;;  %v9274_v44 = vadd.f32 %v11885_v42, %v16334_v30  ;;  %v7555_v53 = vpop.xlane.xlu1 %7554  ;;  %v7552_v42 = vpop.xlane.xlu0 %7551  ;;  %v17248_v47 = vld [vmem:[#allocation33_spill] sm:$0xff] }
 0xbda   : > { %v9268_v24 = vpop.f32.mrf.mxu1 }
 0xbdb   : > { %9462 = vst [vmem:[%s16354_s24 + $0x78] sm:$0xff] %v9430_v11  ;;  %v9429_v62 = vadd.f32 %v9397_v17, %v9361_v25  ;;  %v9364_v48 = vadd.f32 %v9274_v44, %v17240_v22  ;;  %v9269_v29 = vadd.f32 %v16334_v30, %v9268_v24  ;;  %v9408_v11 = vmul.f32 %v16342_v1, %v7555_v53 }
 0xbdc   : > { %v11888_v5 = vpop.f32.mrf.mxu1  ;;  %v9407_v24 = vmul.f32 %v16342_v1, %v7552_v42 }
 0xbdd   : > { %9461 = vst [vmem:[%s16354_s24 + $0x70] sm:$0xff] %v9429_v62  ;;  %v9432_v49 = vadd.f32 %v9400_v60, %v9364_v48  ;;  %v9363_v13 = vadd.f32 %v9269_v29, %v17241_v46  ;;  %v9284_v15 = vadd.f32 %v11888_v5, %v16334_v30  ;;  %v17249_v62 = vld [vmem:[#allocation31_spill] sm:$0xff]  ;;  %v7561_v29 = vpop.xlane.xlu1 %7560 }
 0xbde   : > { %v9278_v23 = vpop.f32.mrf.mxu1  ;;  %v9410_v46 = vmul.f32 %v16342_v1, %v7561_v29 }
 0xbdf   : > { %9464 = vst [vmem:[%s16354_s24 + $0x88] sm:$0xff] %v9432_v49  ;;  %v9431_v21 = vadd.f32 %v9399_v14, %v9363_v13  ;;  %v9366_v10 = vadd.f32 %v9284_v15, %v17242_v63  ;;  %v9279_v38 = vadd.f32 %v16334_v30, %v9278_v23  ;;  %v7558_v14 = vpop.xlane.xlu0 %7557  ;;  %v17250_v13 = vld [vmem:[#allocation32_spill] sm:$0xff] }
 0xbe0   : > { %v9409_v23 = vmul.f32 %v16342_v1, %v7558_v14 }
 0xbe1   : > { %9463 = vst [vmem:[%s16354_s24 + $0x80] sm:$0xff] %v9431_v21  ;;  %v9434_v16 = vadd.f32 %v9402_v35, %v9366_v10  ;;  %v9365_v52 = vadd.f32 %v9279_v38, %v17243_v33  ;;  %v17251_v21 = vld [vmem:[#allocation35_spill] sm:$0xff]  ;;  %v7567_v38 = vpop.xlane.xlu1 %7566 }
 0xbe3   : > { %9466 = vst [vmem:[%s16354_s24 + $0x98] sm:$0xff] %v9434_v16  ;;  %v9433_v51 = vadd.f32 %v9401_v0, %v9365_v52  ;;  %v7564_v33 = vpop.xlane.xlu0 %7563 }
 0xbe4   : > { %v11891_v36 = vpop.f32.mrf.mxu1  ;;  %v9411_v9 = vmul.f32 %v16342_v1, %v7564_v33 }
 0xbe5   : > { %9465 = vst [vmem:[%s16354_s24 + $0x90] sm:$0xff] %v9433_v51  ;;  %v9294_v55 = vadd.f32 %v11891_v36, %v16334_v30  ;;  %v9412_v51 = vmul.f32 %v16342_v1, %v7567_v38 }
 0xbe6   : > { %v9288_v45 = vpop.f32.mrf.mxu1 }
 0xbe7   : > { %v9368_v18 = vadd.f32 %v9294_v55, %v17244_v57  ;;  %v9289_v4 = vadd.f32 %v16334_v30, %v9288_v45 }
 0xbe8   : > { %v11894_v19 = vpop.f32.mrf.mxu1 }
 0xbe9   : > { %v9436_v28 = vadd.f32 %v9404_v34, %v9368_v18  ;;  %v9367_v8 = vadd.f32 %v9289_v4, %v17245_v31  ;;  %v9304_v61 = vadd.f32 %v11894_v19, %v16334_v30  ;;  %v17253_v34 = vld [vmem:[#allocation37_spill] sm:$0xff]  ;;  %v7573_v4 = vpop.xlane.xlu1 %7572  ;;  %v7570_v31 = vpop.xlane.xlu0 %7569 }
 0xbea   : > { %v9298_v12 = vpop.f32.mrf.mxu1  ;;  %v9413_v58 = vmul.f32 %v16342_v1, %v7570_v31 }
 0xbeb   : > { %9468 = vst [vmem:[%s16354_s24 + $0xa8] sm:$0xff] %v9436_v28  ;;  %v9435_v50 = vadd.f32 %v9403_v56, %v9367_v8  ;;  %v9370_v26 = vadd.f32 %v9304_v61, %v17246_v41  ;;  %v9299_v40 = vadd.f32 %v16334_v30, %v9298_v12 }
 0xbed   : > { %9467 = vst [vmem:[%s16354_s24 + $0xa0] sm:$0xff] %v9435_v50  ;;  %v9438_v39 = vadd.f32 %v9406_v59, %v9370_v26  ;;  %v9369_v6 = vadd.f32 %v9299_v40, %v17247_v7  ;;  %v9414_v50 = vmul.f32 %v16342_v1, %v7573_v4  ;;  %v17255_v59 = vld [vmem:[#allocation42_spill] sm:$0xff] }
 0xbef   : > { %9470 = vst [vmem:[%s16354_s24 + $0xb8] sm:$0xff] %v9438_v39  ;;  %v9437_v3 = vadd.f32 %v9405_v37, %v9369_v6  ;;  %v11897_v2 = vpop.f32.mrf.mxu1 }
 0xbf0   : > { %v9314_v54 = vadd.f32 %v11897_v2, %v16334_v30 }
 0xbf1   : > { %9469 = vst [vmem:[%s16354_s24 + $0xb0] sm:$0xff] %v9437_v3  ;;  %v9308_v17 = vpop.f32.mrf.mxu1 }
 0xbf2   : > { %v9372_v25 = vadd.f32 %v9314_v54, %v17248_v47  ;;  %v9309_v44 = vadd.f32 %v16334_v30, %v9308_v17 }
 0xbf4   : > { %v9440_v60 = vadd.f32 %v9408_v11, %v9372_v25  ;;  %v9371_v22 = vadd.f32 %v9309_v44, %v17249_v62 }
 0xbf6   : > { %9472 = vst [vmem:[%s16354_s24 + $0xc8] sm:$0xff] %v9440_v60  ;;  %v9439_v48 = vadd.f32 %v9407_v24, %v9371_v22 }
 0xbf8   : > { %9471 = vst [vmem:[%s16354_s24 + $0xc0] sm:$0xff] %v9439_v48 }
 0xbfe   : > { %v11900_v27 = vpop.f32.mrf.mxu1 }
 0xbff   : > { %v9324_v5 = vadd.f32 %v11900_v27, %v16334_v30 }
 0xc00   : > { %v9318_v49 = vpop.f32.mrf.mxu1 }
 0xc01   : > { %v9374_v15 = vadd.f32 %v9324_v5, %v17250_v13  ;;  %v9319_v43 = vadd.f32 %v16334_v30, %v9318_v49 }
 0xc03   : > { %v9442_v35 = vadd.f32 %v9410_v46, %v9374_v15  ;;  %v9373_v63 = vadd.f32 %v9319_v43, %v17251_v21 }
 0xc05   : > { %9474 = vst [vmem:[%s16354_s24 + $0xd8] sm:$0xff] %v9442_v35  ;;  %v9441_v10 = vadd.f32 %v9409_v23, %v9373_v63 }
 0xc07   : > { %v11903_v0 = vpop.f32.mrf.mxu1  ;;  %9473 = vst [vmem:[%s16354_s24 + $0xd0] sm:$0xff] %v9441_v10 }
 0xc08   : > { %v9334_v16 = vadd.f32 %v11903_v0, %v16334_v30 }
 0xc09   : > { %v9328_v52 = vpop.f32.mrf.mxu1 }
 0xc0a   : > { %v9376_v36 = vadd.f32 %v9334_v16, %v17252_v20  ;;  %v9329_v55 = vadd.f32 %v16334_v30, %v9328_v52 }
 0xc0c   : > { %v9444_v45 = vadd.f32 %v9412_v51, %v9376_v36  ;;  %v9375_v57 = vadd.f32 %v9329_v55, %v17253_v34 }
 0xc0e   : > { %9476 = vst [vmem:[%s16354_s24 + $0xe8] sm:$0xff] %v9444_v45  ;;  %v9443_v18 = vadd.f32 %v9411_v9, %v9375_v57  ;;  %v11906_v56 = vpop.f32.mrf.mxu1 }
 0xc0f   : > { %v9344_v28 = vadd.f32 %v11906_v56, %v16334_v30 }
 0xc10   : > { %9475 = vst [vmem:[%s16354_s24 + $0xe0] sm:$0xff] %v9443_v18  ;;  %v9338_v8 = vpop.f32.mrf.mxu1 }
 0xc11   : > { %v9378_v19 = vadd.f32 %v9344_v28, %v17254_v32  ;;  %v9339_v61 = vadd.f32 %v16334_v30, %v9338_v8 }
 0xc13   : > { %v9446_v12 = vadd.f32 %v9414_v50, %v9378_v19  ;;  %v9377_v41 = vadd.f32 %v9339_v61, %v17255_v59 }
 0xc15   : > { %9478 = vst [vmem:[%s16354_s24 + $0xf8] sm:$0xff] %v9446_v12  ;;  %v9445_v26 = vadd.f32 %v9413_v58, %v9377_v41 }
 0xc17   : > { %9477 = vst [vmem:[%s16354_s24 + $0xf0] sm:$0xff] %v9445_v26 }
 0xc18   : > { %12518 = shalt.err (!%p12515_p3)
}
 0xc19   : > { %s12519_s29 = scalar_lea.hbm %s16477_s30, 4096  ;;  %s12523_s25 = scalar_lea.hbm %s17256_s23, 16384 }
 0xc1a   : > { %p12520_p4 = scmp.ne.s32.totalorder %s16477_s30, %s12519_s29  ;;  %p12524_p9 = scmp.lt.s32.totalorder %s16477_s30, %s17256_s23 }
 0xc1b   : > { %p12525_p10 = scmp.lt.s32.totalorder %s12523_s25, %s12519_s29 }
 0xc1c   : > { %p12521_p7 = pnand %p12520_p4, %p12705_p5 }
 0xc1d   : > { %p12526_p11 = por %p12525_p10, %p12524_p9 }
 0xc1e   : > { %p12522_p8 = pneg %p12521_p7 }
 0xc20   : > { %p12527_p12 = pnand %p12526_p11, %p12522_p8 }
 0xc22   : > { %12530 = shalt.err (!%p12527_p12)
}
 0xc23   : > { %s12570_s22 = smov 128   ;;  %s12571_s21 = smov 8  }
 0xc24   : > { %11917 = dma.vmem_to_hbm [thread:$0]  (%p12705_p5), %s16479_s26, 4096, %s16477_s30, %s16485_s0, %s12570_s22, %s12570_s22, %s12571_s21  }
 0xc25 PF: > { %s17257_s1 = sld [smem:[#allocation7_spill]] }
 0xc26   : > { %s17258_s18 = sld [smem:[#allocation5_spill]] }
 0xc2b   : > { %p11923_p13 = scmp.ge.s32.totalorder %s17257_s1, 2 }
 0xc2c   : > { %s9508_s24 = sand.u32 1, %s17258_s18  }
 0xc2d   : > { %p11920_p0 = pnand %p11923_p13, %p12709_p6  ;;  %s9509_s29 = scalar_lea.sflag [#allocation3], %s9508_s24 }
 0xc2f   : > { %p11921_p1 = pneg %p11920_p0 }
 0xc31   : > { %12548 = dma.done.wait (%p11921_p1), %s9509_s29, 4096  }
 0xc32   : > { %12550 = vsyncadd (%p11921_p1), %s9509_s29, 4294963200  ;;  %s17260_s30 = sld [smem:[#allocation8_spill]]  ;;  %s17263_s27 = smov %s12557_s28 }
 0xc33   : > { %s17261_s25 = sld [smem:[#allocation6_spill]] }
 0xc34   : > { %s17262_s29 = sld [smem:[#allocation9_spill]] }
 0xc38   : > { %p28_p2 = scmp.ge.s32.totalorder %s17260_s30, 6  }
 0xc39   : > { %s17264_s28 = smov %s17261_s25 }
 0xc3a   :  { %30 = sbr.rel (!%p28_p2) target bundleno = 8 (0x8), region = 148 }
 0xc3f   :  { %9514 = vsyncpa [#allocation3], 1 }
 0xc40   :  { %9516 = vsyncpa [#allocation3 + $0x1], 1 }

</bundles_post_ra>
